<compile_context>
chip_gen: v5e
topology: v5e:2x2
jax: 0.10.0
libtpu: 0.0.40
codegen_flags: <defaults>
</compile_context>

<pallas_src>
import functools
import math

import jax
import jax.numpy as jnp
from jax.experimental import pallas as pl
from jax.experimental.pallas import tpu as pltpu

LN_EPS = 1e-5          # PyTorch nn.LayerNorm default
BF16 = jnp.bfloat16
F32 = jnp.float32

_RES_KEYS = ("ln1_g", "ln1_b", "w_qkv", "w_proj", "b_proj",
             "ln2_g", "ln2_b", "w_fc", "b_fc", "w_out", "b_out")


# --------------------------------------------------------------------------- #
# Shared math helpers (pure jnp: usable inside kernels and in the reference).
# --------------------------------------------------------------------------- #
def _layernorm(x, g, b):
    mu = jnp.mean(x, axis=-1, keepdims=True)
    xc = x - mu
    var = jnp.mean(xc * xc, axis=-1, keepdims=True)
    return xc * jax.lax.rsqrt(var + LN_EPS) * g + b


def _gelu(x):
    # TODO(synk): PyTorch nn.GELU() defaults to the exact erf form; tanh approximation
    # (max dev ~1e-3) is used since erf has no guaranteed Mosaic lowering.
    c = math.sqrt(2.0 / math.pi)
    return 0.5 * x * (1.0 + jnp.tanh(c * (x + 0.044715 * x * x * x)))


# --------------------------------------------------------------------------- #
# Fused residual-attention-block math (runs inside the Pallas kernels).
# --------------------------------------------------------------------------- #
def _resblock_math(x, ln1_g, ln1_b, w_qkv, w_proj, b_proj,
                   ln2_g, ln2_b, w_fc, b_fc, w_out, b_out, attn_ref, heads):
    n, w = x.shape
    c = w // heads

    # ---- attention sub-block:  x = x + c_proj(attn(c_qkv(ln_1(x)))) ----
    h = _layernorm(x, ln1_g, ln1_b).astype(BF16)
    # w_qkv is prepped: column layout [all-Q | all-K | all-V], q/k scale folded in.
    # Single bf16 cast of the whole (N, 3W) result; per-head slices feed the MXU as-is.
    qkv = jnp.dot(h, w_qkv, preferred_element_type=F32).astype(BF16)   # (N, 3W) bf16
    q_all = qkv[:, :w]
    k_all = qkv[:, w:2 * w]
    v_all = qkv[:, 2 * w:]

    # TODO(synk): switch to lax.fori_loop(unroll=True) once head slabs are 128-aligned
    # (bounds live ranges at heads>=8); static unroll is fine at these head counts.
    for hh in range(heads):                                            # static unroll
        lo, hi = hh * c, (hh + 1) * c
        q = q_all[:, lo:hi]
        k = k_all[:, lo:hi]
        v = v_all[:, lo:hi]
        s = jax.lax.dot_general(q, k, (((1,), (1,)), ((), ())),
                                preferred_element_type=F32)            # (N, N) f32
        m = jnp.max(s, axis=-1, keepdims=True)
        e = jnp.exp(s - m)
        p = e * pl.reciprocal(jnp.sum(e, axis=-1, keepdims=True), approx=True)
        ho = jnp.dot(p.astype(BF16), v, preferred_element_type=F32)    # (N, c) f32
        # store each head at its lane offset; one full-depth W_proj matmul afterwards
        attn_ref[:, lo:hi] = ho.astype(BF16)

    attn_out = jnp.dot(attn_ref[...], w_proj, preferred_element_type=F32)  # (N, W)
    x = x + attn_out + b_proj

    # ---- MLP sub-block:  x = x + c_proj(gelu(c_fc(ln_2(x)))) ----
    h = _layernorm(x, ln2_g, ln2_b).astype(BF16)
    h = jnp.dot(h, w_fc, preferred_element_type=F32) + b_fc
    h = _gelu(h).astype(BF16)
    h = jnp.dot(h, w_out, preferred_element_type=F32) + b_out
    return x + h


# --------------------------------------------------------------------------- #
# Pallas kernels
# --------------------------------------------------------------------------- #
def _resblock_kernel(x_ref, ln1_g, ln1_b, w_qkv, w_proj, b_proj,
                     ln2_g, ln2_b, w_fc, b_fc, w_out, b_out,
                     o_ref, attn_scr, *, heads):
    o_ref[0] = _resblock_math(
        x_ref[0], ln1_g[...], ln1_b[...], w_qkv[...], w_proj[...], b_proj[...],
        ln2_g[...], ln2_b[...], w_fc[...], b_fc[...], w_out[...], b_out[...],
        attn_scr, heads)


def _skip_resblock_kernel(skip_ref, x_ref, w_skip, w_x, b_skip,
                          ln1_g, ln1_b, w_qkv, w_proj, b_proj,
                          ln2_g, ln2_b, w_fc, b_fc, w_out, b_out,
                          o_ref, attn_scr, *, heads):
    # Linear(width*2 -> width) over cat([skip, x], -1), concat folded into two matmuls
    # and fused into the following resblock (skip_ln=False -> no LayerNorm here).
    x0 = (jnp.dot(skip_ref[0].astype(BF16), w_skip[...], preferred_element_type=F32)
          + jnp.dot(x_ref[0].astype(BF16), w_x[...], preferred_element_type=F32)
          + b_skip[...])
    o_ref[0] = _resblock_math(
        x0, ln1_g[...], ln1_b[...], w_qkv[...], w_proj[...], b_proj[...],
        ln2_g[...], ln2_b[...], w_fc[...], b_fc[...], w_out[...], b_out[...],
        attn_scr, heads)


# --------------------------------------------------------------------------- #
# Wrappers around pallas_call
# --------------------------------------------------------------------------- #
def _weight_spec(shape):
    # Weights: constant block index across the batch grid -> single buffer.
    nd = len(shape)
    idx = lambda b, _nd=nd: (0,) * _nd
    try:
        return pl.BlockSpec(shape, idx, pipeline_mode=pl.Buffered(1))
    except TypeError:   # older jax without pipeline_mode kwarg
        return pl.BlockSpec(shape, idx)


def _weight_bytes(ws):
    return int(sum(int(w.size) * w.dtype.itemsize for w in ws))


def _physical_vmem_bytes():
    try:
        return int(pltpu.get_tpu_info().vmem_capacity_bytes)
    except Exception:
        return 128 * 2**20


def _compiler_params(vmem_need_bytes):
    # Generation-aware cap: ~48 MiB on v7x (64 MiB physical, leave Mosaic headroom),
    # ~100 MiB on v5e/v6e (128 MiB physical).
    phys = _physical_vmem_bytes()
    cap = 48 * 2**20 if phys <= 64 * 2**20 else 100 * 2**20
    limit = int(min(cap, max(24 * 2**20, int(1.5 * vmem_need_bytes))))
    return pltpu.CompilerParams(dimension_semantics=("parallel",),
                                vmem_limit_bytes=limit)


def _resblock_cost(B, N, W, heads, n_act_io, weights):
    flops = 2 * B * N * W * 12 * W + 4 * B * N * N * W
    transcend = B * heads * N * N + B * N * 4 * W
    bytes_acc = n_act_io * B * N * W * 4 + _weight_bytes(weights)
    return pl.CostEstimate(flops=int(flops), transcendentals=int(transcend),
                           bytes_accessed=int(bytes_acc))


def _vmem_need(N, W, n_act_blocks, weights):
    # Weights are single-buffered (resident once).
    wbytes = _weight_bytes(weights)
    acts = n_act_blocks * 2 * N * W * 4                  # double-buffered act blocks
    live = (N * 3 * W * 2            # bf16 qkv copy
            + 2 * N * N * 4          # per-head score / exp buffers
            + 2 * N * W * 4          # residual + attention f32 temporaries
            + N * W * 2              # bf16 attention scratch
            + 2 * N * 4 * W * 4)     # MLP hidden f32 (+ GELU temp)
    return wbytes + acts + live


def resblock(x, p, heads):
    B, N, W = x.shape
    weights = [p[k] for k in _RES_KEYS]
    in_specs = ([pl.BlockSpec((1, N, W), lambda b: (b, 0, 0))]
                + [_weight_spec(wt.shape) for wt in weights])
    return pl.pallas_call(
        functools.partial(_resblock_kernel, heads=heads),
        out_shape=jax.ShapeDtypeStruct((B, N, W), x.dtype),
        grid=(B,),
        in_specs=in_specs,
        out_specs=pl.BlockSpec((1, N, W), lambda b: (b, 0, 0)),
        scratch_shapes=[pltpu.VMEM((N, W), BF16)],
        compiler_params=_compiler_params(_vmem_need(N, W, 2, weights)),
        cost_estimate=_resblock_cost(B, N, W, heads, 2, weights),
    )(x, *weights)


def skip_resblock(skip, x, dp, heads):
    B, N, W = x.shape
    bp = dp["block"]
    weights = [dp["w_skip"], dp["w_x"], dp["b"]] + [bp[k] for k in _RES_KEYS]
    in_specs = ([pl.BlockSpec((1, N, W), lambda b: (b, 0, 0)),
                 pl.BlockSpec((1, N, W), lambda b: (b, 0, 0))]
                + [_weight_spec(wt.shape) for wt in weights])
    cost = _resblock_cost(B, N, W, heads, 3, weights)
    cost = pl.CostEstimate(flops=cost.flops + 4 * B * N * W * W,
                           transcendentals=cost.transcendentals,
                           bytes_accessed=cost.bytes_accessed)
    return pl.pallas_call(
        functools.partial(_skip_resblock_kernel, heads=heads),
        out_shape=jax.ShapeDtypeStruct((B, N, W), x.dtype),
        grid=(B,),
        in_specs=in_specs,
        out_specs=pl.BlockSpec((1, N, W), lambda b: (b, 0, 0)),
        scratch_shapes=[pltpu.VMEM((N, W), BF16)],
        compiler_params=_compiler_params(_vmem_need(N, W, 3, weights)),
        cost_estimate=cost,
    )(skip, x, *weights)


def unet_forward(x, prepped, heads):
    # Mirrors UNetDiffusionTransformer.forward exactly (skip_ln=False).
    enc_outputs = []
    for bp in prepped["encoder"]:
        x = resblock(x, bp, heads)
        enc_outputs.append(x)
    x = resblock(x, prepped["middle"], heads)
    for dp in prepped["decoder"]:
        skip = enc_outputs.pop()
        x = skip_resblock(skip, x, dp, heads)
    return x


# --------------------------------------------------------------------------- #
# Parameter prep: PyTorch-layout f32 weights -> kernel layout (bf16, folded scale).
# --------------------------------------------------------------------------- #
def _prepare_resblock(p, heads):
    W = p["w_qkv"].shape[0]
    c = W // heads
    scale = 1.0 / math.sqrt(math.sqrt(c))      # applied to q AND k (shap-e style)
    wq = p["w_qkv"].reshape(W, heads, 3, c)    # cols: head-major, then (q,k,v), then c
    q = (wq[:, :, 0, :] * scale).reshape(W, W)
    k = (wq[:, :, 1, :] * scale).reshape(W, W)
    v = wq[:, :, 2, :].reshape(W, W)
    out = dict(p)
    out["w_qkv"] = jnp.concatenate([q, k, v], axis=1).astype(BF16)   # [Q|K|V] slabs
    for key in ("w_proj", "w_fc", "w_out"):
        out[key] = p[key].astype(BF16)
    return out


def prepare_params(params, heads):
    prepped = {"encoder": [_prepare_resblock(bp, heads) for bp in params["encoder"]],
               "middle": _prepare_resblock(params["middle"], heads),
               "decoder": []}
    for dp in params["decoder"]:
        prepped["decoder"].append(dict(
            block=_prepare_resblock(dp["block"], heads),
            w_skip=dp["w_skip"].astype(BF16),
            w_x=dp["w_x"].astype(BF16),
            b=dp["b"],
        ))
    return prepped


# --------------------------------------------------------------------------- #
# Pure-JAX reference (PyTorch-layout params, same bf16 matmul precision regime).
# --------------------------------------------------------------------------- #
def _dot_bf16(a, b):
    return jnp.dot(a.astype(BF16), b.astype(BF16), preferred_element_type=F32)


def resblock_ref(x, p, heads):
    B, N, W = x.shape
    c = W // heads
    scale = 1.0 / math.sqrt(math.sqrt(c))
    h = _layernorm(x, p["ln1_g"], p["ln1_b"])
    qkv = _dot_bf16(h, p["w_qkv"]).reshape(B, N, heads, 3 * c)
    q, k, v = qkv[..., :c], qkv[..., c:2 * c], qkv[..., 2 * c:]
    s = jnp.einsum("bthc,bshc->bhts", (q * scale).astype(BF16),
                   (k * scale).astype(BF16), preferred_element_type=F32)
    pa = jax.nn.softmax(s, axis=-1)
    o = jnp.einsum("bhts,bshc->bthc", pa.astype(BF16), v.astype(BF16),
                   preferred_element_type=F32).reshape(B, N, W)
    x = x + _dot_bf16(o, p["w_proj"]) + p["b_proj"]
    h = _layernorm(x, p["ln2_g"], p["ln2_b"])
    h = _dot_bf16(_gelu(_dot_bf16(h, p["w_fc"]) + p["b_fc"]), p["w_out"]) + p["b_out"]
    return x + h


def unet_forward_ref(x, params, heads):
    enc = []
    for bp in params["encoder"]:
        x = resblock_ref(x, bp, heads)
        enc.append(x)
    x = resblock_ref(x, params["middle"], heads)
    for dp in params["decoder"]:
        skip = enc.pop()
        x = _dot_bf16(skip, dp["w_skip"]) + _dot_bf16(x, dp["w_x"]) + dp["b"]
        x = resblock_ref(x, dp["block"], heads)
    return x


# --------------------------------------------------------------------------- #
# Deterministic synthetic parameter init (PyTorch layout / shapes, not a ckpt).
# --------------------------------------------------------------------------- #
def _init_resblock(key, width, init_scale):
    std = init_scale / math.sqrt(width)
    ks = jax.random.split(key, 4)
    return dict(
        ln1_g=jnp.ones((1, width), F32), ln1_b=jnp.zeros((1, width), F32),
        w_qkv=(jax.random.normal(ks[0], (width, 3 * width), F32) * std),  # qkv_bias=False
        w_proj=(jax.random.normal(ks[1], (width, width), F32) * std),
        b_proj=jnp.zeros((1, width), F32),
        ln2_g=jnp.ones((1, width), F32), ln2_b=jnp.zeros((1, width), F32),
        w_fc=(jax.random.normal(ks[2], (width, 4 * width), F32) * std),
        b_fc=jnp.zeros((1, 4 * width), F32),
        w_out=(jax.random.normal(ks[3], (4 * width, width), F32) * std),
        b_out=jnp.zeros((1, width), F32),
    )


def init_params(key, width, layers, init_scale):
    std = init_scale / math.sqrt(width)
    keys = jax.random.split(key, 2 * layers + 1)
    params = {"encoder": [], "decoder": []}
    idx = 0
    for _ in range(layers):
        params["encoder"].append(_init_resblock(keys[idx], width, init_scale)); idx += 1
    params["middle"] = _init_resblock(keys[idx], width, init_scale); idx += 1
    for _ in range(layers):
        kb, kl = jax.random.split(keys[idx]); idx += 1
        params["decoder"].append(dict(
            block=_init_resblock(kb, width, init_scale),
            # nn.Linear(width*2, width): pre-transposed weight split into the
            # skip-half and the x-half of the concat.
            w_skip=(jax.random.normal(jax.random.fold_in(kl, 0),
                                      (width, width), F32) * std),
            w_x=(jax.random.normal(jax.random.fold_in(kl, 1),
                                   (width, width), F32) * std),
            b=jnp.zeros((1, width), F32),
        ))
    return params


# --------------------------------------------------------------------------- #
if __name__ == "__main__":
    B, N_CTX, WIDTH, LAYERS, HEADS = 2, 16, 64, 2, 4
    INIT_SCALE = 0.25

    root = jax.random.PRNGKey(0)
    kx, kp = jax.random.split(root)
    x = jax.random.normal(kx, (B, N_CTX, WIDTH), F32)
    params = init_params(kp, WIDTH, LAYERS, INIT_SCALE)
    prepped = prepare_params(params, HEADS)

    fwd = jax.jit(lambda xx: unet_forward(xx, prepped, HEADS))
    out = jax.block_until_ready(fwd(x))

    ref = jax.block_until_ready(unet_forward_ref(x, params, HEADS))
    err = float(jnp.max(jnp.abs(out - ref)))
    if not bool(jnp.all(jnp.isfinite(out))) or err > 5e-3:
        raise RuntimeError(f"mismatch vs reference: max abs err={err}")
    print("KERNEL_OK")
</pallas_src>

<mosaic_0001>
module attributes {stable_mosaic.version = 11 : i64} {
  func.func @_resblock_kernel(%arg0: i32, %arg1: memref<1x16x64xf32, #tpu.memory_space<vmem>>, %arg2: memref<1x64xf32, #tpu.memory_space<vmem>>, %arg3: memref<1x64xf32, #tpu.memory_space<vmem>>, %arg4: memref<64x192xbf16, #tpu.memory_space<vmem>>, %arg5: memref<64x64xbf16, #tpu.memory_space<vmem>>, %arg6: memref<1x64xf32, #tpu.memory_space<vmem>>, %arg7: memref<1x64xf32, #tpu.memory_space<vmem>>, %arg8: memref<1x64xf32, #tpu.memory_space<vmem>>, %arg9: memref<64x256xbf16, #tpu.memory_space<vmem>>, %arg10: memref<1x256xf32, #tpu.memory_space<vmem>>, %arg11: memref<256x64xbf16, #tpu.memory_space<vmem>>, %arg12: memref<1x64xf32, #tpu.memory_space<vmem>>, %arg13: memref<1x16x64xf32, #tpu.memory_space<vmem>>, %arg14: memref<16x64xbf16, #tpu.memory_space<vmem>>) attributes {dimension_semantics = [#tpu.dimension_semantics<parallel>], iteration_bounds = array<i64: 2>, scalar_prefetch = 0 : i64, scratch_operands = 1 : i64, tpu.core_type = #tpu.core_type<tc>, window_params = [{transform_indices = @transform_0, window_bounds = array<i64: 1, 16, 64>}, {pipeline_mode = #tpu.pipeline_mode<synchronous>, transform_indices = @transform_1, window_bounds = array<i64: 1, 64>}, {pipeline_mode = #tpu.pipeline_mode<synchronous>, transform_indices = @transform_2, window_bounds = array<i64: 1, 64>}, {pipeline_mode = #tpu.pipeline_mode<synchronous>, transform_indices = @transform_3, window_bounds = array<i64: 64, 192>}, {pipeline_mode = #tpu.pipeline_mode<synchronous>, transform_indices = @transform_4, window_bounds = array<i64: 64, 64>}, {pipeline_mode = #tpu.pipeline_mode<synchronous>, transform_indices = @transform_5, window_bounds = array<i64: 1, 64>}, {pipeline_mode = #tpu.pipeline_mode<synchronous>, transform_indices = @transform_6, window_bounds = array<i64: 1, 64>}, {pipeline_mode = #tpu.pipeline_mode<synchronous>, transform_indices = @transform_7, window_bounds = array<i64: 1, 64>}, {pipeline_mode = #tpu.pipeline_mode<synchronous>, transform_indices = @transform_8, window_bounds = array<i64: 64, 256>}, {pipeline_mode = #tpu.pipeline_mode<synchronous>, transform_indices = @transform_9, window_bounds = array<i64: 1, 256>}, {pipeline_mode = #tpu.pipeline_mode<synchronous>, transform_indices = @transform_10, window_bounds = array<i64: 256, 64>}, {pipeline_mode = #tpu.pipeline_mode<synchronous>, transform_indices = @transform_11, window_bounds = array<i64: 1, 64>}, {transform_indices = @transform_12, window_bounds = array<i64: 1, 16, 64>}]} {
    %c0 = arith.constant 0 : index
    %c0_0 = arith.constant 0 : index
    %c0_1 = arith.constant 0 : index
    %0 = vector.load %arg1[%c0, %c0_0, %c0_1] : memref<1x16x64xf32, #tpu.memory_space<vmem>>, vector<1x16x64xf32>
    %1 = vector.shape_cast %0 : vector<1x16x64xf32> to vector<16x64xf32>
    %c0_2 = arith.constant 0 : index
    %c0_3 = arith.constant 0 : index
    %2 = vector.load %arg2[%c0_2, %c0_3] : memref<1x64xf32, #tpu.memory_space<vmem>>, vector<1x64xf32>
    %c0_4 = arith.constant 0 : index
    %c0_5 = arith.constant 0 : index
    %3 = vector.load %arg3[%c0_4, %c0_5] : memref<1x64xf32, #tpu.memory_space<vmem>>, vector<1x64xf32>
    %c0_6 = arith.constant 0 : index
    %c0_7 = arith.constant 0 : index
    %4 = vector.load %arg4[%c0_6, %c0_7] : memref<64x192xbf16, #tpu.memory_space<vmem>>, vector<64x192xbf16>
    %c0_8 = arith.constant 0 : index
    %c0_9 = arith.constant 0 : index
    %5 = vector.load %arg5[%c0_8, %c0_9] : memref<64x64xbf16, #tpu.memory_space<vmem>>, vector<64x64xbf16>
    %c0_10 = arith.constant 0 : index
    %c0_11 = arith.constant 0 : index
    %6 = vector.load %arg6[%c0_10, %c0_11] : memref<1x64xf32, #tpu.memory_space<vmem>>, vector<1x64xf32>
    %c0_12 = arith.constant 0 : index
    %c0_13 = arith.constant 0 : index
    %7 = vector.load %arg7[%c0_12, %c0_13] : memref<1x64xf32, #tpu.memory_space<vmem>>, vector<1x64xf32>
    %c0_14 = arith.constant 0 : index
    %c0_15 = arith.constant 0 : index
    %8 = vector.load %arg8[%c0_14, %c0_15] : memref<1x64xf32, #tpu.memory_space<vmem>>, vector<1x64xf32>
    %c0_16 = arith.constant 0 : index
    %c0_17 = arith.constant 0 : index
    %9 = vector.load %arg9[%c0_16, %c0_17] : memref<64x256xbf16, #tpu.memory_space<vmem>>, vector<64x256xbf16>
    %c0_18 = arith.constant 0 : index
    %c0_19 = arith.constant 0 : index
    %10 = vector.load %arg10[%c0_18, %c0_19] : memref<1x256xf32, #tpu.memory_space<vmem>>, vector<1x256xf32>
    %c0_20 = arith.constant 0 : index
    %c0_21 = arith.constant 0 : index
    %11 = vector.load %arg11[%c0_20, %c0_21] : memref<256x64xbf16, #tpu.memory_space<vmem>>, vector<256x64xbf16>
    %c0_22 = arith.constant 0 : index
    %c0_23 = arith.constant 0 : index
    %12 = vector.load %arg12[%c0_22, %c0_23] : memref<1x64xf32, #tpu.memory_space<vmem>>, vector<1x64xf32>
    %cst = arith.constant dense<0.000000e+00> : vector<16xf32>
    %13 = vector.multi_reduction <add>, %1, %cst [1] : vector<16x64xf32> to vector<16xf32>
    %14 = vector.shape_cast %13 : vector<16xf32> to vector<16x1xf32>
    %cst_24 = arith.constant 6.400000e+01 : f32
    %15 = vector.broadcast %cst_24 : f32 to vector<16x1xf32>
    %16 = arith.divf %14, %15 : vector<16x1xf32>
    %17 = vector.broadcast %16 : vector<16x1xf32> to vector<16x64xf32>
    %18 = arith.subf %1, %17 : vector<16x64xf32>
    %19 = arith.mulf %18, %18 : vector<16x64xf32>
    %cst_25 = arith.constant dense<0.000000e+00> : vector<16xf32>
    %20 = vector.multi_reduction <add>, %19, %cst_25 [1] : vector<16x64xf32> to vector<16xf32>
    %21 = vector.shape_cast %20 : vector<16xf32> to vector<16x1xf32>
    %cst_26 = arith.constant 6.400000e+01 : f32
    %22 = vector.broadcast %cst_26 : f32 to vector<16x1xf32>
    %23 = arith.divf %21, %22 : vector<16x1xf32>
    %cst_27 = arith.constant 9.99999974E-6 : f32
    %24 = vector.broadcast %cst_27 : f32 to vector<16x1xf32>
    %25 = arith.addf %23, %24 : vector<16x1xf32>
    %26 = math.rsqrt %25 : vector<16x1xf32>
    %27 = vector.broadcast %26 : vector<16x1xf32> to vector<16x64xf32>
    %28 = arith.mulf %18, %27 : vector<16x64xf32>
    %29 = vector.broadcast %2 : vector<1x64xf32> to vector<16x64xf32>
    %30 = arith.mulf %28, %29 : vector<16x64xf32>
    %31 = vector.broadcast %3 : vector<1x64xf32> to vector<16x64xf32>
    %32 = arith.addf %30, %31 : vector<16x64xf32>
    %33 = arith.truncf %32 : vector<16x64xf32> to vector<16x64xbf16>
    %cst_28 = arith.constant dense<0.000000e+00> : vector<16x192xf32>
    %34 = tpu.matmul %33, %4, %cst_28 {dimension_numbers = #tpu.dot_dimension_numbers<[1], [0], [0], [1], [0, 0, 1, 1], [], []>} : vector<16x64xbf16>, vector<64x192xbf16>, vector<16x192xf32> -> vector<16x192xf32>
    %35 = arith.truncf %34 : vector<16x192xf32> to vector<16x192xbf16>
    %36 = vector.extract_strided_slice %35 {offsets = [0, 0], sizes = [16, 64], strides = [1, 1]} : vector<16x192xbf16> to vector<16x64xbf16>
    %37 = vector.extract_strided_slice %35 {offsets = [0, 64], sizes = [16, 64], strides = [1, 1]} : vector<16x192xbf16> to vector<16x64xbf16>
    %38 = vector.extract_strided_slice %35 {offsets = [0, 128], sizes = [16, 64], strides = [1, 1]} : vector<16x192xbf16> to vector<16x64xbf16>
    %39 = vector.extract_strided_slice %36 {offsets = [0, 0], sizes = [16, 16], strides = [1, 1]} : vector<16x64xbf16> to vector<16x16xbf16>
    %40 = vector.extract_strided_slice %37 {offsets = [0, 0], sizes = [16, 16], strides = [1, 1]} : vector<16x64xbf16> to vector<16x16xbf16>
    %41 = vector.extract_strided_slice %38 {offsets = [0, 0], sizes = [16, 16], strides = [1, 1]} : vector<16x64xbf16> to vector<16x16xbf16>
    %cst_29 = arith.constant dense<0.000000e+00> : vector<16x16xf32>
    %42 = tpu.matmul %39, %40, %cst_29 {dimension_numbers = #tpu.dot_dimension_numbers<[1], [1], [0], [0], [0, 0, 1, 0], [], []>} : vector<16x16xbf16>, vector<16x16xbf16>, vector<16x16xf32> -> vector<16x16xf32>
    %cst_30 = arith.constant dense<0xFF800000> : vector<16xf32>
    %43 = vector.multi_reduction <maximumf>, %42, %cst_30 [1] : vector<16x16xf32> to vector<16xf32>
    %44 = vector.shape_cast %43 : vector<16xf32> to vector<16x1xf32>
    %45 = vector.broadcast %44 : vector<16x1xf32> to vector<16x16xf32>
    %46 = arith.subf %42, %45 : vector<16x16xf32>
    %47 = math.exp %46 : vector<16x16xf32>
    %cst_31 = arith.constant dense<0.000000e+00> : vector<16xf32>
    %48 = vector.multi_reduction <add>, %47, %cst_31 [1] : vector<16x16xf32> to vector<16xf32>
    %49 = vector.shape_cast %48 : vector<16xf32> to vector<16x1xf32>
    %50 = tpu.reciprocal %49 {approx = true} : vector<16x1xf32> -> vector<16x1xf32>
    %51 = vector.broadcast %50 : vector<16x1xf32> to vector<16x16xf32>
    %52 = arith.mulf %47, %51 : vector<16x16xf32>
    %53 = arith.truncf %52 : vector<16x16xf32> to vector<16x16xbf16>
    %cst_32 = arith.constant dense<0.000000e+00> : vector<16x16xf32>
    %54 = tpu.matmul %53, %41, %cst_32 {dimension_numbers = #tpu.dot_dimension_numbers<[1], [0], [0], [1], [0, 0, 1, 1], [], []>} : vector<16x16xbf16>, vector<16x16xbf16>, vector<16x16xf32> -> vector<16x16xf32>
    %55 = arith.truncf %54 : vector<16x16xf32> to vector<16x16xbf16>
    %c0_33 = arith.constant 0 : index
    %c0_34 = arith.constant 0 : index
    %56 = vector.load %arg14[%c0_33, %c0_34] : memref<16x64xbf16, #tpu.memory_space<vmem>>, vector<16x16xbf16>
    tpu.vector_store %arg14[%c0_33, %c0_34], %55 {strides = array<i32>} : memref<16x64xbf16, #tpu.memory_space<vmem>>, vector<16x16xbf16>,
    %57 = vector.extract_strided_slice %36 {offsets = [0, 16], sizes = [16, 16], strides = [1, 1]} : vector<16x64xbf16> to vector<16x16xbf16>
    %58 = vector.extract_strided_slice %37 {offsets = [0, 16], sizes = [16, 16], strides = [1, 1]} : vector<16x64xbf16> to vector<16x16xbf16>
    %59 = vector.extract_strided_slice %38 {offsets = [0, 16], sizes = [16, 16], strides = [1, 1]} : vector<16x64xbf16> to vector<16x16xbf16>
    %cst_35 = arith.constant dense<0.000000e+00> : vector<16x16xf32>
    %60 = tpu.matmul %57, %58, %cst_35 {dimension_numbers = #tpu.dot_dimension_numbers<[1], [1], [0], [0], [0, 0, 1, 0], [], []>} : vector<16x16xbf16>, vector<16x16xbf16>, vector<16x16xf32> -> vector<16x16xf32>
    %cst_36 = arith.constant dense<0xFF800000> : vector<16xf32>
    %61 = vector.multi_reduction <maximumf>, %60, %cst_36 [1] : vector<16x16xf32> to vector<16xf32>
    %62 = vector.shape_cast %61 : vector<16xf32> to vector<16x1xf32>
    %63 = vector.broadcast %62 : vector<16x1xf32> to vector<16x16xf32>
    %64 = arith.subf %60, %63 : vector<16x16xf32>
    %65 = math.exp %64 : vector<16x16xf32>
    %cst_37 = arith.constant dense<0.000000e+00> : vector<16xf32>
    %66 = vector.multi_reduction <add>, %65, %cst_37 [1] : vector<16x16xf32> to vector<16xf32>
    %67 = vector.shape_cast %66 : vector<16xf32> to vector<16x1xf32>
    %68 = tpu.reciprocal %67 {approx = true} : vector<16x1xf32> -> vector<16x1xf32>
    %69 = vector.broadcast %68 : vector<16x1xf32> to vector<16x16xf32>
    %70 = arith.mulf %65, %69 : vector<16x16xf32>
    %71 = arith.truncf %70 : vector<16x16xf32> to vector<16x16xbf16>
    %cst_38 = arith.constant dense<0.000000e+00> : vector<16x16xf32>
    %72 = tpu.matmul %71, %59, %cst_38 {dimension_numbers = #tpu.dot_dimension_numbers<[1], [0], [0], [1], [0, 0, 1, 1], [], []>} : vector<16x16xbf16>, vector<16x16xbf16>, vector<16x16xf32> -> vector<16x16xf32>
    %73 = arith.truncf %72 : vector<16x16xf32> to vector<16x16xbf16>
    %c0_39 = arith.constant 0 : index
    %c16 = arith.constant 16 : index
    %74 = vector.load %arg14[%c0_39, %c16] : memref<16x64xbf16, #tpu.memory_space<vmem>>, vector<16x16xbf16>
    tpu.vector_store %arg14[%c0_39, %c16], %73 {strides = array<i32>} : memref<16x64xbf16, #tpu.memory_space<vmem>>, vector<16x16xbf16>,
    %75 = vector.extract_strided_slice %36 {offsets = [0, 32], sizes = [16, 16], strides = [1, 1]} : vector<16x64xbf16> to vector<16x16xbf16>
    %76 = vector.extract_strided_slice %37 {offsets = [0, 32], sizes = [16, 16], strides = [1, 1]} : vector<16x64xbf16> to vector<16x16xbf16>
    %77 = vector.extract_strided_slice %38 {offsets = [0, 32], sizes = [16, 16], strides = [1, 1]} : vector<16x64xbf16> to vector<16x16xbf16>
    %cst_40 = arith.constant dense<0.000000e+00> : vector<16x16xf32>
    %78 = tpu.matmul %75, %76, %cst_40 {dimension_numbers = #tpu.dot_dimension_numbers<[1], [1], [0], [0], [0, 0, 1, 0], [], []>} : vector<16x16xbf16>, vector<16x16xbf16>, vector<16x16xf32> -> vector<16x16xf32>
    %cst_41 = arith.constant dense<0xFF800000> : vector<16xf32>
    %79 = vector.multi_reduction <maximumf>, %78, %cst_41 [1] : vector<16x16xf32> to vector<16xf32>
    %80 = vector.shape_cast %79 : vector<16xf32> to vector<16x1xf32>
    %81 = vector.broadcast %80 : vector<16x1xf32> to vector<16x16xf32>
    %82 = arith.subf %78, %81 : vector<16x16xf32>
    %83 = math.exp %82 : vector<16x16xf32>
    %cst_42 = arith.constant dense<0.000000e+00> : vector<16xf32>
    %84 = vector.multi_reduction <add>, %83, %cst_42 [1] : vector<16x16xf32> to vector<16xf32>
    %85 = vector.shape_cast %84 : vector<16xf32> to vector<16x1xf32>
    %86 = tpu.reciprocal %85 {approx = true} : vector<16x1xf32> -> vector<16x1xf32>
    %87 = vector.broadcast %86 : vector<16x1xf32> to vector<16x16xf32>
    %88 = arith.mulf %83, %87 : vector<16x16xf32>
    %89 = arith.truncf %88 : vector<16x16xf32> to vector<16x16xbf16>
    %cst_43 = arith.constant dense<0.000000e+00> : vector<16x16xf32>
    %90 = tpu.matmul %89, %77, %cst_43 {dimension_numbers = #tpu.dot_dimension_numbers<[1], [0], [0], [1], [0, 0, 1, 1], [], []>} : vector<16x16xbf16>, vector<16x16xbf16>, vector<16x16xf32> -> vector<16x16xf32>
    %91 = arith.truncf %90 : vector<16x16xf32> to vector<16x16xbf16>
    %c0_44 = arith.constant 0 : index
    %c32 = arith.constant 32 : index
    %92 = vector.load %arg14[%c0_44, %c32] : memref<16x64xbf16, #tpu.memory_space<vmem>>, vector<16x16xbf16>
    tpu.vector_store %arg14[%c0_44, %c32], %91 {strides = array<i32>} : memref<16x64xbf16, #tpu.memory_space<vmem>>, vector<16x16xbf16>,
    %93 = vector.extract_strided_slice %36 {offsets = [0, 48], sizes = [16, 16], strides = [1, 1]} : vector<16x64xbf16> to vector<16x16xbf16>
    %94 = vector.extract_strided_slice %37 {offsets = [0, 48], sizes = [16, 16], strides = [1, 1]} : vector<16x64xbf16> to vector<16x16xbf16>
    %95 = vector.extract_strided_slice %38 {offsets = [0, 48], sizes = [16, 16], strides = [1, 1]} : vector<16x64xbf16> to vector<16x16xbf16>
    %cst_45 = arith.constant dense<0.000000e+00> : vector<16x16xf32>
    %96 = tpu.matmul %93, %94, %cst_45 {dimension_numbers = #tpu.dot_dimension_numbers<[1], [1], [0], [0], [0, 0, 1, 0], [], []>} : vector<16x16xbf16>, vector<16x16xbf16>, vector<16x16xf32> -> vector<16x16xf32>
    %cst_46 = arith.constant dense<0xFF800000> : vector<16xf32>
    %97 = vector.multi_reduction <maximumf>, %96, %cst_46 [1] : vector<16x16xf32> to vector<16xf32>
    %98 = vector.shape_cast %97 : vector<16xf32> to vector<16x1xf32>
    %99 = vector.broadcast %98 : vector<16x1xf32> to vector<16x16xf32>
    %100 = arith.subf %96, %99 : vector<16x16xf32>
    %101 = math.exp %100 : vector<16x16xf32>
    %cst_47 = arith.constant dense<0.000000e+00> : vector<16xf32>
    %102 = vector.multi_reduction <add>, %101, %cst_47 [1] : vector<16x16xf32> to vector<16xf32>
    %103 = vector.shape_cast %102 : vector<16xf32> to vector<16x1xf32>
    %104 = tpu.reciprocal %103 {approx = true} : vector<16x1xf32> -> vector<16x1xf32>
    %105 = vector.broadcast %104 : vector<16x1xf32> to vector<16x16xf32>
    %106 = arith.mulf %101, %105 : vector<16x16xf32>
    %107 = arith.truncf %106 : vector<16x16xf32> to vector<16x16xbf16>
    %cst_48 = arith.constant dense<0.000000e+00> : vector<16x16xf32>
    %108 = tpu.matmul %107, %95, %cst_48 {dimension_numbers = #tpu.dot_dimension_numbers<[1], [0], [0], [1], [0, 0, 1, 1], [], []>} : vector<16x16xbf16>, vector<16x16xbf16>, vector<16x16xf32> -> vector<16x16xf32>
    %109 = arith.truncf %108 : vector<16x16xf32> to vector<16x16xbf16>
    %c0_49 = arith.constant 0 : index
    %c48 = arith.constant 48 : index
    %110 = vector.load %arg14[%c0_49, %c48] : memref<16x64xbf16, #tpu.memory_space<vmem>>, vector<16x16xbf16>
    tpu.vector_store %arg14[%c0_49, %c48], %109 {strides = array<i32>} : memref<16x64xbf16, #tpu.memory_space<vmem>>, vector<16x16xbf16>,
    %c0_50 = arith.constant 0 : index
    %c0_51 = arith.constant 0 : index
    %111 = vector.load %arg14[%c0_50, %c0_51] : memref<16x64xbf16, #tpu.memory_space<vmem>>, vector<16x64xbf16>
    %cst_52 = arith.constant dense<0.000000e+00> : vector<16x64xf32>
    %112 = tpu.matmul %111, %5, %cst_52 {dimension_numbers = #tpu.dot_dimension_numbers<[1], [0], [0], [1], [0, 0, 1, 1], [], []>} : vector<16x64xbf16>, vector<64x64xbf16>, vector<16x64xf32> -> vector<16x64xf32>
    %113 = arith.addf %1, %112 : vector<16x64xf32>
    %114 = vector.broadcast %6 : vector<1x64xf32> to vector<16x64xf32>
    %115 = arith.addf %113, %114 : vector<16x64xf32>
    %cst_53 = arith.constant dense<0.000000e+00> : vector<16xf32>
    %116 = vector.multi_reduction <add>, %115, %cst_53 [1] : vector<16x64xf32> to vector<16xf32>
    %117 = vector.shape_cast %116 : vector<16xf32> to vector<16x1xf32>
    %cst_54 = arith.constant 6.400000e+01 : f32
    %118 = vector.broadcast %cst_54 : f32 to vector<16x1xf32>
    %119 = arith.divf %117, %118 : vector<16x1xf32>
    %120 = vector.broadcast %119 : vector<16x1xf32> to vector<16x64xf32>
    %121 = arith.subf %115, %120 : vector<16x64xf32>
    %122 = arith.mulf %121, %121 : vector<16x64xf32>
    %cst_55 = arith.constant dense<0.000000e+00> : vector<16xf32>
    %123 = vector.multi_reduction <add>, %122, %cst_55 [1] : vector<16x64xf32> to vector<16xf32>
    %124 = vector.shape_cast %123 : vector<16xf32> to vector<16x1xf32>
    %cst_56 = arith.constant 6.400000e+01 : f32
    %125 = vector.broadcast %cst_56 : f32 to vector<16x1xf32>
    %126 = arith.divf %124, %125 : vector<16x1xf32>
    %cst_57 = arith.constant 9.99999974E-6 : f32
    %127 = vector.broadcast %cst_57 : f32 to vector<16x1xf32>
    %128 = arith.addf %126, %127 : vector<16x1xf32>
    %129 = math.rsqrt %128 : vector<16x1xf32>
    %130 = vector.broadcast %129 : vector<16x1xf32> to vector<16x64xf32>
    %131 = arith.mulf %121, %130 : vector<16x64xf32>
    %132 = vector.broadcast %7 : vector<1x64xf32> to vector<16x64xf32>
    %133 = arith.mulf %131, %132 : vector<16x64xf32>
    %134 = vector.broadcast %8 : vector<1x64xf32> to vector<16x64xf32>
    %135 = arith.addf %133, %134 : vector<16x64xf32>
    %136 = arith.truncf %135 : vector<16x64xf32> to vector<16x64xbf16>
    %cst_58 = arith.constant dense<0.000000e+00> : vector<16x256xf32>
    %137 = tpu.matmul %136, %9, %cst_58 {dimension_numbers = #tpu.dot_dimension_numbers<[1], [0], [0], [1], [0, 0, 1, 1], [], []>} : vector<16x64xbf16>, vector<64x256xbf16>, vector<16x256xf32> -> vector<16x256xf32>
    %138 = vector.broadcast %10 : vector<1x256xf32> to vector<16x256xf32>
    %139 = arith.addf %137, %138 : vector<16x256xf32>
    %cst_59 = arith.constant 5.000000e-01 : f32
    %140 = vector.broadcast %cst_59 : f32 to vector<16x256xf32>
    %141 = arith.mulf %140, %139 : vector<16x256xf32>
    %cst_60 = arith.constant 4.471500e-02 : f32
    %142 = vector.broadcast %cst_60 : f32 to vector<16x256xf32>
    %143 = arith.mulf %142, %139 : vector<16x256xf32>
    %144 = arith.mulf %143, %139 : vector<16x256xf32>
    %145 = arith.mulf %144, %139 : vector<16x256xf32>
    %146 = arith.addf %139, %145 : vector<16x256xf32>
    %cst_61 = arith.constant 0.797884583 : f32
    %147 = vector.broadcast %cst_61 : f32 to vector<16x256xf32>
    %148 = arith.mulf %147, %146 : vector<16x256xf32>
    %149 = math.tanh %148 : vector<16x256xf32>
    %cst_62 = arith.constant 1.000000e+00 : f32
    %150 = vector.broadcast %cst_62 : f32 to vector<16x256xf32>
    %151 = arith.addf %150, %149 : vector<16x256xf32>
    %152 = arith.mulf %141, %151 : vector<16x256xf32>
    %153 = arith.truncf %152 : vector<16x256xf32> to vector<16x256xbf16>
    %cst_63 = arith.constant dense<0.000000e+00> : vector<16x64xf32>
    %154 = tpu.matmul %153, %11, %cst_63 {dimension_numbers = #tpu.dot_dimension_numbers<[1], [0], [0], [1], [0, 0, 1, 1], [], []>} : vector<16x256xbf16>, vector<256x64xbf16>, vector<16x64xf32> -> vector<16x64xf32>
    %155 = vector.broadcast %12 : vector<1x64xf32> to vector<16x64xf32>
    %156 = arith.addf %154, %155 : vector<16x64xf32>
    %157 = arith.addf %115, %156 : vector<16x64xf32>
    %c0_64 = arith.constant 0 : index
    %c0_65 = arith.constant 0 : index
    %c0_66 = arith.constant 0 : index
    %158 = vector.load %arg13[%c0_64, %c0_65, %c0_66] : memref<1x16x64xf32, #tpu.memory_space<vmem>>, vector<1x16x64xf32>
    %159 = vector.shape_cast %158 : vector<1x16x64xf32> to vector<16x64xf32>
    %160 = vector.shape_cast %157 : vector<16x64xf32> to vector<1x16x64xf32>
    tpu.vector_store %arg13[%c0_64, %c0_65, %c0_66], %160 {strides = array<i32>} : memref<1x16x64xf32, #tpu.memory_space<vmem>>, vector<1x16x64xf32>,
    return
  }
  func.func @transform_0(%arg0: i32) -> (i32, i32, i32) {
    %c0_i32 = arith.constant 0 : i32
    %c0_i32_0 = arith.constant 0 : i32
    %c0_i32_1 = arith.constant 0 : i32
    return %arg0, %c0_i32, %c0_i32_0 : i32, i32, i32
  }
  func.func @transform_1(%arg0: i32) -> (i32, i32) {
    %c0_i32 = arith.constant 0 : i32
    %c0_i32_0 = arith.constant 0 : i32
    %c0_i32_1 = arith.constant 0 : i32
    return %c0_i32, %c0_i32_0 : i32, i32
  }
  func.func @transform_2(%arg0: i32) -> (i32, i32) {
    %c0_i32 = arith.constant 0 : i32
    %c0_i32_0 = arith.constant 0 : i32
    %c0_i32_1 = arith.constant 0 : i32
    return %c0_i32, %c0_i32_0 : i32, i32
  }
  func.func @transform_3(%arg0: i32) -> (i32, i32) {
    %c0_i32 = arith.constant 0 : i32
    %c0_i32_0 = arith.constant 0 : i32
    %c0_i32_1 = arith.constant 0 : i32
    return %c0_i32, %c0_i32_0 : i32, i32
  }
  func.func @transform_4(%arg0: i32) -> (i32, i32) {
    %c0_i32 = arith.constant 0 : i32
    %c0_i32_0 = arith.constant 0 : i32
    %c0_i32_1 = arith.constant 0 : i32
    return %c0_i32, %c0_i32_0 : i32, i32
  }
  func.func @transform_5(%arg0: i32) -> (i32, i32) {
    %c0_i32 = arith.constant 0 : i32
    %c0_i32_0 = arith.constant 0 : i32
    %c0_i32_1 = arith.constant 0 : i32
    return %c0_i32, %c0_i32_0 : i32, i32
  }
  func.func @transform_6(%arg0: i32) -> (i32, i32) {
    %c0_i32 = arith.constant 0 : i32
    %c0_i32_0 = arith.constant 0 : i32
    %c0_i32_1 = arith.constant 0 : i32
    return %c0_i32, %c0_i32_0 : i32, i32
  }
  func.func @transform_7(%arg0: i32) -> (i32, i32) {
    %c0_i32 = arith.constant 0 : i32
    %c0_i32_0 = arith.constant 0 : i32
    %c0_i32_1 = arith.constant 0 : i32
    return %c0_i32, %c0_i32_0 : i32, i32
  }
  func.func @transform_8(%arg0: i32) -> (i32, i32) {
    %c0_i32 = arith.constant 0 : i32
    %c0_i32_0 = arith.constant 0 : i32
    %c0_i32_1 = arith.constant 0 : i32
    return %c0_i32, %c0_i32_0 : i32, i32
  }
  func.func @transform_9(%arg0: i32) -> (i32, i32) {
    %c0_i32 = arith.constant 0 : i32
    %c0_i32_0 = arith.constant 0 : i32
    %c0_i32_1 = arith.constant 0 : i32
    return %c0_i32, %c0_i32_0 : i32, i32
  }
  func.func @transform_10(%arg0: i32) -> (i32, i32) {
    %c0_i32 = arith.constant 0 : i32
    %c0_i32_0 = arith.constant 0 : i32
    %c0_i32_1 = arith.constant 0 : i32
    return %c0_i32, %c0_i32_0 : i32, i32
  }
  func.func @transform_11(%arg0: i32) -> (i32, i32) {
    %c0_i32 = arith.constant 0 : i32
    %c0_i32_0 = arith.constant 0 : i32
    %c0_i32_1 = arith.constant 0 : i32
    return %c0_i32, %c0_i32_0 : i32, i32
  }
  func.func @transform_12(%arg0: i32) -> (i32, i32, i32) {
    %c0_i32 = arith.constant 0 : i32
    %c0_i32_0 = arith.constant 0 : i32
    %c0_i32_1 = arith.constant 0 : i32
    return %arg0, %c0_i32, %c0_i32_0 : i32, i32, i32
  }
}

module attributes {stable_mosaic.version = 11 : i64} {
  func.func @_resblock_kernel(%arg0: i32, %arg1: memref<1x16x64xf32, #tpu.memory_space<vmem>>, %arg2: memref<1x64xf32, #tpu.memory_space<vmem>>, %arg3: memref<1x64xf32, #tpu.memory_space<vmem>>, %arg4: memref<64x192xbf16, #tpu.memory_space<vmem>>, %arg5: memref<64x64xbf16, #tpu.memory_space<vmem>>, %arg6: memref<1x64xf32, #tpu.memory_space<vmem>>, %arg7: memref<1x64xf32, #tpu.memory_space<vmem>>, %arg8: memref<1x64xf32, #tpu.memory_space<vmem>>, %arg9: memref<64x256xbf16, #tpu.memory_space<vmem>>, %arg10: memref<1x256xf32, #tpu.memory_space<vmem>>, %arg11: memref<256x64xbf16, #tpu.memory_space<vmem>>, %arg12: memref<1x64xf32, #tpu.memory_space<vmem>>, %arg13: memref<1x16x64xf32, #tpu.memory_space<vmem>>, %arg14: memref<16x64xbf16, #tpu.memory_space<vmem>>) attributes {dimension_semantics = [#tpu.dimension_semantics<parallel>], iteration_bounds = array<i64: 2>, scalar_prefetch = 0 : i64, scratch_operands = 1 : i64, tpu.core_type = #tpu.core_type<tc>, window_params = [{transform_indices = @transform_0, window_bounds = array<i64: 1, 16, 64>}, {pipeline_mode = #tpu.pipeline_mode<synchronous>, transform_indices = @transform_1, window_bounds = array<i64: 1, 64>}, {pipeline_mode = #tpu.pipeline_mode<synchronous>, transform_indices = @transform_2, window_bounds = array<i64: 1, 64>}, {pipeline_mode = #tpu.pipeline_mode<synchronous>, transform_indices = @transform_3, window_bounds = array<i64: 64, 192>}, {pipeline_mode = #tpu.pipeline_mode<synchronous>, transform_indices = @transform_4, window_bounds = array<i64: 64, 64>}, {pipeline_mode = #tpu.pipeline_mode<synchronous>, transform_indices = @transform_5, window_bounds = array<i64: 1, 64>}, {pipeline_mode = #tpu.pipeline_mode<synchronous>, transform_indices = @transform_6, window_bounds = array<i64: 1, 64>}, {pipeline_mode = #tpu.pipeline_mode<synchronous>, transform_indices = @transform_7, window_bounds = array<i64: 1, 64>}, {pipeline_mode = #tpu.pipeline_mode<synchronous>, transform_indices = @transform_8, window_bounds = array<i64: 64, 256>}, {pipeline_mode = #tpu.pipeline_mode<synchronous>, transform_indices = @transform_9, window_bounds = array<i64: 1, 256>}, {pipeline_mode = #tpu.pipeline_mode<synchronous>, transform_indices = @transform_10, window_bounds = array<i64: 256, 64>}, {pipeline_mode = #tpu.pipeline_mode<synchronous>, transform_indices = @transform_11, window_bounds = array<i64: 1, 64>}, {transform_indices = @transform_12, window_bounds = array<i64: 1, 16, 64>}]} {
    %c0 = arith.constant 0 : index
    %c0_0 = arith.constant 0 : index
    %c0_1 = arith.constant 0 : index
    %0 = vector.load %arg1[%c0, %c0_0, %c0_1] : memref<1x16x64xf32, #tpu.memory_space<vmem>>, vector<1x16x64xf32>
    %1 = vector.shape_cast %0 : vector<1x16x64xf32> to vector<16x64xf32>
    %c0_2 = arith.constant 0 : index
    %c0_3 = arith.constant 0 : index
    %2 = vector.load %arg2[%c0_2, %c0_3] : memref<1x64xf32, #tpu.memory_space<vmem>>, vector<1x64xf32>
    %c0_4 = arith.constant 0 : index
    %c0_5 = arith.constant 0 : index
    %3 = vector.load %arg3[%c0_4, %c0_5] : memref<1x64xf32, #tpu.memory_space<vmem>>, vector<1x64xf32>
    %c0_6 = arith.constant 0 : index
    %c0_7 = arith.constant 0 : index
    %4 = vector.load %arg4[%c0_6, %c0_7] : memref<64x192xbf16, #tpu.memory_space<vmem>>, vector<64x192xbf16>
    %c0_8 = arith.constant 0 : index
    %c0_9 = arith.constant 0 : index
    %5 = vector.load %arg5[%c0_8, %c0_9] : memref<64x64xbf16, #tpu.memory_space<vmem>>, vector<64x64xbf16>
    %c0_10 = arith.constant 0 : index
    %c0_11 = arith.constant 0 : index
    %6 = vector.load %arg6[%c0_10, %c0_11] : memref<1x64xf32, #tpu.memory_space<vmem>>, vector<1x64xf32>
    %c0_12 = arith.constant 0 : index
    %c0_13 = arith.constant 0 : index
    %7 = vector.load %arg7[%c0_12, %c0_13] : memref<1x64xf32, #tpu.memory_space<vmem>>, vector<1x64xf32>
    %c0_14 = arith.constant 0 : index
    %c0_15 = arith.constant 0 : index
    %8 = vector.load %arg8[%c0_14, %c0_15] : memref<1x64xf32, #tpu.memory_space<vmem>>, vector<1x64xf32>
    %c0_16 = arith.constant 0 : index
    %c0_17 = arith.constant 0 : index
    %9 = vector.load %arg9[%c0_16, %c0_17] : memref<64x256xbf16, #tpu.memory_space<vmem>>, vector<64x256xbf16>
    %c0_18 = arith.constant 0 : index
    %c0_19 = arith.constant 0 : index
    %10 = vector.load %arg10[%c0_18, %c0_19] : memref<1x256xf32, #tpu.memory_space<vmem>>, vector<1x256xf32>
    %c0_20 = arith.constant 0 : index
    %c0_21 = arith.constant 0 : index
    %11 = vector.load %arg11[%c0_20, %c0_21] : memref<256x64xbf16, #tpu.memory_space<vmem>>, vector<256x64xbf16>
    %c0_22 = arith.constant 0 : index
    %c0_23 = arith.constant 0 : index
    %12 = vector.load %arg12[%c0_22, %c0_23] : memref<1x64xf32, #tpu.memory_space<vmem>>, vector<1x64xf32>
    %cst = arith.constant dense<0.000000e+00> : vector<16xf32>
    %13 = vector.multi_reduction <add>, %1, %cst [1] : vector<16x64xf32> to vector<16xf32>
    %14 = vector.shape_cast %13 : vector<16xf32> to vector<16x1xf32>
    %cst_24 = arith.constant 6.400000e+01 : f32
    %15 = vector.broadcast %cst_24 : f32 to vector<16x1xf32>
    %16 = arith.divf %14, %15 : vector<16x1xf32>
    %17 = vector.broadcast %16 : vector<16x1xf32> to vector<16x64xf32>
    %18 = arith.subf %1, %17 : vector<16x64xf32>
    %19 = arith.mulf %18, %18 : vector<16x64xf32>
    %cst_25 = arith.constant dense<0.000000e+00> : vector<16xf32>
    %20 = vector.multi_reduction <add>, %19, %cst_25 [1] : vector<16x64xf32> to vector<16xf32>
    %21 = vector.shape_cast %20 : vector<16xf32> to vector<16x1xf32>
    %cst_26 = arith.constant 6.400000e+01 : f32
    %22 = vector.broadcast %cst_26 : f32 to vector<16x1xf32>
    %23 = arith.divf %21, %22 : vector<16x1xf32>
    %cst_27 = arith.constant 9.99999974E-6 : f32
    %24 = vector.broadcast %cst_27 : f32 to vector<16x1xf32>
    %25 = arith.addf %23, %24 : vector<16x1xf32>
    %26 = math.rsqrt %25 : vector<16x1xf32>
    %27 = vector.broadcast %26 : vector<16x1xf32> to vector<16x64xf32>
    %28 = arith.mulf %18, %27 : vector<16x64xf32>
    %29 = vector.broadcast %2 : vector<1x64xf32> to vector<16x64xf32>
    %30 = arith.mulf %28, %29 : vector<16x64xf32>
    %31 = vector.broadcast %3 : vector<1x64xf32> to vector<16x64xf32>
    %32 = arith.addf %30, %31 : vector<16x64xf32>
    %33 = arith.truncf %32 : vector<16x64xf32> to vector<16x64xbf16>
    %cst_28 = arith.constant dense<0.000000e+00> : vector<16x192xf32>
    %34 = tpu.matmul %33, %4, %cst_28 {dimension_numbers = #tpu.dot_dimension_numbers<[1], [0], [0], [1], [0, 0, 1, 1], [], []>} : vector<16x64xbf16>, vector<64x192xbf16>, vector<16x192xf32> -> vector<16x192xf32>
    %35 = arith.truncf %34 : vector<16x192xf32> to vector<16x192xbf16>
    %36 = vector.extract_strided_slice %35 {offsets = [0, 0], sizes = [16, 64], strides = [1, 1]} : vector<16x192xbf16> to vector<16x64xbf16>
    %37 = vector.extract_strided_slice %35 {offsets = [0, 64], sizes = [16, 64], strides = [1, 1]} : vector<16x192xbf16> to vector<16x64xbf16>
    %38 = vector.extract_strided_slice %35 {offsets = [0, 128], sizes = [16, 64], strides = [1, 1]} : vector<16x192xbf16> to vector<16x64xbf16>
    %39 = vector.extract_strided_slice %36 {offsets = [0, 0], sizes = [16, 16], strides = [1, 1]} : vector<16x64xbf16> to vector<16x16xbf16>
    %40 = vector.extract_strided_slice %37 {offsets = [0, 0], sizes = [16, 16], strides = [1, 1]} : vector<16x64xbf16> to vector<16x16xbf16>
    %41 = vector.extract_strided_slice %38 {offsets = [0, 0], sizes = [16, 16], strides = [1, 1]} : vector<16x64xbf16> to vector<16x16xbf16>
    %cst_29 = arith.constant dense<0.000000e+00> : vector<16x16xf32>
    %42 = tpu.matmul %39, %40, %cst_29 {dimension_numbers = #tpu.dot_dimension_numbers<[1], [1], [0], [0], [0, 0, 1, 0], [], []>} : vector<16x16xbf16>, vector<16x16xbf16>, vector<16x16xf32> -> vector<16x16xf32>
    %cst_30 = arith.constant dense<0xFF800000> : vector<16xf32>
    %43 = vector.multi_reduction <maximumf>, %42, %cst_30 [1] : vector<16x16xf32> to vector<16xf32>
    %44 = vector.shape_cast %43 : vector<16xf32> to vector<16x1xf32>
    %45 = vector.broadcast %44 : vector<16x1xf32> to vector<16x16xf32>
    %46 = arith.subf %42, %45 : vector<16x16xf32>
    %47 = math.exp %46 : vector<16x16xf32>
    %cst_31 = arith.constant dense<0.000000e+00> : vector<16xf32>
    %48 = vector.multi_reduction <add>, %47, %cst_31 [1] : vector<16x16xf32> to vector<16xf32>
    %49 = vector.shape_cast %48 : vector<16xf32> to vector<16x1xf32>
    %50 = tpu.reciprocal %49 {approx = true} : vector<16x1xf32> -> vector<16x1xf32>
    %51 = vector.broadcast %50 : vector<16x1xf32> to vector<16x16xf32>
    %52 = arith.mulf %47, %51 : vector<16x16xf32>
    %53 = arith.truncf %52 : vector<16x16xf32> to vector<16x16xbf16>
    %cst_32 = arith.constant dense<0.000000e+00> : vector<16x16xf32>
    %54 = tpu.matmul %53, %41, %cst_32 {dimension_numbers = #tpu.dot_dimension_numbers<[1], [0], [0], [1], [0, 0, 1, 1], [], []>} : vector<16x16xbf16>, vector<16x16xbf16>, vector<16x16xf32> -> vector<16x16xf32>
    %55 = arith.truncf %54 : vector<16x16xf32> to vector<16x16xbf16>
    %c0_33 = arith.constant 0 : index
    %c0_34 = arith.constant 0 : index
    %56 = vector.load %arg14[%c0_33, %c0_34] : memref<16x64xbf16, #tpu.memory_space<vmem>>, vector<16x16xbf16>
    tpu.vector_store %arg14[%c0_33, %c0_34], %55 {strides = array<i32>} : memref<16x64xbf16, #tpu.memory_space<vmem>>, vector<16x16xbf16>,
    %57 = vector.extract_strided_slice %36 {offsets = [0, 16], sizes = [16, 16], strides = [1, 1]} : vector<16x64xbf16> to vector<16x16xbf16>
    %58 = vector.extract_strided_slice %37 {offsets = [0, 16], sizes = [16, 16], strides = [1, 1]} : vector<16x64xbf16> to vector<16x16xbf16>
    %59 = vector.extract_strided_slice %38 {offsets = [0, 16], sizes = [16, 16], strides = [1, 1]} : vector<16x64xbf16> to vector<16x16xbf16>
    %cst_35 = arith.constant dense<0.000000e+00> : vector<16x16xf32>
    %60 = tpu.matmul %57, %58, %cst_35 {dimension_numbers = #tpu.dot_dimension_numbers<[1], [1], [0], [0], [0, 0, 1, 0], [], []>} : vector<16x16xbf16>, vector<16x16xbf16>, vector<16x16xf32> -> vector<16x16xf32>
    %cst_36 = arith.constant dense<0xFF800000> : vector<16xf32>
    %61 = vector.multi_reduction <maximumf>, %60, %cst_36 [1] : vector<16x16xf32> to vector<16xf32>
    %62 = vector.shape_cast %61 : vector<16xf32> to vector<16x1xf32>
    %63 = vector.broadcast %62 : vector<16x1xf32> to vector<16x16xf32>
    %64 = arith.subf %60, %63 : vector<16x16xf32>
    %65 = math.exp %64 : vector<16x16xf32>
    %cst_37 = arith.constant dense<0.000000e+00> : vector<16xf32>
    %66 = vector.multi_reduction <add>, %65, %cst_37 [1] : vector<16x16xf32> to vector<16xf32>
    %67 = vector.shape_cast %66 : vector<16xf32> to vector<16x1xf32>
    %68 = tpu.reciprocal %67 {approx = true} : vector<16x1xf32> -> vector<16x1xf32>
    %69 = vector.broadcast %68 : vector<16x1xf32> to vector<16x16xf32>
    %70 = arith.mulf %65, %69 : vector<16x16xf32>
    %71 = arith.truncf %70 : vector<16x16xf32> to vector<16x16xbf16>
    %cst_38 = arith.constant dense<0.000000e+00> : vector<16x16xf32>
    %72 = tpu.matmul %71, %59, %cst_38 {dimension_numbers = #tpu.dot_dimension_numbers<[1], [0], [0], [1], [0, 0, 1, 1], [], []>} : vector<16x16xbf16>, vector<16x16xbf16>, vector<16x16xf32> -> vector<16x16xf32>
    %73 = arith.truncf %72 : vector<16x16xf32> to vector<16x16xbf16>
    %c0_39 = arith.constant 0 : index
    %c16 = arith.constant 16 : index
    %74 = vector.load %arg14[%c0_39, %c16] : memref<16x64xbf16, #tpu.memory_space<vmem>>, vector<16x16xbf16>
    tpu.vector_store %arg14[%c0_39, %c16], %73 {strides = array<i32>} : memref<16x64xbf16, #tpu.memory_space<vmem>>, vector<16x16xbf16>,
    %75 = vector.extract_strided_slice %36 {offsets = [0, 32], sizes = [16, 16], strides = [1, 1]} : vector<16x64xbf16> to vector<16x16xbf16>
    %76 = vector.extract_strided_slice %37 {offsets = [0, 32], sizes = [16, 16], strides = [1, 1]} : vector<16x64xbf16> to vector<16x16xbf16>
    %77 = vector.extract_strided_slice %38 {offsets = [0, 32], sizes = [16, 16], strides = [1, 1]} : vector<16x64xbf16> to vector<16x16xbf16>
    %cst_40 = arith.constant dense<0.000000e+00> : vector<16x16xf32>
    %78 = tpu.matmul %75, %76, %cst_40 {dimension_numbers = #tpu.dot_dimension_numbers<[1], [1], [0], [0], [0, 0, 1, 0], [], []>} : vector<16x16xbf16>, vector<16x16xbf16>, vector<16x16xf32> -> vector<16x16xf32>
    %cst_41 = arith.constant dense<0xFF800000> : vector<16xf32>
    %79 = vector.multi_reduction <maximumf>, %78, %cst_41 [1] : vector<16x16xf32> to vector<16xf32>
    %80 = vector.shape_cast %79 : vector<16xf32> to vector<16x1xf32>
    %81 = vector.broadcast %80 : vector<16x1xf32> to vector<16x16xf32>
    %82 = arith.subf %78, %81 : vector<16x16xf32>
    %83 = math.exp %82 : vector<16x16xf32>
    %cst_42 = arith.constant dense<0.000000e+00> : vector<16xf32>
    %84 = vector.multi_reduction <add>, %83, %cst_42 [1] : vector<16x16xf32> to vector<16xf32>
    %85 = vector.shape_cast %84 : vector<16xf32> to vector<16x1xf32>
    %86 = tpu.reciprocal %85 {approx = true} : vector<16x1xf32> -> vector<16x1xf32>
    %87 = vector.broadcast %86 : vector<16x1xf32> to vector<16x16xf32>
    %88 = arith.mulf %83, %87 : vector<16x16xf32>
    %89 = arith.truncf %88 : vector<16x16xf32> to vector<16x16xbf16>
    %cst_43 = arith.constant dense<0.000000e+00> : vector<16x16xf32>
    %90 = tpu.matmul %89, %77, %cst_43 {dimension_numbers = #tpu.dot_dimension_numbers<[1], [0], [0], [1], [0, 0, 1, 1], [], []>} : vector<16x16xbf16>, vector<16x16xbf16>, vector<16x16xf32> -> vector<16x16xf32>
    %91 = arith.truncf %90 : vector<16x16xf32> to vector<16x16xbf16>
    %c0_44 = arith.constant 0 : index
    %c32 = arith.constant 32 : index
    %92 = vector.load %arg14[%c0_44, %c32] : memref<16x64xbf16, #tpu.memory_space<vmem>>, vector<16x16xbf16>
    tpu.vector_store %arg14[%c0_44, %c32], %91 {strides = array<i32>} : memref<16x64xbf16, #tpu.memory_space<vmem>>, vector<16x16xbf16>,
    %93 = vector.extract_strided_slice %36 {offsets = [0, 48], sizes = [16, 16], strides = [1, 1]} : vector<16x64xbf16> to vector<16x16xbf16>
    %94 = vector.extract_strided_slice %37 {offsets = [0, 48], sizes = [16, 16], strides = [1, 1]} : vector<16x64xbf16> to vector<16x16xbf16>
    %95 = vector.extract_strided_slice %38 {offsets = [0, 48], sizes = [16, 16], strides = [1, 1]} : vector<16x64xbf16> to vector<16x16xbf16>
    %cst_45 = arith.constant dense<0.000000e+00> : vector<16x16xf32>
    %96 = tpu.matmul %93, %94, %cst_45 {dimension_numbers = #tpu.dot_dimension_numbers<[1], [1], [0], [0], [0, 0, 1, 0], [], []>} : vector<16x16xbf16>, vector<16x16xbf16>, vector<16x16xf32> -> vector<16x16xf32>
    %cst_46 = arith.constant dense<0xFF800000> : vector<16xf32>
    %97 = vector.multi_reduction <maximumf>, %96, %cst_46 [1] : vector<16x16xf32> to vector<16xf32>
    %98 = vector.shape_cast %97 : vector<16xf32> to vector<16x1xf32>
    %99 = vector.broadcast %98 : vector<16x1xf32> to vector<16x16xf32>
    %100 = arith.subf %96, %99 : vector<16x16xf32>
    %101 = math.exp %100 : vector<16x16xf32>
    %cst_47 = arith.constant dense<0.000000e+00> : vector<16xf32>
    %102 = vector.multi_reduction <add>, %101, %cst_47 [1] : vector<16x16xf32> to vector<16xf32>
    %103 = vector.shape_cast %102 : vector<16xf32> to vector<16x1xf32>
    %104 = tpu.reciprocal %103 {approx = true} : vector<16x1xf32> -> vector<16x1xf32>
    %105 = vector.broadcast %104 : vector<16x1xf32> to vector<16x16xf32>
    %106 = arith.mulf %101, %105 : vector<16x16xf32>
    %107 = arith.truncf %106 : vector<16x16xf32> to vector<16x16xbf16>
    %cst_48 = arith.constant dense<0.000000e+00> : vector<16x16xf32>
    %108 = tpu.matmul %107, %95, %cst_48 {dimension_numbers = #tpu.dot_dimension_numbers<[1], [0], [0], [1], [0, 0, 1, 1], [], []>} : vector<16x16xbf16>, vector<16x16xbf16>, vector<16x16xf32> -> vector<16x16xf32>
    %109 = arith.truncf %108 : vector<16x16xf32> to vector<16x16xbf16>
    %c0_49 = arith.constant 0 : index
    %c48 = arith.constant 48 : index
    %110 = vector.load %arg14[%c0_49, %c48] : memref<16x64xbf16, #tpu.memory_space<vmem>>, vector<16x16xbf16>
    tpu.vector_store %arg14[%c0_49, %c48], %109 {strides = array<i32>} : memref<16x64xbf16, #tpu.memory_space<vmem>>, vector<16x16xbf16>,
    %c0_50 = arith.constant 0 : index
    %c0_51 = arith.constant 0 : index
    %111 = vector.load %arg14[%c0_50, %c0_51] : memref<16x64xbf16, #tpu.memory_space<vmem>>, vector<16x64xbf16>
    %cst_52 = arith.constant dense<0.000000e+00> : vector<16x64xf32>
    %112 = tpu.matmul %111, %5, %cst_52 {dimension_numbers = #tpu.dot_dimension_numbers<[1], [0], [0], [1], [0, 0, 1, 1], [], []>} : vector<16x64xbf16>, vector<64x64xbf16>, vector<16x64xf32> -> vector<16x64xf32>
    %113 = arith.addf %1, %112 : vector<16x64xf32>
    %114 = vector.broadcast %6 : vector<1x64xf32> to vector<16x64xf32>
    %115 = arith.addf %113, %114 : vector<16x64xf32>
    %cst_53 = arith.constant dense<0.000000e+00> : vector<16xf32>
    %116 = vector.multi_reduction <add>, %115, %cst_53 [1] : vector<16x64xf32> to vector<16xf32>
    %117 = vector.shape_cast %116 : vector<16xf32> to vector<16x1xf32>
    %cst_54 = arith.constant 6.400000e+01 : f32
    %118 = vector.broadcast %cst_54 : f32 to vector<16x1xf32>
    %119 = arith.divf %117, %118 : vector<16x1xf32>
    %120 = vector.broadcast %119 : vector<16x1xf32> to vector<16x64xf32>
    %121 = arith.subf %115, %120 : vector<16x64xf32>
    %122 = arith.mulf %121, %121 : vector<16x64xf32>
    %cst_55 = arith.constant dense<0.000000e+00> : vector<16xf32>
    %123 = vector.multi_reduction <add>, %122, %cst_55 [1] : vector<16x64xf32> to vector<16xf32>
    %124 = vector.shape_cast %123 : vector<16xf32> to vector<16x1xf32>
    %cst_56 = arith.constant 6.400000e+01 : f32
    %125 = vector.broadcast %cst_56 : f32 to vector<16x1xf32>
    %126 = arith.divf %124, %125 : vector<16x1xf32>
    %cst_57 = arith.constant 9.99999974E-6 : f32
    %127 = vector.broadcast %cst_57 : f32 to vector<16x1xf32>
    %128 = arith.addf %126, %127 : vector<16x1xf32>
    %129 = math.rsqrt %128 : vector<16x1xf32>
    %130 = vector.broadcast %129 : vector<16x1xf32> to vector<16x64xf32>
    %131 = arith.mulf %121, %130 : vector<16x64xf32>
    %132 = vector.broadcast %7 : vector<1x64xf32> to vector<16x64xf32>
    %133 = arith.mulf %131, %132 : vector<16x64xf32>
    %134 = vector.broadcast %8 : vector<1x64xf32> to vector<16x64xf32>
    %135 = arith.addf %133, %134 : vector<16x64xf32>
    %136 = arith.truncf %135 : vector<16x64xf32> to vector<16x64xbf16>
    %cst_58 = arith.constant dense<0.000000e+00> : vector<16x256xf32>
    %137 = tpu.matmul %136, %9, %cst_58 {dimension_numbers = #tpu.dot_dimension_numbers<[1], [0], [0], [1], [0, 0, 1, 1], [], []>} : vector<16x64xbf16>, vector<64x256xbf16>, vector<16x256xf32> -> vector<16x256xf32>
    %138 = vector.broadcast %10 : vector<1x256xf32> to vector<16x256xf32>
    %139 = arith.addf %137, %138 : vector<16x256xf32>
    %cst_59 = arith.constant 5.000000e-01 : f32
    %140 = vector.broadcast %cst_59 : f32 to vector<16x256xf32>
    %141 = arith.mulf %140, %139 : vector<16x256xf32>
    %cst_60 = arith.constant 4.471500e-02 : f32
    %142 = vector.broadcast %cst_60 : f32 to vector<16x256xf32>
    %143 = arith.mulf %142, %139 : vector<16x256xf32>
    %144 = arith.mulf %143, %139 : vector<16x256xf32>
    %145 = arith.mulf %144, %139 : vector<16x256xf32>
    %146 = arith.addf %139, %145 : vector<16x256xf32>
    %cst_61 = arith.constant 0.797884583 : f32
    %147 = vector.broadcast %cst_61 : f32 to vector<16x256xf32>
    %148 = arith.mulf %147, %146 : vector<16x256xf32>
    %149 = math.tanh %148 : vector<16x256xf32>
    %cst_62 = arith.constant 1.000000e+00 : f32
    %150 = vector.broadcast %cst_62 : f32 to vector<16x256xf32>
    %151 = arith.addf %150, %149 : vector<16x256xf32>
    %152 = arith.mulf %141, %151 : vector<16x256xf32>
    %153 = arith.truncf %152 : vector<16x256xf32> to vector<16x256xbf16>
    %cst_63 = arith.constant dense<0.000000e+00> : vector<16x64xf32>
    %154 = tpu.matmul %153, %11, %cst_63 {dimension_numbers = #tpu.dot_dimension_numbers<[1], [0], [0], [1], [0, 0, 1, 1], [], []>} : vector<16x256xbf16>, vector<256x64xbf16>, vector<16x64xf32> -> vector<16x64xf32>
    %155 = vector.broadcast %12 : vector<1x64xf32> to vector<16x64xf32>
    %156 = arith.addf %154, %155 : vector<16x64xf32>
    %157 = arith.addf %115, %156 : vector<16x64xf32>
    %c0_64 = arith.constant 0 : index
    %c0_65 = arith.constant 0 : index
    %c0_66 = arith.constant 0 : index
    %158 = vector.load %arg13[%c0_64, %c0_65, %c0_66] : memref<1x16x64xf32, #tpu.memory_space<vmem>>, vector<1x16x64xf32>
    %159 = vector.shape_cast %158 : vector<1x16x64xf32> to vector<16x64xf32>
    %160 = vector.shape_cast %157 : vector<16x64xf32> to vector<1x16x64xf32>
    tpu.vector_store %arg13[%c0_64, %c0_65, %c0_66], %160 {strides = array<i32>} : memref<1x16x64xf32, #tpu.memory_space<vmem>>, vector<1x16x64xf32>,
    return
  }
  func.func @transform_0(%arg0: i32) -> (i32, i32, i32) {
    %c0_i32 = arith.constant 0 : i32
    %c0_i32_0 = arith.constant 0 : i32
    %c0_i32_1 = arith.constant 0 : i32
    return %arg0, %c0_i32, %c0_i32_0 : i32, i32, i32
  }
  func.func @transform_1(%arg0: i32) -> (i32, i32) {
    %c0_i32 = arith.constant 0 : i32
    %c0_i32_0 = arith.constant 0 : i32
    %c0_i32_1 = arith.constant 0 : i32
    return %c0_i32, %c0_i32_0 : i32, i32
  }
  func.func @transform_2(%arg0: i32) -> (i32, i32) {
    %c0_i32 = arith.constant 0 : i32
    %c0_i32_0 = arith.constant 0 : i32
    %c0_i32_1 = arith.constant 0 : i32
    return %c0_i32, %c0_i32_0 : i32, i32
  }
  func.func @transform_3(%arg0: i32) -> (i32, i32) {
    %c0_i32 = arith.constant 0 : i32
    %c0_i32_0 = arith.constant 0 : i32
    %c0_i32_1 = arith.constant 0 : i32
    return %c0_i32, %c0_i32_0 : i32, i32
  }
  func.func @transform_4(%arg0: i32) -> (i32, i32) {
    %c0_i32 = arith.constant 0 : i32
    %c0_i32_0 = arith.constant 0 : i32
    %c0_i32_1 = arith.constant 0 : i32
    return %c0_i32, %c0_i32_0 : i32, i32
  }
  func.func @transform_5(%arg0: i32) -> (i32, i32) {
    %c0_i32 = arith.constant 0 : i32
    %c0_i32_0 = arith.constant 0 : i32
    %c0_i32_1 = arith.constant 0 : i32
    return %c0_i32, %c0_i32_0 : i32, i32
  }
  func.func @transform_6(%arg0: i32) -> (i32, i32) {
    %c0_i32 = arith.constant 0 : i32
    %c0_i32_0 = arith.constant 0 : i32
    %c0_i32_1 = arith.constant 0 : i32
    return %c0_i32, %c0_i32_0 : i32, i32
  }
  func.func @transform_7(%arg0: i32) -> (i32, i32) {
    %c0_i32 = arith.constant 0 : i32
    %c0_i32_0 = arith.constant 0 : i32
    %c0_i32_1 = arith.constant 0 : i32
    return %c0_i32, %c0_i32_0 : i32, i32
  }
  func.func @transform_8(%arg0: i32) -> (i32, i32) {
    %c0_i32 = arith.constant 0 : i32
    %c0_i32_0 = arith.constant 0 : i32
    %c0_i32_1 = arith.constant 0 : i32
    return %c0_i32, %c0_i32_0 : i32, i32
  }
  func.func @transform_9(%arg0: i32) -> (i32, i32) {
    %c0_i32 = arith.constant 0 : i32
    %c0_i32_0 = arith.constant 0 : i32
    %c0_i32_1 = arith.constant 0 : i32
    return %c0_i32, %c0_i32_0 : i32, i32
  }
  func.func @transform_10(%arg0: i32) -> (i32, i32) {
    %c0_i32 = arith.constant 0 : i32
    %c0_i32_0 = arith.constant 0 : i32
    %c0_i32_1 = arith.constant 0 : i32
    return %c0_i32, %c0_i32_0 : i32, i32
  }
  func.func @transform_11(%arg0: i32) -> (i32, i32) {
    %c0_i32 = arith.constant 0 : i32
    %c0_i32_0 = arith.constant 0 : i32
    %c0_i32_1 = arith.constant 0 : i32
    return %c0_i32, %c0_i32_0 : i32, i32
  }
  func.func @transform_12(%arg0: i32) -> (i32, i32, i32) {
    %c0_i32 = arith.constant 0 : i32
    %c0_i32_0 = arith.constant 0 : i32
    %c0_i32_1 = arith.constant 0 : i32
    return %arg0, %c0_i32, %c0_i32_0 : i32, i32, i32
  }
}

module attributes {stable_mosaic.version = 11 : i64} {
  func.func @_resblock_kernel(%arg0: i32, %arg1: memref<1x16x64xf32, #tpu.memory_space<vmem>>, %arg2: memref<1x64xf32, #tpu.memory_space<vmem>>, %arg3: memref<1x64xf32, #tpu.memory_space<vmem>>, %arg4: memref<64x192xbf16, #tpu.memory_space<vmem>>, %arg5: memref<64x64xbf16, #tpu.memory_space<vmem>>, %arg6: memref<1x64xf32, #tpu.memory_space<vmem>>, %arg7: memref<1x64xf32, #tpu.memory_space<vmem>>, %arg8: memref<1x64xf32, #tpu.memory_space<vmem>>, %arg9: memref<64x256xbf16, #tpu.memory_space<vmem>>, %arg10: memref<1x256xf32, #tpu.memory_space<vmem>>, %arg11: memref<256x64xbf16, #tpu.memory_space<vmem>>, %arg12: memref<1x64xf32, #tpu.memory_space<vmem>>, %arg13: memref<1x16x64xf32, #tpu.memory_space<vmem>>, %arg14: memref<16x64xbf16, #tpu.memory_space<vmem>>) attributes {dimension_semantics = [#tpu.dimension_semantics<parallel>], iteration_bounds = array<i64: 2>, scalar_prefetch = 0 : i64, scratch_operands = 1 : i64, tpu.core_type = #tpu.core_type<tc>, window_params = [{transform_indices = @transform_0, window_bounds = array<i64: 1, 16, 64>}, {pipeline_mode = #tpu.pipeline_mode<synchronous>, transform_indices = @transform_1, window_bounds = array<i64: 1, 64>}, {pipeline_mode = #tpu.pipeline_mode<synchronous>, transform_indices = @transform_2, window_bounds = array<i64: 1, 64>}, {pipeline_mode = #tpu.pipeline_mode<synchronous>, transform_indices = @transform_3, window_bounds = array<i64: 64, 192>}, {pipeline_mode = #tpu.pipeline_mode<synchronous>, transform_indices = @transform_4, window_bounds = array<i64: 64, 64>}, {pipeline_mode = #tpu.pipeline_mode<synchronous>, transform_indices = @transform_5, window_bounds = array<i64: 1, 64>}, {pipeline_mode = #tpu.pipeline_mode<synchronous>, transform_indices = @transform_6, window_bounds = array<i64: 1, 64>}, {pipeline_mode = #tpu.pipeline_mode<synchronous>, transform_indices = @transform_7, window_bounds = array<i64: 1, 64>}, {pipeline_mode = #tpu.pipeline_mode<synchronous>, transform_indices = @transform_8, window_bounds = array<i64: 64, 256>}, {pipeline_mode = #tpu.pipeline_mode<synchronous>, transform_indices = @transform_9, window_bounds = array<i64: 1, 256>}, {pipeline_mode = #tpu.pipeline_mode<synchronous>, transform_indices = @transform_10, window_bounds = array<i64: 256, 64>}, {pipeline_mode = #tpu.pipeline_mode<synchronous>, transform_indices = @transform_11, window_bounds = array<i64: 1, 64>}, {transform_indices = @transform_12, window_bounds = array<i64: 1, 16, 64>}]} {
    %c0 = arith.constant 0 : index
    %c0_0 = arith.constant 0 : index
    %c0_1 = arith.constant 0 : index
    %0 = vector.load %arg1[%c0, %c0_0, %c0_1] : memref<1x16x64xf32, #tpu.memory_space<vmem>>, vector<1x16x64xf32>
    %1 = vector.shape_cast %0 : vector<1x16x64xf32> to vector<16x64xf32>
    %c0_2 = arith.constant 0 : index
    %c0_3 = arith.constant 0 : index
    %2 = vector.load %arg2[%c0_2, %c0_3] : memref<1x64xf32, #tpu.memory_space<vmem>>, vector<1x64xf32>
    %c0_4 = arith.constant 0 : index
    %c0_5 = arith.constant 0 : index
    %3 = vector.load %arg3[%c0_4, %c0_5] : memref<1x64xf32, #tpu.memory_space<vmem>>, vector<1x64xf32>
    %c0_6 = arith.constant 0 : index
    %c0_7 = arith.constant 0 : index
    %4 = vector.load %arg4[%c0_6, %c0_7] : memref<64x192xbf16, #tpu.memory_space<vmem>>, vector<64x192xbf16>
    %c0_8 = arith.constant 0 : index
    %c0_9 = arith.constant 0 : index
    %5 = vector.load %arg5[%c0_8, %c0_9] : memref<64x64xbf16, #tpu.memory_space<vmem>>, vector<64x64xbf16>
    %c0_10 = arith.constant 0 : index
    %c0_11 = arith.constant 0 : index
    %6 = vector.load %arg6[%c0_10, %c0_11] : memref<1x64xf32, #tpu.memory_space<vmem>>, vector<1x64xf32>
    %c0_12 = arith.constant 0 : index
    %c0_13 = arith.constant 0 : index
    %7 = vector.load %arg7[%c0_12, %c0_13] : memref<1x64xf32, #tpu.memory_space<vmem>>, vector<1x64xf32>
    %c0_14 = arith.constant 0 : index
    %c0_15 = arith.constant 0 : index
    %8 = vector.load %arg8[%c0_14, %c0_15] : memref<1x64xf32, #tpu.memory_space<vmem>>, vector<1x64xf32>
    %c0_16 = arith.constant 0 : index
    %c0_17 = arith.constant 0 : index
    %9 = vector.load %arg9[%c0_16, %c0_17] : memref<64x256xbf16, #tpu.memory_space<vmem>>, vector<64x256xbf16>
    %c0_18 = arith.constant 0 : index
    %c0_19 = arith.constant 0 : index
    %10 = vector.load %arg10[%c0_18, %c0_19] : memref<1x256xf32, #tpu.memory_space<vmem>>, vector<1x256xf32>
    %c0_20 = arith.constant 0 : index
    %c0_21 = arith.constant 0 : index
    %11 = vector.load %arg11[%c0_20, %c0_21] : memref<256x64xbf16, #tpu.memory_space<vmem>>, vector<256x64xbf16>
    %c0_22 = arith.constant 0 : index
    %c0_23 = arith.constant 0 : index
    %12 = vector.load %arg12[%c0_22, %c0_23] : memref<1x64xf32, #tpu.memory_space<vmem>>, vector<1x64xf32>
    %cst = arith.constant dense<0.000000e+00> : vector<16xf32>
    %13 = vector.multi_reduction <add>, %1, %cst [1] : vector<16x64xf32> to vector<16xf32>
    %14 = vector.shape_cast %13 : vector<16xf32> to vector<16x1xf32>
    %cst_24 = arith.constant 6.400000e+01 : f32
    %15 = vector.broadcast %cst_24 : f32 to vector<16x1xf32>
    %16 = arith.divf %14, %15 : vector<16x1xf32>
    %17 = vector.broadcast %16 : vector<16x1xf32> to vector<16x64xf32>
    %18 = arith.subf %1, %17 : vector<16x64xf32>
    %19 = arith.mulf %18, %18 : vector<16x64xf32>
    %cst_25 = arith.constant dense<0.000000e+00> : vector<16xf32>
    %20 = vector.multi_reduction <add>, %19, %cst_25 [1] : vector<16x64xf32> to vector<16xf32>
    %21 = vector.shape_cast %20 : vector<16xf32> to vector<16x1xf32>
    %cst_26 = arith.constant 6.400000e+01 : f32
    %22 = vector.broadcast %cst_26 : f32 to vector<16x1xf32>
    %23 = arith.divf %21, %22 : vector<16x1xf32>
    %cst_27 = arith.constant 9.99999974E-6 : f32
    %24 = vector.broadcast %cst_27 : f32 to vector<16x1xf32>
    %25 = arith.addf %23, %24 : vector<16x1xf32>
    %26 = math.rsqrt %25 : vector<16x1xf32>
    %27 = vector.broadcast %26 : vector<16x1xf32> to vector<16x64xf32>
    %28 = arith.mulf %18, %27 : vector<16x64xf32>
    %29 = vector.broadcast %2 : vector<1x64xf32> to vector<16x64xf32>
    %30 = arith.mulf %28, %29 : vector<16x64xf32>
    %31 = vector.broadcast %3 : vector<1x64xf32> to vector<16x64xf32>
    %32 = arith.addf %30, %31 : vector<16x64xf32>
    %33 = arith.truncf %32 : vector<16x64xf32> to vector<16x64xbf16>
    %cst_28 = arith.constant dense<0.000000e+00> : vector<16x192xf32>
    %34 = tpu.matmul %33, %4, %cst_28 {dimension_numbers = #tpu.dot_dimension_numbers<[1], [0], [0], [1], [0, 0, 1, 1], [], []>} : vector<16x64xbf16>, vector<64x192xbf16>, vector<16x192xf32> -> vector<16x192xf32>
    %35 = arith.truncf %34 : vector<16x192xf32> to vector<16x192xbf16>
    %36 = vector.extract_strided_slice %35 {offsets = [0, 0], sizes = [16, 64], strides = [1, 1]} : vector<16x192xbf16> to vector<16x64xbf16>
    %37 = vector.extract_strided_slice %35 {offsets = [0, 64], sizes = [16, 64], strides = [1, 1]} : vector<16x192xbf16> to vector<16x64xbf16>
    %38 = vector.extract_strided_slice %35 {offsets = [0, 128], sizes = [16, 64], strides = [1, 1]} : vector<16x192xbf16> to vector<16x64xbf16>
    %39 = vector.extract_strided_slice %36 {offsets = [0, 0], sizes = [16, 16], strides = [1, 1]} : vector<16x64xbf16> to vector<16x16xbf16>
    %40 = vector.extract_strided_slice %37 {offsets = [0, 0], sizes = [16, 16], strides = [1, 1]} : vector<16x64xbf16> to vector<16x16xbf16>
    %41 = vector.extract_strided_slice %38 {offsets = [0, 0], sizes = [16, 16], strides = [1, 1]} : vector<16x64xbf16> to vector<16x16xbf16>
    %cst_29 = arith.constant dense<0.000000e+00> : vector<16x16xf32>
    %42 = tpu.matmul %39, %40, %cst_29 {dimension_numbers = #tpu.dot_dimension_numbers<[1], [1], [0], [0], [0, 0, 1, 0], [], []>} : vector<16x16xbf16>, vector<16x16xbf16>, vector<16x16xf32> -> vector<16x16xf32>
    %cst_30 = arith.constant dense<0xFF800000> : vector<16xf32>
    %43 = vector.multi_reduction <maximumf>, %42, %cst_30 [1] : vector<16x16xf32> to vector<16xf32>
    %44 = vector.shape_cast %43 : vector<16xf32> to vector<16x1xf32>
    %45 = vector.broadcast %44 : vector<16x1xf32> to vector<16x16xf32>
    %46 = arith.subf %42, %45 : vector<16x16xf32>
    %47 = math.exp %46 : vector<16x16xf32>
    %cst_31 = arith.constant dense<0.000000e+00> : vector<16xf32>
    %48 = vector.multi_reduction <add>, %47, %cst_31 [1] : vector<16x16xf32> to vector<16xf32>
    %49 = vector.shape_cast %48 : vector<16xf32> to vector<16x1xf32>
    %50 = tpu.reciprocal %49 {approx = true} : vector<16x1xf32> -> vector<16x1xf32>
    %51 = vector.broadcast %50 : vector<16x1xf32> to vector<16x16xf32>
    %52 = arith.mulf %47, %51 : vector<16x16xf32>
    %53 = arith.truncf %52 : vector<16x16xf32> to vector<16x16xbf16>
    %cst_32 = arith.constant dense<0.000000e+00> : vector<16x16xf32>
    %54 = tpu.matmul %53, %41, %cst_32 {dimension_numbers = #tpu.dot_dimension_numbers<[1], [0], [0], [1], [0, 0, 1, 1], [], []>} : vector<16x16xbf16>, vector<16x16xbf16>, vector<16x16xf32> -> vector<16x16xf32>
    %55 = arith.truncf %54 : vector<16x16xf32> to vector<16x16xbf16>
    %c0_33 = arith.constant 0 : index
    %c0_34 = arith.constant 0 : index
    %56 = vector.load %arg14[%c0_33, %c0_34] : memref<16x64xbf16, #tpu.memory_space<vmem>>, vector<16x16xbf16>
    tpu.vector_store %arg14[%c0_33, %c0_34], %55 {strides = array<i32>} : memref<16x64xbf16, #tpu.memory_space<vmem>>, vector<16x16xbf16>,
    %57 = vector.extract_strided_slice %36 {offsets = [0, 16], sizes = [16, 16], strides = [1, 1]} : vector<16x64xbf16> to vector<16x16xbf16>
    %58 = vector.extract_strided_slice %37 {offsets = [0, 16], sizes = [16, 16], strides = [1, 1]} : vector<16x64xbf16> to vector<16x16xbf16>
    %59 = vector.extract_strided_slice %38 {offsets = [0, 16], sizes = [16, 16], strides = [1, 1]} : vector<16x64xbf16> to vector<16x16xbf16>
    %cst_35 = arith.constant dense<0.000000e+00> : vector<16x16xf32>
    %60 = tpu.matmul %57, %58, %cst_35 {dimension_numbers = #tpu.dot_dimension_numbers<[1], [1], [0], [0], [0, 0, 1, 0], [], []>} : vector<16x16xbf16>, vector<16x16xbf16>, vector<16x16xf32> -> vector<16x16xf32>
    %cst_36 = arith.constant dense<0xFF800000> : vector<16xf32>
    %61 = vector.multi_reduction <maximumf>, %60, %cst_36 [1] : vector<16x16xf32> to vector<16xf32>
    %62 = vector.shape_cast %61 : vector<16xf32> to vector<16x1xf32>
    %63 = vector.broadcast %62 : vector<16x1xf32> to vector<16x16xf32>
    %64 = arith.subf %60, %63 : vector<16x16xf32>
    %65 = math.exp %64 : vector<16x16xf32>
    %cst_37 = arith.constant dense<0.000000e+00> : vector<16xf32>
    %66 = vector.multi_reduction <add>, %65, %cst_37 [1] : vector<16x16xf32> to vector<16xf32>
    %67 = vector.shape_cast %66 : vector<16xf32> to vector<16x1xf32>
    %68 = tpu.reciprocal %67 {approx = true} : vector<16x1xf32> -> vector<16x1xf32>
    %69 = vector.broadcast %68 : vector<16x1xf32> to vector<16x16xf32>
    %70 = arith.mulf %65, %69 : vector<16x16xf32>
    %71 = arith.truncf %70 : vector<16x16xf32> to vector<16x16xbf16>
    %cst_38 = arith.constant dense<0.000000e+00> : vector<16x16xf32>
    %72 = tpu.matmul %71, %59, %cst_38 {dimension_numbers = #tpu.dot_dimension_numbers<[1], [0], [0], [1], [0, 0, 1, 1], [], []>} : vector<16x16xbf16>, vector<16x16xbf16>, vector<16x16xf32> -> vector<16x16xf32>
    %73 = arith.truncf %72 : vector<16x16xf32> to vector<16x16xbf16>
    %c0_39 = arith.constant 0 : index
    %c16 = arith.constant 16 : index
    %74 = vector.load %arg14[%c0_39, %c16] : memref<16x64xbf16, #tpu.memory_space<vmem>>, vector<16x16xbf16>
    tpu.vector_store %arg14[%c0_39, %c16], %73 {strides = array<i32>} : memref<16x64xbf16, #tpu.memory_space<vmem>>, vector<16x16xbf16>,
    %75 = vector.extract_strided_slice %36 {offsets = [0, 32], sizes = [16, 16], strides = [1, 1]} : vector<16x64xbf16> to vector<16x16xbf16>
    %76 = vector.extract_strided_slice %37 {offsets = [0, 32], sizes = [16, 16], strides = [1, 1]} : vector<16x64xbf16> to vector<16x16xbf16>
    %77 = vector.extract_strided_slice %38 {offsets = [0, 32], sizes = [16, 16], strides = [1, 1]} : vector<16x64xbf16> to vector<16x16xbf16>
    %cst_40 = arith.constant dense<0.000000e+00> : vector<16x16xf32>
    %78 = tpu.matmul %75, %76, %cst_40 {dimension_numbers = #tpu.dot_dimension_numbers<[1], [1], [0], [0], [0, 0, 1, 0], [], []>} : vector<16x16xbf16>, vector<16x16xbf16>, vector<16x16xf32> -> vector<16x16xf32>
    %cst_41 = arith.constant dense<0xFF800000> : vector<16xf32>
    %79 = vector.multi_reduction <maximumf>, %78, %cst_41 [1] : vector<16x16xf32> to vector<16xf32>
    %80 = vector.shape_cast %79 : vector<16xf32> to vector<16x1xf32>
    %81 = vector.broadcast %80 : vector<16x1xf32> to vector<16x16xf32>
    %82 = arith.subf %78, %81 : vector<16x16xf32>
    %83 = math.exp %82 : vector<16x16xf32>
    %cst_42 = arith.constant dense<0.000000e+00> : vector<16xf32>
    %84 = vector.multi_reduction <add>, %83, %cst_42 [1] : vector<16x16xf32> to vector<16xf32>
    %85 = vector.shape_cast %84 : vector<16xf32> to vector<16x1xf32>
    %86 = tpu.reciprocal %85 {approx = true} : vector<16x1xf32> -> vector<16x1xf32>
    %87 = vector.broadcast %86 : vector<16x1xf32> to vector<16x16xf32>
    %88 = arith.mulf %83, %87 : vector<16x16xf32>
    %89 = arith.truncf %88 : vector<16x16xf32> to vector<16x16xbf16>
    %cst_43 = arith.constant dense<0.000000e+00> : vector<16x16xf32>
    %90 = tpu.matmul %89, %77, %cst_43 {dimension_numbers = #tpu.dot_dimension_numbers<[1], [0], [0], [1], [0, 0, 1, 1], [], []>} : vector<16x16xbf16>, vector<16x16xbf16>, vector<16x16xf32> -> vector<16x16xf32>
    %91 = arith.truncf %90 : vector<16x16xf32> to vector<16x16xbf16>
    %c0_44 = arith.constant 0 : index
    %c32 = arith.constant 32 : index
    %92 = vector.load %arg14[%c0_44, %c32] : memref<16x64xbf16, #tpu.memory_space<vmem>>, vector<16x16xbf16>
    tpu.vector_store %arg14[%c0_44, %c32], %91 {strides = array<i32>} : memref<16x64xbf16, #tpu.memory_space<vmem>>, vector<16x16xbf16>,
    %93 = vector.extract_strided_slice %36 {offsets = [0, 48], sizes = [16, 16], strides = [1, 1]} : vector<16x64xbf16> to vector<16x16xbf16>
    %94 = vector.extract_strided_slice %37 {offsets = [0, 48], sizes = [16, 16], strides = [1, 1]} : vector<16x64xbf16> to vector<16x16xbf16>
    %95 = vector.extract_strided_slice %38 {offsets = [0, 48], sizes = [16, 16], strides = [1, 1]} : vector<16x64xbf16> to vector<16x16xbf16>
    %cst_45 = arith.constant dense<0.000000e+00> : vector<16x16xf32>
    %96 = tpu.matmul %93, %94, %cst_45 {dimension_numbers = #tpu.dot_dimension_numbers<[1], [1], [0], [0], [0, 0, 1, 0], [], []>} : vector<16x16xbf16>, vector<16x16xbf16>, vector<16x16xf32> -> vector<16x16xf32>
    %cst_46 = arith.constant dense<0xFF800000> : vector<16xf32>
    %97 = vector.multi_reduction <maximumf>, %96, %cst_46 [1] : vector<16x16xf32> to vector<16xf32>
    %98 = vector.shape_cast %97 : vector<16xf32> to vector<16x1xf32>
    %99 = vector.broadcast %98 : vector<16x1xf32> to vector<16x16xf32>
    %100 = arith.subf %96, %99 : vector<16x16xf32>
    %101 = math.exp %100 : vector<16x16xf32>
    %cst_47 = arith.constant dense<0.000000e+00> : vector<16xf32>
    %102 = vector.multi_reduction <add>, %101, %cst_47 [1] : vector<16x16xf32> to vector<16xf32>
    %103 = vector.shape_cast %102 : vector<16xf32> to vector<16x1xf32>
    %104 = tpu.reciprocal %103 {approx = true} : vector<16x1xf32> -> vector<16x1xf32>
    %105 = vector.broadcast %104 : vector<16x1xf32> to vector<16x16xf32>
    %106 = arith.mulf %101, %105 : vector<16x16xf32>
    %107 = arith.truncf %106 : vector<16x16xf32> to vector<16x16xbf16>
    %cst_48 = arith.constant dense<0.000000e+00> : vector<16x16xf32>
    %108 = tpu.matmul %107, %95, %cst_48 {dimension_numbers = #tpu.dot_dimension_numbers<[1], [0], [0], [1], [0, 0, 1, 1], [], []>} : vector<16x16xbf16>, vector<16x16xbf16>, vector<16x16xf32> -> vector<16x16xf32>
    %109 = arith.truncf %108 : vector<16x16xf32> to vector<16x16xbf16>
    %c0_49 = arith.constant 0 : index
    %c48 = arith.constant 48 : index
    %110 = vector.load %arg14[%c0_49, %c48] : memref<16x64xbf16, #tpu.memory_space<vmem>>, vector<16x16xbf16>
    tpu.vector_store %arg14[%c0_49, %c48], %109 {strides = array<i32>} : memref<16x64xbf16, #tpu.memory_space<vmem>>, vector<16x16xbf16>,
    %c0_50 = arith.constant 0 : index
    %c0_51 = arith.constant 0 : index
    %111 = vector.load %arg14[%c0_50, %c0_51] : memref<16x64xbf16, #tpu.memory_space<vmem>>, vector<16x64xbf16>
    %cst_52 = arith.constant dense<0.000000e+00> : vector<16x64xf32>
    %112 = tpu.matmul %111, %5, %cst_52 {dimension_numbers = #tpu.dot_dimension_numbers<[1], [0], [0], [1], [0, 0, 1, 1], [], []>} : vector<16x64xbf16>, vector<64x64xbf16>, vector<16x64xf32> -> vector<16x64xf32>
    %113 = arith.addf %1, %112 : vector<16x64xf32>
    %114 = vector.broadcast %6 : vector<1x64xf32> to vector<16x64xf32>
    %115 = arith.addf %113, %114 : vector<16x64xf32>
    %cst_53 = arith.constant dense<0.000000e+00> : vector<16xf32>
    %116 = vector.multi_reduction <add>, %115, %cst_53 [1] : vector<16x64xf32> to vector<16xf32>
    %117 = vector.shape_cast %116 : vector<16xf32> to vector<16x1xf32>
    %cst_54 = arith.constant 6.400000e+01 : f32
    %118 = vector.broadcast %cst_54 : f32 to vector<16x1xf32>
    %119 = arith.divf %117, %118 : vector<16x1xf32>
    %120 = vector.broadcast %119 : vector<16x1xf32> to vector<16x64xf32>
    %121 = arith.subf %115, %120 : vector<16x64xf32>
    %122 = arith.mulf %121, %121 : vector<16x64xf32>
    %cst_55 = arith.constant dense<0.000000e+00> : vector<16xf32>
    %123 = vector.multi_reduction <add>, %122, %cst_55 [1] : vector<16x64xf32> to vector<16xf32>
    %124 = vector.shape_cast %123 : vector<16xf32> to vector<16x1xf32>
    %cst_56 = arith.constant 6.400000e+01 : f32
    %125 = vector.broadcast %cst_56 : f32 to vector<16x1xf32>
    %126 = arith.divf %124, %125 : vector<16x1xf32>
    %cst_57 = arith.constant 9.99999974E-6 : f32
    %127 = vector.broadcast %cst_57 : f32 to vector<16x1xf32>
    %128 = arith.addf %126, %127 : vector<16x1xf32>
    %129 = math.rsqrt %128 : vector<16x1xf32>
    %130 = vector.broadcast %129 : vector<16x1xf32> to vector<16x64xf32>
    %131 = arith.mulf %121, %130 : vector<16x64xf32>
    %132 = vector.broadcast %7 : vector<1x64xf32> to vector<16x64xf32>
    %133 = arith.mulf %131, %132 : vector<16x64xf32>
    %134 = vector.broadcast %8 : vector<1x64xf32> to vector<16x64xf32>
    %135 = arith.addf %133, %134 : vector<16x64xf32>
    %136 = arith.truncf %135 : vector<16x64xf32> to vector<16x64xbf16>
    %cst_58 = arith.constant dense<0.000000e+00> : vector<16x256xf32>
    %137 = tpu.matmul %136, %9, %cst_58 {dimension_numbers = #tpu.dot_dimension_numbers<[1], [0], [0], [1], [0, 0, 1, 1], [], []>} : vector<16x64xbf16>, vector<64x256xbf16>, vector<16x256xf32> -> vector<16x256xf32>
    %138 = vector.broadcast %10 : vector<1x256xf32> to vector<16x256xf32>
    %139 = arith.addf %137, %138 : vector<16x256xf32>
    %cst_59 = arith.constant 5.000000e-01 : f32
    %140 = vector.broadcast %cst_59 : f32 to vector<16x256xf32>
    %141 = arith.mulf %140, %139 : vector<16x256xf32>
    %cst_60 = arith.constant 4.471500e-02 : f32
    %142 = vector.broadcast %cst_60 : f32 to vector<16x256xf32>
    %143 = arith.mulf %142, %139 : vector<16x256xf32>
    %144 = arith.mulf %143, %139 : vector<16x256xf32>
    %145 = arith.mulf %144, %139 : vector<16x256xf32>
    %146 = arith.addf %139, %145 : vector<16x256xf32>
    %cst_61 = arith.constant 0.797884583 : f32
    %147 = vector.broadcast %cst_61 : f32 to vector<16x256xf32>
    %148 = arith.mulf %147, %146 : vector<16x256xf32>
    %149 = math.tanh %148 : vector<16x256xf32>
    %cst_62 = arith.constant 1.000000e+00 : f32
    %150 = vector.broadcast %cst_62 : f32 to vector<16x256xf32>
    %151 = arith.addf %150, %149 : vector<16x256xf32>
    %152 = arith.mulf %141, %151 : vector<16x256xf32>
    %153 = arith.truncf %152 : vector<16x256xf32> to vector<16x256xbf16>
    %cst_63 = arith.constant dense<0.000000e+00> : vector<16x64xf32>
    %154 = tpu.matmul %153, %11, %cst_63 {dimension_numbers = #tpu.dot_dimension_numbers<[1], [0], [0], [1], [0, 0, 1, 1], [], []>} : vector<16x256xbf16>, vector<256x64xbf16>, vector<16x64xf32> -> vector<16x64xf32>
    %155 = vector.broadcast %12 : vector<1x64xf32> to vector<16x64xf32>
    %156 = arith.addf %154, %155 : vector<16x64xf32>
    %157 = arith.addf %115, %156 : vector<16x64xf32>
    %c0_64 = arith.constant 0 : index
    %c0_65 = arith.constant 0 : index
    %c0_66 = arith.constant 0 : index
    %158 = vector.load %arg13[%c0_64, %c0_65, %c0_66] : memref<1x16x64xf32, #tpu.memory_space<vmem>>, vector<1x16x64xf32>
    %159 = vector.shape_cast %158 : vector<1x16x64xf32> to vector<16x64xf32>
    %160 = vector.shape_cast %157 : vector<16x64xf32> to vector<1x16x64xf32>
    tpu.vector_store %arg13[%c0_64, %c0_65, %c0_66], %160 {strides = array<i32>} : memref<1x16x64xf32, #tpu.memory_space<vmem>>, vector<1x16x64xf32>,
    return
  }
  func.func @transform_0(%arg0: i32) -> (i32, i32, i32) {
    %c0_i32 = arith.constant 0 : i32
    %c0_i32_0 = arith.constant 0 : i32
    %c0_i32_1 = arith.constant 0 : i32
    return %arg0, %c0_i32, %c0_i32_0 : i32, i32, i32
  }
  func.func @transform_1(%arg0: i32) -> (i32, i32) {
    %c0_i32 = arith.constant 0 : i32
    %c0_i32_0 = arith.constant 0 : i32
    %c0_i32_1 = arith.constant 0 : i32
    return %c0_i32, %c0_i32_0 : i32, i32
  }
  func.func @transform_2(%arg0: i32) -> (i32, i32) {
    %c0_i32 = arith.constant 0 : i32
    %c0_i32_0 = arith.constant 0 : i32
    %c0_i32_1 = arith.constant 0 : i32
    return %c0_i32, %c0_i32_0 : i32, i32
  }
  func.func @transform_3(%arg0: i32) -> (i32, i32) {
    %c0_i32 = arith.constant 0 : i32
    %c0_i32_0 = arith.constant 0 : i32
    %c0_i32_1 = arith.constant 0 : i32
    return %c0_i32, %c0_i32_0 : i32, i32
  }
  func.func @transform_4(%arg0: i32) -> (i32, i32) {
    %c0_i32 = arith.constant 0 : i32
    %c0_i32_0 = arith.constant 0 : i32
    %c0_i32_1 = arith.constant 0 : i32
    return %c0_i32, %c0_i32_0 : i32, i32
  }
  func.func @transform_5(%arg0: i32) -> (i32, i32) {
    %c0_i32 = arith.constant 0 : i32
    %c0_i32_0 = arith.constant 0 : i32
    %c0_i32_1 = arith.constant 0 : i32
    return %c0_i32, %c0_i32_0 : i32, i32
  }
  func.func @transform_6(%arg0: i32) -> (i32, i32) {
    %c0_i32 = arith.constant 0 : i32
    %c0_i32_0 = arith.constant 0 : i32
    %c0_i32_1 = arith.constant 0 : i32
    return %c0_i32, %c0_i32_0 : i32, i32
  }
  func.func @transform_7(%arg0: i32) -> (i32, i32) {
    %c0_i32 = arith.constant 0 : i32
    %c0_i32_0 = arith.constant 0 : i32
    %c0_i32_1 = arith.constant 0 : i32
    return %c0_i32, %c0_i32_0 : i32, i32
  }
  func.func @transform_8(%arg0: i32) -> (i32, i32) {
    %c0_i32 = arith.constant 0 : i32
    %c0_i32_0 = arith.constant 0 : i32
    %c0_i32_1 = arith.constant 0 : i32
    return %c0_i32, %c0_i32_0 : i32, i32
  }
  func.func @transform_9(%arg0: i32) -> (i32, i32) {
    %c0_i32 = arith.constant 0 : i32
    %c0_i32_0 = arith.constant 0 : i32
    %c0_i32_1 = arith.constant 0 : i32
    return %c0_i32, %c0_i32_0 : i32, i32
  }
  func.func @transform_10(%arg0: i32) -> (i32, i32) {
    %c0_i32 = arith.constant 0 : i32
    %c0_i32_0 = arith.constant 0 : i32
    %c0_i32_1 = arith.constant 0 : i32
    return %c0_i32, %c0_i32_0 : i32, i32
  }
  func.func @transform_11(%arg0: i32) -> (i32, i32) {
    %c0_i32 = arith.constant 0 : i32
    %c0_i32_0 = arith.constant 0 : i32
    %c0_i32_1 = arith.constant 0 : i32
    return %c0_i32, %c0_i32_0 : i32, i32
  }
  func.func @transform_12(%arg0: i32) -> (i32, i32, i32) {
    %c0_i32 = arith.constant 0 : i32
    %c0_i32_0 = arith.constant 0 : i32
    %c0_i32_1 = arith.constant 0 : i32
    return %arg0, %c0_i32, %c0_i32_0 : i32, i32, i32
  }
}

module attributes {stable_mosaic.version = 11 : i64} {
  func.func @_skip_resblock_kernel(%arg0: i32, %arg1: memref<1x16x64xf32, #tpu.memory_space<vmem>>, %arg2: memref<1x16x64xf32, #tpu.memory_space<vmem>>, %arg3: memref<64x64xbf16, #tpu.memory_space<vmem>>, %arg4: memref<64x64xbf16, #tpu.memory_space<vmem>>, %arg5: memref<1x64xf32, #tpu.memory_space<vmem>>, %arg6: memref<1x64xf32, #tpu.memory_space<vmem>>, %arg7: memref<1x64xf32, #tpu.memory_space<vmem>>, %arg8: memref<64x192xbf16, #tpu.memory_space<vmem>>, %arg9: memref<64x64xbf16, #tpu.memory_space<vmem>>, %arg10: memref<1x64xf32, #tpu.memory_space<vmem>>, %arg11: memref<1x64xf32, #tpu.memory_space<vmem>>, %arg12: memref<1x64xf32, #tpu.memory_space<vmem>>, %arg13: memref<64x256xbf16, #tpu.memory_space<vmem>>, %arg14: memref<1x256xf32, #tpu.memory_space<vmem>>, %arg15: memref<256x64xbf16, #tpu.memory_space<vmem>>, %arg16: memref<1x64xf32, #tpu.memory_space<vmem>>, %arg17: memref<1x16x64xf32, #tpu.memory_space<vmem>>, %arg18: memref<16x64xbf16, #tpu.memory_space<vmem>>) attributes {dimension_semantics = [#tpu.dimension_semantics<parallel>], iteration_bounds = array<i64: 2>, scalar_prefetch = 0 : i64, scratch_operands = 1 : i64, tpu.core_type = #tpu.core_type<tc>, window_params = [{transform_indices = @transform_0, window_bounds = array<i64: 1, 16, 64>}, {transform_indices = @transform_1, window_bounds = array<i64: 1, 16, 64>}, {pipeline_mode = #tpu.pipeline_mode<synchronous>, transform_indices = @transform_2, window_bounds = array<i64: 64, 64>}, {pipeline_mode = #tpu.pipeline_mode<synchronous>, transform_indices = @transform_3, window_bounds = array<i64: 64, 64>}, {pipeline_mode = #tpu.pipeline_mode<synchronous>, transform_indices = @transform_4, window_bounds = array<i64: 1, 64>}, {pipeline_mode = #tpu.pipeline_mode<synchronous>, transform_indices = @transform_5, window_bounds = array<i64: 1, 64>}, {pipeline_mode = #tpu.pipeline_mode<synchronous>, transform_indices = @transform_6, window_bounds = array<i64: 1, 64>}, {pipeline_mode = #tpu.pipeline_mode<synchronous>, transform_indices = @transform_7, window_bounds = array<i64: 64, 192>}, {pipeline_mode = #tpu.pipeline_mode<synchronous>, transform_indices = @transform_8, window_bounds = array<i64: 64, 64>}, {pipeline_mode = #tpu.pipeline_mode<synchronous>, transform_indices = @transform_9, window_bounds = array<i64: 1, 64>}, {pipeline_mode = #tpu.pipeline_mode<synchronous>, transform_indices = @transform_10, window_bounds = array<i64: 1, 64>}, {pipeline_mode = #tpu.pipeline_mode<synchronous>, transform_indices = @transform_11, window_bounds = array<i64: 1, 64>}, {pipeline_mode = #tpu.pipeline_mode<synchronous>, transform_indices = @transform_12, window_bounds = array<i64: 64, 256>}, {pipeline_mode = #tpu.pipeline_mode<synchronous>, transform_indices = @transform_13, window_bounds = array<i64: 1, 256>}, {pipeline_mode = #tpu.pipeline_mode<synchronous>, transform_indices = @transform_14, window_bounds = array<i64: 256, 64>}, {pipeline_mode = #tpu.pipeline_mode<synchronous>, transform_indices = @transform_15, window_bounds = array<i64: 1, 64>}, {transform_indices = @transform_16, window_bounds = array<i64: 1, 16, 64>}]} {
    %c0 = arith.constant 0 : index
    %c0_0 = arith.constant 0 : index
    %c0_1 = arith.constant 0 : index
    %0 = vector.load %arg1[%c0, %c0_0, %c0_1] : memref<1x16x64xf32, #tpu.memory_space<vmem>>, vector<1x16x64xf32>
    %1 = vector.shape_cast %0 : vector<1x16x64xf32> to vector<16x64xf32>
    %2 = arith.truncf %1 : vector<16x64xf32> to vector<16x64xbf16>
    %c0_2 = arith.constant 0 : index
    %c0_3 = arith.constant 0 : index
    %3 = vector.load %arg3[%c0_2, %c0_3] : memref<64x64xbf16, #tpu.memory_space<vmem>>, vector<64x64xbf16>
    %cst = arith.constant dense<0.000000e+00> : vector<16x64xf32>
    %4 = tpu.matmul %2, %3, %cst {dimension_numbers = #tpu.dot_dimension_numbers<[1], [0], [0], [1], [0, 0, 1, 1], [], []>} : vector<16x64xbf16>, vector<64x64xbf16>, vector<16x64xf32> -> vector<16x64xf32>
    %c0_4 = arith.constant 0 : index
    %c0_5 = arith.constant 0 : index
    %c0_6 = arith.constant 0 : index
    %5 = vector.load %arg2[%c0_4, %c0_5, %c0_6] : memref<1x16x64xf32, #tpu.memory_space<vmem>>, vector<1x16x64xf32>
    %6 = vector.shape_cast %5 : vector<1x16x64xf32> to vector<16x64xf32>
    %7 = arith.truncf %6 : vector<16x64xf32> to vector<16x64xbf16>
    %c0_7 = arith.constant 0 : index
    %c0_8 = arith.constant 0 : index
    %8 = vector.load %arg4[%c0_7, %c0_8] : memref<64x64xbf16, #tpu.memory_space<vmem>>, vector<64x64xbf16>
    %cst_9 = arith.constant dense<0.000000e+00> : vector<16x64xf32>
    %9 = tpu.matmul %7, %8, %cst_9 {dimension_numbers = #tpu.dot_dimension_numbers<[1], [0], [0], [1], [0, 0, 1, 1], [], []>} : vector<16x64xbf16>, vector<64x64xbf16>, vector<16x64xf32> -> vector<16x64xf32>
    %10 = arith.addf %4, %9 : vector<16x64xf32>
    %c0_10 = arith.constant 0 : index
    %c0_11 = arith.constant 0 : index
    %11 = vector.load %arg5[%c0_10, %c0_11] : memref<1x64xf32, #tpu.memory_space<vmem>>, vector<1x64xf32>
    %12 = vector.broadcast %11 : vector<1x64xf32> to vector<16x64xf32>
    %13 = arith.addf %10, %12 : vector<16x64xf32>
    %c0_12 = arith.constant 0 : index
    %c0_13 = arith.constant 0 : index
    %14 = vector.load %arg6[%c0_12, %c0_13] : memref<1x64xf32, #tpu.memory_space<vmem>>, vector<1x64xf32>
    %c0_14 = arith.constant 0 : index
    %c0_15 = arith.constant 0 : index
    %15 = vector.load %arg7[%c0_14, %c0_15] : memref<1x64xf32, #tpu.memory_space<vmem>>, vector<1x64xf32>
    %c0_16 = arith.constant 0 : index
    %c0_17 = arith.constant 0 : index
    %16 = vector.load %arg8[%c0_16, %c0_17] : memref<64x192xbf16, #tpu.memory_space<vmem>>, vector<64x192xbf16>
    %c0_18 = arith.constant 0 : index
    %c0_19 = arith.constant 0 : index
    %17 = vector.load %arg9[%c0_18, %c0_19] : memref<64x64xbf16, #tpu.memory_space<vmem>>, vector<64x64xbf16>
    %c0_20 = arith.constant 0 : index
    %c0_21 = arith.constant 0 : index
    %18 = vector.load %arg10[%c0_20, %c0_21] : memref<1x64xf32, #tpu.memory_space<vmem>>, vector<1x64xf32>
    %c0_22 = arith.constant 0 : index
    %c0_23 = arith.constant 0 : index
    %19 = vector.load %arg11[%c0_22, %c0_23] : memref<1x64xf32, #tpu.memory_space<vmem>>, vector<1x64xf32>
    %c0_24 = arith.constant 0 : index
    %c0_25 = arith.constant 0 : index
    %20 = vector.load %arg12[%c0_24, %c0_25] : memref<1x64xf32, #tpu.memory_space<vmem>>, vector<1x64xf32>
    %c0_26 = arith.constant 0 : index
    %c0_27 = arith.constant 0 : index
    %21 = vector.load %arg13[%c0_26, %c0_27] : memref<64x256xbf16, #tpu.memory_space<vmem>>, vector<64x256xbf16>
    %c0_28 = arith.constant 0 : index
    %c0_29 = arith.constant 0 : index
    %22 = vector.load %arg14[%c0_28, %c0_29] : memref<1x256xf32, #tpu.memory_space<vmem>>, vector<1x256xf32>
    %c0_30 = arith.constant 0 : index
    %c0_31 = arith.constant 0 : index
    %23 = vector.load %arg15[%c0_30, %c0_31] : memref<256x64xbf16, #tpu.memory_space<vmem>>, vector<256x64xbf16>
    %c0_32 = arith.constant 0 : index
    %c0_33 = arith.constant 0 : index
    %24 = vector.load %arg16[%c0_32, %c0_33] : memref<1x64xf32, #tpu.memory_space<vmem>>, vector<1x64xf32>
    %cst_34 = arith.constant dense<0.000000e+00> : vector<16xf32>
    %25 = vector.multi_reduction <add>, %13, %cst_34 [1] : vector<16x64xf32> to vector<16xf32>
    %26 = vector.shape_cast %25 : vector<16xf32> to vector<16x1xf32>
    %cst_35 = arith.constant 6.400000e+01 : f32
    %27 = vector.broadcast %cst_35 : f32 to vector<16x1xf32>
    %28 = arith.divf %26, %27 : vector<16x1xf32>
    %29 = vector.broadcast %28 : vector<16x1xf32> to vector<16x64xf32>
    %30 = arith.subf %13, %29 : vector<16x64xf32>
    %31 = arith.mulf %30, %30 : vector<16x64xf32>
    %cst_36 = arith.constant dense<0.000000e+00> : vector<16xf32>
    %32 = vector.multi_reduction <add>, %31, %cst_36 [1] : vector<16x64xf32> to vector<16xf32>
    %33 = vector.shape_cast %32 : vector<16xf32> to vector<16x1xf32>
    %cst_37 = arith.constant 6.400000e+01 : f32
    %34 = vector.broadcast %cst_37 : f32 to vector<16x1xf32>
    %35 = arith.divf %33, %34 : vector<16x1xf32>
    %cst_38 = arith.constant 9.99999974E-6 : f32
    %36 = vector.broadcast %cst_38 : f32 to vector<16x1xf32>
    %37 = arith.addf %35, %36 : vector<16x1xf32>
    %38 = math.rsqrt %37 : vector<16x1xf32>
    %39 = vector.broadcast %38 : vector<16x1xf32> to vector<16x64xf32>
    %40 = arith.mulf %30, %39 : vector<16x64xf32>
    %41 = vector.broadcast %14 : vector<1x64xf32> to vector<16x64xf32>
    %42 = arith.mulf %40, %41 : vector<16x64xf32>
    %43 = vector.broadcast %15 : vector<1x64xf32> to vector<16x64xf32>
    %44 = arith.addf %42, %43 : vector<16x64xf32>
    %45 = arith.truncf %44 : vector<16x64xf32> to vector<16x64xbf16>
    %cst_39 = arith.constant dense<0.000000e+00> : vector<16x192xf32>
    %46 = tpu.matmul %45, %16, %cst_39 {dimension_numbers = #tpu.dot_dimension_numbers<[1], [0], [0], [1], [0, 0, 1, 1], [], []>} : vector<16x64xbf16>, vector<64x192xbf16>, vector<16x192xf32> -> vector<16x192xf32>
    %47 = arith.truncf %46 : vector<16x192xf32> to vector<16x192xbf16>
    %48 = vector.extract_strided_slice %47 {offsets = [0, 0], sizes = [16, 64], strides = [1, 1]} : vector<16x192xbf16> to vector<16x64xbf16>
    %49 = vector.extract_strided_slice %47 {offsets = [0, 64], sizes = [16, 64], strides = [1, 1]} : vector<16x192xbf16> to vector<16x64xbf16>
    %50 = vector.extract_strided_slice %47 {offsets = [0, 128], sizes = [16, 64], strides = [1, 1]} : vector<16x192xbf16> to vector<16x64xbf16>
    %51 = vector.extract_strided_slice %48 {offsets = [0, 0], sizes = [16, 16], strides = [1, 1]} : vector<16x64xbf16> to vector<16x16xbf16>
    %52 = vector.extract_strided_slice %49 {offsets = [0, 0], sizes = [16, 16], strides = [1, 1]} : vector<16x64xbf16> to vector<16x16xbf16>
    %53 = vector.extract_strided_slice %50 {offsets = [0, 0], sizes = [16, 16], strides = [1, 1]} : vector<16x64xbf16> to vector<16x16xbf16>
    %cst_40 = arith.constant dense<0.000000e+00> : vector<16x16xf32>
    %54 = tpu.matmul %51, %52, %cst_40 {dimension_numbers = #tpu.dot_dimension_numbers<[1], [1], [0], [0], [0, 0, 1, 0], [], []>} : vector<16x16xbf16>, vector<16x16xbf16>, vector<16x16xf32> -> vector<16x16xf32>
    %cst_41 = arith.constant dense<0xFF800000> : vector<16xf32>
    %55 = vector.multi_reduction <maximumf>, %54, %cst_41 [1] : vector<16x16xf32> to vector<16xf32>
    %56 = vector.shape_cast %55 : vector<16xf32> to vector<16x1xf32>
    %57 = vector.broadcast %56 : vector<16x1xf32> to vector<16x16xf32>
    %58 = arith.subf %54, %57 : vector<16x16xf32>
    %59 = math.exp %58 : vector<16x16xf32>
    %cst_42 = arith.constant dense<0.000000e+00> : vector<16xf32>
    %60 = vector.multi_reduction <add>, %59, %cst_42 [1] : vector<16x16xf32> to vector<16xf32>
    %61 = vector.shape_cast %60 : vector<16xf32> to vector<16x1xf32>
    %62 = tpu.reciprocal %61 {approx = true} : vector<16x1xf32> -> vector<16x1xf32>
    %63 = vector.broadcast %62 : vector<16x1xf32> to vector<16x16xf32>
    %64 = arith.mulf %59, %63 : vector<16x16xf32>
    %65 = arith.truncf %64 : vector<16x16xf32> to vector<16x16xbf16>
    %cst_43 = arith.constant dense<0.000000e+00> : vector<16x16xf32>
    %66 = tpu.matmul %65, %53, %cst_43 {dimension_numbers = #tpu.dot_dimension_numbers<[1], [0], [0], [1], [0, 0, 1, 1], [], []>} : vector<16x16xbf16>, vector<16x16xbf16>, vector<16x16xf32> -> vector<16x16xf32>
    %67 = arith.truncf %66 : vector<16x16xf32> to vector<16x16xbf16>
    %c0_44 = arith.constant 0 : index
    %c0_45 = arith.constant 0 : index
    %68 = vector.load %arg18[%c0_44, %c0_45] : memref<16x64xbf16, #tpu.memory_space<vmem>>, vector<16x16xbf16>
    tpu.vector_store %arg18[%c0_44, %c0_45], %67 {strides = array<i32>} : memref<16x64xbf16, #tpu.memory_space<vmem>>, vector<16x16xbf16>,
    %69 = vector.extract_strided_slice %48 {offsets = [0, 16], sizes = [16, 16], strides = [1, 1]} : vector<16x64xbf16> to vector<16x16xbf16>
    %70 = vector.extract_strided_slice %49 {offsets = [0, 16], sizes = [16, 16], strides = [1, 1]} : vector<16x64xbf16> to vector<16x16xbf16>
    %71 = vector.extract_strided_slice %50 {offsets = [0, 16], sizes = [16, 16], strides = [1, 1]} : vector<16x64xbf16> to vector<16x16xbf16>
    %cst_46 = arith.constant dense<0.000000e+00> : vector<16x16xf32>
    %72 = tpu.matmul %69, %70, %cst_46 {dimension_numbers = #tpu.dot_dimension_numbers<[1], [1], [0], [0], [0, 0, 1, 0], [], []>} : vector<16x16xbf16>, vector<16x16xbf16>, vector<16x16xf32> -> vector<16x16xf32>
    %cst_47 = arith.constant dense<0xFF800000> : vector<16xf32>
    %73 = vector.multi_reduction <maximumf>, %72, %cst_47 [1] : vector<16x16xf32> to vector<16xf32>
    %74 = vector.shape_cast %73 : vector<16xf32> to vector<16x1xf32>
    %75 = vector.broadcast %74 : vector<16x1xf32> to vector<16x16xf32>
    %76 = arith.subf %72, %75 : vector<16x16xf32>
    %77 = math.exp %76 : vector<16x16xf32>
    %cst_48 = arith.constant dense<0.000000e+00> : vector<16xf32>
    %78 = vector.multi_reduction <add>, %77, %cst_48 [1] : vector<16x16xf32> to vector<16xf32>
    %79 = vector.shape_cast %78 : vector<16xf32> to vector<16x1xf32>
    %80 = tpu.reciprocal %79 {approx = true} : vector<16x1xf32> -> vector<16x1xf32>
    %81 = vector.broadcast %80 : vector<16x1xf32> to vector<16x16xf32>
    %82 = arith.mulf %77, %81 : vector<16x16xf32>
    %83 = arith.truncf %82 : vector<16x16xf32> to vector<16x16xbf16>
    %cst_49 = arith.constant dense<0.000000e+00> : vector<16x16xf32>
    %84 = tpu.matmul %83, %71, %cst_49 {dimension_numbers = #tpu.dot_dimension_numbers<[1], [0], [0], [1], [0, 0, 1, 1], [], []>} : vector<16x16xbf16>, vector<16x16xbf16>, vector<16x16xf32> -> vector<16x16xf32>
    %85 = arith.truncf %84 : vector<16x16xf32> to vector<16x16xbf16>
    %c0_50 = arith.constant 0 : index
    %c16 = arith.constant 16 : index
    %86 = vector.load %arg18[%c0_50, %c16] : memref<16x64xbf16, #tpu.memory_space<vmem>>, vector<16x16xbf16>
    tpu.vector_store %arg18[%c0_50, %c16], %85 {strides = array<i32>} : memref<16x64xbf16, #tpu.memory_space<vmem>>, vector<16x16xbf16>,
    %87 = vector.extract_strided_slice %48 {offsets = [0, 32], sizes = [16, 16], strides = [1, 1]} : vector<16x64xbf16> to vector<16x16xbf16>
    %88 = vector.extract_strided_slice %49 {offsets = [0, 32], sizes = [16, 16], strides = [1, 1]} : vector<16x64xbf16> to vector<16x16xbf16>
    %89 = vector.extract_strided_slice %50 {offsets = [0, 32], sizes = [16, 16], strides = [1, 1]} : vector<16x64xbf16> to vector<16x16xbf16>
    %cst_51 = arith.constant dense<0.000000e+00> : vector<16x16xf32>
    %90 = tpu.matmul %87, %88, %cst_51 {dimension_numbers = #tpu.dot_dimension_numbers<[1], [1], [0], [0], [0, 0, 1, 0], [], []>} : vector<16x16xbf16>, vector<16x16xbf16>, vector<16x16xf32> -> vector<16x16xf32>
    %cst_52 = arith.constant dense<0xFF800000> : vector<16xf32>
    %91 = vector.multi_reduction <maximumf>, %90, %cst_52 [1] : vector<16x16xf32> to vector<16xf32>
    %92 = vector.shape_cast %91 : vector<16xf32> to vector<16x1xf32>
    %93 = vector.broadcast %92 : vector<16x1xf32> to vector<16x16xf32>
    %94 = arith.subf %90, %93 : vector<16x16xf32>
    %95 = math.exp %94 : vector<16x16xf32>
    %cst_53 = arith.constant dense<0.000000e+00> : vector<16xf32>
    %96 = vector.multi_reduction <add>, %95, %cst_53 [1] : vector<16x16xf32> to vector<16xf32>
    %97 = vector.shape_cast %96 : vector<16xf32> to vector<16x1xf32>
    %98 = tpu.reciprocal %97 {approx = true} : vector<16x1xf32> -> vector<16x1xf32>
    %99 = vector.broadcast %98 : vector<16x1xf32> to vector<16x16xf32>
    %100 = arith.mulf %95, %99 : vector<16x16xf32>
    %101 = arith.truncf %100 : vector<16x16xf32> to vector<16x16xbf16>
    %cst_54 = arith.constant dense<0.000000e+00> : vector<16x16xf32>
    %102 = tpu.matmul %101, %89, %cst_54 {dimension_numbers = #tpu.dot_dimension_numbers<[1], [0], [0], [1], [0, 0, 1, 1], [], []>} : vector<16x16xbf16>, vector<16x16xbf16>, vector<16x16xf32> -> vector<16x16xf32>
    %103 = arith.truncf %102 : vector<16x16xf32> to vector<16x16xbf16>
    %c0_55 = arith.constant 0 : index
    %c32 = arith.constant 32 : index
    %104 = vector.load %arg18[%c0_55, %c32] : memref<16x64xbf16, #tpu.memory_space<vmem>>, vector<16x16xbf16>
    tpu.vector_store %arg18[%c0_55, %c32], %103 {strides = array<i32>} : memref<16x64xbf16, #tpu.memory_space<vmem>>, vector<16x16xbf16>,
    %105 = vector.extract_strided_slice %48 {offsets = [0, 48], sizes = [16, 16], strides = [1, 1]} : vector<16x64xbf16> to vector<16x16xbf16>
    %106 = vector.extract_strided_slice %49 {offsets = [0, 48], sizes = [16, 16], strides = [1, 1]} : vector<16x64xbf16> to vector<16x16xbf16>
    %107 = vector.extract_strided_slice %50 {offsets = [0, 48], sizes = [16, 16], strides = [1, 1]} : vector<16x64xbf16> to vector<16x16xbf16>
    %cst_56 = arith.constant dense<0.000000e+00> : vector<16x16xf32>
    %108 = tpu.matmul %105, %106, %cst_56 {dimension_numbers = #tpu.dot_dimension_numbers<[1], [1], [0], [0], [0, 0, 1, 0], [], []>} : vector<16x16xbf16>, vector<16x16xbf16>, vector<16x16xf32> -> vector<16x16xf32>
    %cst_57 = arith.constant dense<0xFF800000> : vector<16xf32>
    %109 = vector.multi_reduction <maximumf>, %108, %cst_57 [1] : vector<16x16xf32> to vector<16xf32>
    %110 = vector.shape_cast %109 : vector<16xf32> to vector<16x1xf32>
    %111 = vector.broadcast %110 : vector<16x1xf32> to vector<16x16xf32>
    %112 = arith.subf %108, %111 : vector<16x16xf32>
    %113 = math.exp %112 : vector<16x16xf32>
    %cst_58 = arith.constant dense<0.000000e+00> : vector<16xf32>
    %114 = vector.multi_reduction <add>, %113, %cst_58 [1] : vector<16x16xf32> to vector<16xf32>
    %115 = vector.shape_cast %114 : vector<16xf32> to vector<16x1xf32>
    %116 = tpu.reciprocal %115 {approx = true} : vector<16x1xf32> -> vector<16x1xf32>
    %117 = vector.broadcast %116 : vector<16x1xf32> to vector<16x16xf32>
    %118 = arith.mulf %113, %117 : vector<16x16xf32>
    %119 = arith.truncf %118 : vector<16x16xf32> to vector<16x16xbf16>
    %cst_59 = arith.constant dense<0.000000e+00> : vector<16x16xf32>
    %120 = tpu.matmul %119, %107, %cst_59 {dimension_numbers = #tpu.dot_dimension_numbers<[1], [0], [0], [1], [0, 0, 1, 1], [], []>} : vector<16x16xbf16>, vector<16x16xbf16>, vector<16x16xf32> -> vector<16x16xf32>
    %121 = arith.truncf %120 : vector<16x16xf32> to vector<16x16xbf16>
    %c0_60 = arith.constant 0 : index
    %c48 = arith.constant 48 : index
    %122 = vector.load %arg18[%c0_60, %c48] : memref<16x64xbf16, #tpu.memory_space<vmem>>, vector<16x16xbf16>
    tpu.vector_store %arg18[%c0_60, %c48], %121 {strides = array<i32>} : memref<16x64xbf16, #tpu.memory_space<vmem>>, vector<16x16xbf16>,
    %c0_61 = arith.constant 0 : index
    %c0_62 = arith.constant 0 : index
    %123 = vector.load %arg18[%c0_61, %c0_62] : memref<16x64xbf16, #tpu.memory_space<vmem>>, vector<16x64xbf16>
    %cst_63 = arith.constant dense<0.000000e+00> : vector<16x64xf32>
    %124 = tpu.matmul %123, %17, %cst_63 {dimension_numbers = #tpu.dot_dimension_numbers<[1], [0], [0], [1], [0, 0, 1, 1], [], []>} : vector<16x64xbf16>, vector<64x64xbf16>, vector<16x64xf32> -> vector<16x64xf32>
    %125 = arith.addf %13, %124 : vector<16x64xf32>
    %126 = vector.broadcast %18 : vector<1x64xf32> to vector<16x64xf32>
    %127 = arith.addf %125, %126 : vector<16x64xf32>
    %cst_64 = arith.constant dense<0.000000e+00> : vector<16xf32>
    %128 = vector.multi_reduction <add>, %127, %cst_64 [1] : vector<16x64xf32> to vector<16xf32>
    %129 = vector.shape_cast %128 : vector<16xf32> to vector<16x1xf32>
    %cst_65 = arith.constant 6.400000e+01 : f32
    %130 = vector.broadcast %cst_65 : f32 to vector<16x1xf32>
    %131 = arith.divf %129, %130 : vector<16x1xf32>
    %132 = vector.broadcast %131 : vector<16x1xf32> to vector<16x64xf32>
    %133 = arith.subf %127, %132 : vector<16x64xf32>
    %134 = arith.mulf %133, %133 : vector<16x64xf32>
    %cst_66 = arith.constant dense<0.000000e+00> : vector<16xf32>
    %135 = vector.multi_reduction <add>, %134, %cst_66 [1] : vector<16x64xf32> to vector<16xf32>
    %136 = vector.shape_cast %135 : vector<16xf32> to vector<16x1xf32>
    %cst_67 = arith.constant 6.400000e+01 : f32
    %137 = vector.broadcast %cst_67 : f32 to vector<16x1xf32>
    %138 = arith.divf %136, %137 : vector<16x1xf32>
    %cst_68 = arith.constant 9.99999974E-6 : f32
    %139 = vector.broadcast %cst_68 : f32 to vector<16x1xf32>
    %140 = arith.addf %138, %139 : vector<16x1xf32>
    %141 = math.rsqrt %140 : vector<16x1xf32>
    %142 = vector.broadcast %141 : vector<16x1xf32> to vector<16x64xf32>
    %143 = arith.mulf %133, %142 : vector<16x64xf32>
    %144 = vector.broadcast %19 : vector<1x64xf32> to vector<16x64xf32>
    %145 = arith.mulf %143, %144 : vector<16x64xf32>
    %146 = vector.broadcast %20 : vector<1x64xf32> to vector<16x64xf32>
    %147 = arith.addf %145, %146 : vector<16x64xf32>
    %148 = arith.truncf %147 : vector<16x64xf32> to vector<16x64xbf16>
    %cst_69 = arith.constant dense<0.000000e+00> : vector<16x256xf32>
    %149 = tpu.matmul %148, %21, %cst_69 {dimension_numbers = #tpu.dot_dimension_numbers<[1], [0], [0], [1], [0, 0, 1, 1], [], []>} : vector<16x64xbf16>, vector<64x256xbf16>, vector<16x256xf32> -> vector<16x256xf32>
    %150 = vector.broadcast %22 : vector<1x256xf32> to vector<16x256xf32>
    %151 = arith.addf %149, %150 : vector<16x256xf32>
    %cst_70 = arith.constant 5.000000e-01 : f32
    %152 = vector.broadcast %cst_70 : f32 to vector<16x256xf32>
    %153 = arith.mulf %152, %151 : vector<16x256xf32>
    %cst_71 = arith.constant 4.471500e-02 : f32
    %154 = vector.broadcast %cst_71 : f32 to vector<16x256xf32>
    %155 = arith.mulf %154, %151 : vector<16x256xf32>
    %156 = arith.mulf %155, %151 : vector<16x256xf32>
    %157 = arith.mulf %156, %151 : vector<16x256xf32>
    %158 = arith.addf %151, %157 : vector<16x256xf32>
    %cst_72 = arith.constant 0.797884583 : f32
    %159 = vector.broadcast %cst_72 : f32 to vector<16x256xf32>
    %160 = arith.mulf %159, %158 : vector<16x256xf32>
    %161 = math.tanh %160 : vector<16x256xf32>
    %cst_73 = arith.constant 1.000000e+00 : f32
    %162 = vector.broadcast %cst_73 : f32 to vector<16x256xf32>
    %163 = arith.addf %162, %161 : vector<16x256xf32>
    %164 = arith.mulf %153, %163 : vector<16x256xf32>
    %165 = arith.truncf %164 : vector<16x256xf32> to vector<16x256xbf16>
    %cst_74 = arith.constant dense<0.000000e+00> : vector<16x64xf32>
    %166 = tpu.matmul %165, %23, %cst_74 {dimension_numbers = #tpu.dot_dimension_numbers<[1], [0], [0], [1], [0, 0, 1, 1], [], []>} : vector<16x256xbf16>, vector<256x64xbf16>, vector<16x64xf32> -> vector<16x64xf32>
    %167 = vector.broadcast %24 : vector<1x64xf32> to vector<16x64xf32>
    %168 = arith.addf %166, %167 : vector<16x64xf32>
    %169 = arith.addf %127, %168 : vector<16x64xf32>
    %c0_75 = arith.constant 0 : index
    %c0_76 = arith.constant 0 : index
    %c0_77 = arith.constant 0 : index
    %170 = vector.load %arg17[%c0_75, %c0_76, %c0_77] : memref<1x16x64xf32, #tpu.memory_space<vmem>>, vector<1x16x64xf32>
    %171 = vector.shape_cast %170 : vector<1x16x64xf32> to vector<16x64xf32>
    %172 = vector.shape_cast %169 : vector<16x64xf32> to vector<1x16x64xf32>
    tpu.vector_store %arg17[%c0_75, %c0_76, %c0_77], %172 {strides = array<i32>} : memref<1x16x64xf32, #tpu.memory_space<vmem>>, vector<1x16x64xf32>,
    return
  }
  func.func @transform_0(%arg0: i32) -> (i32, i32, i32) {
    %c0_i32 = arith.constant 0 : i32
    %c0_i32_0 = arith.constant 0 : i32
    %c0_i32_1 = arith.constant 0 : i32
    return %arg0, %c0_i32, %c0_i32_0 : i32, i32, i32
  }
  func.func @transform_1(%arg0: i32) -> (i32, i32, i32) {
    %c0_i32 = arith.constant 0 : i32
    %c0_i32_0 = arith.constant 0 : i32
    %c0_i32_1 = arith.constant 0 : i32
    return %arg0, %c0_i32, %c0_i32_0 : i32, i32, i32
  }
  func.func @transform_2(%arg0: i32) -> (i32, i32) {
    %c0_i32 = arith.constant 0 : i32
    %c0_i32_0 = arith.constant 0 : i32
    %c0_i32_1 = arith.constant 0 : i32
    return %c0_i32, %c0_i32_0 : i32, i32
  }
  func.func @transform_3(%arg0: i32) -> (i32, i32) {
    %c0_i32 = arith.constant 0 : i32
    %c0_i32_0 = arith.constant 0 : i32
    %c0_i32_1 = arith.constant 0 : i32
    return %c0_i32, %c0_i32_0 : i32, i32
  }
  func.func @transform_4(%arg0: i32) -> (i32, i32) {
    %c0_i32 = arith.constant 0 : i32
    %c0_i32_0 = arith.constant 0 : i32
    %c0_i32_1 = arith.constant 0 : i32
    return %c0_i32, %c0_i32_0 : i32, i32
  }
  func.func @transform_5(%arg0: i32) -> (i32, i32) {
    %c0_i32 = arith.constant 0 : i32
    %c0_i32_0 = arith.constant 0 : i32
    %c0_i32_1 = arith.constant 0 : i32
    return %c0_i32, %c0_i32_0 : i32, i32
  }
  func.func @transform_6(%arg0: i32) -> (i32, i32) {
    %c0_i32 = arith.constant 0 : i32
    %c0_i32_0 = arith.constant 0 : i32
    %c0_i32_1 = arith.constant 0 : i32
    return %c0_i32, %c0_i32_0 : i32, i32
  }
  func.func @transform_7(%arg0: i32) -> (i32, i32) {
    %c0_i32 = arith.constant 0 : i32
    %c0_i32_0 = arith.constant 0 : i32
    %c0_i32_1 = arith.constant 0 : i32
    return %c0_i32, %c0_i32_0 : i32, i32
  }
  func.func @transform_8(%arg0: i32) -> (i32, i32) {
    %c0_i32 = arith.constant 0 : i32
    %c0_i32_0 = arith.constant 0 : i32
    %c0_i32_1 = arith.constant 0 : i32
    return %c0_i32, %c0_i32_0 : i32, i32
  }
  func.func @transform_9(%arg0: i32) -> (i32, i32) {
    %c0_i32 = arith.constant 0 : i32
    %c0_i32_0 = arith.constant 0 : i32
    %c0_i32_1 = arith.constant 0 : i32
    return %c0_i32, %c0_i32_0 : i32, i32
  }
  func.func @transform_10(%arg0: i32) -> (i32, i32) {
    %c0_i32 = arith.constant 0 : i32
    %c0_i32_0 = arith.constant 0 : i32
    %c0_i32_1 = arith.constant 0 : i32
    return %c0_i32, %c0_i32_0 : i32, i32
  }
  func.func @transform_11(%arg0: i32) -> (i32, i32) {
    %c0_i32 = arith.constant 0 : i32
    %c0_i32_0 = arith.constant 0 : i32
    %c0_i32_1 = arith.constant 0 : i32
    return %c0_i32, %c0_i32_0 : i32, i32
  }
  func.func @transform_12(%arg0: i32) -> (i32, i32) {
    %c0_i32 = arith.constant 0 : i32
    %c0_i32_0 = arith.constant 0 : i32
    %c0_i32_1 = arith.constant 0 : i32
    return %c0_i32, %c0_i32_0 : i32, i32
  }
  func.func @transform_13(%arg0: i32) -> (i32, i32) {
    %c0_i32 = arith.constant 0 : i32
    %c0_i32_0 = arith.constant 0 : i32
    %c0_i32_1 = arith.constant 0 : i32
    return %c0_i32, %c0_i32_0 : i32, i32
  }
  func.func @transform_14(%arg0: i32) -> (i32, i32) {
    %c0_i32 = arith.constant 0 : i32
    %c0_i32_0 = arith.constant 0 : i32
    %c0_i32_1 = arith.constant 0 : i32
    return %c0_i32, %c0_i32_0 : i32, i32
  }
  func.func @transform_15(%arg0: i32) -> (i32, i32) {
    %c0_i32 = arith.constant 0 : i32
    %c0_i32_0 = arith.constant 0 : i32
    %c0_i32_1 = arith.constant 0 : i32
    return %c0_i32, %c0_i32_0 : i32, i32
  }
  func.func @transform_16(%arg0: i32) -> (i32, i32, i32) {
    %c0_i32 = arith.constant 0 : i32
    %c0_i32_0 = arith.constant 0 : i32
    %c0_i32_1 = arith.constant 0 : i32
    return %arg0, %c0_i32, %c0_i32_0 : i32, i32, i32
  }
}

module attributes {stable_mosaic.version = 11 : i64} {
  func.func @_skip_resblock_kernel(%arg0: i32, %arg1: memref<1x16x64xf32, #tpu.memory_space<vmem>>, %arg2: memref<1x16x64xf32, #tpu.memory_space<vmem>>, %arg3: memref<64x64xbf16, #tpu.memory_space<vmem>>, %arg4: memref<64x64xbf16, #tpu.memory_space<vmem>>, %arg5: memref<1x64xf32, #tpu.memory_space<vmem>>, %arg6: memref<1x64xf32, #tpu.memory_space<vmem>>, %arg7: memref<1x64xf32, #tpu.memory_space<vmem>>, %arg8: memref<64x192xbf16, #tpu.memory_space<vmem>>, %arg9: memref<64x64xbf16, #tpu.memory_space<vmem>>, %arg10: memref<1x64xf32, #tpu.memory_space<vmem>>, %arg11: memref<1x64xf32, #tpu.memory_space<vmem>>, %arg12: memref<1x64xf32, #tpu.memory_space<vmem>>, %arg13: memref<64x256xbf16, #tpu.memory_space<vmem>>, %arg14: memref<1x256xf32, #tpu.memory_space<vmem>>, %arg15: memref<256x64xbf16, #tpu.memory_space<vmem>>, %arg16: memref<1x64xf32, #tpu.memory_space<vmem>>, %arg17: memref<1x16x64xf32, #tpu.memory_space<vmem>>, %arg18: memref<16x64xbf16, #tpu.memory_space<vmem>>) attributes {dimension_semantics = [#tpu.dimension_semantics<parallel>], iteration_bounds = array<i64: 2>, scalar_prefetch = 0 : i64, scratch_operands = 1 : i64, tpu.core_type = #tpu.core_type<tc>, window_params = [{transform_indices = @transform_0, window_bounds = array<i64: 1, 16, 64>}, {transform_indices = @transform_1, window_bounds = array<i64: 1, 16, 64>}, {pipeline_mode = #tpu.pipeline_mode<synchronous>, transform_indices = @transform_2, window_bounds = array<i64: 64, 64>}, {pipeline_mode = #tpu.pipeline_mode<synchronous>, transform_indices = @transform_3, window_bounds = array<i64: 64, 64>}, {pipeline_mode = #tpu.pipeline_mode<synchronous>, transform_indices = @transform_4, window_bounds = array<i64: 1, 64>}, {pipeline_mode = #tpu.pipeline_mode<synchronous>, transform_indices = @transform_5, window_bounds = array<i64: 1, 64>}, {pipeline_mode = #tpu.pipeline_mode<synchronous>, transform_indices = @transform_6, window_bounds = array<i64: 1, 64>}, {pipeline_mode = #tpu.pipeline_mode<synchronous>, transform_indices = @transform_7, window_bounds = array<i64: 64, 192>}, {pipeline_mode = #tpu.pipeline_mode<synchronous>, transform_indices = @transform_8, window_bounds = array<i64: 64, 64>}, {pipeline_mode = #tpu.pipeline_mode<synchronous>, transform_indices = @transform_9, window_bounds = array<i64: 1, 64>}, {pipeline_mode = #tpu.pipeline_mode<synchronous>, transform_indices = @transform_10, window_bounds = array<i64: 1, 64>}, {pipeline_mode = #tpu.pipeline_mode<synchronous>, transform_indices = @transform_11, window_bounds = array<i64: 1, 64>}, {pipeline_mode = #tpu.pipeline_mode<synchronous>, transform_indices = @transform_12, window_bounds = array<i64: 64, 256>}, {pipeline_mode = #tpu.pipeline_mode<synchronous>, transform_indices = @transform_13, window_bounds = array<i64: 1, 256>}, {pipeline_mode = #tpu.pipeline_mode<synchronous>, transform_indices = @transform_14, window_bounds = array<i64: 256, 64>}, {pipeline_mode = #tpu.pipeline_mode<synchronous>, transform_indices = @transform_15, window_bounds = array<i64: 1, 64>}, {transform_indices = @transform_16, window_bounds = array<i64: 1, 16, 64>}]} {
    %c0 = arith.constant 0 : index
    %c0_0 = arith.constant 0 : index
    %c0_1 = arith.constant 0 : index
    %0 = vector.load %arg1[%c0, %c0_0, %c0_1] : memref<1x16x64xf32, #tpu.memory_space<vmem>>, vector<1x16x64xf32>
    %1 = vector.shape_cast %0 : vector<1x16x64xf32> to vector<16x64xf32>
    %2 = arith.truncf %1 : vector<16x64xf32> to vector<16x64xbf16>
    %c0_2 = arith.constant 0 : index
    %c0_3 = arith.constant 0 : index
    %3 = vector.load %arg3[%c0_2, %c0_3] : memref<64x64xbf16, #tpu.memory_space<vmem>>, vector<64x64xbf16>
    %cst = arith.constant dense<0.000000e+00> : vector<16x64xf32>
    %4 = tpu.matmul %2, %3, %cst {dimension_numbers = #tpu.dot_dimension_numbers<[1], [0], [0], [1], [0, 0, 1, 1], [], []>} : vector<16x64xbf16>, vector<64x64xbf16>, vector<16x64xf32> -> vector<16x64xf32>
    %c0_4 = arith.constant 0 : index
    %c0_5 = arith.constant 0 : index
    %c0_6 = arith.constant 0 : index
    %5 = vector.load %arg2[%c0_4, %c0_5, %c0_6] : memref<1x16x64xf32, #tpu.memory_space<vmem>>, vector<1x16x64xf32>
    %6 = vector.shape_cast %5 : vector<1x16x64xf32> to vector<16x64xf32>
    %7 = arith.truncf %6 : vector<16x64xf32> to vector<16x64xbf16>
    %c0_7 = arith.constant 0 : index
    %c0_8 = arith.constant 0 : index
    %8 = vector.load %arg4[%c0_7, %c0_8] : memref<64x64xbf16, #tpu.memory_space<vmem>>, vector<64x64xbf16>
    %cst_9 = arith.constant dense<0.000000e+00> : vector<16x64xf32>
    %9 = tpu.matmul %7, %8, %cst_9 {dimension_numbers = #tpu.dot_dimension_numbers<[1], [0], [0], [1], [0, 0, 1, 1], [], []>} : vector<16x64xbf16>, vector<64x64xbf16>, vector<16x64xf32> -> vector<16x64xf32>
    %10 = arith.addf %4, %9 : vector<16x64xf32>
    %c0_10 = arith.constant 0 : index
    %c0_11 = arith.constant 0 : index
    %11 = vector.load %arg5[%c0_10, %c0_11] : memref<1x64xf32, #tpu.memory_space<vmem>>, vector<1x64xf32>
    %12 = vector.broadcast %11 : vector<1x64xf32> to vector<16x64xf32>
    %13 = arith.addf %10, %12 : vector<16x64xf32>
    %c0_12 = arith.constant 0 : index
    %c0_13 = arith.constant 0 : index
    %14 = vector.load %arg6[%c0_12, %c0_13] : memref<1x64xf32, #tpu.memory_space<vmem>>, vector<1x64xf32>
    %c0_14 = arith.constant 0 : index
    %c0_15 = arith.constant 0 : index
    %15 = vector.load %arg7[%c0_14, %c0_15] : memref<1x64xf32, #tpu.memory_space<vmem>>, vector<1x64xf32>
    %c0_16 = arith.constant 0 : index
    %c0_17 = arith.constant 0 : index
    %16 = vector.load %arg8[%c0_16, %c0_17] : memref<64x192xbf16, #tpu.memory_space<vmem>>, vector<64x192xbf16>
    %c0_18 = arith.constant 0 : index
    %c0_19 = arith.constant 0 : index
    %17 = vector.load %arg9[%c0_18, %c0_19] : memref<64x64xbf16, #tpu.memory_space<vmem>>, vector<64x64xbf16>
    %c0_20 = arith.constant 0 : index
    %c0_21 = arith.constant 0 : index
    %18 = vector.load %arg10[%c0_20, %c0_21] : memref<1x64xf32, #tpu.memory_space<vmem>>, vector<1x64xf32>
    %c0_22 = arith.constant 0 : index
    %c0_23 = arith.constant 0 : index
    %19 = vector.load %arg11[%c0_22, %c0_23] : memref<1x64xf32, #tpu.memory_space<vmem>>, vector<1x64xf32>
    %c0_24 = arith.constant 0 : index
    %c0_25 = arith.constant 0 : index
    %20 = vector.load %arg12[%c0_24, %c0_25] : memref<1x64xf32, #tpu.memory_space<vmem>>, vector<1x64xf32>
    %c0_26 = arith.constant 0 : index
    %c0_27 = arith.constant 0 : index
    %21 = vector.load %arg13[%c0_26, %c0_27] : memref<64x256xbf16, #tpu.memory_space<vmem>>, vector<64x256xbf16>
    %c0_28 = arith.constant 0 : index
    %c0_29 = arith.constant 0 : index
    %22 = vector.load %arg14[%c0_28, %c0_29] : memref<1x256xf32, #tpu.memory_space<vmem>>, vector<1x256xf32>
    %c0_30 = arith.constant 0 : index
    %c0_31 = arith.constant 0 : index
    %23 = vector.load %arg15[%c0_30, %c0_31] : memref<256x64xbf16, #tpu.memory_space<vmem>>, vector<256x64xbf16>
    %c0_32 = arith.constant 0 : index
    %c0_33 = arith.constant 0 : index
    %24 = vector.load %arg16[%c0_32, %c0_33] : memref<1x64xf32, #tpu.memory_space<vmem>>, vector<1x64xf32>
    %cst_34 = arith.constant dense<0.000000e+00> : vector<16xf32>
    %25 = vector.multi_reduction <add>, %13, %cst_34 [1] : vector<16x64xf32> to vector<16xf32>
    %26 = vector.shape_cast %25 : vector<16xf32> to vector<16x1xf32>
    %cst_35 = arith.constant 6.400000e+01 : f32
    %27 = vector.broadcast %cst_35 : f32 to vector<16x1xf32>
    %28 = arith.divf %26, %27 : vector<16x1xf32>
    %29 = vector.broadcast %28 : vector<16x1xf32> to vector<16x64xf32>
    %30 = arith.subf %13, %29 : vector<16x64xf32>
    %31 = arith.mulf %30, %30 : vector<16x64xf32>
    %cst_36 = arith.constant dense<0.000000e+00> : vector<16xf32>
    %32 = vector.multi_reduction <add>, %31, %cst_36 [1] : vector<16x64xf32> to vector<16xf32>
    %33 = vector.shape_cast %32 : vector<16xf32> to vector<16x1xf32>
    %cst_37 = arith.constant 6.400000e+01 : f32
    %34 = vector.broadcast %cst_37 : f32 to vector<16x1xf32>
    %35 = arith.divf %33, %34 : vector<16x1xf32>
    %cst_38 = arith.constant 9.99999974E-6 : f32
    %36 = vector.broadcast %cst_38 : f32 to vector<16x1xf32>
    %37 = arith.addf %35, %36 : vector<16x1xf32>
    %38 = math.rsqrt %37 : vector<16x1xf32>
    %39 = vector.broadcast %38 : vector<16x1xf32> to vector<16x64xf32>
    %40 = arith.mulf %30, %39 : vector<16x64xf32>
    %41 = vector.broadcast %14 : vector<1x64xf32> to vector<16x64xf32>
    %42 = arith.mulf %40, %41 : vector<16x64xf32>
    %43 = vector.broadcast %15 : vector<1x64xf32> to vector<16x64xf32>
    %44 = arith.addf %42, %43 : vector<16x64xf32>
    %45 = arith.truncf %44 : vector<16x64xf32> to vector<16x64xbf16>
    %cst_39 = arith.constant dense<0.000000e+00> : vector<16x192xf32>
    %46 = tpu.matmul %45, %16, %cst_39 {dimension_numbers = #tpu.dot_dimension_numbers<[1], [0], [0], [1], [0, 0, 1, 1], [], []>} : vector<16x64xbf16>, vector<64x192xbf16>, vector<16x192xf32> -> vector<16x192xf32>
    %47 = arith.truncf %46 : vector<16x192xf32> to vector<16x192xbf16>
    %48 = vector.extract_strided_slice %47 {offsets = [0, 0], sizes = [16, 64], strides = [1, 1]} : vector<16x192xbf16> to vector<16x64xbf16>
    %49 = vector.extract_strided_slice %47 {offsets = [0, 64], sizes = [16, 64], strides = [1, 1]} : vector<16x192xbf16> to vector<16x64xbf16>
    %50 = vector.extract_strided_slice %47 {offsets = [0, 128], sizes = [16, 64], strides = [1, 1]} : vector<16x192xbf16> to vector<16x64xbf16>
    %51 = vector.extract_strided_slice %48 {offsets = [0, 0], sizes = [16, 16], strides = [1, 1]} : vector<16x64xbf16> to vector<16x16xbf16>
    %52 = vector.extract_strided_slice %49 {offsets = [0, 0], sizes = [16, 16], strides = [1, 1]} : vector<16x64xbf16> to vector<16x16xbf16>
    %53 = vector.extract_strided_slice %50 {offsets = [0, 0], sizes = [16, 16], strides = [1, 1]} : vector<16x64xbf16> to vector<16x16xbf16>
    %cst_40 = arith.constant dense<0.000000e+00> : vector<16x16xf32>
    %54 = tpu.matmul %51, %52, %cst_40 {dimension_numbers = #tpu.dot_dimension_numbers<[1], [1], [0], [0], [0, 0, 1, 0], [], []>} : vector<16x16xbf16>, vector<16x16xbf16>, vector<16x16xf32> -> vector<16x16xf32>
    %cst_41 = arith.constant dense<0xFF800000> : vector<16xf32>
    %55 = vector.multi_reduction <maximumf>, %54, %cst_41 [1] : vector<16x16xf32> to vector<16xf32>
    %56 = vector.shape_cast %55 : vector<16xf32> to vector<16x1xf32>
    %57 = vector.broadcast %56 : vector<16x1xf32> to vector<16x16xf32>
    %58 = arith.subf %54, %57 : vector<16x16xf32>
    %59 = math.exp %58 : vector<16x16xf32>
    %cst_42 = arith.constant dense<0.000000e+00> : vector<16xf32>
    %60 = vector.multi_reduction <add>, %59, %cst_42 [1] : vector<16x16xf32> to vector<16xf32>
    %61 = vector.shape_cast %60 : vector<16xf32> to vector<16x1xf32>
    %62 = tpu.reciprocal %61 {approx = true} : vector<16x1xf32> -> vector<16x1xf32>
    %63 = vector.broadcast %62 : vector<16x1xf32> to vector<16x16xf32>
    %64 = arith.mulf %59, %63 : vector<16x16xf32>
    %65 = arith.truncf %64 : vector<16x16xf32> to vector<16x16xbf16>
    %cst_43 = arith.constant dense<0.000000e+00> : vector<16x16xf32>
    %66 = tpu.matmul %65, %53, %cst_43 {dimension_numbers = #tpu.dot_dimension_numbers<[1], [0], [0], [1], [0, 0, 1, 1], [], []>} : vector<16x16xbf16>, vector<16x16xbf16>, vector<16x16xf32> -> vector<16x16xf32>
    %67 = arith.truncf %66 : vector<16x16xf32> to vector<16x16xbf16>
    %c0_44 = arith.constant 0 : index
    %c0_45 = arith.constant 0 : index
    %68 = vector.load %arg18[%c0_44, %c0_45] : memref<16x64xbf16, #tpu.memory_space<vmem>>, vector<16x16xbf16>
    tpu.vector_store %arg18[%c0_44, %c0_45], %67 {strides = array<i32>} : memref<16x64xbf16, #tpu.memory_space<vmem>>, vector<16x16xbf16>,
    %69 = vector.extract_strided_slice %48 {offsets = [0, 16], sizes = [16, 16], strides = [1, 1]} : vector<16x64xbf16> to vector<16x16xbf16>
    %70 = vector.extract_strided_slice %49 {offsets = [0, 16], sizes = [16, 16], strides = [1, 1]} : vector<16x64xbf16> to vector<16x16xbf16>
    %71 = vector.extract_strided_slice %50 {offsets = [0, 16], sizes = [16, 16], strides = [1, 1]} : vector<16x64xbf16> to vector<16x16xbf16>
    %cst_46 = arith.constant dense<0.000000e+00> : vector<16x16xf32>
    %72 = tpu.matmul %69, %70, %cst_46 {dimension_numbers = #tpu.dot_dimension_numbers<[1], [1], [0], [0], [0, 0, 1, 0], [], []>} : vector<16x16xbf16>, vector<16x16xbf16>, vector<16x16xf32> -> vector<16x16xf32>
    %cst_47 = arith.constant dense<0xFF800000> : vector<16xf32>
    %73 = vector.multi_reduction <maximumf>, %72, %cst_47 [1] : vector<16x16xf32> to vector<16xf32>
    %74 = vector.shape_cast %73 : vector<16xf32> to vector<16x1xf32>
    %75 = vector.broadcast %74 : vector<16x1xf32> to vector<16x16xf32>
    %76 = arith.subf %72, %75 : vector<16x16xf32>
    %77 = math.exp %76 : vector<16x16xf32>
    %cst_48 = arith.constant dense<0.000000e+00> : vector<16xf32>
    %78 = vector.multi_reduction <add>, %77, %cst_48 [1] : vector<16x16xf32> to vector<16xf32>
    %79 = vector.shape_cast %78 : vector<16xf32> to vector<16x1xf32>
    %80 = tpu.reciprocal %79 {approx = true} : vector<16x1xf32> -> vector<16x1xf32>
    %81 = vector.broadcast %80 : vector<16x1xf32> to vector<16x16xf32>
    %82 = arith.mulf %77, %81 : vector<16x16xf32>
    %83 = arith.truncf %82 : vector<16x16xf32> to vector<16x16xbf16>
    %cst_49 = arith.constant dense<0.000000e+00> : vector<16x16xf32>
    %84 = tpu.matmul %83, %71, %cst_49 {dimension_numbers = #tpu.dot_dimension_numbers<[1], [0], [0], [1], [0, 0, 1, 1], [], []>} : vector<16x16xbf16>, vector<16x16xbf16>, vector<16x16xf32> -> vector<16x16xf32>
    %85 = arith.truncf %84 : vector<16x16xf32> to vector<16x16xbf16>
    %c0_50 = arith.constant 0 : index
    %c16 = arith.constant 16 : index
    %86 = vector.load %arg18[%c0_50, %c16] : memref<16x64xbf16, #tpu.memory_space<vmem>>, vector<16x16xbf16>
    tpu.vector_store %arg18[%c0_50, %c16], %85 {strides = array<i32>} : memref<16x64xbf16, #tpu.memory_space<vmem>>, vector<16x16xbf16>,
    %87 = vector.extract_strided_slice %48 {offsets = [0, 32], sizes = [16, 16], strides = [1, 1]} : vector<16x64xbf16> to vector<16x16xbf16>
    %88 = vector.extract_strided_slice %49 {offsets = [0, 32], sizes = [16, 16], strides = [1, 1]} : vector<16x64xbf16> to vector<16x16xbf16>
    %89 = vector.extract_strided_slice %50 {offsets = [0, 32], sizes = [16, 16], strides = [1, 1]} : vector<16x64xbf16> to vector<16x16xbf16>
    %cst_51 = arith.constant dense<0.000000e+00> : vector<16x16xf32>
    %90 = tpu.matmul %87, %88, %cst_51 {dimension_numbers = #tpu.dot_dimension_numbers<[1], [1], [0], [0], [0, 0, 1, 0], [], []>} : vector<16x16xbf16>, vector<16x16xbf16>, vector<16x16xf32> -> vector<16x16xf32>
    %cst_52 = arith.constant dense<0xFF800000> : vector<16xf32>
    %91 = vector.multi_reduction <maximumf>, %90, %cst_52 [1] : vector<16x16xf32> to vector<16xf32>
    %92 = vector.shape_cast %91 : vector<16xf32> to vector<16x1xf32>
    %93 = vector.broadcast %92 : vector<16x1xf32> to vector<16x16xf32>
    %94 = arith.subf %90, %93 : vector<16x16xf32>
    %95 = math.exp %94 : vector<16x16xf32>
    %cst_53 = arith.constant dense<0.000000e+00> : vector<16xf32>
    %96 = vector.multi_reduction <add>, %95, %cst_53 [1] : vector<16x16xf32> to vector<16xf32>
    %97 = vector.shape_cast %96 : vector<16xf32> to vector<16x1xf32>
    %98 = tpu.reciprocal %97 {approx = true} : vector<16x1xf32> -> vector<16x1xf32>
    %99 = vector.broadcast %98 : vector<16x1xf32> to vector<16x16xf32>
    %100 = arith.mulf %95, %99 : vector<16x16xf32>
    %101 = arith.truncf %100 : vector<16x16xf32> to vector<16x16xbf16>
    %cst_54 = arith.constant dense<0.000000e+00> : vector<16x16xf32>
    %102 = tpu.matmul %101, %89, %cst_54 {dimension_numbers = #tpu.dot_dimension_numbers<[1], [0], [0], [1], [0, 0, 1, 1], [], []>} : vector<16x16xbf16>, vector<16x16xbf16>, vector<16x16xf32> -> vector<16x16xf32>
    %103 = arith.truncf %102 : vector<16x16xf32> to vector<16x16xbf16>
    %c0_55 = arith.constant 0 : index
    %c32 = arith.constant 32 : index
    %104 = vector.load %arg18[%c0_55, %c32] : memref<16x64xbf16, #tpu.memory_space<vmem>>, vector<16x16xbf16>
    tpu.vector_store %arg18[%c0_55, %c32], %103 {strides = array<i32>} : memref<16x64xbf16, #tpu.memory_space<vmem>>, vector<16x16xbf16>,
    %105 = vector.extract_strided_slice %48 {offsets = [0, 48], sizes = [16, 16], strides = [1, 1]} : vector<16x64xbf16> to vector<16x16xbf16>
    %106 = vector.extract_strided_slice %49 {offsets = [0, 48], sizes = [16, 16], strides = [1, 1]} : vector<16x64xbf16> to vector<16x16xbf16>
    %107 = vector.extract_strided_slice %50 {offsets = [0, 48], sizes = [16, 16], strides = [1, 1]} : vector<16x64xbf16> to vector<16x16xbf16>
    %cst_56 = arith.constant dense<0.000000e+00> : vector<16x16xf32>
    %108 = tpu.matmul %105, %106, %cst_56 {dimension_numbers = #tpu.dot_dimension_numbers<[1], [1], [0], [0], [0, 0, 1, 0], [], []>} : vector<16x16xbf16>, vector<16x16xbf16>, vector<16x16xf32> -> vector<16x16xf32>
    %cst_57 = arith.constant dense<0xFF800000> : vector<16xf32>
    %109 = vector.multi_reduction <maximumf>, %108, %cst_57 [1] : vector<16x16xf32> to vector<16xf32>
    %110 = vector.shape_cast %109 : vector<16xf32> to vector<16x1xf32>
    %111 = vector.broadcast %110 : vector<16x1xf32> to vector<16x16xf32>
    %112 = arith.subf %108, %111 : vector<16x16xf32>
    %113 = math.exp %112 : vector<16x16xf32>
    %cst_58 = arith.constant dense<0.000000e+00> : vector<16xf32>
    %114 = vector.multi_reduction <add>, %113, %cst_58 [1] : vector<16x16xf32> to vector<16xf32>
    %115 = vector.shape_cast %114 : vector<16xf32> to vector<16x1xf32>
    %116 = tpu.reciprocal %115 {approx = true} : vector<16x1xf32> -> vector<16x1xf32>
    %117 = vector.broadcast %116 : vector<16x1xf32> to vector<16x16xf32>
    %118 = arith.mulf %113, %117 : vector<16x16xf32>
    %119 = arith.truncf %118 : vector<16x16xf32> to vector<16x16xbf16>
    %cst_59 = arith.constant dense<0.000000e+00> : vector<16x16xf32>
    %120 = tpu.matmul %119, %107, %cst_59 {dimension_numbers = #tpu.dot_dimension_numbers<[1], [0], [0], [1], [0, 0, 1, 1], [], []>} : vector<16x16xbf16>, vector<16x16xbf16>, vector<16x16xf32> -> vector<16x16xf32>
    %121 = arith.truncf %120 : vector<16x16xf32> to vector<16x16xbf16>
    %c0_60 = arith.constant 0 : index
    %c48 = arith.constant 48 : index
    %122 = vector.load %arg18[%c0_60, %c48] : memref<16x64xbf16, #tpu.memory_space<vmem>>, vector<16x16xbf16>
    tpu.vector_store %arg18[%c0_60, %c48], %121 {strides = array<i32>} : memref<16x64xbf16, #tpu.memory_space<vmem>>, vector<16x16xbf16>,
    %c0_61 = arith.constant 0 : index
    %c0_62 = arith.constant 0 : index
    %123 = vector.load %arg18[%c0_61, %c0_62] : memref<16x64xbf16, #tpu.memory_space<vmem>>, vector<16x64xbf16>
    %cst_63 = arith.constant dense<0.000000e+00> : vector<16x64xf32>
    %124 = tpu.matmul %123, %17, %cst_63 {dimension_numbers = #tpu.dot_dimension_numbers<[1], [0], [0], [1], [0, 0, 1, 1], [], []>} : vector<16x64xbf16>, vector<64x64xbf16>, vector<16x64xf32> -> vector<16x64xf32>
    %125 = arith.addf %13, %124 : vector<16x64xf32>
    %126 = vector.broadcast %18 : vector<1x64xf32> to vector<16x64xf32>
    %127 = arith.addf %125, %126 : vector<16x64xf32>
    %cst_64 = arith.constant dense<0.000000e+00> : vector<16xf32>
    %128 = vector.multi_reduction <add>, %127, %cst_64 [1] : vector<16x64xf32> to vector<16xf32>
    %129 = vector.shape_cast %128 : vector<16xf32> to vector<16x1xf32>
    %cst_65 = arith.constant 6.400000e+01 : f32
    %130 = vector.broadcast %cst_65 : f32 to vector<16x1xf32>
    %131 = arith.divf %129, %130 : vector<16x1xf32>
    %132 = vector.broadcast %131 : vector<16x1xf32> to vector<16x64xf32>
    %133 = arith.subf %127, %132 : vector<16x64xf32>
    %134 = arith.mulf %133, %133 : vector<16x64xf32>
    %cst_66 = arith.constant dense<0.000000e+00> : vector<16xf32>
    %135 = vector.multi_reduction <add>, %134, %cst_66 [1] : vector<16x64xf32> to vector<16xf32>
    %136 = vector.shape_cast %135 : vector<16xf32> to vector<16x1xf32>
    %cst_67 = arith.constant 6.400000e+01 : f32
    %137 = vector.broadcast %cst_67 : f32 to vector<16x1xf32>
    %138 = arith.divf %136, %137 : vector<16x1xf32>
    %cst_68 = arith.constant 9.99999974E-6 : f32
    %139 = vector.broadcast %cst_68 : f32 to vector<16x1xf32>
    %140 = arith.addf %138, %139 : vector<16x1xf32>
    %141 = math.rsqrt %140 : vector<16x1xf32>
    %142 = vector.broadcast %141 : vector<16x1xf32> to vector<16x64xf32>
    %143 = arith.mulf %133, %142 : vector<16x64xf32>
    %144 = vector.broadcast %19 : vector<1x64xf32> to vector<16x64xf32>
    %145 = arith.mulf %143, %144 : vector<16x64xf32>
    %146 = vector.broadcast %20 : vector<1x64xf32> to vector<16x64xf32>
    %147 = arith.addf %145, %146 : vector<16x64xf32>
    %148 = arith.truncf %147 : vector<16x64xf32> to vector<16x64xbf16>
    %cst_69 = arith.constant dense<0.000000e+00> : vector<16x256xf32>
    %149 = tpu.matmul %148, %21, %cst_69 {dimension_numbers = #tpu.dot_dimension_numbers<[1], [0], [0], [1], [0, 0, 1, 1], [], []>} : vector<16x64xbf16>, vector<64x256xbf16>, vector<16x256xf32> -> vector<16x256xf32>
    %150 = vector.broadcast %22 : vector<1x256xf32> to vector<16x256xf32>
    %151 = arith.addf %149, %150 : vector<16x256xf32>
    %cst_70 = arith.constant 5.000000e-01 : f32
    %152 = vector.broadcast %cst_70 : f32 to vector<16x256xf32>
    %153 = arith.mulf %152, %151 : vector<16x256xf32>
    %cst_71 = arith.constant 4.471500e-02 : f32
    %154 = vector.broadcast %cst_71 : f32 to vector<16x256xf32>
    %155 = arith.mulf %154, %151 : vector<16x256xf32>
    %156 = arith.mulf %155, %151 : vector<16x256xf32>
    %157 = arith.mulf %156, %151 : vector<16x256xf32>
    %158 = arith.addf %151, %157 : vector<16x256xf32>
    %cst_72 = arith.constant 0.797884583 : f32
    %159 = vector.broadcast %cst_72 : f32 to vector<16x256xf32>
    %160 = arith.mulf %159, %158 : vector<16x256xf32>
    %161 = math.tanh %160 : vector<16x256xf32>
    %cst_73 = arith.constant 1.000000e+00 : f32
    %162 = vector.broadcast %cst_73 : f32 to vector<16x256xf32>
    %163 = arith.addf %162, %161 : vector<16x256xf32>
    %164 = arith.mulf %153, %163 : vector<16x256xf32>
    %165 = arith.truncf %164 : vector<16x256xf32> to vector<16x256xbf16>
    %cst_74 = arith.constant dense<0.000000e+00> : vector<16x64xf32>
    %166 = tpu.matmul %165, %23, %cst_74 {dimension_numbers = #tpu.dot_dimension_numbers<[1], [0], [0], [1], [0, 0, 1, 1], [], []>} : vector<16x256xbf16>, vector<256x64xbf16>, vector<16x64xf32> -> vector<16x64xf32>
    %167 = vector.broadcast %24 : vector<1x64xf32> to vector<16x64xf32>
    %168 = arith.addf %166, %167 : vector<16x64xf32>
    %169 = arith.addf %127, %168 : vector<16x64xf32>
    %c0_75 = arith.constant 0 : index
    %c0_76 = arith.constant 0 : index
    %c0_77 = arith.constant 0 : index
    %170 = vector.load %arg17[%c0_75, %c0_76, %c0_77] : memref<1x16x64xf32, #tpu.memory_space<vmem>>, vector<1x16x64xf32>
    %171 = vector.shape_cast %170 : vector<1x16x64xf32> to vector<16x64xf32>
    %172 = vector.shape_cast %169 : vector<16x64xf32> to vector<1x16x64xf32>
    tpu.vector_store %arg17[%c0_75, %c0_76, %c0_77], %172 {strides = array<i32>} : memref<1x16x64xf32, #tpu.memory_space<vmem>>, vector<1x16x64xf32>,
    return
  }
  func.func @transform_0(%arg0: i32) -> (i32, i32, i32) {
    %c0_i32 = arith.constant 0 : i32
    %c0_i32_0 = arith.constant 0 : i32
    %c0_i32_1 = arith.constant 0 : i32
    return %arg0, %c0_i32, %c0_i32_0 : i32, i32, i32
  }
  func.func @transform_1(%arg0: i32) -> (i32, i32, i32) {
    %c0_i32 = arith.constant 0 : i32
    %c0_i32_0 = arith.constant 0 : i32
    %c0_i32_1 = arith.constant 0 : i32
    return %arg0, %c0_i32, %c0_i32_0 : i32, i32, i32
  }
  func.func @transform_2(%arg0: i32) -> (i32, i32) {
    %c0_i32 = arith.constant 0 : i32
    %c0_i32_0 = arith.constant 0 : i32
    %c0_i32_1 = arith.constant 0 : i32
    return %c0_i32, %c0_i32_0 : i32, i32
  }
  func.func @transform_3(%arg0: i32) -> (i32, i32) {
    %c0_i32 = arith.constant 0 : i32
    %c0_i32_0 = arith.constant 0 : i32
    %c0_i32_1 = arith.constant 0 : i32
    return %c0_i32, %c0_i32_0 : i32, i32
  }
  func.func @transform_4(%arg0: i32) -> (i32, i32) {
    %c0_i32 = arith.constant 0 : i32
    %c0_i32_0 = arith.constant 0 : i32
    %c0_i32_1 = arith.constant 0 : i32
    return %c0_i32, %c0_i32_0 : i32, i32
  }
  func.func @transform_5(%arg0: i32) -> (i32, i32) {
    %c0_i32 = arith.constant 0 : i32
    %c0_i32_0 = arith.constant 0 : i32
    %c0_i32_1 = arith.constant 0 : i32
    return %c0_i32, %c0_i32_0 : i32, i32
  }
  func.func @transform_6(%arg0: i32) -> (i32, i32) {
    %c0_i32 = arith.constant 0 : i32
    %c0_i32_0 = arith.constant 0 : i32
    %c0_i32_1 = arith.constant 0 : i32
    return %c0_i32, %c0_i32_0 : i32, i32
  }
  func.func @transform_7(%arg0: i32) -> (i32, i32) {
    %c0_i32 = arith.constant 0 : i32
    %c0_i32_0 = arith.constant 0 : i32
    %c0_i32_1 = arith.constant 0 : i32
    return %c0_i32, %c0_i32_0 : i32, i32
  }
  func.func @transform_8(%arg0: i32) -> (i32, i32) {
    %c0_i32 = arith.constant 0 : i32
    %c0_i32_0 = arith.constant 0 : i32
    %c0_i32_1 = arith.constant 0 : i32
    return %c0_i32, %c0_i32_0 : i32, i32
  }
  func.func @transform_9(%arg0: i32) -> (i32, i32) {
    %c0_i32 = arith.constant 0 : i32
    %c0_i32_0 = arith.constant 0 : i32
    %c0_i32_1 = arith.constant 0 : i32
    return %c0_i32, %c0_i32_0 : i32, i32
  }
  func.func @transform_10(%arg0: i32) -> (i32, i32) {
    %c0_i32 = arith.constant 0 : i32
    %c0_i32_0 = arith.constant 0 : i32
    %c0_i32_1 = arith.constant 0 : i32
    return %c0_i32, %c0_i32_0 : i32, i32
  }
  func.func @transform_11(%arg0: i32) -> (i32, i32) {
    %c0_i32 = arith.constant 0 : i32
    %c0_i32_0 = arith.constant 0 : i32
    %c0_i32_1 = arith.constant 0 : i32
    return %c0_i32, %c0_i32_0 : i32, i32
  }
  func.func @transform_12(%arg0: i32) -> (i32, i32) {
    %c0_i32 = arith.constant 0 : i32
    %c0_i32_0 = arith.constant 0 : i32
    %c0_i32_1 = arith.constant 0 : i32
    return %c0_i32, %c0_i32_0 : i32, i32
  }
  func.func @transform_13(%arg0: i32) -> (i32, i32) {
    %c0_i32 = arith.constant 0 : i32
    %c0_i32_0 = arith.constant 0 : i32
    %c0_i32_1 = arith.constant 0 : i32
    return %c0_i32, %c0_i32_0 : i32, i32
  }
  func.func @transform_14(%arg0: i32) -> (i32, i32) {
    %c0_i32 = arith.constant 0 : i32
    %c0_i32_0 = arith.constant 0 : i32
    %c0_i32_1 = arith.constant 0 : i32
    return %c0_i32, %c0_i32_0 : i32, i32
  }
  func.func @transform_15(%arg0: i32) -> (i32, i32) {
    %c0_i32 = arith.constant 0 : i32
    %c0_i32_0 = arith.constant 0 : i32
    %c0_i32_1 = arith.constant 0 : i32
    return %c0_i32, %c0_i32_0 : i32, i32
  }
  func.func @transform_16(%arg0: i32) -> (i32, i32, i32) {
    %c0_i32 = arith.constant 0 : i32
    %c0_i32_0 = arith.constant 0 : i32
    %c0_i32_1 = arith.constant 0 : i32
    return %arg0, %c0_i32, %c0_i32_0 : i32, i32, i32
  }
}

</mosaic_0001>

<bundles_post_ra>
// kernel: _lambda_.5
= control target key start
LH: loop header
LB: loop body
LE: loop exit
PB: predicated region body
PF: predicated region fallthrough
CT: control target
= control target key end

     0   :  { %s2406_s0 = inlined_call_operand.hbm [shape: f32[2,16,64], index: 0, kind: input, shape index: {}]   ;;  %s2407_s1 = inlined_call_operand.vmem [shape: f32[1,64], index: 1, kind: input, shape index: {}, may-alias: {1,6}]   ;;  %s2408_s2 = inlined_call_operand.vmem [shape: f32[1,64], index: 2, kind: input, shape index: {}, may-alias: {2,5,7,11}]   ;;  %s2409_s3 = inlined_call_operand.hbm [shape: bf16[64,192], index: 3, kind: input, shape index: {}]   ;;  %s2410_s4 = inlined_call_operand.hbm [shape: bf16[64,64], index: 4, kind: input, shape index: {}]   ;;  %s2411_s5 = inlined_call_operand.vmem [shape: f32[1,64], index: 5, kind: input, shape index: {}, may-alias: {2,5,7,11}]   ;;  %s2412_s6 = inlined_call_operand.vmem [shape: f32[1,64], index: 6, kind: input, shape index: {}, may-alias: {1,6}]   ;;  %s2413_s7 = inlined_call_operand.vmem [shape: f32[1,64], index: 7, kind: input, shape index: {}, may-alias: {2,5,7,11}]   ;;  %s2414_s8 = inlined_call_operand.hbm [shape: bf16[64,256], index: 8, kind: input, shape index: {}]   ;;  %s2415_s9 = inlined_call_operand.vmem [shape: f32[1,256], index: 9, kind: input, shape index: {}]   ;;  %s2416_s10 = inlined_call_operand.hbm [shape: bf16[256,64], index: 10, kind: input, shape index: {}]   ;;  %s2417_s11 = inlined_call_operand.vmem [shape: f32[1,64], index: 11, kind: input, shape index: {}, may-alias: {2,5,7,11}]   ;;  %s2418_s12 = inlined_call_operand.vmem [shape: f32[2,16,64], index: 12, kind: output, shape index: {}]  }
   0x1   :  { %2421 = sst [smem:[#allocation14_spill]] %s2409_s3 }
   0x2   :  { %2422 = sst [smem:[#allocation15_spill]] %s2410_s4 }
   0x3   :  { %2423 = sst [smem:[#allocation16_spill]] %s2414_s8 }
   0x4   :  { %17 = vsyncpa [#allocation4], 0 }
   0x5   :  { %19 = vsyncpa [#allocation4 + $0x1], 0 }
   0x6   :  { %20 = vsyncpa [#allocation6], 0 }
   0x7   :  { %21 = vsyncpa [#allocation9], 0  ;;  %s2124_s21 = smov 0   ;;  %s2126_s22 = smov 0  }
   0x8   :  { %s2128_s23 = smov 0   ;;  %s2130_s24 = smov 0  }
   0x9 LB: > { %s2143_s25 = sadd.s32 4294967295, %s2041_s24   ;;  %p47_p0 = scmp.ne.s32.totalorder %s2033_s22, %s2029_s21  ;;  %s2041_s24 = sphi %s2130_s24, %s2436_s24   ;;  %s2037_s23 = sphi %s2128_s23, %s2435_s23   ;;  %s2033_s22 = sphi %s2126_s22, %s2434_s22   ;;  %s2029_s21 = sphi %s2124_s21, %s2433_s21  }
   0xa   : > { %p48_p1 = scmp.eq.s32.totalorder %s2143_s25, 0  ;;  %p1482_p2 = scmp.ge.s32.totalorder %s2041_s24, 1 }
   0xb   : > { %p315_p3 = scmp.lt.s32.totalorder %s2041_s24, 3  ;;  %s2425_s3 = sld [smem:[#allocation14_spill]] }
   0xc   : > { %p2151_p4 = por %p48_p1, %p47_p0  ;;  %s2043_s13 = smov [#allocation5]  }
   0xd   : > { %p2158_p5 = pnand %p1482_p2, %p315_p3  ;;  %s334_s14 = sshll.u32 %s2043_s13, 4  ;;  %s335_s14 = int_to_ptr.vmem [resolvable:$true] %s334_s14 }
   0xe   : > { %s2428_s8 = sld [smem:[#allocation16_spill]]  ;;  %s2419_s19 = smov 128  }
   0xf   : > { %p1719_p6 = pneg %p2158_p5  ;;  %s2420_s20 = smov 8  }
  0x10   : > { %s2046_s21 = smov [#allocation8]   ;;  %s2429_s4 = sld [smem:[#allocation15_spill]] }
  0x11   : > { %s332_s29 = sshll.u32 %s2425_s3, 4  ;;  %p2166_p7 = pnand %p1719_p6, %p48_p1  ;;  %s333_s29 = int_to_ptr.hbm [resolvable:$true] %s332_s29 }
  0x12   : > { %s371_s27 = sshll.u32 %s2046_s21, 4  ;;  %s386_s21 = sshll.u32 %s2416_s10, 4  ;;  %s372_s27 = int_to_ptr.vmem [resolvable:$true] %s371_s27  ;;  %s387_s21 = int_to_ptr.hbm [resolvable:$true] %s386_s21 }
  0x13   : > { %1722 = dma.hbm_to_vmem [thread:$0]  (!%p2166_p7), %s333_s29, 1024, %s335_s14, [#allocation6], %s2419_s19, %s2419_s19, %s2420_s20  }
  0x14   : > { %s369_s18 = sshll.u32 %s2428_s8, 4  ;;  %s2047_s29 = smov [#allocation7]   ;;  %s370_s18 = int_to_ptr.hbm [resolvable:$true] %s369_s18 }
  0x15   : > { %1728 = dma.hbm_to_vmem [thread:$0]  (!%p2166_p7), %s370_s18, 1024, %s372_s27, [#allocation9], %s2419_s19, %s2419_s19, %s2420_s20  }
  0x16   : > { %s346_s3 = sshll.u32 %s2429_s4, 4  ;;  %s348_s14 = sshll.u32 %s2047_s29, 4  ;;  %s347_s3 = int_to_ptr.hbm [resolvable:$true] %s346_s3  ;;  %s349_s14 = int_to_ptr.vmem [resolvable:$true] %s348_s14 }
  0x17   : > { %s2048_s28 = smov 64   ;;  %s2049_s13 = smov 4  }
  0x18   : > { %1725 = dma.hbm_to_vmem [thread:$0]  (!%p2166_p7), %s347_s3, 512, %s349_s14, [#allocation6], %s2048_s28, %s2048_s28, %s2049_s13  }
  0x19   : > { %s2050_s18 = smov [#allocation10]   ;;  %s2194_s29 = sadd.s32 1, %s2041_s24  }
  0x1a   : > { %s388_s27 = sshll.u32 %s2050_s18, 4  ;;  %s34_s19 = sadd.s32 1, %s2037_s23  ;;  %s389_s27 = int_to_ptr.vmem [resolvable:$true] %s388_s27 }
  0x1b   : > { %1731 = dma.hbm_to_vmem [thread:$0]  (!%p2166_p7), %s387_s21, 2048, %s389_s27, [#allocation9], %s2048_s28, %s2048_s28, %s2049_s13  }
  0x1c   : > { %s31_s16 = ssub.s32 %s2041_s24, %s2194_s29  ;;  %p41_p8 = scmp.ne.s32.totalorder %s2037_s23, %s2033_s22 }
  0x1d   : > { %p32_p9 = scmp.eq.s32.totalorder %s31_s16, 0  ;;  %p42_p10 = scmp.eq.s32.totalorder %s2041_s24, 0 }
  0x1e   : > { %s405_s17 = sand.u32 1, %s2037_s23   ;;  %p1740_p12 = scmp.lt.s32.totalorder %s2041_s24, 2 }
  0x1f   : > { %s2204_s20 = scalar_select %p32_p9, %s2037_s23, %s34_s19  }
  0x20   : > { %p43_p11 = por %p42_p10, %p41_p8  ;;  %s1488_s3 = sshll.u32 %s405_s17, 4 }
  0x21   : > { %s1662_s14 = sshll.u32 %s2041_s24, 4  ;;  %s409_s28 = scalar_lea.vmem [#allocation3], %s1488_s3 }
  0x22   : > { %s414_s15 = scalar_lea.hbm %s2406_s0, %s1662_s14  ;;  %s417_s13 = sshll.u32 %s409_s28, 4  ;;  %s418_s13 = int_to_ptr.vmem [resolvable:$true] %s417_s13 }
  0x23   : > { %s415_s21 = sshll.u32 %s414_s15, 4  ;;  %p2211_p13 = pnand %p1740_p12, %p43_p11  ;;  %s416_s21 = int_to_ptr.hbm [resolvable:$true] %s415_s21 }
  0x24   : > { %s406_s19 = scalar_lea.sflag [#allocation4], %s405_s17  ;;  %s1969_s16 = sshra.s32 %s416_s21, 4  ;;  %s1970_s16 = int_to_ptr.hbm [resolvable:$true] %s1969_s16 }
  0x25   : > { %s1971_s8 = scalar_lea.hbm %s1970_s16, 16  ;;  %p1973_p2 = pneg %p2211_p13 }
  0x26   : > { %p1972_p0 = scmp.ne.s32.totalorder %s1970_s16, %s1971_s8  ;;  %s1976_s3 = scalar_lea.hbm %s2406_s0, 32 }
  0x27   : > { %p1977_p7 = scmp.lt.s32.totalorder %s1970_s16, %s2406_s0  ;;  %p1978_p8 = scmp.lt.s32.totalorder %s1976_s3, %s1971_s8 }
  0x28   : > { %p1974_p3 = pnand %p1973_p2, %p1972_p0 }
  0x29   : > { %p1979_p9 = por %p1978_p8, %p1977_p7 }
  0x2a   : > { %p1975_p6 = pneg %p1974_p3 }
  0x2c   : > { %p1980_p10 = pnand %p1979_p9, %p1975_p6 }
  0x2e   : > { %1983 = shalt.err (!%p1980_p10)
}
  0x2f   : > { %s2431_s17 = smov 8   ;;  %s2432_s15 = smov 128  }
  0x30   : > { %1735 = dma.hbm_to_vmem [thread:$0]  (!%p2211_p13), %s416_s21, 256, %s418_s13, %s406_s19, %s2432_s15, %s2432_s15, %s2431_s17  }
  0x31   : > { %429 = sbr.rel (%p2158_p5) target bundleno = 2803 (0xaf3), region = 68  ;;  %s431_s28 = sand.u32 (!%p2158_p5), 1, %s2033_s22  }
  0x32   : > { %s1492_s4 = sshll.u32 (!%p2158_p5), %s431_s28, 4  ;;  %s432_s24 = scalar_lea.sflag (!%p2158_p5), [#allocation4], %s431_s28 }
  0x33   : > { %s435_s14 = scalar_lea.vmem (!%p2158_p5), [#allocation3], %s1492_s4 }
  0x36   : > { %2016 = dma.done.wait (%p2151_p4), %s432_s24, 256  }
  0x37   : > { %2018 = vsyncadd (%p2151_p4), %s432_s24, 4294967040 }
  0x38   : > { %2020 = dma.done.wait (%p48_p1), [#allocation6], 1536  }
  0x39   : > { %2022 = vsyncadd (%p48_p1), [#allocation6], 4294965760 }
  0x3a   : > { %2024 = dma.done.wait (%p48_p1), [#allocation9], 3072  }
  0x3b   : > { %2026 = vsyncadd (%p48_p1), [#allocation9], 4294964224  ;;  %vm568_vm0 = vcmask 523264   ;;  %v2243_v0 = vld [vmem:[%s435_s14] sm:$0xff]  ;;  %v2247_v2 = vld [vmem:[%s435_s14 + $0x8] sm:$0xff]  ;;  %v2051_v4 = vmov 64.0  }
  0x3c   : > { %v569_v1 = vsel %vm568_vm0, %v2243_v0, 0.0  ;;  %v572_v3 = vsel %vm568_vm0, %v2247_v2, 0.0  ;;  %1799 = vrcp.f32 %v2051_v4  ;;  %v1525_v21 = vld [vmem:[#allocation5 + $0x30] sm:$0xf]  ;;  %v1671_v22 = vld [vmem:[#allocation5 + $0x34] sm:$0xf0] }
  0x3d   : > { %570 = vadd.xlane.f32.xlu0 %v569_v1  ;;  %v1526_v23 = vor.u32 %v1671_v22, %v1525_v21  ;;  %v1517_v24 = vld [vmem:[#allocation5 + $0x20] sm:$0xf]  ;;  %v1669_v25 = vld [vmem:[#allocation5 + $0x24] sm:$0xf0]  ;;  %v1509_v27 = vld [vmem:[#allocation5 + $0x10] sm:$0xf] }
  0x3e   : > { %v1518_v26 = vor.u32 %v1669_v25, %v1517_v24  ;;  %v1667_v28 = vld [vmem:[#allocation5 + $0x14] sm:$0xf0]  ;;  %v1501_v30 = vld [vmem:[#allocation5] sm:$0xf]  ;;  %v1665_v31 = vld [vmem:[#allocation5 + $0x4] sm:$0xf0] }
  0x3f   : > { %678 = vmatpush.bf16.msra.mxu1 %v1526_v23  ;;  %v1510_v29 = vor.u32 %v1667_v28, %v1509_v27  ;;  %v1502_v33 = vor.u32 %v1665_v31, %v1501_v30  ;;  %v1670_v36 = vld [vmem:[#allocation5 + $0x34] sm:$0xf]  ;;  %v1527_v37 = vld [vmem:[#allocation5 + $0x38] sm:$0xf0]  ;;  %v1668_v39 = vld [vmem:[#allocation5 + $0x24] sm:$0xf] }
  0x40   : > { %v1530_v38 = vor.u32 %v1670_v36, %v1527_v37  ;;  %v1519_v40 = vld [vmem:[#allocation5 + $0x28] sm:$0xf0]  ;;  %v1666_v44 = vld [vmem:[#allocation5 + $0x14] sm:$0xf]  ;;  %v1511_v45 = vld [vmem:[#allocation5 + $0x18] sm:$0xf0] }
  0x41   : > { %v1522_v42 = vor.u32 %v1668_v39, %v1519_v40  ;;  %v1514_v49 = vor.u32 %v1666_v44, %v1511_v45  ;;  %v1664_v50 = vld [vmem:[#allocation5 + $0x4] sm:$0xf]  ;;  %v1503_v51 = vld [vmem:[#allocation5 + $0x8] sm:$0xf0]  ;;  %v1793_v1 = vld [vmem:[%s2407_s1] ss:$0 sm:$0xff] }
  0x42   : > { %v1800_v5 = vpop.eup %1799  ;;  %v1506_v54 = vor.u32 %v1664_v50, %v1503_v51  ;;  %s2052_s13 = smov 64   ;;  %vm711_vm8 = vcmask 130048   ;;  %s2053_s27 = smov 112   ;;  %vm778_vm9 = vcmask 125952   ;;  %vm858_vm10 = vcmask 257152  }
  0x43   : > { %v576_v6 = vmul.f32 64.0, %v1800_v5  ;;  %vm580_vm1 = vweird.f32 %v1800_v5  ;;  %679 = vmatpush.bf16.msra.mxu1 %v1518_v26  ;;  %s2054_s19 = smov 48   ;;  %s2055_s16 = smov 80   ;;  %vm938_vm11 = vcmask 388352   ;;  %vm1018_vm12 = vcmask 519552  }
  0x44   : > { %s2056_s3 = smov 16   ;;  %s2057_s18 = smov 32  }
  0x45   : > { %573 = vadd.xlane.f32.xlu0 %v572_v3  ;;  %v577_v7 = vsub.f32 1.0, %v576_v6  ;;  %s2058_s17 = smov 96   ;;  %p497_p1 = scmp.lt.s32.totalorder %s2143_s25, 1 }
  0x47   : > { %v578_v8 = vmul.f32 %v1800_v5, %v577_v7  ;;  %680 = vmatpush.bf16.msra.mxu1 %v1510_v29  ;;  %v1794_v7 = vld [vmem:[%s2408_s2] ss:$0 sm:$0xff]  ;;  %s2438_s25 = smov (!%p497_p1, %s2143_s25), 1 }
  0x49   : > { %v579_v9 = vadd.f32 %v1800_v5, %v578_v8 }
  0x4b   : > { %v2251_v10 = vsel %vm580_vm1, %v1800_v5, %v579_v9  ;;  %681 = vmatpush.bf16.msra.mxu1 %v1502_v33 }
  0x4f   : > { %692 = vmatpush.bf16.msrb.mxu1 %v1530_v38 }
  0x53   : > { %693 = vmatpush.bf16.msrb.mxu1 %v1522_v42 }
  0x57   : > { %694 = vmatpush.bf16.msrb.mxu1 %v1514_v49 }
  0x5b   : > { %695 = vmatpush.bf16.msrb.mxu1 %v1506_v54 }
  0xb0   : > { %v571_v11 = vpop.xlane.xlu0 %570 }
  0xb1   : > { %v582_v12 = vmul.f32 %v2251_v10, %v571_v11 }
  0xb3   : > { %v2255_v13 = vsub.f32 %v2243_v0, %v582_v12 }
  0xb5   : > { %v586_v14 = vmul.f32 %v2255_v13, %v2255_v13 }
  0xb7   : > { %v588_v15 = vsel %vm568_vm0, %v586_v14, 0.0 }
  0xb8   : > { %589 = vadd.xlane.f32.xlu1 %v588_v15  ;;  %v574_v16 = vpop.xlane.xlu0 %573 }
  0xb9   : > { %v583_v17 = vmul.f32 %v2251_v10, %v574_v16 }
  0xbb   : > { %v2262_v18 = vsub.f32 %v2247_v2, %v583_v17 }
  0xbd   : > { %v587_v19 = vmul.f32 %v2262_v18, %v2262_v18 }
  0xbf   : > { %v591_v20 = vsel %vm568_vm0, %v587_v19, 0.0 }
  0xc0   : > { %592 = vadd.xlane.f32.xlu1 %v591_v20 }
 0x12b   : > { %v590_v32 = vpop.xlane.xlu1 %589 }
 0x12c   : > { %v594_v34 = vmul.f32 %v590_v32, %v2251_v10 }
 0x12e   : > { %v596_v35 = vadd.f32 1e-05, %v594_v34 }
 0x130   : > { %1801 = vrsqrt.f32 %v596_v35  ;;  %vm604_vm3 = vweird.f32 %v596_v35 }
 0x133   : > { %v593_v41 = vpop.xlane.xlu1 %592 }
 0x134   : > { %v595_v43 = vmul.f32 %v593_v41, %v2251_v10 }
 0x136   : > { %v1802_v46 = vpop.eup %1801  ;;  %v597_v47 = vadd.f32 1e-05, %v595_v43 }
 0x137   : > { %v599_v48 = vmul.f32 %v1802_v46, %v596_v35  ;;  %vm605_vm2 = vweird.f32 %v1802_v46 }
 0x138   : > { %1803 = vrsqrt.f32 %v597_v47  ;;  %vm606_vm4 = vmor %vm604_vm3, %vm605_vm2  ;;  %vm614_vm6 = vweird.f32 %v597_v47 }
 0x139   : > { %v600_v52 = vmul.f32 %v1802_v46, %v599_v48 }
 0x13b   : > { %v601_v53 = vmul.f32 0.5, %v600_v52 }
 0x13d   : > { %v602_v55 = vsub.f32 1.5, %v601_v53 }
 0x13e   : > { %v1804_v56 = vpop.eup %1803 }
 0x13f   : > { %v603_v57 = vmul.f32 %v1802_v46, %v602_v55  ;;  %v609_v58 = vmul.f32 %v1804_v56, %v597_v47  ;;  %vm615_vm5 = vweird.f32 %v1804_v56 }
 0x140   : > { %vm616_vm7 = vmor %vm614_vm6, %vm615_vm5 }
 0x141   : > { %v610_v59 = vmul.f32 %v1804_v56, %v609_v58  ;;  %v607_v60 = vsel %vm606_vm4, %v1802_v46, %v603_v57 }
 0x142   : > { %v618_v63 = vmul.f32 %v607_v60, %v2255_v13 }
 0x143   : > { %v611_v61 = vmul.f32 0.5, %v610_v59 }
 0x144   : > { %v623_v6 = vmul.f32 %v1793_v1, %v618_v63 }
 0x145   : > { %v612_v62 = vsub.f32 1.5, %v611_v61 }
 0x146   : > { %v628_v9 = vadd.f32 %v1794_v7, %v623_v6 }
 0x147   : > { %v613_v3 = vmul.f32 %v1804_v56, %v612_v62 }
 0x149   : > { %v617_v4 = vsel %vm616_vm7, %v1804_v56, %v613_v3 }
 0x14a   : > { %v619_v5 = vmul.f32 %v617_v4, %v2262_v18 }
 0x14c   : > { %v624_v8 = vmul.f32 %v1793_v1, %v619_v5 }
 0x14e   : > { %v629_v11 = vadd.f32 %v1794_v7, %v624_v8 }
 0x150   : > { %v630_v12 = vpack.c.bf16 %v629_v11, %v628_v9 }
 0x152   : > { %1531 = vmatmul.msk.bf16.vlgmr.msra.gmra.mxu1 %vm568_vm0, %v630_v12 }
 0x162   : > { %1532 = vmatmul.msk.bf16.vlgmr.msrb.gmra.mxu1 %vm568_vm0, %v630_v12 }
 0x1cf   : > { %v683_v13 = vpop.f32.mrf.mxu1 }
 0x1d7   : > { %v685_v14 = vpop.f32.mrf.mxu1 }
 0x1df   : > { %v697_v15 = vpop.f32.mrf.mxu1 }
 0x1e0   : > { %v702_v16 = vpack.c.bf16 %v697_v15, %v683_v13 }
 0x1e2   : > { %v706_v18 = vunpack.c.l.b16 %v702_v16  ;;  %v755_v20 = vunpack.c.h.b16 %v702_v16 }
 0x1e7   : > { %v699_v17 = vpop.f32.mrf.mxu1 }
 0x1e8   : > { %v703_v19 = vpack.c.bf16 %v699_v17, %v685_v14 }
 0x1ea   : > { %v707_v21 = vunpack.c.l.b16 %v703_v19  ;;  %v756_v22 = vunpack.c.h.b16 %v703_v19 }
 0x1ec   : > { %v2279_v23 = vpack.c.b16 %v707_v21, %v706_v18  ;;  %v2281_v24 = vpack.c.b16 %v756_v22, %v755_v20 }
 0x1ee   : > { %769 = vmatpush.bf16.msra.mxu3 %v2281_v24  ;;  %709 = vrot.lane.b32.xlu2 %v2279_v23, %s2052_s13 }
 0x248   : > { %v710_v25 = vpop.permute.xlu2 %709 }
 0x249   : > { %v716_v26 = vsel %vm711_vm8, %v710_v25, 0 }
 0x24a   : > { %725 = vmatpush.bf16.xpose.msra.mxu2 %v716_v26 }
 0x251   : > { %1533 = vmatmul.msk.bf16.vlgmr.msra.gmra.mxu2 %vm711_vm8, %v2279_v23 }
 0x2d4   : > { %v727_v27 = vpop.f32.mrf.mxu2 }
 0x2d5   : > { %v732_v28 = vsel %vm711_vm8, %v727_v27, -inf }
 0x2d6   : > { %733 = vmax.xlane.f32.xlu2 %v732_v28 }
 0x2dc   : > { %v729_v29 = vpop.f32.mrf.mxu2 }
 0x2dd   : > { %v735_v30 = vsel %vm711_vm8, %v729_v29, -inf }
 0x2de   : > { %736 = vmax.xlane.f32.xlu0 %v735_v30 }
 0x2ee   : > { %828 = vrot.lane.b32.xlu2 %v2281_v24, %s2053_s27 }
 0x349   : > { %v734_v31 = vpop.xlane.xlu2 %733 }
 0x34a   : > { %v738_v32 = vsub.f32 %v727_v27, %v734_v31 }
 0x34c   : > { %v740_v33 = vmul.f32 1.442695, %v738_v32 }
 0x34e   : > { %1805 = vpow2.f32 %v740_v33 }
 0x351   : > { %v737_v34 = vpop.xlane.xlu0 %736  ;;  %v829_v50 = vpop.permute.xlu2 %828 }
 0x352   : > { %v739_v35 = vsub.f32 %v729_v29, %v737_v34 }
 0x354   : > { %v1806_v36 = vpop.eup %1805  ;;  %v742_v37 = vmul.f32 1.442695, %v739_v35 }
 0x355   : > { %v744_v38 = vsel %vm711_vm8, %v1806_v36, 0.0 }
 0x356   : > { %1807 = vpow2.f32 %v742_v37  ;;  %745 = vadd.xlane.f32.xlu1 %v744_v38 }
 0x35c   : > { %v1808_v39 = vpop.eup %1807 }
 0x35d   : > { %v747_v40 = vsel %vm711_vm8, %v1808_v39, 0.0 }
 0x35e   : > { %748 = vadd.xlane.f32.xlu0 %v747_v40 }
 0x36f   : > { %783 = vrot.lane.b32.xlu1 %v2279_v23, %s2054_s19 }
 0x372   : > { %781 = vrot.lane.b32.xlu0 %v2279_v23, %s2053_s27  ;;  %s1663_s27 = sshll.u32 %s2438_s25, 4 }
 0x3c9   : > { %v746_v41 = vpop.xlane.xlu1 %745 }
 0x3ca   : > { %1809 = vrcp.f32 %v746_v41 }
 0x3d0   : > { %v1810_v43 = vpop.eup %1809 }
 0x3d1   : > { %v749_v42 = vpop.xlane.xlu0 %748  ;;  %v752_v45 = vmul.f32 %v1810_v43, %v1806_v36 }
 0x3d2   : > { %1811 = vrcp.f32 %v749_v42 }
 0x3d8   : > { %v1812_v44 = vpop.eup %1811 }
 0x3d9   : > { %v753_v46 = vmul.f32 %v1812_v44, %v1808_v39 }
 0x3db   : > { %v754_v47 = vpack.c.bf16 %v753_v46, %v752_v45 }
 0x3dd   : > { %1534 = vmatmul.msk.bf16.vlgmr.msra.gmra.mxu3 %vm711_vm8, %v754_v47 }
 0x3e1   : > { %v784_v48 = vpop.permute.xlu1 %783 }
 0x3e2   : > { %v789_v49 = vsel %vm711_vm8, %v784_v48, 0 }
 0x3e3   : > { %798 = vmatpush.bf16.xpose.msrb.mxu3 %v789_v49 }
 0x3e4   : > { %v782_v51 = vpop.permute.xlu0 %781 }
 0x3eb   : > { %841 = vmatpush.bf16.msra.mxu3 %v829_v50 }
 0x3ed   : > { %1535 = vmatmul.msk.bf16.vlgmr.msrb.gmra.mxu3 %vm711_vm8, %v782_v51 }
 0x460   : > { %v771_v52 = vpop.f32.mrf.mxu3 }
 0x461   : > { %v776_v53 = vpack.c.bf16 %v771_v52, %v771_v52 }
 0x463   : > { %779 = vst.msk [vmem:[#allocation2] sm:$0xf] %vm778_vm9, %v776_v53 }
 0x468   : > { %v773_v54 = vpop.f32.mrf.mxu3 }
 0x469   : > { %v777_v55 = vpack.c.bf16 %v773_v54, %v773_v54 }
 0x46b   : > { %780 = vst.msk [vmem:[#allocation2 + $0x4] sm:$0xf] %vm778_vm9, %v777_v55 }
 0x470   : > { %v800_v56 = vpop.f32.mrf.mxu3 }
 0x471   : > { %v805_v57 = vsel %vm711_vm8, %v800_v56, -inf }
 0x472   : > { %806 = vmax.xlane.f32.xlu1 %v805_v57 }
 0x478   : > { %v802_v58 = vpop.f32.mrf.mxu3 }
 0x479   : > { %v808_v59 = vsel %vm711_vm8, %v802_v58, -inf }
 0x47a   : > { %809 = vmax.xlane.f32.xlu2 %v808_v59 }
 0x48b   : > { %941 = vrot.lane.b32.xlu1 %v2279_v23, %s2055_s16 }
 0x492   : > { %943 = vrot.lane.b32.xlu2 %v2279_v23, %s2056_s3 }
 0x4e5   : > { %v807_v60 = vpop.xlane.xlu1 %806 }
 0x4e6   : > { %v811_v61 = vsub.f32 %v800_v56, %v807_v60 }
 0x4e8   : > { %v813_v62 = vmul.f32 1.442695, %v811_v61 }
 0x4ea   : > { %1813 = vpow2.f32 %v813_v62 }
 0x4ed   : > { %v810_v63 = vpop.xlane.xlu2 %809 }
 0x4ee   : > { %v812_v1 = vsub.f32 %v802_v58, %v810_v63 }
 0x4f0   : > { %v1814_v3 = vpop.eup %1813  ;;  %v815_v4 = vmul.f32 1.442695, %v812_v1 }
 0x4f1   : > { %v817_v5 = vsel %vm711_vm8, %v1814_v3, 0.0 }
 0x4f2   : > { %1815 = vpow2.f32 %v815_v4  ;;  %818 = vadd.xlane.f32.xlu0 %v817_v5 }
 0x4f5   : > { %v944_v6 = vpop.permute.xlu2 %943 }
 0x4f6   : > { %v949_v7 = vsel %vm711_vm8, %v944_v6, 0 }
 0x4f7   : > { %958 = vmatpush.bf16.xpose.msrb.mxu3 %v949_v7 }
 0x4f8   : > { %v1816_v8 = vpop.eup %1815 }
 0x4f9   : > { %v820_v9 = vsel %vm711_vm8, %v1816_v8, 0.0 }
 0x4fa   : > { %821 = vadd.xlane.f32.xlu2 %v820_v9 }
 0x4fd   : > { %v942_v21 = vpop.permute.xlu1 %941 }
 0x506   : > { %863 = vrot.lane.b32.xlu0 %v2279_v23, %s2057_s18 }
 0x512   : > { %861 = vrot.lane.b32.xlu2 %v2279_v23, %s2058_s17 }
 0x565   : > { %v819_v11 = vpop.xlane.xlu0 %818 }
 0x566   : > { %1817 = vrcp.f32 %v819_v11 }
 0x56c   : > { %v1818_v13 = vpop.eup %1817 }
 0x56d   : > { %v822_v12 = vpop.xlane.xlu2 %821  ;;  %v825_v15 = vmul.f32 %v1818_v13, %v1814_v3 }
 0x56e   : > { %1819 = vrcp.f32 %v822_v12 }
 0x574   : > { %v1820_v14 = vpop.eup %1819 }
 0x575   : > { %v826_v16 = vmul.f32 %v1820_v14, %v1816_v8  ;;  %v862_v20 = vpop.permute.xlu2 %861 }
 0x577   : > { %v827_v17 = vpack.c.bf16 %v826_v16, %v825_v15 }
 0x578   : > { %v864_v19 = vpop.permute.xlu0 %863 }
 0x579   : > { %1536 = vmatmul.msk.bf16.vlgmr.msra.gmra.mxu3 %vm711_vm8, %v827_v17  ;;  %v869_v18 = vsel %vm711_vm8, %v864_v19, 0 }
 0x57a   : > { %878 = vmatpush.bf16.xpose.msra.mxu0 %v869_v18  ;;  %v1675_v18 = vld [vmem:[#allocation7 + $0x18] sm:$0xff] }
 0x581   : > { %1537 = vmatmul.msk.bf16.vlgmr.msra.gmra.mxu0 %vm711_vm8, %v862_v20  ;;  %v1674_v20 = vld [vmem:[#allocation7 + $0x10] sm:$0xff] }
 0x582   : > { %1059 = vmatpush.bf16.msrb.mxu0 %v1675_v18 }
 0x586   : > { %1060 = vmatpush.bf16.msrb.mxu0 %v1674_v20 }
 0x589   : > { %1539 = vmatmul.msk.bf16.vlgmr.msrb.gmra.mxu3 %vm711_vm8, %v942_v21  ;;  %v1673_v21 = vld [vmem:[#allocation7 + $0x8] sm:$0xff] }
 0x58a   : > { %1061 = vmatpush.bf16.msrb.mxu0 %v1673_v21 }
 0x5fc   : > { %v843_v22 = vpop.f32.mrf.mxu3 }
 0x5fd   : > { %v848_v53 = vpack.c.bf16 %v843_v22, %v843_v22  ;;  %v1672_v22 = vld [vmem:[#allocation7] sm:$0xff] }
 0x5fe   : > { %v880_v23 = vpop.f32.mrf.mxu0  ;;  %1062 = vmatpush.bf16.msrb.mxu0 %v1672_v22 }
 0x5ff   : > { %v885_v25 = vsel %vm711_vm8, %v880_v23, -inf }
 0x600   : > { %886 = vmax.xlane.f32.xlu1 %v885_v25 }
 0x604   : > { %v845_v26 = vpop.f32.mrf.mxu3 }
 0x605   : > { %v849_v54 = vpack.c.bf16 %v845_v26, %v845_v26 }
 0x606   : > { %v882_v29 = vpop.f32.mrf.mxu0 }
 0x607   : > { %v888_v32 = vsel %vm711_vm8, %v882_v29, -inf }
 0x60c   : > { %v960_v27 = vpop.f32.mrf.mxu3 }
 0x60d   : > { %v965_v28 = vsel %vm711_vm8, %v960_v27, -inf }
 0x60e   : > { %966 = vmax.xlane.f32.xlu2 %v965_v28 }
 0x614   : > { %v962_v30 = vpop.f32.mrf.mxu3 }
 0x615   : > { %v968_v31 = vsel %vm711_vm8, %v962_v30, -inf }
 0x616   : > { %969 = vmax.xlane.f32.xlu0 %v968_v31  ;;  %889 = vmax.xlane.f32.xlu2 %v888_v32 }
 0x673   : > { %v887_v33 = vpop.xlane.xlu1 %886 }
 0x674   : > { %v891_v34 = vsub.f32 %v880_v23, %v887_v33 }
 0x676   : > { %v893_v35 = vmul.f32 1.442695, %v891_v34 }
 0x678   : > { %1821 = vpow2.f32 %v893_v35 }
 0x67e   : > { %v1822_v36 = vpop.eup %1821 }
 0x67f   : > { %v897_v37 = vsel %vm711_vm8, %v1822_v36, 0.0 }
 0x680   : > { %898 = vadd.xlane.f32.xlu1 %v897_v37 }
 0x681   : > { %v967_v38 = vpop.xlane.xlu2 %966 }
 0x682   : > { %v971_v39 = vsub.f32 %v960_v27, %v967_v38 }
 0x684   : > { %v973_v40 = vmul.f32 1.442695, %v971_v39 }
 0x686   : > { %1823 = vpow2.f32 %v973_v40 }
 0x689   : > { %v970_v41 = vpop.xlane.xlu0 %969  ;;  %v890_v42 = vpop.xlane.xlu2 %889 }
 0x68a   : > { %v972_v43 = vsub.f32 %v962_v30, %v970_v41  ;;  %v892_v44 = vsub.f32 %v882_v29, %v890_v42  ;;  %v1795_v29 = vld [vmem:[%s2411_s5] ss:$0 sm:$0xff] }
 0x68c   : > { %v1824_v45 = vpop.eup %1823  ;;  %v975_v46 = vmul.f32 1.442695, %v972_v43  ;;  %v895_v47 = vmul.f32 1.442695, %v892_v44 }
 0x68d   : > { %v977_v48 = vsel %vm711_vm8, %v1824_v45, 0.0 }
 0x68e   : > { %1825 = vpow2.f32 %v975_v46  ;;  %978 = vadd.xlane.f32.xlu2 %v977_v48  ;;  %v1588_v46 = vld [vmem:[#allocation8 + $0x30] sm:$0xf]  ;;  %v1682_v48 = vld [vmem:[#allocation8 + $0x34] sm:$0xf] }
 0x68f   : > { %1827 = vpow2.f32 %v895_v47  ;;  %v1683_v47 = vld [vmem:[#allocation8 + $0x34] sm:$0xf0] }
 0x694   : > { %v1826_v49 = vpop.eup %1825 }
 0x695   : > { %v1828_v50 = vpop.eup %1827  ;;  %v980_v51 = vsel %vm711_vm8, %v1826_v49, 0.0 }
 0x696   : > { %981 = vadd.xlane.f32.xlu0 %v980_v51  ;;  %v900_v52 = vsel %vm711_vm8, %v1828_v50, 0.0 }
 0x697   : > { %901 = vadd.xlane.f32.xlu2 %v900_v52  ;;  %v1580_v52 = vld [vmem:[#allocation8 + $0x20] sm:$0xf] }
 0x699   : > { %908 = vrot.lane.b32.xlu1 %v2281_v24, %s2058_s17 }
 0x6aa   : > { %988 = vrot.lane.b32.xlu0 %v2281_v24, %s2055_s16 }
 0x6af   : > { %852 = vrot.lane.b32.xlu2 %v848_v53, %s2056_s3  ;;  %v1681_v53 = vld [vmem:[#allocation8 + $0x24] sm:$0xf0] }
 0x6b2   : > { %854 = vrot.lane.b32.xlu0 %v849_v54, %s2056_s3  ;;  %v1680_v54 = vld [vmem:[#allocation8 + $0x24] sm:$0xf]  ;;  %s501_s3 = scalar_lea.vmem %s2418_s12, %s1663_s27 }
 0x6f3   : > { %v899_v56 = vpop.xlane.xlu1 %898 }
 0x6f4   : > { %1829 = vrcp.f32 %v899_v56  ;;  %v1582_v56 = vld [vmem:[#allocation8 + $0x28] sm:$0xf0] }
 0x6fa   : > { %v1830_v60 = vpop.eup %1829 }
 0x6fb   : > { %v905_v62 = vmul.f32 %v1830_v60, %v1822_v36  ;;  %v1678_v60 = vld [vmem:[#allocation8 + $0x14] sm:$0xf] }
 0x701   : > { %v979_v55 = vpop.xlane.xlu2 %978 }
 0x709   : > { %v982_v59 = vpop.xlane.xlu0 %981 }
 0x70a   : > { %v902_v57 = vpop.xlane.xlu2 %901 }
 0x70b   : > { %1831 = vrcp.f32 %v902_v57  ;;  %v909_v58 = vpop.permute.xlu1 %908  ;;  %v1585_v57 = vor.u32 %v1680_v54, %v1582_v56  ;;  %v1692_v56 = vld [vmem:[#allocation10 + $0x40] sm:$0xff] }
 0x70c   : > { %921 = vmatpush.bf16.msra.mxu1 %v909_v58  ;;  %1833 = vrcp.f32 %v982_v59  ;;  %v1572_v58 = vld [vmem:[#allocation8 + $0x10] sm:$0xf]  ;;  %v1679_v59 = vld [vmem:[#allocation8 + $0x14] sm:$0xf0] }
 0x70d   : > { %1835 = vrcp.f32 %v979_v55  ;;  %v1581_v55 = vor.u32 %v1681_v53, %v1580_v52  ;;  %v1693_v53 = vld [vmem:[#allocation10 + $0x48] sm:$0xff] }
 0x711   : > { %v1832_v61 = vpop.eup %1831 }
 0x712   : > { %v906_v24 = vmul.f32 %v1832_v61, %v1828_v50  ;;  %v853_v63 = vpop.permute.xlu2 %852  ;;  %v1834_v3 = vpop.eup %1833  ;;  %v1590_v50 = vld [vmem:[#allocation8 + $0x38] sm:$0xf0]  ;;  %v1573_v61 = vor.u32 %v1679_v59, %v1572_v58 }
 0x713   : > { %859 = vst.msk [vmem:[#allocation2] sm:$0xf] %vm858_vm10, %v853_v63  ;;  %v1836_v4 = vpop.eup %1835  ;;  %v986_v5 = vmul.f32 %v1834_v3, %v1826_v49  ;;  %v1589_v49 = vor.u32 %v1683_v47, %v1588_v46  ;;  %v1593_v51 = vor.u32 %v1682_v48, %v1590_v50  ;;  %v1564_v3 = vld [vmem:[#allocation8] sm:$0xf]  ;;  %v1686_v46 = vld [vmem:[#allocation10 + $0x10] sm:$0xff]  ;;  %v1695_v47 = vld [vmem:[#allocation10 + $0x58] sm:$0xff] }
 0x714   : > { %v907_v1 = vpack.c.bf16 %v906_v24, %v905_v62  ;;  %v985_v6 = vmul.f32 %v1836_v4, %v1824_v45  ;;  %v1574_v62 = vld [vmem:[#allocation8 + $0x18] sm:$0xf0]  ;;  %v1677_v4 = vld [vmem:[#allocation8 + $0x4] sm:$0xf0]  ;;  %v1694_v50 = vld [vmem:[#allocation10 + $0x50] sm:$0xff] }
 0x715   : > { %1183 = vmatpush.bf16.msrb.mxu1 %v1589_v49  ;;  %1197 = vmatpush.bf16.msra.mxu3 %v1593_v51  ;;  %v1577_v63 = vor.u32 %v1678_v60, %v1574_v62  ;;  %v1685_v48 = vld [vmem:[#allocation10 + $0x8] sm:$0xff]  ;;  %v534_v49 = vld [vmem:[%s2415_s9] sm:$0x3]  ;;  %v1684_v51 = vld [vmem:[#allocation10] sm:$0xff] }
 0x716   : > { %1538 = vmatmul.msk.bf16.vlgmr.msra.gmra.mxu1 %vm711_vm8, %v907_v1  ;;  %v987_v8 = vpack.c.bf16 %v986_v5, %v985_v6  ;;  %v1676_v5 = vld [vmem:[#allocation8 + $0x4] sm:$0xf]  ;;  %v1132_v52 = vperm.slane %v534_v49, 0  ;;  %v1133_v58 = vperm.slane %v534_v49, 1 }
 0x719   : > { %1184 = vmatpush.bf16.msrb.mxu1 %v1581_v55  ;;  %1198 = vmatpush.bf16.msra.mxu3 %v1585_v57 }
 0x71c   : > { %v989_v7 = vpop.permute.xlu0 %988 }
 0x71d   : > { %1001 = vmatpush.bf16.msrb.mxu2 %v989_v7  ;;  %1185 = vmatpush.bf16.msrb.mxu1 %v1573_v61  ;;  %v1565_v7 = vor.u32 %v1677_v4, %v1564_v3 }
 0x71e   : > { %1199 = vmatpush.bf16.msra.mxu3 %v1577_v63 }
 0x720   : > { %1540 = vmatmul.msk.bf16.vlgmr.msrb.gmra.mxu2 %vm711_vm8, %v987_v8  ;;  %v1566_v8 = vld [vmem:[#allocation8 + $0x8] sm:$0xf0] }
 0x721   : > { %1186 = vmatpush.bf16.msrb.mxu1 %v1565_v7 }
 0x724   : > { %v855_v9 = vpop.permute.xlu0 %854 }
 0x725   : > { %860 = vst.msk [vmem:[#allocation2 + $0x4] sm:$0xf] %vm858_vm10, %v855_v9  ;;  %v1569_v9 = vor.u32 %v1676_v5, %v1566_v8 }
 0x727   : > { %1200 = vmatpush.bf16.msra.mxu3 %v1569_v9 }
 0x793   : > { %v923_v11 = vpop.f32.mrf.mxu1 }
 0x794   : > { %v928_v12 = vpack.c.bf16 %v923_v11, %v923_v11 }
 0x796   : > { %932 = vrot.lane.b32.xlu1 %v928_v12, %s2057_s18 }
 0x79b   : > { %v925_v13 = vpop.f32.mrf.mxu1 }
 0x79c   : > { %v929_v14 = vpack.c.bf16 %v925_v13, %v925_v13 }
 0x79e   : > { %934 = vrot.lane.b32.xlu0 %v929_v14, %s2057_s18 }
 0x7a3   : > { %v1003_v15 = vpop.f32.mrf.mxu2 }
 0x7a4   : > { %v1008_v16 = vpack.c.bf16 %v1003_v15, %v1003_v15 }
 0x7a6   : > { %1012 = vrot.lane.b32.xlu2 %v1008_v16, %s2054_s19 }
 0x7ab   : > { %v1005_v17 = vpop.f32.mrf.mxu2 }
 0x7ac   : > { %v1009_v19 = vpack.c.bf16 %v1005_v17, %v1005_v17 }
 0x7ae   : > { %1014 = vrot.lane.b32.xlu1 %v1009_v19, %s2054_s19 }
 0x800   : > { %v1013_v25 = vpop.permute.xlu2 %1012 }
 0x808   : > { %v933_v23 = vpop.permute.xlu1 %932 }
 0x809   : > { %939 = vst.msk [vmem:[#allocation2] sm:$0xf] %vm938_vm11, %v933_v23 }
 0x80a   : > { %1019 = vst.msk [vmem:[#allocation2] sm:$0xf] %vm1018_vm12, %v1013_v25 }
 0x810   : > { %v935_v26 = vpop.permute.xlu0 %934 }
 0x811   : > { %940 = vst.msk [vmem:[#allocation2 + $0x4] sm:$0xf] %vm938_vm11, %v935_v26 }
 0x820   : > { %v1015_v27 = vpop.permute.xlu1 %1014 }
 0x821   : > { %1020 = vst.msk [vmem:[#allocation2 + $0x4] sm:$0xf] %vm1018_vm12, %v1015_v27 }
 0x828   : > { %v1700_v28 = vld [vmem:[#allocation2] sm:$0xff] }
 0x829   : > { %1561 = vmatmul.msk.bf16.vlgmr.msrb.gmra.mxu0 %vm568_vm0, %v1700_v28 }
 0x8a6   : > { %v1064_v30 = vpop.f32.mrf.mxu0 }
 0x8a7   : > { %v1069_v31 = vadd.f32 %v1064_v30, %v2243_v0  ;;  %v1797_v30 = vld [vmem:[%s2413_s7] ss:$0 sm:$0xff] }
 0x8a9   : > { %v2343_v32 = vadd.f32 %v1795_v29, %v1069_v31 }
 0x8ab   : > { %v1076_v33 = vsel %vm568_vm0, %v2343_v32, 0.0 }
 0x8ac   : > { %1077 = vadd.xlane.f32.xlu0 %v1076_v33 }
 0x8ae   : > { %v1066_v34 = vpop.f32.mrf.mxu0 }
 0x8af   : > { %v1070_v35 = vadd.f32 %v1066_v34, %v2247_v2 }
 0x8b1   : > { %v2348_v36 = vadd.f32 %v1795_v29, %v1070_v35 }
 0x8b3   : > { %v1079_v37 = vsel %vm568_vm0, %v2348_v36, 0.0 }
 0x8b4   : > { %1080 = vadd.xlane.f32.xlu2 %v1079_v37 }
 0x91f   : > { %v1078_v38 = vpop.xlane.xlu0 %1077 }
 0x920   : > { %v1082_v39 = vmul.f32 %v1078_v38, %v2251_v10 }
 0x922   : > { %v2354_v0 = vsub.f32 %v2343_v32, %v1082_v39  ;;  %v1691_v39 = vld [vmem:[#allocation10 + $0x38] sm:$0xff] }
 0x923   : > { %1344 = vmatpush.bf16.msra.mxu2 %v1691_v39 }
 0x924   : > { %v1086_v40 = vmul.f32 %v2354_v0, %v2354_v0 }
 0x926   : > { %v1088_v41 = vsel %vm568_vm0, %v1086_v40, 0.0  ;;  %v1699_v40 = vld [vmem:[#allocation10 + $0x78] sm:$0xff] }
 0x927   : > { %1089 = vadd.xlane.f32.xlu1 %v1088_v41  ;;  %v1081_v42 = vpop.xlane.xlu2 %1080  ;;  %1358 = vmatpush.bf16.msra.mxu0 %v1699_v40  ;;  %v1689_v41 = vld [vmem:[#allocation10 + $0x28] sm:$0xff] }
 0x928   : > { %v1083_v2 = vmul.f32 %v1081_v42, %v2251_v10  ;;  %v1698_v42 = vld [vmem:[#allocation10 + $0x70] sm:$0xff] }
 0x92a   : > { %v2361_v43 = vsub.f32 %v2348_v36, %v1083_v2  ;;  %v1688_v2 = vld [vmem:[#allocation10 + $0x20] sm:$0xff] }
 0x92b   : > { %1359 = vmatpush.bf16.msra.mxu0 %v1698_v42 }
 0x92c   : > { %v1087_v44 = vmul.f32 %v2361_v43, %v2361_v43 }
 0x92e   : > { %v1091_v45 = vsel %vm568_vm0, %v1087_v44, 0.0  ;;  %v1687_v44 = vld [vmem:[#allocation10 + $0x18] sm:$0xff] }
 0x92f   : > { %1092 = vadd.xlane.f32.xlu0 %v1091_v45  ;;  %v1696_v45 = vld [vmem:[#allocation10 + $0x60] sm:$0xff] }
 0x99a   : > { %v1090_v24 = vpop.xlane.xlu1 %1089 }
 0x99b   : > { %v1094_v1 = vmul.f32 %v1090_v24, %v2251_v10 }
 0x99d   : > { %v1096_v6 = vadd.f32 1e-05, %v1094_v1 }
 0x99f   : > { %1837 = vrsqrt.f32 %v1096_v6  ;;  %vm1104_vm14 = vweird.f32 %v1096_v6 }
 0x9a2   : > { %v1093_v11 = vpop.xlane.xlu0 %1092 }
 0x9a3   : > { %v1095_v12 = vmul.f32 %v1093_v11, %v2251_v10  ;;  %v1796_v10 = vld [vmem:[%s2412_s6] ss:$0 sm:$0xff] }
 0x9a5   : > { %v1838_v13 = vpop.eup %1837  ;;  %v1097_v14 = vadd.f32 1e-05, %v1095_v12 }
 0x9a6   : > { %v1099_v15 = vmul.f32 %v1838_v13, %v1096_v6  ;;  %vm1105_vm13 = vweird.f32 %v1838_v13 }
 0x9a7   : > { %1839 = vrsqrt.f32 %v1097_v14  ;;  %vm1106_vm15 = vmor %vm1104_vm14, %vm1105_vm13  ;;  %vm1114_vm2 = vweird.f32 %v1097_v14 }
 0x9a8   : > { %v1100_v16 = vmul.f32 %v1838_v13, %v1099_v15 }
 0x9aa   : > { %v1101_v17 = vmul.f32 0.5, %v1100_v16 }
 0x9ac   : > { %v1102_v19 = vsub.f32 1.5, %v1101_v17 }
 0x9ad   : > { %v1840_v18 = vpop.eup %1839 }
 0x9ae   : > { %v1103_v20 = vmul.f32 %v1838_v13, %v1102_v19  ;;  %v1109_v21 = vmul.f32 %v1840_v18, %v1097_v14  ;;  %vm1115_vm1 = vweird.f32 %v1840_v18 }
 0x9af   : > { %vm1116_vm3 = vmor %vm1114_vm2, %vm1115_vm1 }
 0x9b0   : > { %v1110_v22 = vmul.f32 %v1840_v18, %v1109_v21  ;;  %v1107_v23 = vsel %vm1106_vm15, %v1838_v13, %v1103_v20 }
 0x9b1   : > { %v1118_v27 = vmul.f32 %v1107_v23, %v2354_v0  ;;  %v1690_v0 = vld [vmem:[#allocation10 + $0x30] sm:$0xff] }
 0x9b2   : > { %v1111_v25 = vmul.f32 0.5, %v1110_v22  ;;  %1345 = vmatpush.bf16.msra.mxu2 %v1690_v0 }
 0x9b3   : > { %v1123_v31 = vmul.f32 %v1796_v10, %v1118_v27 }
 0x9b4   : > { %v1112_v26 = vsub.f32 1.5, %v1111_v25 }
 0x9b5   : > { %v1128_v35 = vadd.f32 %v1797_v30, %v1123_v31 }
 0x9b6   : > { %v1113_v28 = vmul.f32 %v1840_v18, %v1112_v26  ;;  %1346 = vmatpush.bf16.msra.mxu2 %v1689_v41  ;;  %v1798_v41 = vld [vmem:[%s2417_s11] ss:$0 sm:$0xff] }
 0x9b8   : > { %v1117_v29 = vsel %vm1116_vm3, %v1840_v18, %v1113_v28 }
 0x9b9   : > { %v1119_v33 = vmul.f32 %v1117_v29, %v2361_v43  ;;  %v1697_v43 = vld [vmem:[#allocation10 + $0x68] sm:$0xff] }
 0x9ba   : > { %1347 = vmatpush.bf16.msra.mxu2 %v1688_v2  ;;  %1360 = vmatpush.bf16.msra.mxu0 %v1697_v43 }
 0x9bb   : > { %v1124_v34 = vmul.f32 %v1796_v10, %v1119_v33 }
 0x9bd   : > { %v1129_v37 = vadd.f32 %v1797_v30, %v1124_v34 }
 0x9be   : > { %1348 = vmatpush.bf16.msra.mxu2 %v1687_v44  ;;  %1361 = vmatpush.bf16.msra.mxu0 %v1696_v45 }
 0x9bf   : > { %v1130_v38 = vpack.c.bf16 %v1129_v37, %v1128_v35 }
 0x9c1   : > { %1594 = vmatmul.msk.bf16.vlgmr.msrb.gmra.mxu1 %vm568_vm0, %v1130_v38  ;;  %1595 = vmatmul.msk.bf16.vlgmr.msra.gmra.mxu3 %vm568_vm0, %v1130_v38 }
 0x9c2   : > { %1349 = vmatpush.bf16.msra.mxu2 %v1686_v46  ;;  %1362 = vmatpush.bf16.msra.mxu0 %v1695_v47 }
 0x9c6   : > { %1350 = vmatpush.bf16.msra.mxu2 %v1685_v48  ;;  %1363 = vmatpush.bf16.msra.mxu0 %v1694_v50 }
 0x9ca   : > { %1351 = vmatpush.bf16.msra.mxu2 %v1684_v51  ;;  %1364 = vmatpush.bf16.msra.mxu0 %v1693_v53 }
 0x9ce   : > { %1365 = vmatpush.bf16.msra.mxu0 %v1692_v56 }
 0xa3e   : > { %v1188_v54 = vpop.f32.mrf.mxu1 }
 0xa3f   : > { %v1189_v55 = vadd.f32 %v1188_v54, %v1132_v52 }
 0xa41   : > { %v1211_v57 = vmul.f32 0.044715, %v1189_v55  ;;  %v1207_v26 = vmul.f32 0.5, %v1189_v55 }
 0xa43   : > { %v1215_v59 = vmul.f32 %v1211_v57, %v1189_v55 }
 0xa44   : > { %v1202_v60 = vpop.f32.mrf.mxu3 }
 0xa45   : > { %v1219_v61 = vmul.f32 %v1215_v59, %v1189_v55  ;;  %v1203_v62 = vadd.f32 %v1202_v60, %v1133_v58 }
 0xa46   : > { %v1190_v24 = vpop.f32.mrf.mxu1 }
 0xa47   : > { %v1223_v63 = vadd.f32 %v1219_v61, %v1189_v55  ;;  %v1212_v1 = vmul.f32 0.044715, %v1203_v62  ;;  %v1191_v3 = vadd.f32 %v1190_v24, %v1132_v52  ;;  %v1208_v35 = vmul.f32 0.5, %v1203_v62 }
 0xa49   : > { %v1216_v4 = vmul.f32 %v1212_v1, %v1203_v62  ;;  %v1213_v5 = vmul.f32 0.044715, %v1191_v3  ;;  %v1227_v6 = vmul.f32 0.7978846, %v1223_v63  ;;  %v1209_v10 = vmul.f32 0.5, %v1191_v3 }
 0xa4b   : > { %v1220_v7 = vmul.f32 %v1216_v4, %v1203_v62  ;;  %v1217_v8 = vmul.f32 %v1213_v5, %v1191_v3  ;;  %1841 = vtanh.f32 %v1227_v6 }
 0xa4c   : > { %v1204_v9 = vpop.f32.mrf.mxu3 }
 0xa4d   : > { %v1224_v11 = vadd.f32 %v1220_v7, %v1203_v62  ;;  %v1221_v12 = vmul.f32 %v1217_v8, %v1191_v3  ;;  %v1205_v13 = vadd.f32 %v1204_v9, %v1133_v58 }
 0xa4f   : > { %v1225_v14 = vadd.f32 %v1221_v12, %v1191_v3  ;;  %v1214_v15 = vmul.f32 0.044715, %v1205_v13  ;;  %v1228_v16 = vmul.f32 0.7978846, %v1224_v11  ;;  %v1210_v37 = vmul.f32 0.5, %v1205_v13 }
 0xa51   : > { %v1229_v17 = vmul.f32 0.7978846, %v1225_v14  ;;  %v1218_v19 = vmul.f32 %v1214_v15, %v1205_v13  ;;  %v1842_v20 = vpop.eup %1841 }
 0xa52   : > { %v1235_v23 = vadd.f32 1.0, %v1842_v20 }
 0xa53   : > { %v1222_v18 = vmul.f32 %v1218_v19, %v1205_v13  ;;  %1843 = vtanh.f32 %v1229_v17 }
 0xa54   : > { %1845 = vtanh.f32 %v1228_v16  ;;  %v1239_v29 = vmul.f32 %v1235_v23, %v1207_v26 }
 0xa55   : > { %v1226_v21 = vadd.f32 %v1222_v18, %v1205_v13 }
 0xa57   : > { %v1230_v22 = vmul.f32 0.7978846, %v1226_v21 }
 0xa59   : > { %v1844_v25 = vpop.eup %1843  ;;  %1847 = vtanh.f32 %v1230_v22 }
 0xa5a   : > { %v1237_v27 = vadd.f32 1.0, %v1844_v25  ;;  %v1846_v28 = vpop.eup %1845 }
 0xa5b   : > { %v1236_v33 = vadd.f32 1.0, %v1846_v28 }
 0xa5c   : > { %v1241_v30 = vmul.f32 %v1237_v27, %v1209_v10 }
 0xa5d   : > { %v1240_v39 = vmul.f32 %v1236_v33, %v1208_v35 }
 0xa5e   : > { %v1243_v31 = vpack.c.bf16 %v1241_v30, %v1239_v29 }
 0xa5f   : > { %v1848_v34 = vpop.eup %1847 }
 0xa60   : > { %1352 = vmatmul.bf16.vlgmr.msra.gmra.mxu2 %v1243_v31  ;;  %v1238_v38 = vadd.f32 1.0, %v1848_v34 }
 0xa62   : > { %v1242_v0 = vmul.f32 %v1238_v38, %v1210_v37 }
 0xa64   : > { %v1244_v40 = vpack.c.bf16 %v1242_v0, %v1240_v39 }
 0xa66   : > { %1366 = vmatmul.bf16.vlgmr.msra.gmra.mxu0 %v1244_v40 }
 0xae3   : > { %v1353_v42 = vpop.f32.mrf.mxu2  ;;  %v1367_v2 = vpop.f32.mrf.mxu0 }
 0xae4   : > { %v1354_v43 = vadd.f32 %v1798_v41, %v1353_v42 }
 0xae6   : > { %v1368_v44 = vadd.f32 %v1367_v2, %v1354_v43 }
 0xae8   : > { %v1372_v45 = vadd.f32 %v1368_v44, %v2343_v32 }
 0xaea   : > { %1374 = vst.msk [vmem:[%s501_s3] sm:$0xff] %vm568_vm0, %v1372_v45 }
 0xaeb   : > { %v1355_v46 = vpop.f32.mrf.mxu2  ;;  %v1369_v48 = vpop.f32.mrf.mxu0 }
 0xaec   : > { %v1356_v47 = vadd.f32 %v1798_v41, %v1355_v46 }
 0xaee   : > { %v1370_v49 = vadd.f32 %v1369_v48, %v1356_v47 }
 0xaf0   : > { %v1373_v50 = vadd.f32 %v1370_v49, %v2348_v36 }
 0xaf2   : > { %1375 = vst.msk [vmem:[%s501_s3 + $0x8] sm:$0xff] %vm568_vm0, %v1373_v50 }
 0xaf3 PF: > { %p24_p4 = scmp.ge.s32.totalorder %s2194_s29, 4   ;;  %s2433_s21 = smov %s2033_s22 }
 0xaf4   : > { %s2434_s22 = smov %s2037_s23  ;;  %s2435_s23 = smov %s2204_s20 }
 0xaf5   : > { %s2436_s24 = smov %s2194_s29  ;;  %26 = sbr.rel (!%p24_p4) target bundleno = 9 (0x9), region = 124 }
 0xafa   :  { %1397 = vsyncpa [#allocation4], 1 }
 0xafb   :  { %1399 = vsyncpa [#allocation4 + $0x1], 1 }
 0xafc   :  { %1400 = vsyncpa [#allocation6], 1 }
 0xafd   :  { %1401 = vsyncpa [#allocation9], 1 }

// kernel: _lambda_.6
= control target key start
LH: loop header
LB: loop body
LE: loop exit
PB: predicated region body
PF: predicated region fallthrough
CT: control target
= control target key end

     0   :  { %17 = vsyncpa [#allocation4], 0  ;;  %s2150_s0 = inlined_call_operand.vmem [shape: f32[2,16,64], index: 0, kind: input, shape index: {}]   ;;  %s2151_s1 = inlined_call_operand.vmem [shape: f32[1,64], index: 1, kind: input, shape index: {}, may-alias: {1,6}]   ;;  %s2152_s2 = inlined_call_operand.vmem [shape: f32[1,64], index: 2, kind: input, shape index: {}, may-alias: {2,5,7,11}]   ;;  %s2153_s3 = inlined_call_operand.hbm [shape: bf16[64,192], index: 3, kind: input, shape index: {}]   ;;  %s2154_s4 = inlined_call_operand.hbm [shape: bf16[64,64], index: 4, kind: input, shape index: {}]   ;;  %s2155_s5 = inlined_call_operand.vmem [shape: f32[1,64], index: 5, kind: input, shape index: {}, may-alias: {2,5,7,11}]   ;;  %s2156_s6 = inlined_call_operand.vmem [shape: f32[1,64], index: 6, kind: input, shape index: {}, may-alias: {1,6}]   ;;  %s2157_s7 = inlined_call_operand.vmem [shape: f32[1,64], index: 7, kind: input, shape index: {}, may-alias: {2,5,7,11}]   ;;  %s2158_s8 = inlined_call_operand.vmem [shape: bf16[64,256], index: 8, kind: input, shape index: {}]   ;;  %s2159_s9 = inlined_call_operand.vmem [shape: f32[1,256], index: 9, kind: input, shape index: {}]   ;;  %s2160_s10 = inlined_call_operand.vmem [shape: bf16[256,64], index: 10, kind: input, shape index: {}]   ;;  %s2161_s11 = inlined_call_operand.vmem [shape: f32[1,64], index: 11, kind: input, shape index: {}, may-alias: {2,5,7,11}]   ;;  %s2162_s12 = inlined_call_operand.vmem [shape: f32[2,16,64], index: 12, kind: output, shape index: {}]  }
   0x1   :  { %18 = vsyncpa [#allocation6], 0  ;;  %s1866_s21 = smov 0  }
   0x2 LB: > { %s329_s24 = sshll.u32 %s2153_s3, 4  ;;  %s1399_s25 = sadd.s32 4294967295, %s1785_s21   ;;  %s1785_s21 = sphi %s1866_s21, %s24_s21   ;;  %s330_s24 = int_to_ptr.hbm [resolvable:$true] %s329_s24 }
   0x3   : > { %p1401_p0 = scmp.ge.s32.totalorder %s1785_s21, 1  ;;  %p312_p1 = scmp.lt.s32.totalorder %s1785_s21, 3 }
   0x4   : > { %p1629_p2 = scmp.eq.s32.totalorder %s1399_s25, 0  ;;  %s1787_s27 = smov [#allocation3]  }
   0x5   : > { %p1877_p3 = pnand %p1401_p0, %p312_p1  ;;  %s331_s28 = sshll.u32 %s1787_s27, 4  ;;  %s332_s28 = int_to_ptr.vmem [resolvable:$true] %s331_s28 }
   0x6   : > { %s343_s13 = sshll.u32 %s2154_s4, 4  ;;  %s1788_s14 = smov [#allocation5]   ;;  %s344_s13 = int_to_ptr.hbm [resolvable:$true] %s343_s13 }
   0x7   : > { %p1622_p4 = pneg %p1877_p3  ;;  %s345_s15 = sshll.u32 %s1788_s14, 4  ;;  %s346_s15 = int_to_ptr.vmem [resolvable:$true] %s345_s15 }
   0x8   : > { %s1789_s16 = smov 128   ;;  %s1790_s17 = smov 8  }
   0x9   : > { %p1623_p5 = pnand %p1629_p2, %p1622_p4  ;;  %s1791_s18 = smov 64  }
   0xa   : > { %s1792_s19 = smov 4   ;;  %390 = sbr.rel (%p1877_p3) target bundleno = 2767 (0xacf), region = 68 }
   0xb   : > { %1625 = dma.hbm_to_vmem [thread:$0]  (!%p1623_p5), %s330_s24, 1024, %s332_s28, [#allocation4], %s1789_s16, %s1789_s16, %s1790_s17  }
   0xc   : > { %1628 = dma.hbm_to_vmem [thread:$0]  (!%p1623_p5), %s344_s13, 512, %s346_s15, [#allocation6], %s1791_s18, %s1791_s18, %s1792_s19  }
   0xf   : > { %1776 = dma.done.wait (%p1629_p2), [#allocation4], 1024  }
  0x10   : > { %1778 = vsyncadd (%p1629_p2), [#allocation4], 4294966272 }
  0x11   : > { %1780 = dma.done.wait (%p1629_p2), [#allocation6], 512  }
  0x12   : > { %1782 = vsyncadd (%p1629_p2), [#allocation6], 4294966784  ;;  %p438_p6 = scmp.lt.s32.totalorder %s1399_s25, 1  ;;  %vm514_vm0 = vcmask 523264   ;;  %v1793_v4 = vmov 64.0   ;;  %s1794_s30 = smov 64  }
  0x13   : > { %1661 = vrcp.f32 %v1793_v4  ;;  %v1438_v21 = vld [vmem:[#allocation3 + $0x30] sm:$0xf]  ;;  %v1584_v22 = vld [vmem:[#allocation3 + $0x34] sm:$0xf0]  ;;  %v1430_v24 = vld [vmem:[#allocation3 + $0x20] sm:$0xf] }
  0x14   : > { %s2165_s25 = smov (!%p438_p6, %s1399_s25), 1  ;;  %v1439_v23 = vor.u32 %v1584_v22, %v1438_v21  ;;  %v1582_v25 = vld [vmem:[#allocation3 + $0x24] sm:$0xf0]  ;;  %v1422_v27 = vld [vmem:[#allocation3 + $0x10] sm:$0xf]  ;;  %vm657_vm8 = vcmask 130048  }
  0x15   : > { %s1575_s20 = sshll.u32 %s2165_s25, 4  ;;  %v1431_v26 = vor.u32 %v1582_v25, %v1430_v24  ;;  %v1580_v28 = vld [vmem:[#allocation3 + $0x14] sm:$0xf0]  ;;  %v1414_v30 = vld [vmem:[#allocation3] sm:$0xf]  ;;  %s1795_s13 = smov 112  }
  0x16   : > { %s442_s24 = scalar_lea.vmem %s2150_s0, %s1575_s20  ;;  %624 = vmatpush.bf16.msra.mxu1 %v1439_v23  ;;  %v1423_v29 = vor.u32 %v1580_v28, %v1422_v27  ;;  %v1578_v31 = vld [vmem:[#allocation3 + $0x4] sm:$0xf0]  ;;  %v1583_v36 = vld [vmem:[#allocation3 + $0x34] sm:$0xf]  ;;  %v1440_v37 = vld [vmem:[#allocation3 + $0x38] sm:$0xf0]  ;;  %s447_s22 = scalar_lea.vmem %s2162_s12, %s1575_s20 }
  0x17   : > { %v1901_v0 = vld [vmem:[%s442_s24] sm:$0xff]  ;;  %v1905_v2 = vld [vmem:[%s442_s24 + $0x8] sm:$0xff]  ;;  %v1415_v33 = vor.u32 %v1578_v31, %v1414_v30  ;;  %v1443_v38 = vor.u32 %v1583_v36, %v1440_v37  ;;  %v1432_v40 = vld [vmem:[#allocation3 + $0x28] sm:$0xf0]  ;;  %s1796_s14 = smov 48   ;;  %vm724_vm9 = vcmask 125952  }
  0x18   : > { %v515_v1 = vsel %vm514_vm0, %v1901_v0, 0.0  ;;  %v518_v3 = vsel %vm514_vm0, %v1905_v2, 0.0  ;;  %v1581_v39 = vld [vmem:[#allocation3 + $0x24] sm:$0xf]  ;;  %v1579_v44 = vld [vmem:[#allocation3 + $0x14] sm:$0xf] }
  0x19   : > { %516 = vadd.xlane.f32.xlu0 %v515_v1  ;;  %v1662_v5 = vpop.eup %1661  ;;  %v1435_v42 = vor.u32 %v1581_v39, %v1432_v40  ;;  %v1424_v45 = vld [vmem:[#allocation3 + $0x18] sm:$0xf0]  ;;  %v1577_v50 = vld [vmem:[#allocation3 + $0x4] sm:$0xf]  ;;  %v1416_v51 = vld [vmem:[#allocation3 + $0x8] sm:$0xf0] }
  0x1a   : > { %v522_v6 = vmul.f32 64.0, %v1662_v5  ;;  %vm526_vm1 = vweird.f32 %v1662_v5  ;;  %625 = vmatpush.bf16.msra.mxu1 %v1431_v26  ;;  %v1427_v49 = vor.u32 %v1579_v44, %v1424_v45  ;;  %v1419_v54 = vor.u32 %v1577_v50, %v1416_v51  ;;  %v1655_v1 = vld [vmem:[%s2151_s1] ss:$0 sm:$0xff]  ;;  %s1797_s15 = smov 80   ;;  %s1798_s16 = smov 16  }
  0x1b   : > { %s1799_s17 = smov 32   ;;  %s1800_s18 = smov 96   ;;  %vm804_vm10 = vcmask 257152   ;;  %vm884_vm11 = vcmask 388352   ;;  %vm964_vm12 = vcmask 519552  }
  0x1c   : > { %v523_v7 = vsub.f32 1.0, %v522_v6 }
  0x1e   : > { %v524_v8 = vmul.f32 %v1662_v5, %v523_v7  ;;  %626 = vmatpush.bf16.msra.mxu1 %v1423_v29  ;;  %v1656_v7 = vld [vmem:[%s2152_s2] ss:$0 sm:$0xff] }
  0x20   : > { %v525_v9 = vadd.f32 %v1662_v5, %v524_v8 }
  0x21   : > { %519 = vadd.xlane.f32.xlu0 %v518_v3 }
  0x22   : > { %v1909_v10 = vsel %vm526_vm1, %v1662_v5, %v525_v9  ;;  %627 = vmatpush.bf16.msra.mxu1 %v1415_v33 }
  0x26   : > { %638 = vmatpush.bf16.msrb.mxu1 %v1443_v38 }
  0x2a   : > { %639 = vmatpush.bf16.msrb.mxu1 %v1435_v42 }
  0x2e   : > { %640 = vmatpush.bf16.msrb.mxu1 %v1427_v49 }
  0x32   : > { %641 = vmatpush.bf16.msrb.mxu1 %v1419_v54 }
  0x8c   : > { %v517_v11 = vpop.xlane.xlu0 %516 }
  0x8d   : > { %v528_v12 = vmul.f32 %v1909_v10, %v517_v11 }
  0x8f   : > { %v1913_v13 = vsub.f32 %v1901_v0, %v528_v12 }
  0x91   : > { %v532_v14 = vmul.f32 %v1913_v13, %v1913_v13 }
  0x93   : > { %v534_v15 = vsel %vm514_vm0, %v532_v14, 0.0 }
  0x94   : > { %535 = vadd.xlane.f32.xlu1 %v534_v15  ;;  %v520_v16 = vpop.xlane.xlu0 %519 }
  0x95   : > { %v529_v17 = vmul.f32 %v1909_v10, %v520_v16 }
  0x97   : > { %v1920_v18 = vsub.f32 %v1905_v2, %v529_v17 }
  0x99   : > { %v533_v19 = vmul.f32 %v1920_v18, %v1920_v18 }
  0x9b   : > { %v537_v20 = vsel %vm514_vm0, %v533_v19, 0.0 }
  0x9c   : > { %538 = vadd.xlane.f32.xlu1 %v537_v20 }
 0x107   : > { %v536_v32 = vpop.xlane.xlu1 %535 }
 0x108   : > { %v540_v34 = vmul.f32 %v536_v32, %v1909_v10 }
 0x10a   : > { %v542_v35 = vadd.f32 1e-05, %v540_v34 }
 0x10c   : > { %1663 = vrsqrt.f32 %v542_v35  ;;  %vm550_vm3 = vweird.f32 %v542_v35 }
 0x10f   : > { %v539_v41 = vpop.xlane.xlu1 %538 }
 0x110   : > { %v541_v43 = vmul.f32 %v539_v41, %v1909_v10 }
 0x112   : > { %v1664_v46 = vpop.eup %1663  ;;  %v543_v47 = vadd.f32 1e-05, %v541_v43 }
 0x113   : > { %v545_v48 = vmul.f32 %v1664_v46, %v542_v35  ;;  %vm551_vm2 = vweird.f32 %v1664_v46 }
 0x114   : > { %1665 = vrsqrt.f32 %v543_v47  ;;  %vm552_vm4 = vmor %vm550_vm3, %vm551_vm2  ;;  %vm560_vm6 = vweird.f32 %v543_v47 }
 0x115   : > { %v546_v52 = vmul.f32 %v1664_v46, %v545_v48 }
 0x117   : > { %v547_v53 = vmul.f32 0.5, %v546_v52 }
 0x119   : > { %v548_v55 = vsub.f32 1.5, %v547_v53 }
 0x11a   : > { %v1666_v56 = vpop.eup %1665 }
 0x11b   : > { %v549_v57 = vmul.f32 %v1664_v46, %v548_v55  ;;  %v555_v58 = vmul.f32 %v1666_v56, %v543_v47  ;;  %vm561_vm5 = vweird.f32 %v1666_v56 }
 0x11c   : > { %vm562_vm7 = vmor %vm560_vm6, %vm561_vm5 }
 0x11d   : > { %v556_v59 = vmul.f32 %v1666_v56, %v555_v58  ;;  %v553_v60 = vsel %vm552_vm4, %v1664_v46, %v549_v57 }
 0x11e   : > { %v564_v63 = vmul.f32 %v553_v60, %v1913_v13 }
 0x11f   : > { %v557_v61 = vmul.f32 0.5, %v556_v59 }
 0x120   : > { %v569_v6 = vmul.f32 %v1655_v1, %v564_v63 }
 0x121   : > { %v558_v62 = vsub.f32 1.5, %v557_v61 }
 0x122   : > { %v574_v9 = vadd.f32 %v1656_v7, %v569_v6 }
 0x123   : > { %v559_v3 = vmul.f32 %v1666_v56, %v558_v62 }
 0x125   : > { %v563_v4 = vsel %vm562_vm7, %v1666_v56, %v559_v3 }
 0x126   : > { %v565_v5 = vmul.f32 %v563_v4, %v1920_v18 }
 0x128   : > { %v570_v8 = vmul.f32 %v1655_v1, %v565_v5 }
 0x12a   : > { %v575_v11 = vadd.f32 %v1656_v7, %v570_v8 }
 0x12c   : > { %v576_v12 = vpack.c.bf16 %v575_v11, %v574_v9 }
 0x12e   : > { %1444 = vmatmul.msk.bf16.vlgmr.msra.gmra.mxu1 %vm514_vm0, %v576_v12 }
 0x13e   : > { %1445 = vmatmul.msk.bf16.vlgmr.msrb.gmra.mxu1 %vm514_vm0, %v576_v12 }
 0x1ab   : > { %v629_v13 = vpop.f32.mrf.mxu1 }
 0x1b3   : > { %v631_v14 = vpop.f32.mrf.mxu1 }
 0x1bb   : > { %v643_v15 = vpop.f32.mrf.mxu1 }
 0x1bc   : > { %v648_v16 = vpack.c.bf16 %v643_v15, %v629_v13 }
 0x1be   : > { %v652_v18 = vunpack.c.l.b16 %v648_v16  ;;  %v701_v20 = vunpack.c.h.b16 %v648_v16 }
 0x1c3   : > { %v645_v17 = vpop.f32.mrf.mxu1 }
 0x1c4   : > { %v649_v19 = vpack.c.bf16 %v645_v17, %v631_v14 }
 0x1c6   : > { %v653_v21 = vunpack.c.l.b16 %v649_v19  ;;  %v702_v22 = vunpack.c.h.b16 %v649_v19 }
 0x1c8   : > { %v1937_v23 = vpack.c.b16 %v653_v21, %v652_v18  ;;  %v1939_v24 = vpack.c.b16 %v702_v22, %v701_v20 }
 0x1ca   : > { %715 = vmatpush.bf16.msra.mxu3 %v1939_v24  ;;  %655 = vrot.lane.b32.xlu2 %v1937_v23, %s1794_s30 }
 0x224   : > { %v656_v25 = vpop.permute.xlu2 %655 }
 0x225   : > { %v662_v26 = vsel %vm657_vm8, %v656_v25, 0 }
 0x226   : > { %671 = vmatpush.bf16.xpose.msra.mxu2 %v662_v26 }
 0x22d   : > { %1446 = vmatmul.msk.bf16.vlgmr.msra.gmra.mxu2 %vm657_vm8, %v1937_v23 }
 0x2b0   : > { %v673_v27 = vpop.f32.mrf.mxu2 }
 0x2b1   : > { %v678_v28 = vsel %vm657_vm8, %v673_v27, -inf }
 0x2b2   : > { %679 = vmax.xlane.f32.xlu2 %v678_v28 }
 0x2b8   : > { %v675_v29 = vpop.f32.mrf.mxu2 }
 0x2b9   : > { %v681_v30 = vsel %vm657_vm8, %v675_v29, -inf }
 0x2ba   : > { %682 = vmax.xlane.f32.xlu0 %v681_v30 }
 0x2ca   : > { %774 = vrot.lane.b32.xlu2 %v1939_v24, %s1795_s13 }
 0x325   : > { %v680_v31 = vpop.xlane.xlu2 %679 }
 0x326   : > { %v684_v32 = vsub.f32 %v673_v27, %v680_v31 }
 0x328   : > { %v686_v33 = vmul.f32 1.442695, %v684_v32 }
 0x32a   : > { %1667 = vpow2.f32 %v686_v33 }
 0x32d   : > { %v683_v34 = vpop.xlane.xlu0 %682  ;;  %v775_v50 = vpop.permute.xlu2 %774 }
 0x32e   : > { %v685_v35 = vsub.f32 %v675_v29, %v683_v34 }
 0x330   : > { %v1668_v36 = vpop.eup %1667  ;;  %v688_v37 = vmul.f32 1.442695, %v685_v35 }
 0x331   : > { %v690_v38 = vsel %vm657_vm8, %v1668_v36, 0.0 }
 0x332   : > { %1669 = vpow2.f32 %v688_v37  ;;  %691 = vadd.xlane.f32.xlu1 %v690_v38 }
 0x338   : > { %v1670_v39 = vpop.eup %1669 }
 0x339   : > { %v693_v40 = vsel %vm657_vm8, %v1670_v39, 0.0 }
 0x33a   : > { %694 = vadd.xlane.f32.xlu0 %v693_v40 }
 0x34b   : > { %729 = vrot.lane.b32.xlu1 %v1937_v23, %s1796_s14 }
 0x34e   : > { %727 = vrot.lane.b32.xlu0 %v1937_v23, %s1795_s13 }
 0x3a5   : > { %v692_v41 = vpop.xlane.xlu1 %691 }
 0x3a6   : > { %1671 = vrcp.f32 %v692_v41 }
 0x3ac   : > { %v1672_v43 = vpop.eup %1671 }
 0x3ad   : > { %v695_v42 = vpop.xlane.xlu0 %694  ;;  %v698_v45 = vmul.f32 %v1672_v43, %v1668_v36 }
 0x3ae   : > { %1673 = vrcp.f32 %v695_v42 }
 0x3b4   : > { %v1674_v44 = vpop.eup %1673 }
 0x3b5   : > { %v699_v46 = vmul.f32 %v1674_v44, %v1670_v39 }
 0x3b7   : > { %v700_v47 = vpack.c.bf16 %v699_v46, %v698_v45 }
 0x3b9   : > { %1447 = vmatmul.msk.bf16.vlgmr.msra.gmra.mxu3 %vm657_vm8, %v700_v47 }
 0x3bd   : > { %v730_v48 = vpop.permute.xlu1 %729 }
 0x3be   : > { %v735_v49 = vsel %vm657_vm8, %v730_v48, 0 }
 0x3bf   : > { %744 = vmatpush.bf16.xpose.msrb.mxu3 %v735_v49 }
 0x3c0   : > { %v728_v51 = vpop.permute.xlu0 %727 }
 0x3c7   : > { %787 = vmatpush.bf16.msra.mxu3 %v775_v50 }
 0x3c9   : > { %1448 = vmatmul.msk.bf16.vlgmr.msrb.gmra.mxu3 %vm657_vm8, %v728_v51 }
 0x43c   : > { %v717_v52 = vpop.f32.mrf.mxu3 }
 0x43d   : > { %v722_v53 = vpack.c.bf16 %v717_v52, %v717_v52 }
 0x43f   : > { %725 = vst.msk [vmem:[#allocation2] sm:$0xf] %vm724_vm9, %v722_v53 }
 0x444   : > { %v719_v54 = vpop.f32.mrf.mxu3 }
 0x445   : > { %v723_v55 = vpack.c.bf16 %v719_v54, %v719_v54 }
 0x447   : > { %726 = vst.msk [vmem:[#allocation2 + $0x4] sm:$0xf] %vm724_vm9, %v723_v55 }
 0x44c   : > { %v746_v56 = vpop.f32.mrf.mxu3 }
 0x44d   : > { %v751_v57 = vsel %vm657_vm8, %v746_v56, -inf }
 0x44e   : > { %752 = vmax.xlane.f32.xlu1 %v751_v57 }
 0x454   : > { %v748_v58 = vpop.f32.mrf.mxu3 }
 0x455   : > { %v754_v59 = vsel %vm657_vm8, %v748_v58, -inf }
 0x456   : > { %755 = vmax.xlane.f32.xlu2 %v754_v59 }
 0x467   : > { %887 = vrot.lane.b32.xlu1 %v1937_v23, %s1797_s15 }
 0x46e   : > { %889 = vrot.lane.b32.xlu2 %v1937_v23, %s1798_s16 }
 0x4c1   : > { %v753_v60 = vpop.xlane.xlu1 %752 }
 0x4c2   : > { %v757_v61 = vsub.f32 %v746_v56, %v753_v60 }
 0x4c4   : > { %v759_v62 = vmul.f32 1.442695, %v757_v61 }
 0x4c6   : > { %1675 = vpow2.f32 %v759_v62 }
 0x4c9   : > { %v756_v63 = vpop.xlane.xlu2 %755 }
 0x4ca   : > { %v758_v1 = vsub.f32 %v748_v58, %v756_v63 }
 0x4cc   : > { %v1676_v3 = vpop.eup %1675  ;;  %v761_v4 = vmul.f32 1.442695, %v758_v1 }
 0x4cd   : > { %v763_v5 = vsel %vm657_vm8, %v1676_v3, 0.0 }
 0x4ce   : > { %1677 = vpow2.f32 %v761_v4  ;;  %764 = vadd.xlane.f32.xlu0 %v763_v5 }
 0x4d1   : > { %v890_v6 = vpop.permute.xlu2 %889 }
 0x4d2   : > { %v895_v7 = vsel %vm657_vm8, %v890_v6, 0 }
 0x4d3   : > { %904 = vmatpush.bf16.xpose.msrb.mxu3 %v895_v7 }
 0x4d4   : > { %v1678_v8 = vpop.eup %1677 }
 0x4d5   : > { %v766_v9 = vsel %vm657_vm8, %v1678_v8, 0.0 }
 0x4d6   : > { %767 = vadd.xlane.f32.xlu2 %v766_v9 }
 0x4d9   : > { %v888_v21 = vpop.permute.xlu1 %887 }
 0x4e2   : > { %809 = vrot.lane.b32.xlu0 %v1937_v23, %s1799_s17 }
 0x4ee   : > { %807 = vrot.lane.b32.xlu2 %v1937_v23, %s1800_s18 }
 0x541   : > { %v765_v11 = vpop.xlane.xlu0 %764 }
 0x542   : > { %1679 = vrcp.f32 %v765_v11 }
 0x548   : > { %v1680_v13 = vpop.eup %1679 }
 0x549   : > { %v768_v12 = vpop.xlane.xlu2 %767  ;;  %v771_v15 = vmul.f32 %v1680_v13, %v1676_v3 }
 0x54a   : > { %1681 = vrcp.f32 %v768_v12 }
 0x550   : > { %v1682_v14 = vpop.eup %1681 }
 0x551   : > { %v772_v16 = vmul.f32 %v1682_v14, %v1678_v8  ;;  %v808_v20 = vpop.permute.xlu2 %807 }
 0x553   : > { %v773_v17 = vpack.c.bf16 %v772_v16, %v771_v15 }
 0x554   : > { %v810_v19 = vpop.permute.xlu0 %809 }
 0x555   : > { %1449 = vmatmul.msk.bf16.vlgmr.msra.gmra.mxu3 %vm657_vm8, %v773_v17  ;;  %v815_v18 = vsel %vm657_vm8, %v810_v19, 0 }
 0x556   : > { %824 = vmatpush.bf16.xpose.msra.mxu0 %v815_v18  ;;  %v1588_v18 = vld [vmem:[#allocation5 + $0x18] sm:$0xff] }
 0x55d   : > { %1450 = vmatmul.msk.bf16.vlgmr.msra.gmra.mxu0 %vm657_vm8, %v808_v20  ;;  %v1587_v20 = vld [vmem:[#allocation5 + $0x10] sm:$0xff] }
 0x55e   : > { %1005 = vmatpush.bf16.msrb.mxu0 %v1588_v18 }
 0x562   : > { %1006 = vmatpush.bf16.msrb.mxu0 %v1587_v20 }
 0x565   : > { %1452 = vmatmul.msk.bf16.vlgmr.msrb.gmra.mxu3 %vm657_vm8, %v888_v21  ;;  %v1586_v21 = vld [vmem:[#allocation5 + $0x8] sm:$0xff] }
 0x566   : > { %1007 = vmatpush.bf16.msrb.mxu0 %v1586_v21 }
 0x5d8   : > { %v789_v22 = vpop.f32.mrf.mxu3 }
 0x5d9   : > { %v794_v53 = vpack.c.bf16 %v789_v22, %v789_v22  ;;  %v1585_v22 = vld [vmem:[#allocation5] sm:$0xff] }
 0x5da   : > { %v826_v23 = vpop.f32.mrf.mxu0  ;;  %1008 = vmatpush.bf16.msrb.mxu0 %v1585_v22 }
 0x5db   : > { %v831_v25 = vsel %vm657_vm8, %v826_v23, -inf }
 0x5dc   : > { %832 = vmax.xlane.f32.xlu1 %v831_v25 }
 0x5e0   : > { %v791_v26 = vpop.f32.mrf.mxu3 }
 0x5e1   : > { %v795_v54 = vpack.c.bf16 %v791_v26, %v791_v26 }
 0x5e2   : > { %v828_v29 = vpop.f32.mrf.mxu0 }
 0x5e3   : > { %v834_v32 = vsel %vm657_vm8, %v828_v29, -inf }
 0x5e8   : > { %v906_v27 = vpop.f32.mrf.mxu3 }
 0x5e9   : > { %v911_v28 = vsel %vm657_vm8, %v906_v27, -inf }
 0x5ea   : > { %912 = vmax.xlane.f32.xlu2 %v911_v28 }
 0x5f0   : > { %v908_v30 = vpop.f32.mrf.mxu3 }
 0x5f1   : > { %v914_v31 = vsel %vm657_vm8, %v908_v30, -inf }
 0x5f2   : > { %915 = vmax.xlane.f32.xlu0 %v914_v31  ;;  %835 = vmax.xlane.f32.xlu2 %v834_v32 }
 0x64f   : > { %v833_v33 = vpop.xlane.xlu1 %832 }
 0x650   : > { %v837_v34 = vsub.f32 %v826_v23, %v833_v33 }
 0x652   : > { %v839_v35 = vmul.f32 1.442695, %v837_v34 }
 0x654   : > { %1683 = vpow2.f32 %v839_v35 }
 0x65a   : > { %v1684_v36 = vpop.eup %1683 }
 0x65b   : > { %v843_v37 = vsel %vm657_vm8, %v1684_v36, 0.0 }
 0x65c   : > { %844 = vadd.xlane.f32.xlu1 %v843_v37 }
 0x65d   : > { %v913_v38 = vpop.xlane.xlu2 %912 }
 0x65e   : > { %v917_v39 = vsub.f32 %v906_v27, %v913_v38 }
 0x660   : > { %v919_v40 = vmul.f32 1.442695, %v917_v39 }
 0x662   : > { %1685 = vpow2.f32 %v919_v40 }
 0x665   : > { %v916_v41 = vpop.xlane.xlu0 %915  ;;  %v836_v42 = vpop.xlane.xlu2 %835 }
 0x666   : > { %v918_v43 = vsub.f32 %v908_v30, %v916_v41  ;;  %v838_v44 = vsub.f32 %v828_v29, %v836_v42  ;;  %v1657_v29 = vld [vmem:[%s2155_s5] ss:$0 sm:$0xff] }
 0x668   : > { %v1686_v45 = vpop.eup %1685  ;;  %v921_v46 = vmul.f32 1.442695, %v918_v43  ;;  %v841_v47 = vmul.f32 1.442695, %v838_v44 }
 0x669   : > { %v923_v48 = vsel %vm657_vm8, %v1686_v45, 0.0 }
 0x66a   : > { %1687 = vpow2.f32 %v921_v46  ;;  %924 = vadd.xlane.f32.xlu2 %v923_v48  ;;  %v1501_v46 = vld [vmem:[%s2158_s8 + $0x30] sm:$0xf]  ;;  %v1595_v48 = vld [vmem:[%s2158_s8 + $0x34] sm:$0xf] }
 0x66b   : > { %1689 = vpow2.f32 %v841_v47  ;;  %v1596_v47 = vld [vmem:[%s2158_s8 + $0x34] sm:$0xf0] }
 0x670   : > { %v1688_v49 = vpop.eup %1687 }
 0x671   : > { %v1690_v50 = vpop.eup %1689  ;;  %v926_v51 = vsel %vm657_vm8, %v1688_v49, 0.0 }
 0x672   : > { %927 = vadd.xlane.f32.xlu0 %v926_v51  ;;  %v846_v52 = vsel %vm657_vm8, %v1690_v50, 0.0 }
 0x673   : > { %847 = vadd.xlane.f32.xlu2 %v846_v52  ;;  %v1493_v52 = vld [vmem:[%s2158_s8 + $0x20] sm:$0xf] }
 0x675   : > { %854 = vrot.lane.b32.xlu1 %v1939_v24, %s1800_s18 }
 0x686   : > { %934 = vrot.lane.b32.xlu0 %v1939_v24, %s1797_s15 }
 0x68b   : > { %798 = vrot.lane.b32.xlu2 %v794_v53, %s1798_s16  ;;  %v1594_v53 = vld [vmem:[%s2158_s8 + $0x24] sm:$0xf0] }
 0x68e   : > { %800 = vrot.lane.b32.xlu0 %v795_v54, %s1798_s16  ;;  %v1593_v54 = vld [vmem:[%s2158_s8 + $0x24] sm:$0xf] }
 0x6cf   : > { %v845_v56 = vpop.xlane.xlu1 %844 }
 0x6d0   : > { %1691 = vrcp.f32 %v845_v56  ;;  %v1495_v56 = vld [vmem:[%s2158_s8 + $0x28] sm:$0xf0] }
 0x6d6   : > { %v1692_v60 = vpop.eup %1691 }
 0x6d7   : > { %v851_v62 = vmul.f32 %v1692_v60, %v1684_v36  ;;  %v1591_v60 = vld [vmem:[%s2158_s8 + $0x14] sm:$0xf] }
 0x6dd   : > { %v925_v55 = vpop.xlane.xlu2 %924 }
 0x6e5   : > { %v928_v59 = vpop.xlane.xlu0 %927 }
 0x6e6   : > { %v848_v57 = vpop.xlane.xlu2 %847 }
 0x6e7   : > { %1693 = vrcp.f32 %v848_v57  ;;  %v855_v58 = vpop.permute.xlu1 %854  ;;  %v1498_v57 = vor.u32 %v1593_v54, %v1495_v56  ;;  %v1605_v56 = vld [vmem:[%s2160_s10 + $0x40] sm:$0xff] }
 0x6e8   : > { %867 = vmatpush.bf16.msra.mxu1 %v855_v58  ;;  %1695 = vrcp.f32 %v928_v59  ;;  %v1485_v58 = vld [vmem:[%s2158_s8 + $0x10] sm:$0xf]  ;;  %v1592_v59 = vld [vmem:[%s2158_s8 + $0x14] sm:$0xf0] }
 0x6e9   : > { %1697 = vrcp.f32 %v925_v55  ;;  %v1494_v55 = vor.u32 %v1594_v53, %v1493_v52  ;;  %v1606_v53 = vld [vmem:[%s2160_s10 + $0x48] sm:$0xff] }
 0x6ed   : > { %v1694_v61 = vpop.eup %1693 }
 0x6ee   : > { %v852_v24 = vmul.f32 %v1694_v61, %v1690_v50  ;;  %v799_v63 = vpop.permute.xlu2 %798  ;;  %v1696_v3 = vpop.eup %1695  ;;  %v1503_v50 = vld [vmem:[%s2158_s8 + $0x38] sm:$0xf0]  ;;  %v1486_v61 = vor.u32 %v1592_v59, %v1485_v58 }
 0x6ef   : > { %805 = vst.msk [vmem:[#allocation2] sm:$0xf] %vm804_vm10, %v799_v63  ;;  %v1698_v4 = vpop.eup %1697  ;;  %v932_v5 = vmul.f32 %v1696_v3, %v1688_v49  ;;  %v1502_v49 = vor.u32 %v1596_v47, %v1501_v46  ;;  %v1506_v51 = vor.u32 %v1595_v48, %v1503_v50  ;;  %v1477_v3 = vld [vmem:[%s2158_s8] sm:$0xf]  ;;  %v1599_v46 = vld [vmem:[%s2160_s10 + $0x10] sm:$0xff]  ;;  %v1608_v47 = vld [vmem:[%s2160_s10 + $0x58] sm:$0xff] }
 0x6f0   : > { %v853_v1 = vpack.c.bf16 %v852_v24, %v851_v62  ;;  %v931_v6 = vmul.f32 %v1698_v4, %v1686_v45  ;;  %v1487_v62 = vld [vmem:[%s2158_s8 + $0x18] sm:$0xf0]  ;;  %v1590_v4 = vld [vmem:[%s2158_s8 + $0x4] sm:$0xf0]  ;;  %v1607_v50 = vld [vmem:[%s2160_s10 + $0x50] sm:$0xff] }
 0x6f1   : > { %1129 = vmatpush.bf16.msrb.mxu1 %v1502_v49  ;;  %1143 = vmatpush.bf16.msra.mxu3 %v1506_v51  ;;  %v1490_v63 = vor.u32 %v1591_v60, %v1487_v62  ;;  %v1598_v48 = vld [vmem:[%s2160_s10 + $0x8] sm:$0xff]  ;;  %v480_v49 = vld [vmem:[%s2159_s9] sm:$0x3] }
 0x6f2   : > { %1451 = vmatmul.msk.bf16.vlgmr.msra.gmra.mxu1 %vm657_vm8, %v853_v1  ;;  %v933_v8 = vpack.c.bf16 %v932_v5, %v931_v6  ;;  %v1589_v5 = vld [vmem:[%s2158_s8 + $0x4] sm:$0xf]  ;;  %v1078_v52 = vperm.slane %v480_v49, 0  ;;  %v1079_v58 = vperm.slane %v480_v49, 1 }
 0x6f3   : > { %v1597_v51 = vld [vmem:[%s2160_s10] sm:$0xff] }
 0x6f5   : > { %1130 = vmatpush.bf16.msrb.mxu1 %v1494_v55  ;;  %1144 = vmatpush.bf16.msra.mxu3 %v1498_v57 }
 0x6f8   : > { %v935_v7 = vpop.permute.xlu0 %934 }
 0x6f9   : > { %947 = vmatpush.bf16.msrb.mxu2 %v935_v7  ;;  %1131 = vmatpush.bf16.msrb.mxu1 %v1486_v61  ;;  %v1478_v7 = vor.u32 %v1590_v4, %v1477_v3 }
 0x6fa   : > { %1145 = vmatpush.bf16.msra.mxu3 %v1490_v63 }
 0x6fc   : > { %1453 = vmatmul.msk.bf16.vlgmr.msrb.gmra.mxu2 %vm657_vm8, %v933_v8  ;;  %v1479_v8 = vld [vmem:[%s2158_s8 + $0x8] sm:$0xf0] }
 0x6fd   : > { %1132 = vmatpush.bf16.msrb.mxu1 %v1478_v7 }
 0x700   : > { %v801_v9 = vpop.permute.xlu0 %800 }
 0x701   : > { %806 = vst.msk [vmem:[#allocation2 + $0x4] sm:$0xf] %vm804_vm10, %v801_v9  ;;  %v1482_v9 = vor.u32 %v1589_v5, %v1479_v8 }
 0x703   : > { %1146 = vmatpush.bf16.msra.mxu3 %v1482_v9 }
 0x76f   : > { %v869_v11 = vpop.f32.mrf.mxu1 }
 0x770   : > { %v874_v12 = vpack.c.bf16 %v869_v11, %v869_v11 }
 0x772   : > { %878 = vrot.lane.b32.xlu1 %v874_v12, %s1799_s17 }
 0x777   : > { %v871_v13 = vpop.f32.mrf.mxu1 }
 0x778   : > { %v875_v14 = vpack.c.bf16 %v871_v13, %v871_v13 }
 0x77a   : > { %880 = vrot.lane.b32.xlu0 %v875_v14, %s1799_s17 }
 0x77f   : > { %v949_v15 = vpop.f32.mrf.mxu2 }
 0x780   : > { %v954_v16 = vpack.c.bf16 %v949_v15, %v949_v15 }
 0x782   : > { %958 = vrot.lane.b32.xlu2 %v954_v16, %s1796_s14 }
 0x787   : > { %v951_v17 = vpop.f32.mrf.mxu2 }
 0x788   : > { %v955_v19 = vpack.c.bf16 %v951_v17, %v951_v17 }
 0x78a   : > { %960 = vrot.lane.b32.xlu1 %v955_v19, %s1796_s14 }
 0x7dc   : > { %v959_v25 = vpop.permute.xlu2 %958 }
 0x7e4   : > { %v879_v23 = vpop.permute.xlu1 %878 }
 0x7e5   : > { %885 = vst.msk [vmem:[#allocation2] sm:$0xf] %vm884_vm11, %v879_v23 }
 0x7e6   : > { %965 = vst.msk [vmem:[#allocation2] sm:$0xf] %vm964_vm12, %v959_v25 }
 0x7ec   : > { %v881_v26 = vpop.permute.xlu0 %880 }
 0x7ed   : > { %886 = vst.msk [vmem:[#allocation2 + $0x4] sm:$0xf] %vm884_vm11, %v881_v26 }
 0x7fc   : > { %v961_v27 = vpop.permute.xlu1 %960 }
 0x7fd   : > { %966 = vst.msk [vmem:[#allocation2 + $0x4] sm:$0xf] %vm964_vm12, %v961_v27 }
 0x804   : > { %v1613_v28 = vld [vmem:[#allocation2] sm:$0xff] }
 0x805   : > { %1474 = vmatmul.msk.bf16.vlgmr.msrb.gmra.mxu0 %vm514_vm0, %v1613_v28 }
 0x882   : > { %v1010_v30 = vpop.f32.mrf.mxu0 }
 0x883   : > { %v1015_v31 = vadd.f32 %v1010_v30, %v1901_v0  ;;  %v1659_v30 = vld [vmem:[%s2157_s7] ss:$0 sm:$0xff] }
 0x885   : > { %v2001_v32 = vadd.f32 %v1657_v29, %v1015_v31 }
 0x887   : > { %v1022_v33 = vsel %vm514_vm0, %v2001_v32, 0.0 }
 0x888   : > { %1023 = vadd.xlane.f32.xlu0 %v1022_v33 }
 0x88a   : > { %v1012_v34 = vpop.f32.mrf.mxu0 }
 0x88b   : > { %v1016_v35 = vadd.f32 %v1012_v34, %v1905_v2 }
 0x88d   : > { %v2006_v36 = vadd.f32 %v1657_v29, %v1016_v35 }
 0x88f   : > { %v1025_v37 = vsel %vm514_vm0, %v2006_v36, 0.0 }
 0x890   : > { %1026 = vadd.xlane.f32.xlu2 %v1025_v37 }
 0x8fb   : > { %v1024_v38 = vpop.xlane.xlu0 %1023 }
 0x8fc   : > { %v1028_v39 = vmul.f32 %v1024_v38, %v1909_v10 }
 0x8fe   : > { %v2012_v0 = vsub.f32 %v2001_v32, %v1028_v39  ;;  %v1604_v39 = vld [vmem:[%s2160_s10 + $0x38] sm:$0xff] }
 0x8ff   : > { %1290 = vmatpush.bf16.msra.mxu2 %v1604_v39 }
 0x900   : > { %v1032_v40 = vmul.f32 %v2012_v0, %v2012_v0 }
 0x902   : > { %v1034_v41 = vsel %vm514_vm0, %v1032_v40, 0.0  ;;  %v1612_v40 = vld [vmem:[%s2160_s10 + $0x78] sm:$0xff] }
 0x903   : > { %1035 = vadd.xlane.f32.xlu1 %v1034_v41  ;;  %v1027_v42 = vpop.xlane.xlu2 %1026  ;;  %1304 = vmatpush.bf16.msra.mxu0 %v1612_v40  ;;  %v1602_v41 = vld [vmem:[%s2160_s10 + $0x28] sm:$0xff] }
 0x904   : > { %v1029_v2 = vmul.f32 %v1027_v42, %v1909_v10  ;;  %v1611_v42 = vld [vmem:[%s2160_s10 + $0x70] sm:$0xff] }
 0x906   : > { %v2019_v43 = vsub.f32 %v2006_v36, %v1029_v2  ;;  %v1601_v2 = vld [vmem:[%s2160_s10 + $0x20] sm:$0xff] }
 0x907   : > { %1305 = vmatpush.bf16.msra.mxu0 %v1611_v42 }
 0x908   : > { %v1033_v44 = vmul.f32 %v2019_v43, %v2019_v43 }
 0x90a   : > { %v1037_v45 = vsel %vm514_vm0, %v1033_v44, 0.0  ;;  %v1600_v44 = vld [vmem:[%s2160_s10 + $0x18] sm:$0xff] }
 0x90b   : > { %1038 = vadd.xlane.f32.xlu0 %v1037_v45  ;;  %v1609_v45 = vld [vmem:[%s2160_s10 + $0x60] sm:$0xff] }
 0x976   : > { %v1036_v24 = vpop.xlane.xlu1 %1035 }
 0x977   : > { %v1040_v1 = vmul.f32 %v1036_v24, %v1909_v10 }
 0x979   : > { %v1042_v6 = vadd.f32 1e-05, %v1040_v1 }
 0x97b   : > { %1699 = vrsqrt.f32 %v1042_v6  ;;  %vm1050_vm14 = vweird.f32 %v1042_v6 }
 0x97e   : > { %v1039_v11 = vpop.xlane.xlu0 %1038 }
 0x97f   : > { %v1041_v12 = vmul.f32 %v1039_v11, %v1909_v10  ;;  %v1658_v10 = vld [vmem:[%s2156_s6] ss:$0 sm:$0xff] }
 0x981   : > { %v1700_v13 = vpop.eup %1699  ;;  %v1043_v14 = vadd.f32 1e-05, %v1041_v12 }
 0x982   : > { %v1045_v15 = vmul.f32 %v1700_v13, %v1042_v6  ;;  %vm1051_vm13 = vweird.f32 %v1700_v13 }
 0x983   : > { %1701 = vrsqrt.f32 %v1043_v14  ;;  %vm1052_vm15 = vmor %vm1050_vm14, %vm1051_vm13  ;;  %vm1060_vm2 = vweird.f32 %v1043_v14 }
 0x984   : > { %v1046_v16 = vmul.f32 %v1700_v13, %v1045_v15 }
 0x986   : > { %v1047_v17 = vmul.f32 0.5, %v1046_v16 }
 0x988   : > { %v1048_v19 = vsub.f32 1.5, %v1047_v17 }
 0x989   : > { %v1702_v18 = vpop.eup %1701 }
 0x98a   : > { %v1049_v20 = vmul.f32 %v1700_v13, %v1048_v19  ;;  %v1055_v21 = vmul.f32 %v1702_v18, %v1043_v14  ;;  %vm1061_vm1 = vweird.f32 %v1702_v18 }
 0x98b   : > { %vm1062_vm3 = vmor %vm1060_vm2, %vm1061_vm1 }
 0x98c   : > { %v1056_v22 = vmul.f32 %v1702_v18, %v1055_v21  ;;  %v1053_v23 = vsel %vm1052_vm15, %v1700_v13, %v1049_v20 }
 0x98d   : > { %v1064_v27 = vmul.f32 %v1053_v23, %v2012_v0  ;;  %v1603_v0 = vld [vmem:[%s2160_s10 + $0x30] sm:$0xff] }
 0x98e   : > { %v1057_v25 = vmul.f32 0.5, %v1056_v22  ;;  %1291 = vmatpush.bf16.msra.mxu2 %v1603_v0 }
 0x98f   : > { %v1069_v31 = vmul.f32 %v1658_v10, %v1064_v27 }
 0x990   : > { %v1058_v26 = vsub.f32 1.5, %v1057_v25 }
 0x991   : > { %v1074_v35 = vadd.f32 %v1659_v30, %v1069_v31 }
 0x992   : > { %v1059_v28 = vmul.f32 %v1702_v18, %v1058_v26  ;;  %1292 = vmatpush.bf16.msra.mxu2 %v1602_v41  ;;  %v1660_v41 = vld [vmem:[%s2161_s11] ss:$0 sm:$0xff] }
 0x994   : > { %v1063_v29 = vsel %vm1062_vm3, %v1702_v18, %v1059_v28 }
 0x995   : > { %v1065_v33 = vmul.f32 %v1063_v29, %v2019_v43  ;;  %v1610_v43 = vld [vmem:[%s2160_s10 + $0x68] sm:$0xff] }
 0x996   : > { %1293 = vmatpush.bf16.msra.mxu2 %v1601_v2  ;;  %1306 = vmatpush.bf16.msra.mxu0 %v1610_v43 }
 0x997   : > { %v1070_v34 = vmul.f32 %v1658_v10, %v1065_v33 }
 0x999   : > { %v1075_v37 = vadd.f32 %v1659_v30, %v1070_v34 }
 0x99a   : > { %1294 = vmatpush.bf16.msra.mxu2 %v1600_v44  ;;  %1307 = vmatpush.bf16.msra.mxu0 %v1609_v45 }
 0x99b   : > { %v1076_v38 = vpack.c.bf16 %v1075_v37, %v1074_v35 }
 0x99d   : > { %1507 = vmatmul.msk.bf16.vlgmr.msrb.gmra.mxu1 %vm514_vm0, %v1076_v38  ;;  %1508 = vmatmul.msk.bf16.vlgmr.msra.gmra.mxu3 %vm514_vm0, %v1076_v38 }
 0x99e   : > { %1295 = vmatpush.bf16.msra.mxu2 %v1599_v46  ;;  %1308 = vmatpush.bf16.msra.mxu0 %v1608_v47 }
 0x9a2   : > { %1296 = vmatpush.bf16.msra.mxu2 %v1598_v48  ;;  %1309 = vmatpush.bf16.msra.mxu0 %v1607_v50 }
 0x9a6   : > { %1297 = vmatpush.bf16.msra.mxu2 %v1597_v51  ;;  %1310 = vmatpush.bf16.msra.mxu0 %v1606_v53 }
 0x9aa   : > { %1311 = vmatpush.bf16.msra.mxu0 %v1605_v56 }
 0xa1a   : > { %v1134_v54 = vpop.f32.mrf.mxu1 }
 0xa1b   : > { %v1135_v55 = vadd.f32 %v1134_v54, %v1078_v52 }
 0xa1d   : > { %v1157_v57 = vmul.f32 0.044715, %v1135_v55  ;;  %v1153_v26 = vmul.f32 0.5, %v1135_v55 }
 0xa1f   : > { %v1161_v59 = vmul.f32 %v1157_v57, %v1135_v55 }
 0xa20   : > { %v1148_v60 = vpop.f32.mrf.mxu3 }
 0xa21   : > { %v1165_v61 = vmul.f32 %v1161_v59, %v1135_v55  ;;  %v1149_v62 = vadd.f32 %v1148_v60, %v1079_v58 }
 0xa22   : > { %v1136_v24 = vpop.f32.mrf.mxu1 }
 0xa23   : > { %v1169_v63 = vadd.f32 %v1165_v61, %v1135_v55  ;;  %v1158_v1 = vmul.f32 0.044715, %v1149_v62  ;;  %v1137_v3 = vadd.f32 %v1136_v24, %v1078_v52  ;;  %v1154_v35 = vmul.f32 0.5, %v1149_v62 }
 0xa25   : > { %v1162_v4 = vmul.f32 %v1158_v1, %v1149_v62  ;;  %v1159_v5 = vmul.f32 0.044715, %v1137_v3  ;;  %v1173_v6 = vmul.f32 0.7978846, %v1169_v63  ;;  %v1155_v10 = vmul.f32 0.5, %v1137_v3 }
 0xa27   : > { %v1166_v7 = vmul.f32 %v1162_v4, %v1149_v62  ;;  %v1163_v8 = vmul.f32 %v1159_v5, %v1137_v3  ;;  %1703 = vtanh.f32 %v1173_v6 }
 0xa28   : > { %v1150_v9 = vpop.f32.mrf.mxu3 }
 0xa29   : > { %v1170_v11 = vadd.f32 %v1166_v7, %v1149_v62  ;;  %v1167_v12 = vmul.f32 %v1163_v8, %v1137_v3  ;;  %v1151_v13 = vadd.f32 %v1150_v9, %v1079_v58 }
 0xa2b   : > { %v1171_v14 = vadd.f32 %v1167_v12, %v1137_v3  ;;  %v1160_v15 = vmul.f32 0.044715, %v1151_v13  ;;  %v1174_v16 = vmul.f32 0.7978846, %v1170_v11  ;;  %v1156_v37 = vmul.f32 0.5, %v1151_v13 }
 0xa2d   : > { %v1175_v17 = vmul.f32 0.7978846, %v1171_v14  ;;  %v1164_v19 = vmul.f32 %v1160_v15, %v1151_v13  ;;  %v1704_v20 = vpop.eup %1703 }
 0xa2e   : > { %v1181_v23 = vadd.f32 1.0, %v1704_v20 }
 0xa2f   : > { %v1168_v18 = vmul.f32 %v1164_v19, %v1151_v13  ;;  %1705 = vtanh.f32 %v1175_v17 }
 0xa30   : > { %1707 = vtanh.f32 %v1174_v16  ;;  %v1185_v29 = vmul.f32 %v1181_v23, %v1153_v26 }
 0xa31   : > { %v1172_v21 = vadd.f32 %v1168_v18, %v1151_v13 }
 0xa33   : > { %v1176_v22 = vmul.f32 0.7978846, %v1172_v21 }
 0xa35   : > { %v1706_v25 = vpop.eup %1705  ;;  %1709 = vtanh.f32 %v1176_v22 }
 0xa36   : > { %v1183_v27 = vadd.f32 1.0, %v1706_v25  ;;  %v1708_v28 = vpop.eup %1707 }
 0xa37   : > { %v1182_v33 = vadd.f32 1.0, %v1708_v28 }
 0xa38   : > { %v1187_v30 = vmul.f32 %v1183_v27, %v1155_v10 }
 0xa39   : > { %v1186_v39 = vmul.f32 %v1182_v33, %v1154_v35 }
 0xa3a   : > { %v1189_v31 = vpack.c.bf16 %v1187_v30, %v1185_v29 }
 0xa3b   : > { %v1710_v34 = vpop.eup %1709 }
 0xa3c   : > { %1298 = vmatmul.bf16.vlgmr.msra.gmra.mxu2 %v1189_v31  ;;  %v1184_v38 = vadd.f32 1.0, %v1710_v34 }
 0xa3e   : > { %v1188_v0 = vmul.f32 %v1184_v38, %v1156_v37 }
 0xa40   : > { %v1190_v40 = vpack.c.bf16 %v1188_v0, %v1186_v39 }
 0xa42   : > { %1312 = vmatmul.bf16.vlgmr.msra.gmra.mxu0 %v1190_v40 }
 0xabf   : > { %v1299_v42 = vpop.f32.mrf.mxu2  ;;  %v1313_v2 = vpop.f32.mrf.mxu0 }
 0xac0   : > { %v1300_v43 = vadd.f32 %v1660_v41, %v1299_v42 }
 0xac2   : > { %v1314_v44 = vadd.f32 %v1313_v2, %v1300_v43 }
 0xac4   : > { %v1318_v45 = vadd.f32 %v1314_v44, %v2001_v32 }
 0xac6   : > { %1320 = vst.msk [vmem:[%s447_s22] sm:$0xff] %vm514_vm0, %v1318_v45 }
 0xac7   : > { %v1301_v46 = vpop.f32.mrf.mxu2  ;;  %v1315_v48 = vpop.f32.mrf.mxu0 }
 0xac8   : > { %v1302_v47 = vadd.f32 %v1660_v41, %v1301_v46 }
 0xaca   : > { %v1316_v49 = vadd.f32 %v1315_v48, %v1302_v47 }
 0xacc   : > { %v1319_v50 = vadd.f32 %v1316_v49, %v2006_v36 }
 0xace   : > { %1321 = vst.msk [vmem:[%s447_s22 + $0x8] sm:$0xff] %vm514_vm0, %v1319_v50 }
 0xacf PF: > { %s24_s21 = sadd.s32 1, %s1785_s21  }
 0xad0   : > { %p21_p7 = scmp.ge.s32.totalorder %s24_s21, 4  }
 0xad2   :  { %23 = sbr.rel (!%p21_p7) target bundleno = 2 (0x2), region = 107 }
 0xad7   :  { %1343 = vsyncpa [#allocation4], 1 }
 0xad8   :  { %1345 = vsyncpa [#allocation4 + $0x1], 1 }
 0xad9   :  { %1346 = vsyncpa [#allocation6], 1 }

// kernel: _lambda_.7
= control target key start
LH: loop header
LB: loop body
LE: loop exit
PB: predicated region body
PF: predicated region fallthrough
CT: control target
= control target key end

     0   :  { %17 = vsyncpa [#allocation4], 0  ;;  %s1788_s21 = smov 0   ;;  %s2104_s0 = inlined_call_operand.vmem [shape: f32[2,16,64], index: 0, kind: input, shape index: {}]   ;;  %s2105_s1 = inlined_call_operand.vmem [shape: f32[1,64], index: 1, kind: input, shape index: {}, may-alias: {1,6}]   ;;  %s2106_s2 = inlined_call_operand.vmem [shape: f32[1,64], index: 2, kind: input, shape index: {}, may-alias: {2,5,7,11}]   ;;  %s2107_s3 = inlined_call_operand.vmem [shape: bf16[64,192], index: 3, kind: input, shape index: {}]   ;;  %s2108_s4 = inlined_call_operand.hbm [shape: bf16[64,64], index: 4, kind: input, shape index: {}]   ;;  %s2109_s5 = inlined_call_operand.vmem [shape: f32[1,64], index: 5, kind: input, shape index: {}, may-alias: {2,5,7,11}]   ;;  %s2110_s6 = inlined_call_operand.vmem [shape: f32[1,64], index: 6, kind: input, shape index: {}, may-alias: {1,6}]   ;;  %s2111_s7 = inlined_call_operand.vmem [shape: f32[1,64], index: 7, kind: input, shape index: {}, may-alias: {2,5,7,11}]   ;;  %s2112_s8 = inlined_call_operand.vmem [shape: bf16[64,256], index: 8, kind: input, shape index: {}]   ;;  %s2113_s9 = inlined_call_operand.vmem [shape: f32[1,256], index: 9, kind: input, shape index: {}]   ;;  %s2114_s10 = inlined_call_operand.vmem [shape: bf16[256,64], index: 10, kind: input, shape index: {}]   ;;  %s2115_s11 = inlined_call_operand.vmem [shape: f32[1,64], index: 11, kind: input, shape index: {}, may-alias: {2,5,7,11}]   ;;  %s2116_s12 = inlined_call_operand.vmem [shape: f32[2,16,64], index: 12, kind: output, shape index: {}]  }
   0x1 LB: > { %s331_s24 = sshll.u32 %s2108_s4, 4  ;;  %s1372_s25 = sadd.s32 4294967295, %s1710_s21   ;;  %s1710_s21 = sphi %s1788_s21, %s23_s21   ;;  %s332_s24 = int_to_ptr.hbm [resolvable:$true] %s331_s24 }
   0x2   : > { %p1374_p0 = scmp.ge.s32.totalorder %s1710_s21, 1  ;;  %p311_p1 = scmp.lt.s32.totalorder %s1710_s21, 3 }
   0x3   : > { %p1593_p2 = scmp.eq.s32.totalorder %s1372_s25, 0  ;;  %s1712_s26 = smov [#allocation3]  }
   0x4   : > { %p312_p3 = pnand %p1374_p0, %p311_p1  ;;  %s333_s27 = sshll.u32 %s1712_s26, 4  ;;  %s334_s27 = int_to_ptr.vmem [resolvable:$true] %s333_s27 }
   0x5   : > { %s1713_s28 = smov 64   ;;  %s1714_s29 = smov 4  }
   0x6   : > { %p1589_p4 = pneg %p312_p3  ;;  %378 = sbr.rel (%p312_p3) target bundleno = 2761 (0xac9), region = 68 }
   0x8   : > { %p1590_p5 = pnand %p1593_p2, %p1589_p4 }
   0xa   : > { %1592 = dma.hbm_to_vmem [thread:$0]  (!%p1590_p5), %s332_s24, 512, %s334_s27, [#allocation4], %s1713_s28, %s1713_s28, %s1714_s29  }
   0xb   : > { %1705 = dma.done.wait (%p1593_p2), [#allocation4], 512  }
   0xc   : > { %1707 = vsyncadd (%p1593_p2), [#allocation4], 4294966784  ;;  %p421_p6 = scmp.lt.s32.totalorder %s1372_s25, 1  ;;  %vm497_vm0 = vcmask 523264   ;;  %v1715_v4 = vmov 64.0   ;;  %s1716_s23 = smov 64  }
   0xd   : > { %1620 = vrcp.f32 %v1715_v4  ;;  %v1409_v21 = vld [vmem:[%s2107_s3 + $0x30] sm:$0xf]  ;;  %v1555_v22 = vld [vmem:[%s2107_s3 + $0x34] sm:$0xf0]  ;;  %v1401_v24 = vld [vmem:[%s2107_s3 + $0x20] sm:$0xf] }
   0xe   : > { %s2118_s25 = smov (!%p421_p6, %s1372_s25), 1  ;;  %v1410_v23 = vor.u32 %v1555_v22, %v1409_v21  ;;  %v1553_v25 = vld [vmem:[%s2107_s3 + $0x24] sm:$0xf0]  ;;  %v1393_v27 = vld [vmem:[%s2107_s3 + $0x10] sm:$0xf]  ;;  %vm640_vm8 = vcmask 130048  }
   0xf   : > { %s1546_s30 = sshll.u32 %s2118_s25, 4  ;;  %v1402_v26 = vor.u32 %v1553_v25, %v1401_v24  ;;  %v1551_v28 = vld [vmem:[%s2107_s3 + $0x14] sm:$0xf0]  ;;  %v1385_v30 = vld [vmem:[%s2107_s3] sm:$0xf]  ;;  %s1717_s24 = smov 112  }
  0x10   : > { %s425_s15 = scalar_lea.vmem %s2104_s0, %s1546_s30  ;;  %607 = vmatpush.bf16.msra.mxu1 %v1410_v23  ;;  %v1394_v29 = vor.u32 %v1551_v28, %v1393_v27  ;;  %v1549_v31 = vld [vmem:[%s2107_s3 + $0x4] sm:$0xf0]  ;;  %v1554_v36 = vld [vmem:[%s2107_s3 + $0x34] sm:$0xf]  ;;  %v1411_v37 = vld [vmem:[%s2107_s3 + $0x38] sm:$0xf0] }
  0x11   : > { %v1807_v0 = vld [vmem:[%s425_s15] sm:$0xff]  ;;  %v1811_v2 = vld [vmem:[%s425_s15 + $0x8] sm:$0xff]  ;;  %v1386_v33 = vor.u32 %v1549_v31, %v1385_v30  ;;  %v1414_v38 = vor.u32 %v1554_v36, %v1411_v37  ;;  %v1550_v44 = vld [vmem:[%s2107_s3 + $0x14] sm:$0xf]  ;;  %s1718_s26 = smov 48   ;;  %vm707_vm9 = vcmask 125952   ;;  %s430_s15 = scalar_lea.vmem %s2116_s12, %s1546_s30 }
  0x12   : > { %v498_v1 = vsel %vm497_vm0, %v1807_v0, 0.0  ;;  %v501_v3 = vsel %vm497_vm0, %v1811_v2, 0.0  ;;  %v1552_v39 = vld [vmem:[%s2107_s3 + $0x24] sm:$0xf]  ;;  %v1403_v40 = vld [vmem:[%s2107_s3 + $0x28] sm:$0xf0] }
  0x13   : > { %499 = vadd.xlane.f32.xlu0 %v498_v1  ;;  %v1621_v5 = vpop.eup %1620  ;;  %v1406_v42 = vor.u32 %v1552_v39, %v1403_v40  ;;  %v1395_v45 = vld [vmem:[%s2107_s3 + $0x18] sm:$0xf0]  ;;  %v1548_v50 = vld [vmem:[%s2107_s3 + $0x4] sm:$0xf]  ;;  %v1387_v51 = vld [vmem:[%s2107_s3 + $0x8] sm:$0xf0] }
  0x14   : > { %v505_v6 = vmul.f32 64.0, %v1621_v5  ;;  %vm509_vm1 = vweird.f32 %v1621_v5  ;;  %608 = vmatpush.bf16.msra.mxu1 %v1402_v26  ;;  %v1398_v49 = vor.u32 %v1550_v44, %v1395_v45  ;;  %v1390_v54 = vor.u32 %v1548_v50, %v1387_v51  ;;  %v1614_v1 = vld [vmem:[%s2105_s1] ss:$0 sm:$0xff]  ;;  %s1719_s27 = smov 80   ;;  %s1720_s28 = smov 16  }
  0x15   : > { %s1721_s29 = smov 32   ;;  %s1722_s13 = smov 96   ;;  %vm787_vm10 = vcmask 257152   ;;  %vm867_vm11 = vcmask 388352   ;;  %vm947_vm12 = vcmask 519552  }
  0x16   : > { %v506_v7 = vsub.f32 1.0, %v505_v6 }
  0x18   : > { %v507_v8 = vmul.f32 %v1621_v5, %v506_v7  ;;  %609 = vmatpush.bf16.msra.mxu1 %v1394_v29  ;;  %v1615_v7 = vld [vmem:[%s2106_s2] ss:$0 sm:$0xff] }
  0x1a   : > { %v508_v9 = vadd.f32 %v1621_v5, %v507_v8 }
  0x1b   : > { %502 = vadd.xlane.f32.xlu0 %v501_v3 }
  0x1c   : > { %v1815_v10 = vsel %vm509_vm1, %v1621_v5, %v508_v9  ;;  %610 = vmatpush.bf16.msra.mxu1 %v1386_v33 }
  0x20   : > { %621 = vmatpush.bf16.msrb.mxu1 %v1414_v38 }
  0x24   : > { %622 = vmatpush.bf16.msrb.mxu1 %v1406_v42 }
  0x28   : > { %623 = vmatpush.bf16.msrb.mxu1 %v1398_v49 }
  0x2c   : > { %624 = vmatpush.bf16.msrb.mxu1 %v1390_v54 }
  0x86   : > { %v500_v11 = vpop.xlane.xlu0 %499 }
  0x87   : > { %v511_v12 = vmul.f32 %v1815_v10, %v500_v11 }
  0x89   : > { %v1819_v13 = vsub.f32 %v1807_v0, %v511_v12 }
  0x8b   : > { %v515_v14 = vmul.f32 %v1819_v13, %v1819_v13 }
  0x8d   : > { %v517_v15 = vsel %vm497_vm0, %v515_v14, 0.0 }
  0x8e   : > { %518 = vadd.xlane.f32.xlu1 %v517_v15  ;;  %v503_v16 = vpop.xlane.xlu0 %502 }
  0x8f   : > { %v512_v17 = vmul.f32 %v1815_v10, %v503_v16 }
  0x91   : > { %v1826_v18 = vsub.f32 %v1811_v2, %v512_v17 }
  0x93   : > { %v516_v19 = vmul.f32 %v1826_v18, %v1826_v18 }
  0x95   : > { %v520_v20 = vsel %vm497_vm0, %v516_v19, 0.0 }
  0x96   : > { %521 = vadd.xlane.f32.xlu1 %v520_v20 }
 0x101   : > { %v519_v32 = vpop.xlane.xlu1 %518 }
 0x102   : > { %v523_v34 = vmul.f32 %v519_v32, %v1815_v10 }
 0x104   : > { %v525_v35 = vadd.f32 1e-05, %v523_v34 }
 0x106   : > { %1622 = vrsqrt.f32 %v525_v35  ;;  %vm533_vm3 = vweird.f32 %v525_v35 }
 0x109   : > { %v522_v41 = vpop.xlane.xlu1 %521 }
 0x10a   : > { %v524_v43 = vmul.f32 %v522_v41, %v1815_v10 }
 0x10c   : > { %v1623_v46 = vpop.eup %1622  ;;  %v526_v47 = vadd.f32 1e-05, %v524_v43 }
 0x10d   : > { %v528_v48 = vmul.f32 %v1623_v46, %v525_v35  ;;  %vm534_vm2 = vweird.f32 %v1623_v46 }
 0x10e   : > { %1624 = vrsqrt.f32 %v526_v47  ;;  %vm535_vm4 = vmor %vm533_vm3, %vm534_vm2  ;;  %vm543_vm6 = vweird.f32 %v526_v47 }
 0x10f   : > { %v529_v52 = vmul.f32 %v1623_v46, %v528_v48 }
 0x111   : > { %v530_v53 = vmul.f32 0.5, %v529_v52 }
 0x113   : > { %v531_v55 = vsub.f32 1.5, %v530_v53 }
 0x114   : > { %v1625_v56 = vpop.eup %1624 }
 0x115   : > { %v532_v57 = vmul.f32 %v1623_v46, %v531_v55  ;;  %v538_v58 = vmul.f32 %v1625_v56, %v526_v47  ;;  %vm544_vm5 = vweird.f32 %v1625_v56 }
 0x116   : > { %vm545_vm7 = vmor %vm543_vm6, %vm544_vm5 }
 0x117   : > { %v539_v59 = vmul.f32 %v1625_v56, %v538_v58  ;;  %v536_v60 = vsel %vm535_vm4, %v1623_v46, %v532_v57 }
 0x118   : > { %v547_v63 = vmul.f32 %v536_v60, %v1819_v13 }
 0x119   : > { %v540_v61 = vmul.f32 0.5, %v539_v59 }
 0x11a   : > { %v552_v6 = vmul.f32 %v1614_v1, %v547_v63 }
 0x11b   : > { %v541_v62 = vsub.f32 1.5, %v540_v61 }
 0x11c   : > { %v557_v9 = vadd.f32 %v1615_v7, %v552_v6 }
 0x11d   : > { %v542_v3 = vmul.f32 %v1625_v56, %v541_v62 }
 0x11f   : > { %v546_v4 = vsel %vm545_vm7, %v1625_v56, %v542_v3 }
 0x120   : > { %v548_v5 = vmul.f32 %v546_v4, %v1826_v18 }
 0x122   : > { %v553_v8 = vmul.f32 %v1614_v1, %v548_v5 }
 0x124   : > { %v558_v11 = vadd.f32 %v1615_v7, %v553_v8 }
 0x126   : > { %v559_v12 = vpack.c.bf16 %v558_v11, %v557_v9 }
 0x128   : > { %1415 = vmatmul.msk.bf16.vlgmr.msra.gmra.mxu1 %vm497_vm0, %v559_v12 }
 0x138   : > { %1416 = vmatmul.msk.bf16.vlgmr.msrb.gmra.mxu1 %vm497_vm0, %v559_v12 }
 0x1a5   : > { %v612_v13 = vpop.f32.mrf.mxu1 }
 0x1ad   : > { %v614_v14 = vpop.f32.mrf.mxu1 }
 0x1b5   : > { %v626_v15 = vpop.f32.mrf.mxu1 }
 0x1b6   : > { %v631_v16 = vpack.c.bf16 %v626_v15, %v612_v13 }
 0x1b8   : > { %v635_v18 = vunpack.c.l.b16 %v631_v16  ;;  %v684_v20 = vunpack.c.h.b16 %v631_v16 }
 0x1bd   : > { %v628_v17 = vpop.f32.mrf.mxu1 }
 0x1be   : > { %v632_v19 = vpack.c.bf16 %v628_v17, %v614_v14 }
 0x1c0   : > { %v636_v21 = vunpack.c.l.b16 %v632_v19  ;;  %v685_v22 = vunpack.c.h.b16 %v632_v19 }
 0x1c2   : > { %v1891_v23 = vpack.c.b16 %v636_v21, %v635_v18  ;;  %v1893_v24 = vpack.c.b16 %v685_v22, %v684_v20 }
 0x1c4   : > { %698 = vmatpush.bf16.msra.mxu3 %v1893_v24  ;;  %638 = vrot.lane.b32.xlu2 %v1891_v23, %s1716_s23 }
 0x21e   : > { %v639_v25 = vpop.permute.xlu2 %638 }
 0x21f   : > { %v645_v26 = vsel %vm640_vm8, %v639_v25, 0 }
 0x220   : > { %654 = vmatpush.bf16.xpose.msra.mxu2 %v645_v26 }
 0x227   : > { %1417 = vmatmul.msk.bf16.vlgmr.msra.gmra.mxu2 %vm640_vm8, %v1891_v23 }
 0x2aa   : > { %v656_v27 = vpop.f32.mrf.mxu2 }
 0x2ab   : > { %v661_v28 = vsel %vm640_vm8, %v656_v27, -inf }
 0x2ac   : > { %662 = vmax.xlane.f32.xlu2 %v661_v28 }
 0x2b2   : > { %v658_v29 = vpop.f32.mrf.mxu2 }
 0x2b3   : > { %v664_v30 = vsel %vm640_vm8, %v658_v29, -inf }
 0x2b4   : > { %665 = vmax.xlane.f32.xlu0 %v664_v30 }
 0x2c4   : > { %757 = vrot.lane.b32.xlu2 %v1893_v24, %s1717_s24 }
 0x31f   : > { %v663_v31 = vpop.xlane.xlu2 %662 }
 0x320   : > { %v667_v32 = vsub.f32 %v656_v27, %v663_v31 }
 0x322   : > { %v669_v33 = vmul.f32 1.442695, %v667_v32 }
 0x324   : > { %1626 = vpow2.f32 %v669_v33 }
 0x327   : > { %v666_v34 = vpop.xlane.xlu0 %665  ;;  %v758_v50 = vpop.permute.xlu2 %757 }
 0x328   : > { %v668_v35 = vsub.f32 %v658_v29, %v666_v34 }
 0x32a   : > { %v1627_v36 = vpop.eup %1626  ;;  %v671_v37 = vmul.f32 1.442695, %v668_v35 }
 0x32b   : > { %v673_v38 = vsel %vm640_vm8, %v1627_v36, 0.0 }
 0x32c   : > { %1628 = vpow2.f32 %v671_v37  ;;  %674 = vadd.xlane.f32.xlu1 %v673_v38 }
 0x332   : > { %v1629_v39 = vpop.eup %1628 }
 0x333   : > { %v676_v40 = vsel %vm640_vm8, %v1629_v39, 0.0 }
 0x334   : > { %677 = vadd.xlane.f32.xlu0 %v676_v40 }
 0x345   : > { %712 = vrot.lane.b32.xlu1 %v1891_v23, %s1718_s26 }
 0x348   : > { %710 = vrot.lane.b32.xlu0 %v1891_v23, %s1717_s24 }
 0x39f   : > { %v675_v41 = vpop.xlane.xlu1 %674 }
 0x3a0   : > { %1630 = vrcp.f32 %v675_v41 }
 0x3a6   : > { %v1631_v43 = vpop.eup %1630 }
 0x3a7   : > { %v678_v42 = vpop.xlane.xlu0 %677  ;;  %v681_v45 = vmul.f32 %v1631_v43, %v1627_v36 }
 0x3a8   : > { %1632 = vrcp.f32 %v678_v42 }
 0x3ae   : > { %v1633_v44 = vpop.eup %1632 }
 0x3af   : > { %v682_v46 = vmul.f32 %v1633_v44, %v1629_v39 }
 0x3b1   : > { %v683_v47 = vpack.c.bf16 %v682_v46, %v681_v45 }
 0x3b3   : > { %1418 = vmatmul.msk.bf16.vlgmr.msra.gmra.mxu3 %vm640_vm8, %v683_v47 }
 0x3b7   : > { %v713_v48 = vpop.permute.xlu1 %712 }
 0x3b8   : > { %v718_v49 = vsel %vm640_vm8, %v713_v48, 0 }
 0x3b9   : > { %727 = vmatpush.bf16.xpose.msrb.mxu3 %v718_v49 }
 0x3ba   : > { %v711_v51 = vpop.permute.xlu0 %710 }
 0x3c1   : > { %770 = vmatpush.bf16.msra.mxu3 %v758_v50 }
 0x3c3   : > { %1419 = vmatmul.msk.bf16.vlgmr.msrb.gmra.mxu3 %vm640_vm8, %v711_v51 }
 0x436   : > { %v700_v52 = vpop.f32.mrf.mxu3 }
 0x437   : > { %v705_v53 = vpack.c.bf16 %v700_v52, %v700_v52 }
 0x439   : > { %708 = vst.msk [vmem:[#allocation2] sm:$0xf] %vm707_vm9, %v705_v53 }
 0x43e   : > { %v702_v54 = vpop.f32.mrf.mxu3 }
 0x43f   : > { %v706_v55 = vpack.c.bf16 %v702_v54, %v702_v54 }
 0x441   : > { %709 = vst.msk [vmem:[#allocation2 + $0x4] sm:$0xf] %vm707_vm9, %v706_v55 }
 0x446   : > { %v729_v56 = vpop.f32.mrf.mxu3 }
 0x447   : > { %v734_v57 = vsel %vm640_vm8, %v729_v56, -inf }
 0x448   : > { %735 = vmax.xlane.f32.xlu1 %v734_v57 }
 0x44e   : > { %v731_v58 = vpop.f32.mrf.mxu3 }
 0x44f   : > { %v737_v59 = vsel %vm640_vm8, %v731_v58, -inf }
 0x450   : > { %738 = vmax.xlane.f32.xlu2 %v737_v59 }
 0x461   : > { %870 = vrot.lane.b32.xlu1 %v1891_v23, %s1719_s27 }
 0x468   : > { %872 = vrot.lane.b32.xlu2 %v1891_v23, %s1720_s28 }
 0x4bb   : > { %v736_v60 = vpop.xlane.xlu1 %735 }
 0x4bc   : > { %v740_v61 = vsub.f32 %v729_v56, %v736_v60 }
 0x4be   : > { %v742_v62 = vmul.f32 1.442695, %v740_v61 }
 0x4c0   : > { %1634 = vpow2.f32 %v742_v62 }
 0x4c3   : > { %v739_v63 = vpop.xlane.xlu2 %738 }
 0x4c4   : > { %v741_v1 = vsub.f32 %v731_v58, %v739_v63 }
 0x4c6   : > { %v1635_v3 = vpop.eup %1634  ;;  %v744_v4 = vmul.f32 1.442695, %v741_v1 }
 0x4c7   : > { %v746_v5 = vsel %vm640_vm8, %v1635_v3, 0.0 }
 0x4c8   : > { %1636 = vpow2.f32 %v744_v4  ;;  %747 = vadd.xlane.f32.xlu0 %v746_v5 }
 0x4cb   : > { %v873_v6 = vpop.permute.xlu2 %872 }
 0x4cc   : > { %v878_v7 = vsel %vm640_vm8, %v873_v6, 0 }
 0x4cd   : > { %887 = vmatpush.bf16.xpose.msrb.mxu3 %v878_v7 }
 0x4ce   : > { %v1637_v8 = vpop.eup %1636 }
 0x4cf   : > { %v749_v9 = vsel %vm640_vm8, %v1637_v8, 0.0 }
 0x4d0   : > { %750 = vadd.xlane.f32.xlu2 %v749_v9 }
 0x4d3   : > { %v871_v21 = vpop.permute.xlu1 %870 }
 0x4dc   : > { %792 = vrot.lane.b32.xlu0 %v1891_v23, %s1721_s29 }
 0x4e8   : > { %790 = vrot.lane.b32.xlu2 %v1891_v23, %s1722_s13 }
 0x53b   : > { %v748_v11 = vpop.xlane.xlu0 %747 }
 0x53c   : > { %1638 = vrcp.f32 %v748_v11 }
 0x542   : > { %v1639_v13 = vpop.eup %1638 }
 0x543   : > { %v751_v12 = vpop.xlane.xlu2 %750  ;;  %v754_v15 = vmul.f32 %v1639_v13, %v1635_v3 }
 0x544   : > { %1640 = vrcp.f32 %v751_v12 }
 0x54a   : > { %v1641_v14 = vpop.eup %1640 }
 0x54b   : > { %v755_v16 = vmul.f32 %v1641_v14, %v1637_v8  ;;  %v791_v20 = vpop.permute.xlu2 %790 }
 0x54d   : > { %v756_v17 = vpack.c.bf16 %v755_v16, %v754_v15 }
 0x54e   : > { %v793_v19 = vpop.permute.xlu0 %792 }
 0x54f   : > { %1420 = vmatmul.msk.bf16.vlgmr.msra.gmra.mxu3 %vm640_vm8, %v756_v17  ;;  %v798_v18 = vsel %vm640_vm8, %v793_v19, 0 }
 0x550   : > { %807 = vmatpush.bf16.xpose.msra.mxu0 %v798_v18  ;;  %v1559_v18 = vld [vmem:[#allocation3 + $0x18] sm:$0xff] }
 0x557   : > { %1421 = vmatmul.msk.bf16.vlgmr.msra.gmra.mxu0 %vm640_vm8, %v791_v20  ;;  %v1558_v20 = vld [vmem:[#allocation3 + $0x10] sm:$0xff] }
 0x558   : > { %988 = vmatpush.bf16.msrb.mxu0 %v1559_v18 }
 0x55c   : > { %989 = vmatpush.bf16.msrb.mxu0 %v1558_v20 }
 0x55f   : > { %1423 = vmatmul.msk.bf16.vlgmr.msrb.gmra.mxu3 %vm640_vm8, %v871_v21  ;;  %v1557_v21 = vld [vmem:[#allocation3 + $0x8] sm:$0xff] }
 0x560   : > { %990 = vmatpush.bf16.msrb.mxu0 %v1557_v21 }
 0x5d2   : > { %v772_v22 = vpop.f32.mrf.mxu3 }
 0x5d3   : > { %v777_v53 = vpack.c.bf16 %v772_v22, %v772_v22  ;;  %v1556_v22 = vld [vmem:[#allocation3] sm:$0xff] }
 0x5d4   : > { %v809_v23 = vpop.f32.mrf.mxu0  ;;  %991 = vmatpush.bf16.msrb.mxu0 %v1556_v22 }
 0x5d5   : > { %v814_v25 = vsel %vm640_vm8, %v809_v23, -inf }
 0x5d6   : > { %815 = vmax.xlane.f32.xlu1 %v814_v25 }
 0x5da   : > { %v774_v26 = vpop.f32.mrf.mxu3 }
 0x5db   : > { %v778_v54 = vpack.c.bf16 %v774_v26, %v774_v26 }
 0x5dc   : > { %v811_v29 = vpop.f32.mrf.mxu0 }
 0x5dd   : > { %v817_v32 = vsel %vm640_vm8, %v811_v29, -inf }
 0x5e2   : > { %v889_v27 = vpop.f32.mrf.mxu3 }
 0x5e3   : > { %v894_v28 = vsel %vm640_vm8, %v889_v27, -inf }
 0x5e4   : > { %895 = vmax.xlane.f32.xlu2 %v894_v28 }
 0x5ea   : > { %v891_v30 = vpop.f32.mrf.mxu3 }
 0x5eb   : > { %v897_v31 = vsel %vm640_vm8, %v891_v30, -inf }
 0x5ec   : > { %898 = vmax.xlane.f32.xlu0 %v897_v31  ;;  %818 = vmax.xlane.f32.xlu2 %v817_v32 }
 0x649   : > { %v816_v33 = vpop.xlane.xlu1 %815 }
 0x64a   : > { %v820_v34 = vsub.f32 %v809_v23, %v816_v33 }
 0x64c   : > { %v822_v35 = vmul.f32 1.442695, %v820_v34 }
 0x64e   : > { %1642 = vpow2.f32 %v822_v35 }
 0x654   : > { %v1643_v36 = vpop.eup %1642 }
 0x655   : > { %v826_v37 = vsel %vm640_vm8, %v1643_v36, 0.0 }
 0x656   : > { %827 = vadd.xlane.f32.xlu1 %v826_v37 }
 0x657   : > { %v896_v38 = vpop.xlane.xlu2 %895 }
 0x658   : > { %v900_v39 = vsub.f32 %v889_v27, %v896_v38 }
 0x65a   : > { %v902_v40 = vmul.f32 1.442695, %v900_v39 }
 0x65c   : > { %1644 = vpow2.f32 %v902_v40 }
 0x65f   : > { %v899_v41 = vpop.xlane.xlu0 %898  ;;  %v819_v42 = vpop.xlane.xlu2 %818 }
 0x660   : > { %v901_v43 = vsub.f32 %v891_v30, %v899_v41  ;;  %v821_v44 = vsub.f32 %v811_v29, %v819_v42  ;;  %v1616_v29 = vld [vmem:[%s2109_s5] ss:$0 sm:$0xff] }
 0x662   : > { %v1645_v45 = vpop.eup %1644  ;;  %v904_v46 = vmul.f32 1.442695, %v901_v43  ;;  %v824_v47 = vmul.f32 1.442695, %v821_v44 }
 0x663   : > { %v906_v48 = vsel %vm640_vm8, %v1645_v45, 0.0 }
 0x664   : > { %1646 = vpow2.f32 %v904_v46  ;;  %907 = vadd.xlane.f32.xlu2 %v906_v48  ;;  %v1472_v46 = vld [vmem:[%s2112_s8 + $0x30] sm:$0xf]  ;;  %v1566_v48 = vld [vmem:[%s2112_s8 + $0x34] sm:$0xf] }
 0x665   : > { %1648 = vpow2.f32 %v824_v47  ;;  %v1567_v47 = vld [vmem:[%s2112_s8 + $0x34] sm:$0xf0] }
 0x66a   : > { %v1647_v49 = vpop.eup %1646 }
 0x66b   : > { %v1649_v50 = vpop.eup %1648  ;;  %v909_v51 = vsel %vm640_vm8, %v1647_v49, 0.0 }
 0x66c   : > { %910 = vadd.xlane.f32.xlu0 %v909_v51  ;;  %v829_v52 = vsel %vm640_vm8, %v1649_v50, 0.0 }
 0x66d   : > { %830 = vadd.xlane.f32.xlu2 %v829_v52  ;;  %v1464_v52 = vld [vmem:[%s2112_s8 + $0x20] sm:$0xf] }
 0x66f   : > { %837 = vrot.lane.b32.xlu1 %v1893_v24, %s1722_s13 }
 0x680   : > { %917 = vrot.lane.b32.xlu0 %v1893_v24, %s1719_s27 }
 0x685   : > { %781 = vrot.lane.b32.xlu2 %v777_v53, %s1720_s28  ;;  %v1565_v53 = vld [vmem:[%s2112_s8 + $0x24] sm:$0xf0] }
 0x688   : > { %783 = vrot.lane.b32.xlu0 %v778_v54, %s1720_s28  ;;  %v1564_v54 = vld [vmem:[%s2112_s8 + $0x24] sm:$0xf] }
 0x6c9   : > { %v828_v56 = vpop.xlane.xlu1 %827 }
 0x6ca   : > { %1650 = vrcp.f32 %v828_v56  ;;  %v1466_v56 = vld [vmem:[%s2112_s8 + $0x28] sm:$0xf0] }
 0x6d0   : > { %v1651_v60 = vpop.eup %1650 }
 0x6d1   : > { %v834_v62 = vmul.f32 %v1651_v60, %v1643_v36  ;;  %v1562_v60 = vld [vmem:[%s2112_s8 + $0x14] sm:$0xf] }
 0x6d7   : > { %v908_v55 = vpop.xlane.xlu2 %907 }
 0x6df   : > { %v911_v59 = vpop.xlane.xlu0 %910 }
 0x6e0   : > { %v831_v57 = vpop.xlane.xlu2 %830 }
 0x6e1   : > { %1652 = vrcp.f32 %v831_v57  ;;  %v838_v58 = vpop.permute.xlu1 %837  ;;  %v1469_v57 = vor.u32 %v1564_v54, %v1466_v56  ;;  %v1576_v56 = vld [vmem:[%s2114_s10 + $0x40] sm:$0xff] }
 0x6e2   : > { %850 = vmatpush.bf16.msra.mxu1 %v838_v58  ;;  %1654 = vrcp.f32 %v911_v59  ;;  %v1456_v58 = vld [vmem:[%s2112_s8 + $0x10] sm:$0xf]  ;;  %v1563_v59 = vld [vmem:[%s2112_s8 + $0x14] sm:$0xf0] }
 0x6e3   : > { %1656 = vrcp.f32 %v908_v55  ;;  %v1465_v55 = vor.u32 %v1565_v53, %v1464_v52  ;;  %v1577_v53 = vld [vmem:[%s2114_s10 + $0x48] sm:$0xff] }
 0x6e7   : > { %v1653_v61 = vpop.eup %1652 }
 0x6e8   : > { %v835_v24 = vmul.f32 %v1653_v61, %v1649_v50  ;;  %v782_v63 = vpop.permute.xlu2 %781  ;;  %v1655_v3 = vpop.eup %1654  ;;  %v1474_v50 = vld [vmem:[%s2112_s8 + $0x38] sm:$0xf0]  ;;  %v1457_v61 = vor.u32 %v1563_v59, %v1456_v58 }
 0x6e9   : > { %788 = vst.msk [vmem:[#allocation2] sm:$0xf] %vm787_vm10, %v782_v63  ;;  %v1657_v4 = vpop.eup %1656  ;;  %v915_v5 = vmul.f32 %v1655_v3, %v1647_v49  ;;  %v1473_v49 = vor.u32 %v1567_v47, %v1472_v46  ;;  %v1477_v51 = vor.u32 %v1566_v48, %v1474_v50  ;;  %v1448_v3 = vld [vmem:[%s2112_s8] sm:$0xf]  ;;  %v1570_v46 = vld [vmem:[%s2114_s10 + $0x10] sm:$0xff]  ;;  %v1579_v47 = vld [vmem:[%s2114_s10 + $0x58] sm:$0xff] }
 0x6ea   : > { %v836_v1 = vpack.c.bf16 %v835_v24, %v834_v62  ;;  %v914_v6 = vmul.f32 %v1657_v4, %v1645_v45  ;;  %v1458_v62 = vld [vmem:[%s2112_s8 + $0x18] sm:$0xf0]  ;;  %v1561_v4 = vld [vmem:[%s2112_s8 + $0x4] sm:$0xf0]  ;;  %v1578_v50 = vld [vmem:[%s2114_s10 + $0x50] sm:$0xff] }
 0x6eb   : > { %1112 = vmatpush.bf16.msrb.mxu1 %v1473_v49  ;;  %1126 = vmatpush.bf16.msra.mxu3 %v1477_v51  ;;  %v1461_v63 = vor.u32 %v1562_v60, %v1458_v62  ;;  %v1569_v48 = vld [vmem:[%s2114_s10 + $0x8] sm:$0xff]  ;;  %v463_v49 = vld [vmem:[%s2113_s9] sm:$0x3] }
 0x6ec   : > { %1422 = vmatmul.msk.bf16.vlgmr.msra.gmra.mxu1 %vm640_vm8, %v836_v1  ;;  %v916_v8 = vpack.c.bf16 %v915_v5, %v914_v6  ;;  %v1560_v5 = vld [vmem:[%s2112_s8 + $0x4] sm:$0xf]  ;;  %v1061_v52 = vperm.slane %v463_v49, 0  ;;  %v1062_v58 = vperm.slane %v463_v49, 1 }
 0x6ed   : > { %v1568_v51 = vld [vmem:[%s2114_s10] sm:$0xff] }
 0x6ef   : > { %1113 = vmatpush.bf16.msrb.mxu1 %v1465_v55  ;;  %1127 = vmatpush.bf16.msra.mxu3 %v1469_v57 }
 0x6f2   : > { %v918_v7 = vpop.permute.xlu0 %917 }
 0x6f3   : > { %930 = vmatpush.bf16.msrb.mxu2 %v918_v7  ;;  %1114 = vmatpush.bf16.msrb.mxu1 %v1457_v61  ;;  %v1449_v7 = vor.u32 %v1561_v4, %v1448_v3 }
 0x6f4   : > { %1128 = vmatpush.bf16.msra.mxu3 %v1461_v63 }
 0x6f6   : > { %1424 = vmatmul.msk.bf16.vlgmr.msrb.gmra.mxu2 %vm640_vm8, %v916_v8  ;;  %v1450_v8 = vld [vmem:[%s2112_s8 + $0x8] sm:$0xf0] }
 0x6f7   : > { %1115 = vmatpush.bf16.msrb.mxu1 %v1449_v7 }
 0x6fa   : > { %v784_v9 = vpop.permute.xlu0 %783 }
 0x6fb   : > { %789 = vst.msk [vmem:[#allocation2 + $0x4] sm:$0xf] %vm787_vm10, %v784_v9  ;;  %v1453_v9 = vor.u32 %v1560_v5, %v1450_v8 }
 0x6fd   : > { %1129 = vmatpush.bf16.msra.mxu3 %v1453_v9 }
 0x769   : > { %v852_v11 = vpop.f32.mrf.mxu1 }
 0x76a   : > { %v857_v12 = vpack.c.bf16 %v852_v11, %v852_v11 }
 0x76c   : > { %861 = vrot.lane.b32.xlu1 %v857_v12, %s1721_s29 }
 0x771   : > { %v854_v13 = vpop.f32.mrf.mxu1 }
 0x772   : > { %v858_v14 = vpack.c.bf16 %v854_v13, %v854_v13 }
 0x774   : > { %863 = vrot.lane.b32.xlu0 %v858_v14, %s1721_s29 }
 0x779   : > { %v932_v15 = vpop.f32.mrf.mxu2 }
 0x77a   : > { %v937_v16 = vpack.c.bf16 %v932_v15, %v932_v15 }
 0x77c   : > { %941 = vrot.lane.b32.xlu2 %v937_v16, %s1718_s26 }
 0x781   : > { %v934_v17 = vpop.f32.mrf.mxu2 }
 0x782   : > { %v938_v19 = vpack.c.bf16 %v934_v17, %v934_v17 }
 0x784   : > { %943 = vrot.lane.b32.xlu1 %v938_v19, %s1718_s26 }
 0x7d6   : > { %v942_v25 = vpop.permute.xlu2 %941 }
 0x7de   : > { %v862_v23 = vpop.permute.xlu1 %861 }
 0x7df   : > { %868 = vst.msk [vmem:[#allocation2] sm:$0xf] %vm867_vm11, %v862_v23 }
 0x7e0   : > { %948 = vst.msk [vmem:[#allocation2] sm:$0xf] %vm947_vm12, %v942_v25 }
 0x7e6   : > { %v864_v26 = vpop.permute.xlu0 %863 }
 0x7e7   : > { %869 = vst.msk [vmem:[#allocation2 + $0x4] sm:$0xf] %vm867_vm11, %v864_v26 }
 0x7f6   : > { %v944_v27 = vpop.permute.xlu1 %943 }
 0x7f7   : > { %949 = vst.msk [vmem:[#allocation2 + $0x4] sm:$0xf] %vm947_vm12, %v944_v27 }
 0x7fe   : > { %v1584_v28 = vld [vmem:[#allocation2] sm:$0xff] }
 0x7ff   : > { %1445 = vmatmul.msk.bf16.vlgmr.msrb.gmra.mxu0 %vm497_vm0, %v1584_v28 }
 0x87c   : > { %v993_v30 = vpop.f32.mrf.mxu0 }
 0x87d   : > { %v998_v31 = vadd.f32 %v993_v30, %v1807_v0  ;;  %v1618_v30 = vld [vmem:[%s2111_s7] ss:$0 sm:$0xff] }
 0x87f   : > { %v1955_v32 = vadd.f32 %v1616_v29, %v998_v31 }
 0x881   : > { %v1005_v33 = vsel %vm497_vm0, %v1955_v32, 0.0 }
 0x882   : > { %1006 = vadd.xlane.f32.xlu0 %v1005_v33 }
 0x884   : > { %v995_v34 = vpop.f32.mrf.mxu0 }
 0x885   : > { %v999_v35 = vadd.f32 %v995_v34, %v1811_v2 }
 0x887   : > { %v1960_v36 = vadd.f32 %v1616_v29, %v999_v35 }
 0x889   : > { %v1008_v37 = vsel %vm497_vm0, %v1960_v36, 0.0 }
 0x88a   : > { %1009 = vadd.xlane.f32.xlu2 %v1008_v37 }
 0x8f5   : > { %v1007_v38 = vpop.xlane.xlu0 %1006 }
 0x8f6   : > { %v1011_v39 = vmul.f32 %v1007_v38, %v1815_v10 }
 0x8f8   : > { %v1966_v0 = vsub.f32 %v1955_v32, %v1011_v39  ;;  %v1575_v39 = vld [vmem:[%s2114_s10 + $0x38] sm:$0xff] }
 0x8f9   : > { %1273 = vmatpush.bf16.msra.mxu2 %v1575_v39 }
 0x8fa   : > { %v1015_v40 = vmul.f32 %v1966_v0, %v1966_v0 }
 0x8fc   : > { %v1017_v41 = vsel %vm497_vm0, %v1015_v40, 0.0  ;;  %v1583_v40 = vld [vmem:[%s2114_s10 + $0x78] sm:$0xff] }
 0x8fd   : > { %1018 = vadd.xlane.f32.xlu1 %v1017_v41  ;;  %v1010_v42 = vpop.xlane.xlu2 %1009  ;;  %1287 = vmatpush.bf16.msra.mxu0 %v1583_v40  ;;  %v1573_v41 = vld [vmem:[%s2114_s10 + $0x28] sm:$0xff] }
 0x8fe   : > { %v1012_v2 = vmul.f32 %v1010_v42, %v1815_v10  ;;  %v1582_v42 = vld [vmem:[%s2114_s10 + $0x70] sm:$0xff] }
 0x900   : > { %v1973_v43 = vsub.f32 %v1960_v36, %v1012_v2  ;;  %v1572_v2 = vld [vmem:[%s2114_s10 + $0x20] sm:$0xff] }
 0x901   : > { %1288 = vmatpush.bf16.msra.mxu0 %v1582_v42 }
 0x902   : > { %v1016_v44 = vmul.f32 %v1973_v43, %v1973_v43 }
 0x904   : > { %v1020_v45 = vsel %vm497_vm0, %v1016_v44, 0.0  ;;  %v1571_v44 = vld [vmem:[%s2114_s10 + $0x18] sm:$0xff] }
 0x905   : > { %1021 = vadd.xlane.f32.xlu0 %v1020_v45  ;;  %v1580_v45 = vld [vmem:[%s2114_s10 + $0x60] sm:$0xff] }
 0x970   : > { %v1019_v24 = vpop.xlane.xlu1 %1018 }
 0x971   : > { %v1023_v1 = vmul.f32 %v1019_v24, %v1815_v10 }
 0x973   : > { %v1025_v6 = vadd.f32 1e-05, %v1023_v1 }
 0x975   : > { %1658 = vrsqrt.f32 %v1025_v6  ;;  %vm1033_vm14 = vweird.f32 %v1025_v6 }
 0x978   : > { %v1022_v11 = vpop.xlane.xlu0 %1021 }
 0x979   : > { %v1024_v12 = vmul.f32 %v1022_v11, %v1815_v10  ;;  %v1617_v10 = vld [vmem:[%s2110_s6] ss:$0 sm:$0xff] }
 0x97b   : > { %v1659_v13 = vpop.eup %1658  ;;  %v1026_v14 = vadd.f32 1e-05, %v1024_v12 }
 0x97c   : > { %v1028_v15 = vmul.f32 %v1659_v13, %v1025_v6  ;;  %vm1034_vm13 = vweird.f32 %v1659_v13 }
 0x97d   : > { %1660 = vrsqrt.f32 %v1026_v14  ;;  %vm1035_vm15 = vmor %vm1033_vm14, %vm1034_vm13  ;;  %vm1043_vm2 = vweird.f32 %v1026_v14 }
 0x97e   : > { %v1029_v16 = vmul.f32 %v1659_v13, %v1028_v15 }
 0x980   : > { %v1030_v17 = vmul.f32 0.5, %v1029_v16 }
 0x982   : > { %v1031_v19 = vsub.f32 1.5, %v1030_v17 }
 0x983   : > { %v1661_v18 = vpop.eup %1660 }
 0x984   : > { %v1032_v20 = vmul.f32 %v1659_v13, %v1031_v19  ;;  %v1038_v21 = vmul.f32 %v1661_v18, %v1026_v14  ;;  %vm1044_vm1 = vweird.f32 %v1661_v18 }
 0x985   : > { %vm1045_vm3 = vmor %vm1043_vm2, %vm1044_vm1 }
 0x986   : > { %v1039_v22 = vmul.f32 %v1661_v18, %v1038_v21  ;;  %v1036_v23 = vsel %vm1035_vm15, %v1659_v13, %v1032_v20 }
 0x987   : > { %v1047_v27 = vmul.f32 %v1036_v23, %v1966_v0  ;;  %v1574_v0 = vld [vmem:[%s2114_s10 + $0x30] sm:$0xff] }
 0x988   : > { %v1040_v25 = vmul.f32 0.5, %v1039_v22  ;;  %1274 = vmatpush.bf16.msra.mxu2 %v1574_v0 }
 0x989   : > { %v1052_v31 = vmul.f32 %v1617_v10, %v1047_v27 }
 0x98a   : > { %v1041_v26 = vsub.f32 1.5, %v1040_v25 }
 0x98b   : > { %v1057_v35 = vadd.f32 %v1618_v30, %v1052_v31 }
 0x98c   : > { %v1042_v28 = vmul.f32 %v1661_v18, %v1041_v26  ;;  %1275 = vmatpush.bf16.msra.mxu2 %v1573_v41  ;;  %v1619_v41 = vld [vmem:[%s2115_s11] ss:$0 sm:$0xff] }
 0x98e   : > { %v1046_v29 = vsel %vm1045_vm3, %v1661_v18, %v1042_v28 }
 0x98f   : > { %v1048_v33 = vmul.f32 %v1046_v29, %v1973_v43  ;;  %v1581_v43 = vld [vmem:[%s2114_s10 + $0x68] sm:$0xff] }
 0x990   : > { %1276 = vmatpush.bf16.msra.mxu2 %v1572_v2  ;;  %1289 = vmatpush.bf16.msra.mxu0 %v1581_v43 }
 0x991   : > { %v1053_v34 = vmul.f32 %v1617_v10, %v1048_v33 }
 0x993   : > { %v1058_v37 = vadd.f32 %v1618_v30, %v1053_v34 }
 0x994   : > { %1277 = vmatpush.bf16.msra.mxu2 %v1571_v44  ;;  %1290 = vmatpush.bf16.msra.mxu0 %v1580_v45 }
 0x995   : > { %v1059_v38 = vpack.c.bf16 %v1058_v37, %v1057_v35 }
 0x997   : > { %1478 = vmatmul.msk.bf16.vlgmr.msrb.gmra.mxu1 %vm497_vm0, %v1059_v38  ;;  %1479 = vmatmul.msk.bf16.vlgmr.msra.gmra.mxu3 %vm497_vm0, %v1059_v38 }
 0x998   : > { %1278 = vmatpush.bf16.msra.mxu2 %v1570_v46  ;;  %1291 = vmatpush.bf16.msra.mxu0 %v1579_v47 }
 0x99c   : > { %1279 = vmatpush.bf16.msra.mxu2 %v1569_v48  ;;  %1292 = vmatpush.bf16.msra.mxu0 %v1578_v50 }
 0x9a0   : > { %1280 = vmatpush.bf16.msra.mxu2 %v1568_v51  ;;  %1293 = vmatpush.bf16.msra.mxu0 %v1577_v53 }
 0x9a4   : > { %1294 = vmatpush.bf16.msra.mxu0 %v1576_v56 }
 0xa14   : > { %v1117_v54 = vpop.f32.mrf.mxu1 }
 0xa15   : > { %v1118_v55 = vadd.f32 %v1117_v54, %v1061_v52 }
 0xa17   : > { %v1140_v57 = vmul.f32 0.044715, %v1118_v55  ;;  %v1136_v26 = vmul.f32 0.5, %v1118_v55 }
 0xa19   : > { %v1144_v59 = vmul.f32 %v1140_v57, %v1118_v55 }
 0xa1a   : > { %v1131_v60 = vpop.f32.mrf.mxu3 }
 0xa1b   : > { %v1148_v61 = vmul.f32 %v1144_v59, %v1118_v55  ;;  %v1132_v62 = vadd.f32 %v1131_v60, %v1062_v58 }
 0xa1c   : > { %v1119_v24 = vpop.f32.mrf.mxu1 }
 0xa1d   : > { %v1152_v63 = vadd.f32 %v1148_v61, %v1118_v55  ;;  %v1141_v1 = vmul.f32 0.044715, %v1132_v62  ;;  %v1120_v3 = vadd.f32 %v1119_v24, %v1061_v52  ;;  %v1137_v35 = vmul.f32 0.5, %v1132_v62 }
 0xa1f   : > { %v1145_v4 = vmul.f32 %v1141_v1, %v1132_v62  ;;  %v1142_v5 = vmul.f32 0.044715, %v1120_v3  ;;  %v1156_v6 = vmul.f32 0.7978846, %v1152_v63  ;;  %v1138_v10 = vmul.f32 0.5, %v1120_v3 }
 0xa21   : > { %v1149_v7 = vmul.f32 %v1145_v4, %v1132_v62  ;;  %v1146_v8 = vmul.f32 %v1142_v5, %v1120_v3  ;;  %1662 = vtanh.f32 %v1156_v6 }
 0xa22   : > { %v1133_v9 = vpop.f32.mrf.mxu3 }
 0xa23   : > { %v1153_v11 = vadd.f32 %v1149_v7, %v1132_v62  ;;  %v1150_v12 = vmul.f32 %v1146_v8, %v1120_v3  ;;  %v1134_v13 = vadd.f32 %v1133_v9, %v1062_v58 }
 0xa25   : > { %v1154_v14 = vadd.f32 %v1150_v12, %v1120_v3  ;;  %v1143_v15 = vmul.f32 0.044715, %v1134_v13  ;;  %v1157_v16 = vmul.f32 0.7978846, %v1153_v11  ;;  %v1139_v37 = vmul.f32 0.5, %v1134_v13 }
 0xa27   : > { %v1158_v17 = vmul.f32 0.7978846, %v1154_v14  ;;  %v1147_v19 = vmul.f32 %v1143_v15, %v1134_v13  ;;  %v1663_v20 = vpop.eup %1662 }
 0xa28   : > { %v1164_v23 = vadd.f32 1.0, %v1663_v20 }
 0xa29   : > { %v1151_v18 = vmul.f32 %v1147_v19, %v1134_v13  ;;  %1664 = vtanh.f32 %v1158_v17 }
 0xa2a   : > { %1666 = vtanh.f32 %v1157_v16  ;;  %v1168_v29 = vmul.f32 %v1164_v23, %v1136_v26 }
 0xa2b   : > { %v1155_v21 = vadd.f32 %v1151_v18, %v1134_v13 }
 0xa2d   : > { %v1159_v22 = vmul.f32 0.7978846, %v1155_v21 }
 0xa2f   : > { %v1665_v25 = vpop.eup %1664  ;;  %1668 = vtanh.f32 %v1159_v22 }
 0xa30   : > { %v1166_v27 = vadd.f32 1.0, %v1665_v25  ;;  %v1667_v28 = vpop.eup %1666 }
 0xa31   : > { %v1165_v33 = vadd.f32 1.0, %v1667_v28 }
 0xa32   : > { %v1170_v30 = vmul.f32 %v1166_v27, %v1138_v10 }
 0xa33   : > { %v1169_v39 = vmul.f32 %v1165_v33, %v1137_v35 }
 0xa34   : > { %v1172_v31 = vpack.c.bf16 %v1170_v30, %v1168_v29 }
 0xa35   : > { %v1669_v34 = vpop.eup %1668 }
 0xa36   : > { %1281 = vmatmul.bf16.vlgmr.msra.gmra.mxu2 %v1172_v31  ;;  %v1167_v38 = vadd.f32 1.0, %v1669_v34 }
 0xa38   : > { %v1171_v0 = vmul.f32 %v1167_v38, %v1139_v37 }
 0xa3a   : > { %v1173_v40 = vpack.c.bf16 %v1171_v0, %v1169_v39 }
 0xa3c   : > { %1295 = vmatmul.bf16.vlgmr.msra.gmra.mxu0 %v1173_v40 }
 0xab9   : > { %v1282_v42 = vpop.f32.mrf.mxu2  ;;  %v1296_v2 = vpop.f32.mrf.mxu0 }
 0xaba   : > { %v1283_v43 = vadd.f32 %v1619_v41, %v1282_v42 }
 0xabc   : > { %v1297_v44 = vadd.f32 %v1296_v2, %v1283_v43 }
 0xabe   : > { %v1301_v45 = vadd.f32 %v1297_v44, %v1955_v32 }
 0xac0   : > { %1303 = vst.msk [vmem:[%s430_s15] sm:$0xff] %vm497_vm0, %v1301_v45 }
 0xac1   : > { %v1284_v46 = vpop.f32.mrf.mxu2  ;;  %v1298_v48 = vpop.f32.mrf.mxu0 }
 0xac2   : > { %v1285_v47 = vadd.f32 %v1619_v41, %v1284_v46 }
 0xac4   : > { %v1299_v49 = vadd.f32 %v1298_v48, %v1285_v47 }
 0xac6   : > { %v1302_v50 = vadd.f32 %v1299_v49, %v1960_v36 }
 0xac8   : > { %1304 = vst.msk [vmem:[%s430_s15 + $0x8] sm:$0xff] %vm497_vm0, %v1302_v50 }
 0xac9 PF: > { %s23_s21 = sadd.s32 1, %s1710_s21  }
 0xaca   : > { %p20_p7 = scmp.ge.s32.totalorder %s23_s21, 4  }
 0xacc   :  { %22 = sbr.rel (!%p20_p7) target bundleno = 1 (0x1), region = 103 }
 0xad1   :  { %1326 = vsyncpa [#allocation4], 1 }
 0xad2   :  { %1328 = vsyncpa [#allocation4 + $0x1], 1 }

// kernel: _lambda_.8
= control target key start
LH: loop header
LB: loop body
LE: loop exit
PB: predicated region body
PF: predicated region fallthrough
CT: control target
= control target key end

     0   :  { %s2587_s0 = inlined_call_operand.vmem [shape: f32[2,16,64], index: 0, kind: input, shape index: {}]   ;;  %s2588_s1 = inlined_call_operand.vmem [shape: f32[2,16,64], index: 1, kind: input, shape index: {}]   ;;  %s2589_s2 = inlined_call_operand.hbm [shape: bf16[64,64], index: 2, kind: input, shape index: {}]   ;;  %s2590_s3 = inlined_call_operand.hbm [shape: bf16[64,64], index: 3, kind: input, shape index: {}]   ;;  %s2591_s4 = inlined_call_operand.vmem [shape: f32[1,64], index: 4, kind: input, shape index: {}, may-alias: {4,6,9,11,15}]   ;;  %s2592_s5 = inlined_call_operand.vmem [shape: f32[1,64], index: 5, kind: input, shape index: {}, may-alias: {5,10}]   ;;  %s2593_s6 = inlined_call_operand.vmem [shape: f32[1,64], index: 6, kind: input, shape index: {}, may-alias: {4,6,9,11,15}]   ;;  %s2594_s7 = inlined_call_operand.vmem [shape: bf16[64,192], index: 7, kind: input, shape index: {}]   ;;  %s2595_s8 = inlined_call_operand.hbm [shape: bf16[64,64], index: 8, kind: input, shape index: {}]   ;;  %s2596_s9 = inlined_call_operand.vmem [shape: f32[1,64], index: 9, kind: input, shape index: {}, may-alias: {4,6,9,11,15}]   ;;  %s2597_s10 = inlined_call_operand.vmem [shape: f32[1,64], index: 10, kind: input, shape index: {}, may-alias: {5,10}]   ;;  %s2598_s11 = inlined_call_operand.vmem [shape: f32[1,64], index: 11, kind: input, shape index: {}, may-alias: {4,6,9,11,15}]   ;;  %s2599_s12 = inlined_call_operand.vmem [shape: bf16[64,256], index: 12, kind: input, shape index: {}]   ;;  %s2600_s13 = inlined_call_operand.vmem [shape: f32[1,256], index: 13, kind: input, shape index: {}]   ;;  %s2601_s14 = inlined_call_operand.vmem [shape: bf16[256,64], index: 14, kind: input, shape index: {}]   ;;  %s2602_s15 = inlined_call_operand.vmem [shape: f32[1,64], index: 15, kind: input, shape index: {}, may-alias: {4,6,9,11,15}]   ;;  %s2603_s16 = inlined_call_operand.vmem [shape: f32[2,16,64], index: 16, kind: output, shape index: {}]  }
   0x1   :  { %2604 = sst [smem:[#allocation10_spill]] %s2587_s0 }
   0x2   :  { %2605 = sst [smem:[#allocation11_spill]] %s2590_s3 }
   0x3   :  { %21 = vsyncpa [#allocation4], 0 }
   0x4   :  { %22 = vsyncpa [#allocation6], 0  ;;  %s2244_s21 = smov 0  }
   0x5 LB: > { %s2250_s22 = sadd.s32 4294967295, %s2144_s21   ;;  %p1674_p0 = scmp.ge.s32.totalorder %s2144_s21, 1  ;;  %s2144_s21 = sphi %s2244_s21, %s28_s21  }
   0x6   : > { %p405_p1 = scmp.lt.s32.totalorder %s2144_s21, 3  ;;  %p1956_p2 = scmp.eq.s32.totalorder %s2250_s22, 0 }
   0x7   : > { %s2606_s3 = sld [smem:[#allocation11_spill]]  ;;  %s416_s29 = sshll.u32 %s2589_s2, 4  ;;  %s417_s29 = int_to_ptr.hbm [resolvable:$true] %s416_s29 }
   0x8   : > { %p2258_p3 = pnand %p1674_p0, %p405_p1  ;;  %s2146_s30 = smov [#allocation5]  }
   0x9   : > { %s432_s0 = sshll.u32 %s2146_s30, 4  ;;  %s2147_s17 = smov [#allocation3]   ;;  %s433_s0 = int_to_ptr.vmem [resolvable:$true] %s432_s0 }
   0xa   : > { %p1946_p4 = pneg %p2258_p3  ;;  %s418_s18 = sshll.u32 %s2147_s17, 4  ;;  %s419_s18 = int_to_ptr.vmem [resolvable:$true] %s418_s18 }
   0xb   : > { %s456_s23 = sshll.u32 %s2595_s8, 4  ;;  %s2148_s24 = smov 64   ;;  %s457_s23 = int_to_ptr.hbm [resolvable:$true] %s456_s23 }
   0xc   : > { %p1947_p5 = pnand %p1956_p2, %p1946_p4  ;;  %s2150_s27 = smov [#allocation7]  }
   0xd   : > { %s430_s25 = sshll.u32 %s2606_s3, 4  ;;  %s2149_s3 = smov 4   ;;  %s431_s25 = int_to_ptr.hbm [resolvable:$true] %s430_s25 }
   0xe   : > { %1952 = dma.hbm_to_vmem [thread:$0]  (!%p1947_p5), %s431_s25, 512, %s433_s0, [#allocation6], %s2148_s24, %s2148_s24, %s2149_s3  }
   0xf   : > { %1949 = dma.hbm_to_vmem [thread:$0]  (!%p1947_p5), %s417_s29, 512, %s419_s18, [#allocation4], %s2148_s24, %s2148_s24, %s2149_s3  }
  0x10   : > { %s458_s28 = sshll.u32 %s2150_s27, 4  ;;  %511 = sbr.rel (%p2258_p3) target bundleno = 2121 (0x849), region = 84  ;;  %s459_s28 = int_to_ptr.vmem [resolvable:$true] %s458_s28 }
  0x11   : > { %1955 = dma.hbm_to_vmem [thread:$0]  (!%p1947_p5), %s457_s23, 512, %s459_s28, [#allocation6], %s2148_s24, %s2148_s24, %s2149_s3  }
  0x15   : > { %2135 = dma.done.wait (%p1956_p2), [#allocation4], 512  }
  0x16   : > { %2137 = vsyncadd (%p1956_p2), [#allocation4], 4294966784 }
  0x17   : > { %2139 = dma.done.wait (%p1956_p2), [#allocation6], 1024  }
  0x18   : > { %2141 = vsyncadd (%p1956_p2), [#allocation6], 4294966272  ;;  %p577_p6 = scmp.lt.s32.totalorder %s2250_s22, 1  ;;  %v1896_v0 = vld [vmem:[#allocation5 + $0x18] sm:$0xff]  ;;  %v1895_v1 = vld [vmem:[#allocation5 + $0x10] sm:$0xff]  ;;  %vm639_vm0 = vcmask 523264  }
  0x19   : > { %647 = vmatpush.bf16.msra.mxu1 %v1896_v0  ;;  %v1894_v2 = vld [vmem:[#allocation5 + $0x8] sm:$0xff]  ;;  %v1893_v3 = vld [vmem:[#allocation5] sm:$0xff]  ;;  %v1892_v6 = vld [vmem:[#allocation3 + $0x18] sm:$0xff]  ;;  %s2608_s0 = sld [smem:[#allocation10_spill]]  ;;  %v2151_v25 = vmov 64.0   ;;  %s2153_s30 = smov 64  }
  0x1a   : > { %s2610_s22 = smov (!%p577_p6, %s2250_s22), 1  ;;  %v1891_v8 = vld [vmem:[#allocation3 + $0x10] sm:$0xff]  ;;  %v1890_v9 = vld [vmem:[#allocation3 + $0x8] sm:$0xff]  ;;  %v1889_v10 = vld [vmem:[#allocation3] sm:$0xff]  ;;  %1990 = vrcp.f32 %v2151_v25  ;;  %s2156_s18 = smov 80   ;;  %vm909_vm8 = vcmask 130048  }
  0x1b   : > { %s2284_s3 = sshll.u32 %s2610_s22, 4  ;;  %v1983_v16 = vld [vmem:[%s2591_s4] ss:$0 sm:$0xff]  ;;  %v1749_v42 = vld [vmem:[%s2594_s7 + $0x30] sm:$0xf]  ;;  %s2152_s22 = smov 16  }
  0x1c   : > { %s586_s29 = scalar_lea.vmem %s2588_s1, %s2284_s3  ;;  %v1904_v43 = vld [vmem:[%s2594_s7 + $0x34] sm:$0xf0]  ;;  %v1903_v44 = vld [vmem:[%s2594_s7 + $0x34] sm:$0xf]  ;;  %v1751_v46 = vld [vmem:[%s2594_s7 + $0x38] sm:$0xf0] }
  0x1d   : > { %648 = vmatpush.bf16.msra.mxu1 %v1895_v1  ;;  %v604_v4 = vld [vmem:[%s586_s29] sm:$0xff]  ;;  %v605_v5 = vld [vmem:[%s586_s29 + $0x8] sm:$0xff]  ;;  %v1750_v45 = vor.u32 %v1904_v43, %v1749_v42  ;;  %v1754_v47 = vor.u32 %v1903_v44, %v1751_v46  ;;  %v1733_v54 = vld [vmem:[%s2594_s7 + $0x10] sm:$0xf]  ;;  %s2157_s19 = smov 32   ;;  %s2158_s20 = smov 96  }
  0x1e   : > { %v606_v7 = vpack.c.bf16 %v605_v5, %v604_v4  ;;  %v1741_v48 = vld [vmem:[%s2594_s7 + $0x20] sm:$0xf]  ;;  %v1902_v49 = vld [vmem:[%s2594_s7 + $0x24] sm:$0xf0]  ;;  %v1901_v50 = vld [vmem:[%s2594_s7 + $0x24] sm:$0xf]  ;;  %s591_s29 = scalar_lea.vmem %s2603_s16, %s2284_s3 }
  0x1f   : > { %s581_s17 = scalar_lea.vmem %s2608_s0, %s2284_s3  ;;  %876 = vmatpush.bf16.msra.mxu2 %v1750_v45  ;;  %890 = vmatpush.bf16.msra.mxu3 %v1754_v47  ;;  %v1742_v51 = vor.u32 %v1902_v49, %v1741_v48  ;;  %v1743_v52 = vld [vmem:[%s2594_s7 + $0x28] sm:$0xf0]  ;;  %v1900_v55 = vld [vmem:[%s2594_s7 + $0x14] sm:$0xf0]  ;;  %v1899_v56 = vld [vmem:[%s2594_s7 + $0x14] sm:$0xf] }
  0x20   : > { %v593_v11 = vld [vmem:[%s581_s17] sm:$0xff]  ;;  %v594_v12 = vld [vmem:[%s581_s17 + $0x8] sm:$0xff]  ;;  %v1991_v26 = vpop.eup %1990  ;;  %v1746_v53 = vor.u32 %v1901_v50, %v1743_v52  ;;  %v1734_v57 = vor.u32 %v1900_v55, %v1733_v54  ;;  %v1735_v58 = vld [vmem:[%s2594_s7 + $0x18] sm:$0xf0]  ;;  %s2154_s0 = smov 48   ;;  %s2155_s17 = smov 112  }
  0x21   : > { %649 = vmatpush.bf16.msra.mxu1 %v1894_v2  ;;  %v595_v13 = vpack.c.bf16 %v594_v12, %v593_v11  ;;  %v774_v27 = vmul.f32 64.0, %v1991_v26  ;;  %vm778_vm1 = vweird.f32 %v1991_v26  ;;  %v1738_v59 = vor.u32 %v1899_v56, %v1735_v58  ;;  %v1725_v60 = vld [vmem:[%s2594_s7] sm:$0xf]  ;;  %v1898_v61 = vld [vmem:[%s2594_s7 + $0x4] sm:$0xf0] }
  0x22   : > { %v1897_v62 = vld [vmem:[%s2594_s7 + $0x4] sm:$0xf]  ;;  %v1726_v0 = vor.u32 %v1898_v61, %v1725_v60  ;;  %v1727_v1 = vld [vmem:[%s2594_s7 + $0x8] sm:$0xf0]  ;;  %vm976_vm9 = vcmask 125952   ;;  %vm1056_vm10 = vcmask 257152  }
  0x23   : > { %v775_v28 = vsub.f32 1.0, %v774_v27  ;;  %877 = vmatpush.bf16.msra.mxu2 %v1742_v51  ;;  %891 = vmatpush.bf16.msra.mxu3 %v1746_v53  ;;  %vm1136_vm11 = vcmask 388352   ;;  %vm1216_vm12 = vcmask 519552  }
  0x25   : > { %650 = vmatpush.bf16.msra.mxu1 %v1893_v3  ;;  %v776_v29 = vmul.f32 %v1991_v26, %v775_v28  ;;  %v1730_v3 = vor.u32 %v1897_v62, %v1727_v1  ;;  %v1985_v28 = vld [vmem:[%s2593_s6] ss:$0 sm:$0xff] }
  0x27   : > { %v777_v30 = vadd.f32 %v1991_v26, %v776_v29  ;;  %878 = vmatpush.bf16.msra.mxu2 %v1734_v57  ;;  %892 = vmatpush.bf16.msra.mxu3 %v1738_v59 }
  0x28   : > { %1705 = vmatmul.msk.bf16.vlgmr.msra.gmra.mxu1 %vm639_vm0, %v606_v7 }
  0x29   : > { %688 = vmatpush.bf16.msrb.mxu1 %v1892_v6  ;;  %v2307_v31 = vsel %vm778_vm1, %v1991_v26, %v777_v30 }
  0x2b   : > { %879 = vmatpush.bf16.msra.mxu2 %v1726_v0  ;;  %893 = vmatpush.bf16.msra.mxu3 %v1730_v3 }
  0x2d   : > { %689 = vmatpush.bf16.msrb.mxu1 %v1891_v8 }
  0x31   : > { %690 = vmatpush.bf16.msrb.mxu1 %v1890_v9 }
  0x35   : > { %691 = vmatpush.bf16.msrb.mxu1 %v1889_v10 }
  0x38   : > { %1722 = vmatmul.msk.bf16.vlgmr.msrb.gmra.mxu1 %vm639_vm0, %v595_v13 }
  0xa5   : > { %v652_v14 = vpop.f32.mrf.mxu1 }
  0xad   : > { %v654_v15 = vpop.f32.mrf.mxu1 }
  0xb5   : > { %v693_v17 = vpop.f32.mrf.mxu1 }
  0xb6   : > { %v694_v18 = vadd.f32 %v693_v17, %v652_v14 }
  0xb8   : > { %v2299_v19 = vadd.f32 %v1983_v16, %v694_v18 }
  0xba   : > { %v767_v20 = vsel %vm639_vm0, %v2299_v19, 0.0 }
  0xbb   : > { %768 = vadd.xlane.f32.xlu0 %v767_v20 }
  0xbd   : > { %v695_v21 = vpop.f32.mrf.mxu1 }
  0xbe   : > { %v696_v22 = vadd.f32 %v695_v21, %v654_v15 }
  0xc0   : > { %v2303_v23 = vadd.f32 %v1983_v16, %v696_v22  ;;  %v1984_v22 = vld [vmem:[%s2592_s5] ss:$0 sm:$0xff] }
  0xc2   : > { %v770_v24 = vsel %vm639_vm0, %v2303_v23, 0.0 }
  0xc3   : > { %771 = vadd.xlane.f32.xlu0 %v770_v24 }
 0x12e   : > { %v769_v32 = vpop.xlane.xlu0 %768 }
 0x12f   : > { %v780_v33 = vmul.f32 %v2307_v31, %v769_v32 }
 0x131   : > { %v2311_v34 = vsub.f32 %v2299_v19, %v780_v33 }
 0x133   : > { %v784_v35 = vmul.f32 %v2311_v34, %v2311_v34 }
 0x135   : > { %v786_v36 = vsel %vm639_vm0, %v784_v35, 0.0 }
 0x136   : > { %787 = vadd.xlane.f32.xlu1 %v786_v36  ;;  %v772_v37 = vpop.xlane.xlu0 %771 }
 0x137   : > { %v781_v38 = vmul.f32 %v2307_v31, %v772_v37 }
 0x139   : > { %v2318_v39 = vsub.f32 %v2303_v23, %v781_v38 }
 0x13b   : > { %v785_v40 = vmul.f32 %v2318_v39, %v2318_v39 }
 0x13d   : > { %v789_v41 = vsel %vm639_vm0, %v785_v40, 0.0 }
 0x13e   : > { %790 = vadd.xlane.f32.xlu1 %v789_v41 }
 0x1a9   : > { %v788_v63 = vpop.xlane.xlu1 %787 }
 0x1aa   : > { %v792_v2 = vmul.f32 %v788_v63, %v2307_v31 }
 0x1ac   : > { %v794_v4 = vadd.f32 1e-05, %v792_v2 }
 0x1ae   : > { %1992 = vrsqrt.f32 %v794_v4  ;;  %vm802_vm3 = vweird.f32 %v794_v4 }
 0x1b1   : > { %v791_v5 = vpop.xlane.xlu1 %790 }
 0x1b2   : > { %v793_v6 = vmul.f32 %v791_v5, %v2307_v31 }
 0x1b4   : > { %v1993_v7 = vpop.eup %1992  ;;  %v795_v8 = vadd.f32 1e-05, %v793_v6 }
 0x1b5   : > { %v797_v9 = vmul.f32 %v1993_v7, %v794_v4  ;;  %vm803_vm2 = vweird.f32 %v1993_v7 }
 0x1b6   : > { %1994 = vrsqrt.f32 %v795_v8  ;;  %vm804_vm4 = vmor %vm802_vm3, %vm803_vm2  ;;  %vm812_vm6 = vweird.f32 %v795_v8 }
 0x1b7   : > { %v798_v10 = vmul.f32 %v1993_v7, %v797_v9 }
 0x1b9   : > { %v799_v11 = vmul.f32 0.5, %v798_v10 }
 0x1bb   : > { %v800_v12 = vsub.f32 1.5, %v799_v11 }
 0x1bc   : > { %v1995_v13 = vpop.eup %1994 }
 0x1bd   : > { %v801_v14 = vmul.f32 %v1993_v7, %v800_v12  ;;  %v807_v15 = vmul.f32 %v1995_v13, %v795_v8  ;;  %vm813_vm5 = vweird.f32 %v1995_v13 }
 0x1be   : > { %vm814_vm7 = vmor %vm812_vm6, %vm813_vm5 }
 0x1bf   : > { %v808_v16 = vmul.f32 %v1995_v13, %v807_v15  ;;  %v805_v17 = vsel %vm804_vm4, %v1993_v7, %v801_v14 }
 0x1c0   : > { %v816_v21 = vmul.f32 %v805_v17, %v2311_v34 }
 0x1c1   : > { %v809_v18 = vmul.f32 0.5, %v808_v16 }
 0x1c2   : > { %v821_v27 = vmul.f32 %v1984_v22, %v816_v21 }
 0x1c3   : > { %v810_v20 = vsub.f32 1.5, %v809_v18 }
 0x1c4   : > { %v826_v30 = vadd.f32 %v1985_v28, %v821_v27 }
 0x1c5   : > { %v811_v24 = vmul.f32 %v1995_v13, %v810_v20 }
 0x1c7   : > { %v815_v25 = vsel %vm814_vm7, %v1995_v13, %v811_v24 }
 0x1c8   : > { %v817_v26 = vmul.f32 %v815_v25, %v2318_v39 }
 0x1ca   : > { %v822_v29 = vmul.f32 %v1984_v22, %v817_v26 }
 0x1cc   : > { %v827_v32 = vadd.f32 %v1985_v28, %v822_v29 }
 0x1ce   : > { %v828_v33 = vpack.c.bf16 %v827_v32, %v826_v30 }
 0x1d0   : > { %1755 = vmatmul.msk.bf16.vlgmr.msra.gmra.mxu2 %vm639_vm0, %v828_v33  ;;  %1756 = vmatmul.msk.bf16.vlgmr.msra.gmra.mxu3 %vm639_vm0, %v828_v33 }
 0x253   : > { %v881_v34 = vpop.f32.mrf.mxu2  ;;  %v895_v35 = vpop.f32.mrf.mxu3 }
 0x254   : > { %v900_v36 = vpack.c.bf16 %v895_v35, %v881_v34 }
 0x256   : > { %v904_v39 = vunpack.c.l.b16 %v900_v36  ;;  %v953_v41 = vunpack.c.h.b16 %v900_v36 }
 0x25b   : > { %v883_v37 = vpop.f32.mrf.mxu2  ;;  %v897_v38 = vpop.f32.mrf.mxu3 }
 0x25c   : > { %v901_v40 = vpack.c.bf16 %v897_v38, %v883_v37 }
 0x25e   : > { %v905_v42 = vunpack.c.l.b16 %v901_v40  ;;  %v954_v43 = vunpack.c.h.b16 %v901_v40 }
 0x260   : > { %v906_v44 = vpack.c.b16 %v905_v42, %v904_v39  ;;  %v2383_v45 = vpack.c.b16 %v954_v43, %v953_v41 }
 0x262   : > { %967 = vmatpush.bf16.msra.mxu1 %v2383_v45  ;;  %1141 = vrot.lane.b32.xlu1 %v906_v44, %s2152_s22 }
 0x263   : > { %907 = vrot.lane.b32.xlu0 %v906_v44, %s2153_s30  ;;  %981 = vrot.lane.b32.xlu2 %v906_v44, %s2154_s0 }
 0x26b   : > { %979 = vrot.lane.b32.xlu2 %v906_v44, %s2155_s17 }
 0x273   : > { %1139 = vrot.lane.b32.xlu2 %v906_v44, %s2156_s18 }
 0x27b   : > { %1061 = vrot.lane.b32.xlu2 %v906_v44, %s2157_s19 }
 0x283   : > { %1059 = vrot.lane.b32.xlu2 %v906_v44, %s2158_s20 }
 0x2bd   : > { %v982_v46 = vpop.permute.xlu2 %981 }
 0x2be   : > { %v987_v47 = vsel %vm909_vm8, %v982_v46, 0 }
 0x2bf   : > { %996 = vmatpush.bf16.xpose.msrb.mxu2 %v987_v47 }
 0x2c5   : > { %v980_v48 = vpop.permute.xlu2 %979 }
 0x2c6   : > { %1759 = vmatmul.msk.bf16.vlgmr.msrb.gmra.mxu2 %vm909_vm8, %v980_v48 }
 0x2cd   : > { %v1140_v49 = vpop.permute.xlu2 %1139 }
 0x2d4   : > { %v1142_v50 = vpop.permute.xlu1 %1141 }
 0x2d5   : > { %v1147_v51 = vsel %vm909_vm8, %v1142_v50, 0  ;;  %v908_v52 = vpop.permute.xlu0 %907  ;;  %v1062_v53 = vpop.permute.xlu2 %1061 }
 0x2d6   : > { %v914_v54 = vsel %vm909_vm8, %v908_v52, 0  ;;  %1156 = vmatpush.bf16.xpose.msra.mxu2 %v1147_v51  ;;  %v1067_v55 = vsel %vm909_vm8, %v1062_v53, 0 }
 0x2d7   : > { %923 = vmatpush.bf16.xpose.msra.mxu0 %v914_v54 }
 0x2dd   : > { %1763 = vmatmul.msk.bf16.vlgmr.msra.gmra.mxu2 %vm909_vm8, %v1140_v49  ;;  %v1060_v56 = vpop.permute.xlu2 %1059 }
 0x2de   : > { %1757 = vmatmul.msk.bf16.vlgmr.msra.gmra.mxu0 %vm909_vm8, %v906_v44 }
 0x2df   : > { %1076 = vmatpush.bf16.xpose.msrb.mxu0 %v1067_v55 }
 0x2ee   : > { %1761 = vmatmul.msk.bf16.vlgmr.msrb.gmra.mxu0 %vm909_vm8, %v1060_v56 }
 0x349   : > { %v998_v57 = vpop.f32.mrf.mxu2 }
 0x34a   : > { %v1003_v58 = vsel %vm909_vm8, %v998_v57, -inf }
 0x34b   : > { %1004 = vmax.xlane.f32.xlu0 %v1003_v58 }
 0x351   : > { %v1000_v59 = vpop.f32.mrf.mxu2 }
 0x352   : > { %v1006_v60 = vsel %vm909_vm8, %v1000_v59, -inf }
 0x353   : > { %1007 = vmax.xlane.f32.xlu2 %v1006_v60 }
 0x35b   : > { %v925_v61 = vpop.f32.mrf.mxu0 }
 0x35c   : > { %v930_v62 = vsel %vm909_vm8, %v925_v61, -inf }
 0x35d   : > { %931 = vmax.xlane.f32.xlu1 %v930_v62 }
 0x360   : > { %v1158_v63 = vpop.f32.mrf.mxu2 }
 0x361   : > { %v1163_v0 = vsel %vm909_vm8, %v1158_v63, -inf }
 0x362   : > { %1164 = vmax.xlane.f32.xlu2 %v1163_v0 }
 0x363   : > { %v927_v1 = vpop.f32.mrf.mxu0 }
 0x364   : > { %v933_v2 = vsel %vm909_vm8, %v927_v1, -inf }
 0x365   : > { %934 = vmax.xlane.f32.xlu0 %v933_v2 }
 0x368   : > { %v1160_v3 = vpop.f32.mrf.mxu2 }
 0x369   : > { %v1166_v4 = vsel %vm909_vm8, %v1160_v3, -inf }
 0x36a   : > { %1167 = vmax.xlane.f32.xlu1 %v1166_v4 }
 0x36b   : > { %v1078_v5 = vpop.f32.mrf.mxu0 }
 0x36c   : > { %v1083_v6 = vsel %vm909_vm8, %v1078_v5, -inf }
 0x36d   : > { %1084 = vmax.xlane.f32.xlu0 %v1083_v6 }
 0x373   : > { %v1080_v7 = vpop.f32.mrf.mxu0 }
 0x374   : > { %v1086_v8 = vsel %vm909_vm8, %v1080_v7, -inf }
 0x375   : > { %1087 = vmax.xlane.f32.xlu2 %v1086_v8 }
 0x381   : > { %1026 = vrot.lane.b32.xlu0 %v2383_v45, %s2155_s17 }
 0x3be   : > { %v1005_v9 = vpop.xlane.xlu0 %1004 }
 0x3bf   : > { %v1009_v10 = vsub.f32 %v998_v57, %v1005_v9 }
 0x3c1   : > { %v1011_v11 = vmul.f32 1.442695, %v1009_v10 }
 0x3c3   : > { %1996 = vpow2.f32 %v1011_v11 }
 0x3c6   : > { %v1008_v12 = vpop.xlane.xlu2 %1007 }
 0x3c7   : > { %v1010_v13 = vsub.f32 %v1000_v59, %v1008_v12 }
 0x3c9   : > { %v1997_v14 = vpop.eup %1996  ;;  %v1013_v15 = vmul.f32 1.442695, %v1010_v13 }
 0x3ca   : > { %v1015_v16 = vsel %vm909_vm8, %v1997_v14, 0.0 }
 0x3cb   : > { %1998 = vpow2.f32 %v1013_v15  ;;  %1016 = vadd.xlane.f32.xlu1 %v1015_v16 }
 0x3d0   : > { %v932_v17 = vpop.xlane.xlu1 %931 }
 0x3d1   : > { %v1999_v18 = vpop.eup %1998  ;;  %v936_v20 = vsub.f32 %v925_v61, %v932_v17 }
 0x3d2   : > { %v1018_v21 = vsel %vm909_vm8, %v1999_v18, 0.0 }
 0x3d3   : > { %v938_v22 = vmul.f32 1.442695, %v936_v20  ;;  %1019 = vadd.xlane.f32.xlu0 %v1018_v21 }
 0x3d5   : > { %2000 = vpow2.f32 %v938_v22  ;;  %v1165_v32 = vpop.xlane.xlu2 %1164 }
 0x3d6   : > { %v1169_v37 = vsub.f32 %v1158_v63, %v1165_v32 }
 0x3d8   : > { %v935_v24 = vpop.xlane.xlu0 %934  ;;  %v1171_v39 = vmul.f32 1.442695, %v1169_v37 }
 0x3d9   : > { %v937_v25 = vsub.f32 %v927_v1, %v935_v24 }
 0x3db   : > { %v2001_v26 = vpop.eup %2000  ;;  %v940_v27 = vmul.f32 1.442695, %v937_v25 }
 0x3dc   : > { %v942_v28 = vsel %vm909_vm8, %v2001_v26, 0.0 }
 0x3dd   : > { %2002 = vpow2.f32 %v940_v27  ;;  %943 = vadd.xlane.f32.xlu2 %v942_v28  ;;  %v1168_v29 = vpop.xlane.xlu1 %1167 }
 0x3de   : > { %v1170_v30 = vsub.f32 %v1160_v3, %v1168_v29 }
 0x3e0   : > { %v1173_v33 = vmul.f32 1.442695, %v1170_v30  ;;  %v1085_v34 = vpop.xlane.xlu0 %1084 }
 0x3e1   : > { %v1089_v35 = vsub.f32 %v1078_v5, %v1085_v34 }
 0x3e2   : > { %2004 = vpow2.f32 %v1173_v33 }
 0x3e3   : > { %v2003_v36 = vpop.eup %2002  ;;  %v1091_v38 = vmul.f32 1.442695, %v1089_v35 }
 0x3e4   : > { %v945_v40 = vsel %vm909_vm8, %v2003_v36, 0.0 }
 0x3e5   : > { %2006 = vpow2.f32 %v1091_v38  ;;  %946 = vadd.xlane.f32.xlu1 %v945_v40  ;;  %v1908_v40 = vld [vmem:[#allocation7 + $0x18] sm:$0xff] }
 0x3e6   : > { %2008 = vpow2.f32 %v1171_v39  ;;  %1257 = vmatpush.bf16.msra.mxu0 %v1908_v40  ;;  %v1907_v39 = vld [vmem:[#allocation7 + $0x10] sm:$0xff] }
 0x3e7   : > { %1106 = vrot.lane.b32.xlu0 %v2383_v45, %s2158_s20 }
 0x3e8   : > { %v1088_v41 = vpop.xlane.xlu2 %1087  ;;  %v2005_v42 = vpop.eup %2004 }
 0x3e9   : > { %v1090_v43 = vsub.f32 %v1080_v7, %v1088_v41  ;;  %v1178_v47 = vsel %vm909_vm8, %v2005_v42, 0.0  ;;  %v1906_v41 = vld [vmem:[#allocation7 + $0x8] sm:$0xff] }
 0x3ea   : > { %1258 = vmatpush.bf16.msra.mxu0 %v1907_v39 }
 0x3eb   : > { %v2007_v44 = vpop.eup %2006  ;;  %v1093_v46 = vmul.f32 1.442695, %v1090_v43 }
 0x3ec   : > { %v1095_v48 = vsel %vm909_vm8, %v2007_v44, 0.0  ;;  %v2009_v49 = vpop.eup %2008 }
 0x3ed   : > { %2010 = vpow2.f32 %v1093_v46  ;;  %1179 = vadd.xlane.f32.xlu1 %v1178_v47  ;;  %1096 = vadd.xlane.f32.xlu2 %v1095_v48  ;;  %v1175_v52 = vsel %vm909_vm8, %v2009_v49, 0.0 }
 0x3ee   : > { %1259 = vmatpush.bf16.msra.mxu0 %v1906_v41 }
 0x3f3   : > { %v2011_v50 = vpop.eup %2010  ;;  %v1027_v51 = vpop.permute.xlu0 %1026 }
 0x3f4   : > { %1039 = vmatpush.bf16.msrb.mxu3 %v1027_v51  ;;  %v1098_v53 = vsel %vm909_vm8, %v2011_v50, 0.0 }
 0x3f5   : > { %1176 = vadd.xlane.f32.xlu2 %v1175_v52  ;;  %1099 = vadd.xlane.f32.xlu1 %v1098_v53 }
 0x40d   : > { %1186 = vrot.lane.b32.xlu2 %v2383_v45, %s2156_s18 }
 0x43e   : > { %v1017_v54 = vpop.xlane.xlu1 %1016 }
 0x43f   : > { %2012 = vrcp.f32 %v1017_v54 }
 0x445   : > { %v2013_v56 = vpop.eup %2012 }
 0x446   : > { %v1020_v55 = vpop.xlane.xlu0 %1019  ;;  %v1023_v58 = vmul.f32 %v2013_v56, %v1997_v14 }
 0x447   : > { %2014 = vrcp.f32 %v1020_v55 }
 0x44d   : > { %v2015_v57 = vpop.eup %2014 }
 0x44e   : > { %v1024_v59 = vmul.f32 %v2015_v57, %v1999_v18 }
 0x450   : > { %v1025_v60 = vpack.c.bf16 %v1024_v59, %v1023_v58  ;;  %v944_v61 = vpop.xlane.xlu2 %943 }
 0x451   : > { %2016 = vrcp.f32 %v944_v61 }
 0x452   : > { %1760 = vmatmul.msk.bf16.vlgmr.msrb.gmra.mxu3 %vm909_vm8, %v1025_v60 }
 0x457   : > { %v2017_v0 = vpop.eup %2016 }
 0x458   : > { %v947_v62 = vpop.xlane.xlu1 %946  ;;  %v950_v45 = vmul.f32 %v2017_v0, %v2001_v26 }
 0x459   : > { %2018 = vrcp.f32 %v947_v62  ;;  %v1107_v63 = vpop.permute.xlu0 %1106 }
 0x45a   : > { %1119 = vmatpush.bf16.msrb.mxu1 %v1107_v63 }
 0x45f   : > { %v2019_v1 = vpop.eup %2018 }
 0x460   : > { %v951_v2 = vmul.f32 %v2019_v1, %v2003_v36  ;;  %v1180_v3 = vpop.xlane.xlu1 %1179  ;;  %v1097_v4 = vpop.xlane.xlu2 %1096 }
 0x461   : > { %2020 = vrcp.f32 %v1097_v4  ;;  %v1915_v4 = vld [vmem:[%s2599_s12 + $0x34] sm:$0xf] }
 0x462   : > { %v952_v5 = vpack.c.bf16 %v951_v2, %v950_v45  ;;  %2022 = vrcp.f32 %v1180_v3  ;;  %v1812_v2 = vld [vmem:[%s2599_s12 + $0x30] sm:$0xf]  ;;  %v1916_v3 = vld [vmem:[%s2599_s12 + $0x34] sm:$0xf0] }
 0x464   : > { %1758 = vmatmul.msk.bf16.vlgmr.msra.gmra.mxu1 %vm909_vm8, %v952_v5  ;;  %v1813_v5 = vor.u32 %v1916_v3, %v1812_v2  ;;  %v1919_v2 = vld [vmem:[%s2601_s14 + $0x10] sm:$0xff]  ;;  %v1928_v3 = vld [vmem:[%s2601_s14 + $0x58] sm:$0xff] }
 0x466   : > { %1381 = vmatpush.bf16.msra.mxu1 %v1813_v5  ;;  %v733_v5 = vld [vmem:[%s2600_s13] sm:$0x3] }
 0x467   : > { %v2021_v8 = vpop.eup %2020 }
 0x468   : > { %v1100_v6 = vpop.xlane.xlu1 %1099  ;;  %v1177_v7 = vpop.xlane.xlu2 %1176  ;;  %v1103_v12 = vmul.f32 %v2021_v8, %v2007_v44  ;;  %v1804_v8 = vld [vmem:[%s2599_s12 + $0x20] sm:$0xf] }
 0x469   : > { %2024 = vrcp.f32 %v1100_v6  ;;  %v2023_v9 = vpop.eup %2022  ;;  %v1814_v6 = vld [vmem:[%s2599_s12 + $0x38] sm:$0xf0] }
 0x46a   : > { %2026 = vrcp.f32 %v1177_v7  ;;  %v1184_v15 = vmul.f32 %v2023_v9, %v2005_v42  ;;  %v1905_v42 = vld [vmem:[#allocation7] sm:$0xff]  ;;  %v1817_v7 = vor.u32 %v1915_v4, %v1814_v6  ;;  %v1927_v6 = vld [vmem:[%s2601_s14 + $0x50] sm:$0xff] }
 0x46b   : > { %1260 = vmatpush.bf16.msra.mxu0 %v1905_v42  ;;  %v1914_v9 = vld [vmem:[%s2599_s12 + $0x24] sm:$0xf0] }
 0x46c   : > { %1395 = vmatpush.bf16.msrb.mxu2 %v1817_v7  ;;  %v1918_v4 = vld [vmem:[%s2601_s14 + $0x8] sm:$0xff]  ;;  %v1917_v7 = vld [vmem:[%s2601_s14] sm:$0xff] }
 0x46f   : > { %v2025_v10 = vpop.eup %2024 }
 0x470   : > { %v2027_v11 = vpop.eup %2026  ;;  %v1104_v13 = vmul.f32 %v2025_v10, %v2011_v50  ;;  %v1187_v14 = vpop.permute.xlu2 %1186  ;;  %v1986_v50 = vld [vmem:[%s2596_s9] ss:$0 sm:$0xff]  ;;  %v1913_v10 = vld [vmem:[%s2599_s12 + $0x24] sm:$0xf] }
 0x471   : > { %v1183_v16 = vmul.f32 %v2027_v11, %v2009_v49  ;;  %1199 = vmatpush.bf16.msra.mxu3 %v1187_v14  ;;  %v1805_v11 = vor.u32 %v1914_v9, %v1804_v8  ;;  %v1796_v14 = vld [vmem:[%s2599_s12 + $0x10] sm:$0xf]  ;;  %v1330_v8 = vperm.slane %v733_v5, 0  ;;  %v1926_v9 = vld [vmem:[%s2601_s14 + $0x48] sm:$0xff] }
 0x472   : > { %v1105_v17 = vpack.c.bf16 %v1104_v13, %v1103_v12  ;;  %v1806_v12 = vld [vmem:[%s2599_s12 + $0x28] sm:$0xf0] }
 0x473   : > { %v1185_v18 = vpack.c.bf16 %v1184_v15, %v1183_v16  ;;  %v1809_v13 = vor.u32 %v1913_v10, %v1806_v12  ;;  %1382 = vmatpush.bf16.msra.mxu1 %v1805_v11  ;;  %v1912_v15 = vld [vmem:[%s2599_s12 + $0x14] sm:$0xf0]  ;;  %v1911_v16 = vld [vmem:[%s2599_s12 + $0x14] sm:$0xf]  ;;  %v1925_v12 = vld [vmem:[%s2601_s14 + $0x40] sm:$0xff] }
 0x474   : > { %1762 = vmatmul.msk.bf16.vlgmr.msrb.gmra.mxu1 %vm909_vm8, %v1105_v17  ;;  %v1797_v17 = vor.u32 %v1912_v15, %v1796_v14  ;;  %v1331_v14 = vperm.slane %v733_v5, 1 }
 0x475   : > { %1764 = vmatmul.msk.bf16.vlgmr.msra.gmra.mxu3 %vm909_vm8, %v1185_v18  ;;  %1396 = vmatpush.bf16.msrb.mxu2 %v1809_v13  ;;  %v1798_v18 = vld [vmem:[%s2599_s12 + $0x18] sm:$0xf0] }
 0x477   : > { %1383 = vmatpush.bf16.msra.mxu1 %v1797_v17 }
 0x4d5   : > { %v1041_v20 = vpop.f32.mrf.mxu3 }
 0x4d6   : > { %v1046_v21 = vpack.c.bf16 %v1041_v20, %v1041_v20 }
 0x4d8   : > { %1050 = vrot.lane.b32.xlu1 %v1046_v21, %s2152_s22  ;;  %v1801_v21 = vor.u32 %v1911_v16, %v1798_v18 }
 0x4da   : > { %1397 = vmatpush.bf16.msrb.mxu2 %v1801_v21 }
 0x4dd   : > { %v1043_v27 = vpop.f32.mrf.mxu3 }
 0x4de   : > { %v1047_v33 = vpack.c.bf16 %v1043_v27, %v1043_v27 }
 0x4e1   : > { %v969_v22 = vpop.f32.mrf.mxu1 }
 0x4e2   : > { %v974_v24 = vpack.c.bf16 %v969_v22, %v969_v22 }
 0x4e4   : > { %977 = vst.msk [vmem:[#allocation2] sm:$0xf] %vm976_vm9, %v974_v24  ;;  %v1788_v24 = vld [vmem:[%s2599_s12] sm:$0xf] }
 0x4e9   : > { %v971_v25 = vpop.f32.mrf.mxu1 }
 0x4ea   : > { %v975_v26 = vpack.c.bf16 %v971_v25, %v971_v25  ;;  %v1910_v25 = vld [vmem:[%s2599_s12 + $0x4] sm:$0xf0] }
 0x4ec   : > { %978 = vst.msk [vmem:[#allocation2 + $0x4] sm:$0xf] %vm976_vm9, %v975_v26  ;;  %v1909_v26 = vld [vmem:[%s2599_s12 + $0x4] sm:$0xf] }
 0x4f1   : > { %v1121_v28 = vpop.f32.mrf.mxu1 }
 0x4f2   : > { %v1126_v29 = vpack.c.bf16 %v1121_v28, %v1121_v28  ;;  %v1789_v28 = vor.u32 %v1910_v25, %v1788_v24 }
 0x4f4   : > { %1130 = vrot.lane.b32.xlu0 %v1126_v29, %s2157_s19  ;;  %v1790_v29 = vld [vmem:[%s2599_s12 + $0x8] sm:$0xf0]  ;;  %1384 = vmatpush.bf16.msra.mxu1 %v1789_v28 }
 0x4f8   : > { %v1201_v30 = vpop.f32.mrf.mxu3 }
 0x4f9   : > { %v1123_v32 = vpop.f32.mrf.mxu1  ;;  %v1206_v37 = vpack.c.bf16 %v1201_v30, %v1201_v30  ;;  %v1793_v30 = vor.u32 %v1909_v26, %v1790_v29 }
 0x4fa   : > { %v1127_v34 = vpack.c.bf16 %v1123_v32, %v1123_v32 }
 0x4fb   : > { %1398 = vmatpush.bf16.msrb.mxu2 %v1793_v30 }
 0x4fc   : > { %1052 = vrot.lane.b32.xlu0 %v1047_v33, %s2152_s22  ;;  %1132 = vrot.lane.b32.xlu2 %v1127_v34, %s2157_s19 }
 0x500   : > { %v1203_v35 = vpop.f32.mrf.mxu3 }
 0x501   : > { %v1207_v36 = vpack.c.bf16 %v1203_v35, %v1203_v35 }
 0x503   : > { %1212 = vrot.lane.b32.xlu1 %v1207_v36, %s2154_s0 }
 0x504   : > { %1210 = vrot.lane.b32.xlu0 %v1206_v37, %s2154_s0 }
 0x54a   : > { %v1051_v38 = vpop.permute.xlu1 %1050 }
 0x54b   : > { %1057 = vst.msk [vmem:[#allocation2] sm:$0xf] %vm1056_vm10, %v1051_v38 }
 0x556   : > { %v1133_v46 = vpop.permute.xlu2 %1132 }
 0x566   : > { %v1131_v43 = vpop.permute.xlu0 %1130 }
 0x567   : > { %1137 = vst.msk [vmem:[#allocation2] sm:$0xf] %vm1136_vm11, %v1131_v43 }
 0x56e   : > { %v1053_v44 = vpop.permute.xlu0 %1052 }
 0x56f   : > { %1058 = vst.msk [vmem:[#allocation2 + $0x4] sm:$0xf] %vm1056_vm10, %v1053_v44 }
 0x570   : > { %1138 = vst.msk [vmem:[#allocation2 + $0x4] sm:$0xf] %vm1136_vm11, %v1133_v46 }
 0x575   : > { %v1213_v47 = vpop.permute.xlu1 %1212 }
 0x576   : > { %1218 = vst.msk [vmem:[#allocation2 + $0x4] sm:$0xf] %vm1216_vm12, %v1213_v47  ;;  %v1211_v48 = vpop.permute.xlu0 %1210 }
 0x577   : > { %1217 = vst.msk [vmem:[#allocation2] sm:$0xf] %vm1216_vm12, %v1211_v48 }
 0x57e   : > { %v1933_v49 = vld [vmem:[#allocation2] sm:$0xff] }
 0x57f   : > { %1785 = vmatmul.msk.bf16.vlgmr.msra.gmra.mxu0 %vm639_vm0, %v1933_v49 }
 0x5fc   : > { %v1262_v51 = vpop.f32.mrf.mxu0 }
 0x5fd   : > { %v1267_v52 = vadd.f32 %v1262_v51, %v2299_v19  ;;  %v1988_v51 = vld [vmem:[%s2598_s11] ss:$0 sm:$0xff] }
 0x5ff   : > { %v2439_v53 = vadd.f32 %v1986_v50, %v1267_v52 }
 0x601   : > { %v1274_v54 = vsel %vm639_vm0, %v2439_v53, 0.0 }
 0x602   : > { %1275 = vadd.xlane.f32.xlu2 %v1274_v54 }
 0x604   : > { %v1264_v55 = vpop.f32.mrf.mxu0 }
 0x605   : > { %v1268_v56 = vadd.f32 %v1264_v55, %v2303_v23 }
 0x607   : > { %v2444_v57 = vadd.f32 %v1986_v50, %v1268_v56 }
 0x609   : > { %v1277_v58 = vsel %vm639_vm0, %v2444_v57, 0.0 }
 0x60a   : > { %1278 = vadd.xlane.f32.xlu0 %v1277_v58 }
 0x675   : > { %v1276_v59 = vpop.xlane.xlu2 %1275 }
 0x676   : > { %v1280_v60 = vmul.f32 %v1276_v59, %v2307_v31 }
 0x678   : > { %v2450_v19 = vsub.f32 %v2439_v53, %v1280_v60  ;;  %v1924_v60 = vld [vmem:[%s2601_s14 + $0x38] sm:$0xff] }
 0x679   : > { %1542 = vmatpush.bf16.msrb.mxu3 %v1924_v60 }
 0x67a   : > { %v1284_v61 = vmul.f32 %v2450_v19, %v2450_v19 }
 0x67c   : > { %v1286_v62 = vsel %vm639_vm0, %v1284_v61, 0.0  ;;  %v1932_v61 = vld [vmem:[%s2601_s14 + $0x78] sm:$0xff] }
 0x67d   : > { %1287 = vadd.xlane.f32.xlu1 %v1286_v62  ;;  %v1279_v63 = vpop.xlane.xlu0 %1278  ;;  %1556 = vmatpush.bf16.msrb.mxu0 %v1932_v61  ;;  %v1922_v62 = vld [vmem:[%s2601_s14 + $0x28] sm:$0xff] }
 0x67e   : > { %v1281_v23 = vmul.f32 %v1279_v63, %v2307_v31  ;;  %v1931_v63 = vld [vmem:[%s2601_s14 + $0x70] sm:$0xff] }
 0x680   : > { %v2457_v0 = vsub.f32 %v2444_v57, %v1281_v23  ;;  %v1921_v23 = vld [vmem:[%s2601_s14 + $0x20] sm:$0xff] }
 0x681   : > { %1557 = vmatpush.bf16.msrb.mxu0 %v1931_v63 }
 0x682   : > { %v1285_v1 = vmul.f32 %v2457_v0, %v2457_v0 }
 0x684   : > { %v1289_v45 = vsel %vm639_vm0, %v1285_v1, 0.0  ;;  %v1920_v1 = vld [vmem:[%s2601_s14 + $0x18] sm:$0xff] }
 0x685   : > { %1290 = vadd.xlane.f32.xlu2 %v1289_v45  ;;  %v1929_v45 = vld [vmem:[%s2601_s14 + $0x60] sm:$0xff] }
 0x6f0   : > { %v1288_v20 = vpop.xlane.xlu1 %1287 }
 0x6f1   : > { %v1292_v22 = vmul.f32 %v1288_v20, %v2307_v31 }
 0x6f3   : > { %v1294_v27 = vadd.f32 1e-05, %v1292_v22 }
 0x6f5   : > { %2028 = vrsqrt.f32 %v1294_v27  ;;  %vm1302_vm14 = vweird.f32 %v1294_v27 }
 0x6f8   : > { %v1291_v32 = vpop.xlane.xlu2 %1290 }
 0x6f9   : > { %v1293_v33 = vmul.f32 %v1291_v32, %v2307_v31  ;;  %v1987_v31 = vld [vmem:[%s2597_s10] ss:$0 sm:$0xff] }
 0x6fb   : > { %v2029_v34 = vpop.eup %2028  ;;  %v1295_v35 = vadd.f32 1e-05, %v1293_v33 }
 0x6fc   : > { %v1297_v36 = vmul.f32 %v2029_v34, %v1294_v27  ;;  %vm1303_vm13 = vweird.f32 %v2029_v34 }
 0x6fd   : > { %2030 = vrsqrt.f32 %v1295_v35  ;;  %vm1304_vm15 = vmor %vm1302_vm14, %vm1303_vm13  ;;  %vm1312_vm2 = vweird.f32 %v1295_v35 }
 0x6fe   : > { %v1298_v37 = vmul.f32 %v2029_v34, %v1297_v36 }
 0x700   : > { %v1299_v38 = vmul.f32 0.5, %v1298_v37 }
 0x702   : > { %v1300_v40 = vsub.f32 1.5, %v1299_v38 }
 0x703   : > { %v2031_v39 = vpop.eup %2030 }
 0x704   : > { %v1301_v41 = vmul.f32 %v2029_v34, %v1300_v40  ;;  %v1307_v42 = vmul.f32 %v2031_v39, %v1295_v35  ;;  %vm1313_vm1 = vweird.f32 %v2031_v39 }
 0x705   : > { %vm1314_vm3 = vmor %vm1312_vm2, %vm1313_vm1 }
 0x706   : > { %v1308_v43 = vmul.f32 %v2031_v39, %v1307_v42  ;;  %v1305_v44 = vsel %vm1304_vm15, %v2029_v34, %v1301_v41 }
 0x707   : > { %v1316_v48 = vmul.f32 %v1305_v44, %v2450_v19  ;;  %v1923_v19 = vld [vmem:[%s2601_s14 + $0x30] sm:$0xff] }
 0x708   : > { %v1309_v46 = vmul.f32 0.5, %v1308_v43  ;;  %1543 = vmatpush.bf16.msrb.mxu3 %v1923_v19 }
 0x709   : > { %v1321_v52 = vmul.f32 %v1987_v31, %v1316_v48 }
 0x70a   : > { %v1310_v47 = vsub.f32 1.5, %v1309_v46 }
 0x70b   : > { %v1326_v56 = vadd.f32 %v1988_v51, %v1321_v52 }
 0x70c   : > { %v1311_v49 = vmul.f32 %v2031_v39, %v1310_v47  ;;  %1544 = vmatpush.bf16.msrb.mxu3 %v1922_v62  ;;  %v1989_v62 = vld [vmem:[%s2602_s15] ss:$0 sm:$0xff] }
 0x70e   : > { %v1315_v50 = vsel %vm1314_vm3, %v2031_v39, %v1311_v49 }
 0x70f   : > { %v1317_v54 = vmul.f32 %v1315_v50, %v2457_v0  ;;  %v1930_v0 = vld [vmem:[%s2601_s14 + $0x68] sm:$0xff] }
 0x710   : > { %1545 = vmatpush.bf16.msrb.mxu3 %v1921_v23  ;;  %1558 = vmatpush.bf16.msrb.mxu0 %v1930_v0 }
 0x711   : > { %v1322_v55 = vmul.f32 %v1987_v31, %v1317_v54 }
 0x713   : > { %v1327_v58 = vadd.f32 %v1988_v51, %v1322_v55 }
 0x714   : > { %1546 = vmatpush.bf16.msrb.mxu3 %v1920_v1  ;;  %1559 = vmatpush.bf16.msrb.mxu0 %v1929_v45 }
 0x715   : > { %v1328_v59 = vpack.c.bf16 %v1327_v58, %v1326_v56 }
 0x717   : > { %1818 = vmatmul.msk.bf16.vlgmr.msra.gmra.mxu1 %vm639_vm0, %v1328_v59  ;;  %1819 = vmatmul.msk.bf16.vlgmr.msrb.gmra.mxu2 %vm639_vm0, %v1328_v59 }
 0x718   : > { %1547 = vmatpush.bf16.msrb.mxu3 %v1919_v2  ;;  %1560 = vmatpush.bf16.msrb.mxu0 %v1928_v3 }
 0x71c   : > { %1548 = vmatpush.bf16.msrb.mxu3 %v1918_v4  ;;  %1561 = vmatpush.bf16.msrb.mxu0 %v1927_v6 }
 0x720   : > { %1549 = vmatpush.bf16.msrb.mxu3 %v1917_v7  ;;  %1562 = vmatpush.bf16.msrb.mxu0 %v1926_v9 }
 0x724   : > { %1563 = vmatpush.bf16.msrb.mxu0 %v1925_v12 }
 0x794   : > { %v1386_v10 = vpop.f32.mrf.mxu1 }
 0x795   : > { %v1387_v11 = vadd.f32 %v1386_v10, %v1330_v8 }
 0x797   : > { %v1409_v13 = vmul.f32 0.044715, %v1387_v11  ;;  %v1405_v47 = vmul.f32 0.5, %v1387_v11 }
 0x799   : > { %v1413_v15 = vmul.f32 %v1409_v13, %v1387_v11 }
 0x79a   : > { %v1400_v16 = vpop.f32.mrf.mxu2 }
 0x79b   : > { %v1417_v17 = vmul.f32 %v1413_v15, %v1387_v11  ;;  %v1401_v18 = vadd.f32 %v1400_v16, %v1331_v14 }
 0x79c   : > { %v1388_v20 = vpop.f32.mrf.mxu1 }
 0x79d   : > { %v1421_v21 = vadd.f32 %v1417_v17, %v1387_v11  ;;  %v1410_v22 = vmul.f32 0.044715, %v1401_v18  ;;  %v1389_v24 = vadd.f32 %v1388_v20, %v1330_v8  ;;  %v1406_v56 = vmul.f32 0.5, %v1401_v18 }
 0x79f   : > { %v1414_v25 = vmul.f32 %v1410_v22, %v1401_v18  ;;  %v1411_v26 = vmul.f32 0.044715, %v1389_v24  ;;  %v1425_v27 = vmul.f32 0.7978846, %v1421_v21  ;;  %v1407_v31 = vmul.f32 0.5, %v1389_v24 }
 0x7a1   : > { %v1418_v28 = vmul.f32 %v1414_v25, %v1401_v18  ;;  %v1415_v29 = vmul.f32 %v1411_v26, %v1389_v24  ;;  %2032 = vtanh.f32 %v1425_v27 }
 0x7a2   : > { %v1402_v30 = vpop.f32.mrf.mxu2 }
 0x7a3   : > { %v1422_v32 = vadd.f32 %v1418_v28, %v1401_v18  ;;  %v1419_v33 = vmul.f32 %v1415_v29, %v1389_v24  ;;  %v1403_v34 = vadd.f32 %v1402_v30, %v1331_v14 }
 0x7a5   : > { %v1423_v35 = vadd.f32 %v1419_v33, %v1389_v24  ;;  %v1412_v36 = vmul.f32 0.044715, %v1403_v34  ;;  %v1426_v37 = vmul.f32 0.7978846, %v1422_v32  ;;  %v1408_v58 = vmul.f32 0.5, %v1403_v34 }
 0x7a7   : > { %v1427_v38 = vmul.f32 0.7978846, %v1423_v35  ;;  %v1416_v40 = vmul.f32 %v1412_v36, %v1403_v34  ;;  %v2033_v41 = vpop.eup %2032 }
 0x7a8   : > { %v1433_v44 = vadd.f32 1.0, %v2033_v41 }
 0x7a9   : > { %v1420_v39 = vmul.f32 %v1416_v40, %v1403_v34  ;;  %2034 = vtanh.f32 %v1427_v38 }
 0x7aa   : > { %2036 = vtanh.f32 %v1426_v37  ;;  %v1437_v50 = vmul.f32 %v1433_v44, %v1405_v47 }
 0x7ab   : > { %v1424_v42 = vadd.f32 %v1420_v39, %v1403_v34 }
 0x7ad   : > { %v1428_v43 = vmul.f32 0.7978846, %v1424_v42 }
 0x7af   : > { %v2035_v46 = vpop.eup %2034  ;;  %2038 = vtanh.f32 %v1428_v43 }
 0x7b0   : > { %v1435_v48 = vadd.f32 1.0, %v2035_v46  ;;  %v2037_v49 = vpop.eup %2036 }
 0x7b1   : > { %v1434_v54 = vadd.f32 1.0, %v2037_v49 }
 0x7b2   : > { %v1439_v51 = vmul.f32 %v1435_v48, %v1407_v31 }
 0x7b3   : > { %v1438_v60 = vmul.f32 %v1434_v54, %v1406_v56 }
 0x7b4   : > { %v1441_v52 = vpack.c.bf16 %v1439_v51, %v1437_v50 }
 0x7b5   : > { %v2039_v55 = vpop.eup %2038 }
 0x7b6   : > { %1550 = vmatmul.bf16.vlgmr.msrb.gmra.mxu3 %v1441_v52  ;;  %v1436_v59 = vadd.f32 1.0, %v2039_v55 }
 0x7b8   : > { %v1440_v19 = vmul.f32 %v1436_v59, %v1408_v58 }
 0x7ba   : > { %v1442_v61 = vpack.c.bf16 %v1440_v19, %v1438_v60 }
 0x7bc   : > { %1564 = vmatmul.bf16.vlgmr.msrb.gmra.mxu0 %v1442_v61 }
 0x839   : > { %v1551_v63 = vpop.f32.mrf.mxu3  ;;  %v1565_v23 = vpop.f32.mrf.mxu0 }
 0x83a   : > { %v1552_v0 = vadd.f32 %v1989_v62, %v1551_v63 }
 0x83c   : > { %v1566_v1 = vadd.f32 %v1565_v23, %v1552_v0 }
 0x83e   : > { %v1570_v45 = vadd.f32 %v1566_v1, %v2439_v53 }
 0x840   : > { %1572 = vst.msk [vmem:[%s591_s29] sm:$0xff] %vm639_vm0, %v1570_v45 }
 0x841   : > { %v1553_v2 = vpop.f32.mrf.mxu3  ;;  %v1567_v4 = vpop.f32.mrf.mxu0 }
 0x842   : > { %v1554_v3 = vadd.f32 %v1989_v62, %v1553_v2 }
 0x844   : > { %v1568_v5 = vadd.f32 %v1567_v4, %v1554_v3 }
 0x846   : > { %v1571_v6 = vadd.f32 %v1568_v5, %v2444_v57 }
 0x848   : > { %1573 = vst.msk [vmem:[%s591_s29 + $0x8] sm:$0xff] %vm639_vm0, %v1571_v6 }
 0x849 PF: > { %s28_s21 = sadd.s32 1, %s2144_s21  }
 0x84a   : > { %p25_p7 = scmp.ge.s32.totalorder %s28_s21, 4  }
 0x84c   :  { %27 = sbr.rel (!%p25_p7) target bundleno = 5 (0x5), region = 130 }
 0x851   :  { %1595 = vsyncpa [#allocation4], 1 }
 0x852   :  { %1597 = vsyncpa [#allocation4 + $0x1], 1 }
 0x853   :  { %1598 = vsyncpa [#allocation6], 1 }

// kernel: _lambda_.9
= control target key start
LH: loop header
LB: loop body
LE: loop exit
PB: predicated region body
PF: predicated region fallthrough
CT: control target
= control target key end

     0   :  { %s2769_s0 = inlined_call_operand.vmem [shape: f32[2,16,64], index: 0, kind: input, shape index: {}]   ;;  %s2770_s1 = inlined_call_operand.vmem [shape: f32[2,16,64], index: 1, kind: input, shape index: {}]   ;;  %s2771_s2 = inlined_call_operand.hbm [shape: bf16[64,64], index: 2, kind: input, shape index: {}]   ;;  %s2772_s3 = inlined_call_operand.hbm [shape: bf16[64,64], index: 3, kind: input, shape index: {}]   ;;  %s2773_s4 = inlined_call_operand.vmem [shape: f32[1,64], index: 4, kind: input, shape index: {}, may-alias: {4,6,9,11,15}]   ;;  %s2774_s5 = inlined_call_operand.vmem [shape: f32[1,64], index: 5, kind: input, shape index: {}, may-alias: {5,10}]   ;;  %s2775_s6 = inlined_call_operand.vmem [shape: f32[1,64], index: 6, kind: input, shape index: {}, may-alias: {4,6,9,11,15}]   ;;  %s2776_s7 = inlined_call_operand.vmem [shape: bf16[64,192], index: 7, kind: input, shape index: {}]   ;;  %s2777_s8 = inlined_call_operand.hbm [shape: bf16[64,64], index: 8, kind: input, shape index: {}]   ;;  %s2778_s9 = inlined_call_operand.vmem [shape: f32[1,64], index: 9, kind: input, shape index: {}, may-alias: {4,6,9,11,15}]   ;;  %s2779_s10 = inlined_call_operand.vmem [shape: f32[1,64], index: 10, kind: input, shape index: {}, may-alias: {5,10}]   ;;  %s2780_s11 = inlined_call_operand.vmem [shape: f32[1,64], index: 11, kind: input, shape index: {}, may-alias: {4,6,9,11,15}]   ;;  %s2781_s12 = inlined_call_operand.vmem [shape: bf16[64,256], index: 12, kind: input, shape index: {}]   ;;  %s2782_s13 = inlined_call_operand.vmem [shape: f32[1,256], index: 13, kind: input, shape index: {}]   ;;  %s2783_s14 = inlined_call_operand.vmem [shape: bf16[256,64], index: 14, kind: input, shape index: {}]   ;;  %s2784_s15 = inlined_call_operand.vmem [shape: f32[1,64], index: 15, kind: input, shape index: {}, may-alias: {4,6,9,11,15}]   ;;  %s2785_s16 = inlined_call_operand.hbm [shape: f32[2,16,64], index: 16, kind: output, shape index: {}]  }
   0x1   :  { %2794 = sst [smem:[#allocation20_spill]] %s2769_s0 }
   0x2   :  { %2795 = sst [smem:[#allocation21_spill]] %s2771_s2 }
   0x3   :  { %2796 = sst [smem:[#allocation22_spill]] %s2772_s3 }
   0x4   :  { %21 = vsyncpa [#allocation4], 0 }
   0x5   :  { %22 = vsyncpa [#allocation7], 0 }
   0x6   :  { %23 = vsyncpa [#allocation5], 0 }
   0x7   :  { %25 = vsyncpa [#allocation5 + $0x1], 0  ;;  %s2357_s21 = smov 0   ;;  %s2359_s22 = smov 0  }
   0x8   :  { %s2361_s23 = smov 0   ;;  %s2363_s24 = smov 0  }
   0x9 LB: > { %2797 = sst [smem:[#allocation13_spill]] %s2243_s21  ;;  %s2378_s25 = sadd.s32 4294967295, %s2255_s24   ;;  %s2255_s24 = sphi %s2363_s24, %s2815_s24   ;;  %s2251_s23 = sphi %s2361_s23, %s2820_s23   ;;  %s2247_s22 = sphi %s2359_s22, %s2819_s22   ;;  %s2243_s21 = sphi %s2357_s21, %s2818_s21  }
   0xa   : > { %2798 = sst [smem:[#allocation14_spill]] %s2251_s23  ;;  %s1693_s26 = sadd.s32 4294967294, %s2255_s24  }
   0xb   : > { %2799 = sst [smem:[#allocation15_spill]] %s2255_s24  ;;  %s2382_s27 = sadd.s32 1, %s2255_s24  }
   0xc   : > { %2800 = sst [smem:[#allocation16_spill]] %s2382_s27  ;;  %s384_s28 = sadd.s32 1, %s2251_s23 }
   0xd   : > { %s381_s29 = ssub.s32 %s2255_s24, %s2382_s27  ;;  %p394_p0 = scmp.ne.s32.totalorder %s2251_s23, %s2247_s22 }
   0xe   : > { %p382_p1 = scmp.eq.s32.totalorder %s381_s29, 0  ;;  %p395_p2 = scmp.eq.s32.totalorder %s2378_s25, 1 }
   0xf   : > { %p400_p3 = scmp.ne.s32.totalorder %s2247_s22, %s2243_s21  ;;  %p401_p4 = scmp.eq.s32.totalorder %s1693_s26, 1 }
  0x10   : > { %s2393_s30 = scalar_select %p382_p1, %s2251_s23, %s384_s28  }
  0x11   : > { %p2395_p5 = por %p395_p2, %p394_p0  ;;  %p2399_p6 = por %p401_p4, %p400_p3 }
  0x12   : > { %2801 = sst [smem:[#allocation17_spill]] %s2393_s30  ;;  %p1694_p7 = scmp.ge.s32.totalorder %s2255_s24, 1 }
  0x13   : > { %s2802_s0 = scalar_select %p2395_p5, 1, 0 }
  0x14   : > { %s2804_s17 = scalar_select %p2399_p6, 1, 0 }
  0x15   : > { %2803 = sst [smem:[#allocation18_spill]] %s2802_s0  ;;  %p408_p8 = scmp.lt.s32.totalorder %s2255_s24, 3 }
  0x16   : > { %2805 = sst [smem:[#allocation19_spill]] %s2804_s17  ;;  %p1984_p9 = scmp.eq.s32.totalorder %s2378_s25, 0 }
  0x17   : > { %p2406_p10 = pnand %p1694_p7, %p408_p8  ;;  %s2807_s3 = sld [smem:[#allocation22_spill]] }
  0x18   : > { %s2808_s2 = sld [smem:[#allocation21_spill]]  ;;  %s2257_s27 = smov [#allocation6]  }
  0x19   : > { %p1970_p11 = pneg %p2406_p10  ;;  %s435_s17 = sshll.u32 %s2257_s27, 4  ;;  %s436_s17 = int_to_ptr.vmem [resolvable:$true] %s435_s17 }
  0x1a   : > { %s2258_s19 = smov 64   ;;  %s2259_s20 = smov 4  }
  0x1b   : > { %p2420_p12 = pnand %p1984_p9, %p1970_p11  ;;  %s2261_s24 = smov [#allocation8]  }
  0x1c   : > { %s461_s0 = sshll.u32 %s2261_s24, 4  ;;  %s462_s0 = int_to_ptr.vmem [resolvable:$true] %s461_s0 }
  0x1d   : > { %s433_s26 = sshll.u32 %s2807_s3, 4  ;;  %s2260_s3 = smov [#allocation3]   ;;  %s434_s26 = int_to_ptr.hbm [resolvable:$true] %s433_s26 }
  0x1e   : > { %s419_s30 = sshll.u32 %s2808_s2, 4  ;;  %s421_s21 = sshll.u32 %s2260_s3, 4  ;;  %s420_s30 = int_to_ptr.hbm [resolvable:$true] %s419_s30  ;;  %s422_s21 = int_to_ptr.vmem [resolvable:$true] %s421_s21 }
  0x1f   : > { %1976 = dma.hbm_to_vmem [thread:$0]  (!%p2420_p12), %s434_s26, 512, %s436_s17, [#allocation7], %s2258_s19, %s2258_s19, %s2259_s20  }
  0x20   : > { %s459_s2 = sshll.u32 %s2777_s8, 4  ;;  %514 = sbr.rel (%p2406_p10) target bundleno = 2140 (0x85c), region = 84  ;;  %s460_s2 = int_to_ptr.hbm [resolvable:$true] %s459_s2 }
  0x21   : > { %1973 = dma.hbm_to_vmem [thread:$0]  (!%p2420_p12), %s420_s30, 512, %s422_s21, [#allocation4], %s2258_s19, %s2258_s19, %s2259_s20  }
  0x22   : > { %1979 = dma.hbm_to_vmem [thread:$0]  (!%p2420_p12), %s460_s2, 512, %s462_s0, [#allocation7], %s2258_s19, %s2258_s19, %s2259_s20  }
  0x25   : > { %2230 = dma.done.wait (%p1984_p9), [#allocation4], 512  }
  0x26   : > { %2232 = vsyncadd (%p1984_p9), [#allocation4], 4294966784 }
  0x27   : > { %2234 = dma.done.wait (%p1984_p9), [#allocation7], 1024  }
  0x28   : > { %2236 = vsyncadd (%p1984_p9), [#allocation7], 4294966272  ;;  %p580_p13 = scmp.lt.s32.totalorder %s2378_s25, 1  ;;  %v1917_v0 = vld [vmem:[#allocation6 + $0x18] sm:$0xff]  ;;  %v1916_v1 = vld [vmem:[#allocation6 + $0x10] sm:$0xff]  ;;  %vm637_vm0 = vcmask 523264  }
  0x29   : > { %645 = vmatpush.bf16.msra.mxu1 %v1917_v0  ;;  %v1915_v2 = vld [vmem:[#allocation6 + $0x8] sm:$0xff]  ;;  %v1914_v3 = vld [vmem:[#allocation6] sm:$0xff]  ;;  %v1913_v6 = vld [vmem:[#allocation3 + $0x18] sm:$0xff]  ;;  %s2810_s0 = sld [smem:[#allocation20_spill]]  ;;  %v2262_v25 = vmov 64.0   ;;  %s2263_s21 = smov 16  }
  0x2a   : > { %s581_s3 = scalar_select %p580_p13, %s2378_s25, 1  ;;  %v1912_v8 = vld [vmem:[#allocation3 + $0x10] sm:$0xff]  ;;  %v1911_v9 = vld [vmem:[#allocation3 + $0x8] sm:$0xff]  ;;  %v1910_v10 = vld [vmem:[#allocation3] sm:$0xff]  ;;  %2045 = vrcp.f32 %v2262_v25  ;;  %vm907_vm8 = vcmask 130048   ;;  %vm974_vm9 = vcmask 125952  }
  0x2b   : > { %v2038_v16 = vld [vmem:[%s2773_s4] ss:$0 sm:$0xff]  ;;  %v1768_v42 = vld [vmem:[%s2776_s7 + $0x30] sm:$0xf]  ;;  %v1925_v43 = vld [vmem:[%s2776_s7 + $0x34] sm:$0xf0] }
  0x2c   : > { %s1908_s2 = sshll.u32 %s581_s3, 4  ;;  %v1924_v44 = vld [vmem:[%s2776_s7 + $0x34] sm:$0xf]  ;;  %v1769_v45 = vor.u32 %v1925_v43, %v1768_v42  ;;  %v1770_v46 = vld [vmem:[%s2776_s7 + $0x38] sm:$0xf0]  ;;  %s2264_s23 = smov 64  }
  0x2d   : > { %646 = vmatpush.bf16.msra.mxu1 %v1916_v1  ;;  %s589_s24 = scalar_lea.vmem %s2770_s1, %s1908_s2  ;;  %v1773_v47 = vor.u32 %v1924_v44, %v1770_v46  ;;  %v1760_v48 = vld [vmem:[%s2776_s7 + $0x20] sm:$0xf]  ;;  %v1923_v49 = vld [vmem:[%s2776_s7 + $0x24] sm:$0xf0]  ;;  %v1922_v50 = vld [vmem:[%s2776_s7 + $0x24] sm:$0xf] }
  0x2e   : > { %v602_v4 = vld [vmem:[%s589_s24] sm:$0xff]  ;;  %v603_v5 = vld [vmem:[%s589_s24 + $0x8] sm:$0xff]  ;;  %874 = vmatpush.bf16.msra.mxu2 %v1769_v45  ;;  %v1761_v51 = vor.u32 %v1923_v49, %v1760_v48  ;;  %v1752_v54 = vld [vmem:[%s2776_s7 + $0x10] sm:$0xf]  ;;  %s2265_s24 = smov 48   ;;  %s2266_s27 = smov 112  }
  0x2f   : > { %v604_v7 = vpack.c.bf16 %v603_v5, %v602_v4  ;;  %s584_s17 = scalar_lea.vmem %s2810_s0, %s1908_s2  ;;  %888 = vmatpush.bf16.msra.mxu3 %v1773_v47  ;;  %v1762_v52 = vld [vmem:[%s2776_s7 + $0x28] sm:$0xf0]  ;;  %v1921_v55 = vld [vmem:[%s2776_s7 + $0x14] sm:$0xf0]  ;;  %v1920_v56 = vld [vmem:[%s2776_s7 + $0x14] sm:$0xf] }
  0x30   : > { %v591_v11 = vld [vmem:[%s584_s17] sm:$0xff]  ;;  %v592_v12 = vld [vmem:[%s584_s17 + $0x8] sm:$0xff]  ;;  %v2046_v26 = vpop.eup %2045  ;;  %v1765_v53 = vor.u32 %v1922_v50, %v1762_v52  ;;  %v1753_v57 = vor.u32 %v1921_v55, %v1752_v54  ;;  %v1754_v58 = vld [vmem:[%s2776_s7 + $0x18] sm:$0xf0]  ;;  %s2267_s30 = smov 80   ;;  %s2268_s0 = smov 32  }
  0x31   : > { %647 = vmatpush.bf16.msra.mxu1 %v1915_v2  ;;  %v593_v13 = vpack.c.bf16 %v592_v12, %v591_v11  ;;  %v772_v27 = vmul.f32 64.0, %v2046_v26  ;;  %vm776_vm1 = vweird.f32 %v2046_v26  ;;  %v1757_v59 = vor.u32 %v1920_v56, %v1754_v58  ;;  %v1744_v60 = vld [vmem:[%s2776_s7] sm:$0xf]  ;;  %v1919_v61 = vld [vmem:[%s2776_s7 + $0x4] sm:$0xf0]  ;;  %s2269_s17 = smov 96  }
  0x32   : > { %875 = vmatpush.bf16.msra.mxu2 %v1761_v51  ;;  %v1918_v62 = vld [vmem:[%s2776_s7 + $0x4] sm:$0xf]  ;;  %v1745_v0 = vor.u32 %v1919_v61, %v1744_v60  ;;  %v1746_v1 = vld [vmem:[%s2776_s7 + $0x8] sm:$0xf0]  ;;  %vm1054_vm10 = vcmask 257152   ;;  %vm1134_vm11 = vcmask 388352  }
  0x33   : > { %v773_v28 = vsub.f32 1.0, %v772_v27  ;;  %889 = vmatpush.bf16.msra.mxu3 %v1765_v53  ;;  %vm1214_vm12 = vcmask 519552   ;;  %s1955_s26 = sshll.u32 %s2378_s25, 4 }
  0x34   : > { %s1584_s28 = scalar_lea.hbm %s2785_s16, %s1955_s26 }
  0x35   : > { %648 = vmatpush.bf16.msra.mxu1 %v1914_v3  ;;  %v774_v29 = vmul.f32 %v2046_v26, %v773_v28  ;;  %v1749_v3 = vor.u32 %v1918_v62, %v1746_v1  ;;  %v2040_v28 = vld [vmem:[%s2775_s6] ss:$0 sm:$0xff] }
  0x36   : > { %876 = vmatpush.bf16.msra.mxu2 %v1753_v57 }
  0x37   : > { %v775_v30 = vadd.f32 %v2046_v26, %v774_v29  ;;  %890 = vmatpush.bf16.msra.mxu3 %v1757_v59 }
  0x38   : > { %1724 = vmatmul.msk.bf16.vlgmr.msra.gmra.mxu1 %vm637_vm0, %v604_v7 }
  0x39   : > { %686 = vmatpush.bf16.msrb.mxu1 %v1913_v6  ;;  %v2464_v31 = vsel %vm776_vm1, %v2046_v26, %v775_v30 }
  0x3a   : > { %877 = vmatpush.bf16.msra.mxu2 %v1745_v0 }
  0x3b   : > { %891 = vmatpush.bf16.msra.mxu3 %v1749_v3 }
  0x3d   : > { %687 = vmatpush.bf16.msrb.mxu1 %v1912_v8 }
  0x41   : > { %688 = vmatpush.bf16.msrb.mxu1 %v1911_v9 }
  0x45   : > { %689 = vmatpush.bf16.msrb.mxu1 %v1910_v10 }
  0x48   : > { %1741 = vmatmul.msk.bf16.vlgmr.msrb.gmra.mxu1 %vm637_vm0, %v593_v13 }
  0xb5   : > { %v650_v14 = vpop.f32.mrf.mxu1 }
  0xbd   : > { %v652_v15 = vpop.f32.mrf.mxu1 }
  0xc5   : > { %v691_v17 = vpop.f32.mrf.mxu1 }
  0xc6   : > { %v692_v18 = vadd.f32 %v691_v17, %v650_v14 }
  0xc8   : > { %v2456_v19 = vadd.f32 %v2038_v16, %v692_v18 }
  0xca   : > { %v765_v20 = vsel %vm637_vm0, %v2456_v19, 0.0 }
  0xcb   : > { %766 = vadd.xlane.f32.xlu0 %v765_v20 }
  0xcd   : > { %v693_v21 = vpop.f32.mrf.mxu1 }
  0xce   : > { %v694_v22 = vadd.f32 %v693_v21, %v652_v15 }
  0xd0   : > { %v2460_v23 = vadd.f32 %v2038_v16, %v694_v22  ;;  %v2039_v22 = vld [vmem:[%s2774_s5] ss:$0 sm:$0xff] }
  0xd2   : > { %v768_v24 = vsel %vm637_vm0, %v2460_v23, 0.0 }
  0xd3   : > { %769 = vadd.xlane.f32.xlu0 %v768_v24 }
 0x13e   : > { %v767_v32 = vpop.xlane.xlu0 %766 }
 0x13f   : > { %v778_v33 = vmul.f32 %v2464_v31, %v767_v32 }
 0x141   : > { %v2468_v34 = vsub.f32 %v2456_v19, %v778_v33 }
 0x143   : > { %v782_v35 = vmul.f32 %v2468_v34, %v2468_v34 }
 0x145   : > { %v784_v36 = vsel %vm637_vm0, %v782_v35, 0.0 }
 0x146   : > { %785 = vadd.xlane.f32.xlu1 %v784_v36  ;;  %v770_v37 = vpop.xlane.xlu0 %769 }
 0x147   : > { %v779_v38 = vmul.f32 %v2464_v31, %v770_v37 }
 0x149   : > { %v2475_v39 = vsub.f32 %v2460_v23, %v779_v38 }
 0x14b   : > { %v783_v40 = vmul.f32 %v2475_v39, %v2475_v39 }
 0x14d   : > { %v787_v41 = vsel %vm637_vm0, %v783_v40, 0.0 }
 0x14e   : > { %788 = vadd.xlane.f32.xlu1 %v787_v41 }
 0x1b9   : > { %v786_v63 = vpop.xlane.xlu1 %785 }
 0x1ba   : > { %v790_v2 = vmul.f32 %v786_v63, %v2464_v31 }
 0x1bc   : > { %v792_v4 = vadd.f32 1e-05, %v790_v2 }
 0x1be   : > { %2047 = vrsqrt.f32 %v792_v4  ;;  %vm800_vm3 = vweird.f32 %v792_v4 }
 0x1c1   : > { %v789_v5 = vpop.xlane.xlu1 %788 }
 0x1c2   : > { %v791_v6 = vmul.f32 %v789_v5, %v2464_v31 }
 0x1c4   : > { %v2048_v7 = vpop.eup %2047  ;;  %v793_v8 = vadd.f32 1e-05, %v791_v6 }
 0x1c5   : > { %v795_v9 = vmul.f32 %v2048_v7, %v792_v4  ;;  %vm801_vm2 = vweird.f32 %v2048_v7 }
 0x1c6   : > { %2049 = vrsqrt.f32 %v793_v8  ;;  %vm802_vm4 = vmor %vm800_vm3, %vm801_vm2  ;;  %vm810_vm6 = vweird.f32 %v793_v8 }
 0x1c7   : > { %v796_v10 = vmul.f32 %v2048_v7, %v795_v9 }
 0x1c9   : > { %v797_v11 = vmul.f32 0.5, %v796_v10 }
 0x1cb   : > { %v798_v12 = vsub.f32 1.5, %v797_v11 }
 0x1cc   : > { %v2050_v13 = vpop.eup %2049 }
 0x1cd   : > { %v799_v14 = vmul.f32 %v2048_v7, %v798_v12  ;;  %v805_v15 = vmul.f32 %v2050_v13, %v793_v8  ;;  %vm811_vm5 = vweird.f32 %v2050_v13 }
 0x1ce   : > { %vm812_vm7 = vmor %vm810_vm6, %vm811_vm5 }
 0x1cf   : > { %v806_v16 = vmul.f32 %v2050_v13, %v805_v15  ;;  %v803_v17 = vsel %vm802_vm4, %v2048_v7, %v799_v14 }
 0x1d0   : > { %v814_v21 = vmul.f32 %v803_v17, %v2468_v34 }
 0x1d1   : > { %v807_v18 = vmul.f32 0.5, %v806_v16 }
 0x1d2   : > { %v819_v27 = vmul.f32 %v2039_v22, %v814_v21 }
 0x1d3   : > { %v808_v20 = vsub.f32 1.5, %v807_v18 }
 0x1d4   : > { %v824_v30 = vadd.f32 %v2040_v28, %v819_v27 }
 0x1d5   : > { %v809_v24 = vmul.f32 %v2050_v13, %v808_v20 }
 0x1d7   : > { %v813_v25 = vsel %vm812_vm7, %v2050_v13, %v809_v24 }
 0x1d8   : > { %v815_v26 = vmul.f32 %v813_v25, %v2475_v39 }
 0x1da   : > { %v820_v29 = vmul.f32 %v2039_v22, %v815_v26 }
 0x1dc   : > { %v825_v32 = vadd.f32 %v2040_v28, %v820_v29 }
 0x1de   : > { %v826_v33 = vpack.c.bf16 %v825_v32, %v824_v30 }
 0x1e0   : > { %1774 = vmatmul.msk.bf16.vlgmr.msra.gmra.mxu2 %vm637_vm0, %v826_v33  ;;  %1775 = vmatmul.msk.bf16.vlgmr.msra.gmra.mxu3 %vm637_vm0, %v826_v33 }
 0x263   : > { %v879_v34 = vpop.f32.mrf.mxu2  ;;  %v893_v35 = vpop.f32.mrf.mxu3 }
 0x264   : > { %v898_v36 = vpack.c.bf16 %v893_v35, %v879_v34 }
 0x266   : > { %v902_v39 = vunpack.c.l.b16 %v898_v36  ;;  %v951_v41 = vunpack.c.h.b16 %v898_v36 }
 0x26b   : > { %v881_v37 = vpop.f32.mrf.mxu2  ;;  %v895_v38 = vpop.f32.mrf.mxu3 }
 0x26c   : > { %v899_v40 = vpack.c.bf16 %v895_v38, %v881_v37 }
 0x26e   : > { %v903_v42 = vunpack.c.l.b16 %v899_v40  ;;  %v952_v43 = vunpack.c.h.b16 %v899_v40 }
 0x270   : > { %v904_v44 = vpack.c.b16 %v903_v42, %v902_v39  ;;  %v2540_v45 = vpack.c.b16 %v952_v43, %v951_v41 }
 0x272   : > { %965 = vmatpush.bf16.msra.mxu1 %v2540_v45  ;;  %1139 = vrot.lane.b32.xlu1 %v904_v44, %s2263_s21 }
 0x273   : > { %905 = vrot.lane.b32.xlu0 %v904_v44, %s2264_s23  ;;  %979 = vrot.lane.b32.xlu2 %v904_v44, %s2265_s24 }
 0x27b   : > { %977 = vrot.lane.b32.xlu2 %v904_v44, %s2266_s27 }
 0x283   : > { %1137 = vrot.lane.b32.xlu2 %v904_v44, %s2267_s30 }
 0x28b   : > { %1059 = vrot.lane.b32.xlu2 %v904_v44, %s2268_s0 }
 0x293   : > { %1057 = vrot.lane.b32.xlu2 %v904_v44, %s2269_s17 }
 0x2cd   : > { %v980_v46 = vpop.permute.xlu2 %979 }
 0x2ce   : > { %v985_v47 = vsel %vm907_vm8, %v980_v46, 0 }
 0x2cf   : > { %994 = vmatpush.bf16.xpose.msrb.mxu2 %v985_v47 }
 0x2d5   : > { %v978_v48 = vpop.permute.xlu2 %977 }
 0x2d6   : > { %1778 = vmatmul.msk.bf16.vlgmr.msrb.gmra.mxu2 %vm907_vm8, %v978_v48 }
 0x2dd   : > { %v1138_v49 = vpop.permute.xlu2 %1137 }
 0x2e4   : > { %v1140_v50 = vpop.permute.xlu1 %1139 }
 0x2e5   : > { %v1145_v51 = vsel %vm907_vm8, %v1140_v50, 0  ;;  %v906_v52 = vpop.permute.xlu0 %905  ;;  %v1060_v53 = vpop.permute.xlu2 %1059 }
 0x2e6   : > { %v912_v54 = vsel %vm907_vm8, %v906_v52, 0  ;;  %1154 = vmatpush.bf16.xpose.msra.mxu2 %v1145_v51  ;;  %v1065_v55 = vsel %vm907_vm8, %v1060_v53, 0 }
 0x2e7   : > { %921 = vmatpush.bf16.xpose.msra.mxu0 %v912_v54 }
 0x2ed   : > { %1782 = vmatmul.msk.bf16.vlgmr.msra.gmra.mxu2 %vm907_vm8, %v1138_v49  ;;  %v1058_v56 = vpop.permute.xlu2 %1057 }
 0x2ee   : > { %1776 = vmatmul.msk.bf16.vlgmr.msra.gmra.mxu0 %vm907_vm8, %v904_v44 }
 0x2ef   : > { %1074 = vmatpush.bf16.xpose.msrb.mxu0 %v1065_v55 }
 0x2fe   : > { %1780 = vmatmul.msk.bf16.vlgmr.msrb.gmra.mxu0 %vm907_vm8, %v1058_v56 }
 0x359   : > { %v996_v57 = vpop.f32.mrf.mxu2 }
 0x35a   : > { %v1001_v58 = vsel %vm907_vm8, %v996_v57, -inf }
 0x35b   : > { %1002 = vmax.xlane.f32.xlu0 %v1001_v58 }
 0x361   : > { %v998_v59 = vpop.f32.mrf.mxu2 }
 0x362   : > { %v1004_v60 = vsel %vm907_vm8, %v998_v59, -inf }
 0x363   : > { %1005 = vmax.xlane.f32.xlu2 %v1004_v60 }
 0x36b   : > { %v923_v61 = vpop.f32.mrf.mxu0 }
 0x36c   : > { %v928_v62 = vsel %vm907_vm8, %v923_v61, -inf }
 0x36d   : > { %929 = vmax.xlane.f32.xlu1 %v928_v62 }
 0x370   : > { %v1156_v63 = vpop.f32.mrf.mxu2 }
 0x371   : > { %v1161_v0 = vsel %vm907_vm8, %v1156_v63, -inf }
 0x372   : > { %1162 = vmax.xlane.f32.xlu2 %v1161_v0 }
 0x373   : > { %v925_v1 = vpop.f32.mrf.mxu0 }
 0x374   : > { %v931_v2 = vsel %vm907_vm8, %v925_v1, -inf }
 0x375   : > { %932 = vmax.xlane.f32.xlu0 %v931_v2 }
 0x378   : > { %v1158_v3 = vpop.f32.mrf.mxu2 }
 0x379   : > { %v1164_v4 = vsel %vm907_vm8, %v1158_v3, -inf }
 0x37a   : > { %1165 = vmax.xlane.f32.xlu1 %v1164_v4 }
 0x37b   : > { %v1076_v5 = vpop.f32.mrf.mxu0 }
 0x37c   : > { %v1081_v6 = vsel %vm907_vm8, %v1076_v5, -inf }
 0x37d   : > { %1082 = vmax.xlane.f32.xlu0 %v1081_v6 }
 0x383   : > { %v1078_v7 = vpop.f32.mrf.mxu0 }
 0x384   : > { %v1084_v8 = vsel %vm907_vm8, %v1078_v7, -inf }
 0x385   : > { %1085 = vmax.xlane.f32.xlu2 %v1084_v8 }
 0x391   : > { %1024 = vrot.lane.b32.xlu0 %v2540_v45, %s2266_s27 }
 0x3ce   : > { %v1003_v9 = vpop.xlane.xlu0 %1002 }
 0x3cf   : > { %v1007_v10 = vsub.f32 %v996_v57, %v1003_v9 }
 0x3d1   : > { %v1009_v11 = vmul.f32 1.442695, %v1007_v10 }
 0x3d3   : > { %2051 = vpow2.f32 %v1009_v11 }
 0x3d6   : > { %v1006_v12 = vpop.xlane.xlu2 %1005 }
 0x3d7   : > { %v1008_v13 = vsub.f32 %v998_v59, %v1006_v12 }
 0x3d9   : > { %v2052_v14 = vpop.eup %2051  ;;  %v1011_v15 = vmul.f32 1.442695, %v1008_v13 }
 0x3da   : > { %v1013_v16 = vsel %vm907_vm8, %v2052_v14, 0.0 }
 0x3db   : > { %2053 = vpow2.f32 %v1011_v15  ;;  %1014 = vadd.xlane.f32.xlu1 %v1013_v16 }
 0x3e0   : > { %v930_v17 = vpop.xlane.xlu1 %929 }
 0x3e1   : > { %v2054_v18 = vpop.eup %2053  ;;  %v934_v20 = vsub.f32 %v923_v61, %v930_v17 }
 0x3e2   : > { %v1016_v21 = vsel %vm907_vm8, %v2054_v18, 0.0 }
 0x3e3   : > { %v936_v22 = vmul.f32 1.442695, %v934_v20  ;;  %1017 = vadd.xlane.f32.xlu0 %v1016_v21 }
 0x3e5   : > { %2055 = vpow2.f32 %v936_v22  ;;  %v1163_v32 = vpop.xlane.xlu2 %1162 }
 0x3e6   : > { %v1167_v37 = vsub.f32 %v1156_v63, %v1163_v32 }
 0x3e8   : > { %v933_v24 = vpop.xlane.xlu0 %932  ;;  %v1169_v39 = vmul.f32 1.442695, %v1167_v37 }
 0x3e9   : > { %v935_v25 = vsub.f32 %v925_v1, %v933_v24 }
 0x3eb   : > { %v2056_v26 = vpop.eup %2055  ;;  %v938_v27 = vmul.f32 1.442695, %v935_v25 }
 0x3ec   : > { %v940_v28 = vsel %vm907_vm8, %v2056_v26, 0.0 }
 0x3ed   : > { %2057 = vpow2.f32 %v938_v27  ;;  %941 = vadd.xlane.f32.xlu2 %v940_v28  ;;  %v1166_v29 = vpop.xlane.xlu1 %1165 }
 0x3ee   : > { %v1168_v30 = vsub.f32 %v1158_v3, %v1166_v29 }
 0x3f0   : > { %v1171_v33 = vmul.f32 1.442695, %v1168_v30  ;;  %v1083_v34 = vpop.xlane.xlu0 %1082 }
 0x3f1   : > { %v1087_v35 = vsub.f32 %v1076_v5, %v1083_v34 }
 0x3f2   : > { %2059 = vpow2.f32 %v1171_v33 }
 0x3f3   : > { %v2058_v36 = vpop.eup %2057  ;;  %v1089_v38 = vmul.f32 1.442695, %v1087_v35 }
 0x3f4   : > { %v943_v40 = vsel %vm907_vm8, %v2058_v36, 0.0 }
 0x3f5   : > { %2061 = vpow2.f32 %v1089_v38  ;;  %944 = vadd.xlane.f32.xlu1 %v943_v40  ;;  %v1929_v40 = vld [vmem:[#allocation8 + $0x18] sm:$0xff] }
 0x3f6   : > { %2063 = vpow2.f32 %v1169_v39  ;;  %1255 = vmatpush.bf16.msra.mxu0 %v1929_v40  ;;  %v1928_v39 = vld [vmem:[#allocation8 + $0x10] sm:$0xff] }
 0x3f7   : > { %1104 = vrot.lane.b32.xlu0 %v2540_v45, %s2269_s17  ;;  %s577_s17 = sand.u32 1, %s2247_s22  }
 0x3f8   : > { %v1086_v41 = vpop.xlane.xlu2 %1085  ;;  %v2060_v42 = vpop.eup %2059  ;;  %s1703_s18 = sshll.u32 %s577_s17, 4  ;;  %s1573_s25 = scalar_lea.sflag [#allocation5], %s577_s17 }
 0x3f9   : > { %v1088_v43 = vsub.f32 %v1078_v7, %v1086_v41  ;;  %v1176_v47 = vsel %vm907_vm8, %v2060_v42, 0.0  ;;  %v1927_v41 = vld [vmem:[#allocation8 + $0x8] sm:$0xff]  ;;  %s579_s29 = scalar_lea.vmem [#allocation9], %s1703_s18 }
 0x3fa   : > { %1256 = vmatpush.bf16.msra.mxu0 %v1928_v39  ;;  %s1585_s2 = sshll.u32 %s579_s29, 4  ;;  %s1586_s2 = int_to_ptr.vmem [resolvable:$true] %s1585_s2 }
 0x3fb   : > { %v2062_v44 = vpop.eup %2061  ;;  %v1091_v46 = vmul.f32 1.442695, %v1088_v43 }
 0x3fc   : > { %v1093_v48 = vsel %vm907_vm8, %v2062_v44, 0.0  ;;  %v2064_v49 = vpop.eup %2063 }
 0x3fd   : > { %2065 = vpow2.f32 %v1091_v46  ;;  %1177 = vadd.xlane.f32.xlu1 %v1176_v47  ;;  %1094 = vadd.xlane.f32.xlu2 %v1093_v48  ;;  %v1173_v52 = vsel %vm907_vm8, %v2064_v49, 0.0 }
 0x3fe   : > { %1257 = vmatpush.bf16.msra.mxu0 %v1927_v41 }
 0x403   : > { %v2066_v50 = vpop.eup %2065  ;;  %v1025_v51 = vpop.permute.xlu0 %1024 }
 0x404   : > { %1037 = vmatpush.bf16.msrb.mxu3 %v1025_v51  ;;  %v1096_v53 = vsel %vm907_vm8, %v2066_v50, 0.0 }
 0x405   : > { %1174 = vadd.xlane.f32.xlu2 %v1173_v52  ;;  %1097 = vadd.xlane.f32.xlu1 %v1096_v53 }
 0x41d   : > { %1184 = vrot.lane.b32.xlu2 %v2540_v45, %s2267_s30 }
 0x44e   : > { %v1015_v54 = vpop.xlane.xlu1 %1014 }
 0x44f   : > { %2067 = vrcp.f32 %v1015_v54 }
 0x455   : > { %v2068_v56 = vpop.eup %2067 }
 0x456   : > { %v1018_v55 = vpop.xlane.xlu0 %1017  ;;  %v1021_v58 = vmul.f32 %v2068_v56, %v2052_v14 }
 0x457   : > { %2069 = vrcp.f32 %v1018_v55 }
 0x45d   : > { %v2070_v57 = vpop.eup %2069 }
 0x45e   : > { %v1022_v59 = vmul.f32 %v2070_v57, %v2054_v18 }
 0x460   : > { %v1023_v60 = vpack.c.bf16 %v1022_v59, %v1021_v58  ;;  %v942_v61 = vpop.xlane.xlu2 %941 }
 0x461   : > { %2071 = vrcp.f32 %v942_v61 }
 0x462   : > { %1779 = vmatmul.msk.bf16.vlgmr.msrb.gmra.mxu3 %vm907_vm8, %v1023_v60 }
 0x467   : > { %v2072_v0 = vpop.eup %2071 }
 0x468   : > { %v945_v62 = vpop.xlane.xlu1 %944  ;;  %v948_v45 = vmul.f32 %v2072_v0, %v2056_v26 }
 0x469   : > { %2073 = vrcp.f32 %v945_v62  ;;  %v1105_v63 = vpop.permute.xlu0 %1104 }
 0x46a   : > { %1117 = vmatpush.bf16.msrb.mxu1 %v1105_v63 }
 0x46f   : > { %v2074_v1 = vpop.eup %2073 }
 0x470   : > { %v949_v2 = vmul.f32 %v2074_v1, %v2058_v36  ;;  %v1178_v3 = vpop.xlane.xlu1 %1177  ;;  %v1095_v4 = vpop.xlane.xlu2 %1094 }
 0x471   : > { %2075 = vrcp.f32 %v1095_v4  ;;  %v1936_v4 = vld [vmem:[%s2781_s12 + $0x34] sm:$0xf] }
 0x472   : > { %v950_v5 = vpack.c.bf16 %v949_v2, %v948_v45  ;;  %2077 = vrcp.f32 %v1178_v3  ;;  %v1831_v2 = vld [vmem:[%s2781_s12 + $0x30] sm:$0xf]  ;;  %v1937_v3 = vld [vmem:[%s2781_s12 + $0x34] sm:$0xf0] }
 0x474   : > { %1777 = vmatmul.msk.bf16.vlgmr.msra.gmra.mxu1 %vm907_vm8, %v950_v5  ;;  %v1832_v5 = vor.u32 %v1937_v3, %v1831_v2  ;;  %v1940_v2 = vld [vmem:[%s2783_s14 + $0x10] sm:$0xff]  ;;  %v1949_v3 = vld [vmem:[%s2783_s14 + $0x58] sm:$0xff] }
 0x476   : > { %1379 = vmatpush.bf16.msra.mxu1 %v1832_v5  ;;  %v731_v5 = vld [vmem:[%s2782_s13] sm:$0x3] }
 0x477   : > { %v2076_v8 = vpop.eup %2075 }
 0x478   : > { %v1098_v6 = vpop.xlane.xlu1 %1097  ;;  %v1175_v7 = vpop.xlane.xlu2 %1174  ;;  %v1101_v12 = vmul.f32 %v2076_v8, %v2062_v44  ;;  %v1823_v8 = vld [vmem:[%s2781_s12 + $0x20] sm:$0xf] }
 0x479   : > { %2079 = vrcp.f32 %v1098_v6  ;;  %v2078_v9 = vpop.eup %2077  ;;  %v1833_v6 = vld [vmem:[%s2781_s12 + $0x38] sm:$0xf0] }
 0x47a   : > { %2081 = vrcp.f32 %v1175_v7  ;;  %v1182_v15 = vmul.f32 %v2078_v9, %v2060_v42  ;;  %v1926_v42 = vld [vmem:[#allocation8] sm:$0xff]  ;;  %v1836_v7 = vor.u32 %v1936_v4, %v1833_v6  ;;  %v1948_v6 = vld [vmem:[%s2783_s14 + $0x50] sm:$0xff] }
 0x47b   : > { %1258 = vmatpush.bf16.msra.mxu0 %v1926_v42  ;;  %v1935_v9 = vld [vmem:[%s2781_s12 + $0x24] sm:$0xf0] }
 0x47c   : > { %1393 = vmatpush.bf16.msrb.mxu2 %v1836_v7  ;;  %v1939_v4 = vld [vmem:[%s2783_s14 + $0x8] sm:$0xff]  ;;  %v1938_v7 = vld [vmem:[%s2783_s14] sm:$0xff] }
 0x47f   : > { %v2080_v10 = vpop.eup %2079 }
 0x480   : > { %v2082_v11 = vpop.eup %2081  ;;  %v1102_v13 = vmul.f32 %v2080_v10, %v2066_v50  ;;  %v1185_v14 = vpop.permute.xlu2 %1184  ;;  %v2041_v50 = vld [vmem:[%s2778_s9] ss:$0 sm:$0xff]  ;;  %v1934_v10 = vld [vmem:[%s2781_s12 + $0x24] sm:$0xf] }
 0x481   : > { %v1181_v16 = vmul.f32 %v2082_v11, %v2064_v49  ;;  %1197 = vmatpush.bf16.msra.mxu3 %v1185_v14  ;;  %v1824_v11 = vor.u32 %v1935_v9, %v1823_v8  ;;  %v1815_v14 = vld [vmem:[%s2781_s12 + $0x10] sm:$0xf]  ;;  %v1328_v8 = vperm.slane %v731_v5, 0  ;;  %v1947_v9 = vld [vmem:[%s2783_s14 + $0x48] sm:$0xff] }
 0x482   : > { %v1103_v17 = vpack.c.bf16 %v1102_v13, %v1101_v12  ;;  %v1825_v12 = vld [vmem:[%s2781_s12 + $0x28] sm:$0xf0] }
 0x483   : > { %v1183_v18 = vpack.c.bf16 %v1182_v15, %v1181_v16  ;;  %v1828_v13 = vor.u32 %v1934_v10, %v1825_v12  ;;  %1380 = vmatpush.bf16.msra.mxu1 %v1824_v11  ;;  %v1933_v15 = vld [vmem:[%s2781_s12 + $0x14] sm:$0xf0]  ;;  %v1932_v16 = vld [vmem:[%s2781_s12 + $0x14] sm:$0xf]  ;;  %v1946_v12 = vld [vmem:[%s2783_s14 + $0x40] sm:$0xff] }
 0x484   : > { %1781 = vmatmul.msk.bf16.vlgmr.msrb.gmra.mxu1 %vm907_vm8, %v1103_v17  ;;  %v1816_v17 = vor.u32 %v1933_v15, %v1815_v14  ;;  %v1329_v14 = vperm.slane %v731_v5, 1 }
 0x485   : > { %1783 = vmatmul.msk.bf16.vlgmr.msra.gmra.mxu3 %vm907_vm8, %v1183_v18  ;;  %1394 = vmatpush.bf16.msrb.mxu2 %v1828_v13  ;;  %v1817_v18 = vld [vmem:[%s2781_s12 + $0x18] sm:$0xf0] }
 0x487   : > { %1381 = vmatpush.bf16.msra.mxu1 %v1816_v17 }
 0x4e5   : > { %v1039_v20 = vpop.f32.mrf.mxu3 }
 0x4e6   : > { %v1044_v21 = vpack.c.bf16 %v1039_v20, %v1039_v20 }
 0x4e8   : > { %1048 = vrot.lane.b32.xlu1 %v1044_v21, %s2263_s21  ;;  %v1820_v21 = vor.u32 %v1932_v16, %v1817_v18 }
 0x4ea   : > { %1395 = vmatpush.bf16.msrb.mxu2 %v1820_v21 }
 0x4ed   : > { %v1041_v27 = vpop.f32.mrf.mxu3 }
 0x4ee   : > { %v1045_v33 = vpack.c.bf16 %v1041_v27, %v1041_v27 }
 0x4f1   : > { %v967_v22 = vpop.f32.mrf.mxu1 }
 0x4f2   : > { %v972_v24 = vpack.c.bf16 %v967_v22, %v967_v22 }
 0x4f4   : > { %975 = vst.msk [vmem:[#allocation2] sm:$0xf] %vm974_vm9, %v972_v24  ;;  %v1807_v24 = vld [vmem:[%s2781_s12] sm:$0xf] }
 0x4f9   : > { %v969_v25 = vpop.f32.mrf.mxu1 }
 0x4fa   : > { %v973_v26 = vpack.c.bf16 %v969_v25, %v969_v25  ;;  %v1931_v25 = vld [vmem:[%s2781_s12 + $0x4] sm:$0xf0] }
 0x4fc   : > { %976 = vst.msk [vmem:[#allocation2 + $0x4] sm:$0xf] %vm974_vm9, %v973_v26  ;;  %v1930_v26 = vld [vmem:[%s2781_s12 + $0x4] sm:$0xf] }
 0x501   : > { %v1119_v28 = vpop.f32.mrf.mxu1 }
 0x502   : > { %v1124_v29 = vpack.c.bf16 %v1119_v28, %v1119_v28  ;;  %v1808_v28 = vor.u32 %v1931_v25, %v1807_v24 }
 0x504   : > { %1128 = vrot.lane.b32.xlu0 %v1124_v29, %s2268_s0  ;;  %v1809_v29 = vld [vmem:[%s2781_s12 + $0x8] sm:$0xf0]  ;;  %1382 = vmatpush.bf16.msra.mxu1 %v1808_v28 }
 0x508   : > { %v1199_v30 = vpop.f32.mrf.mxu3 }
 0x509   : > { %v1121_v32 = vpop.f32.mrf.mxu1  ;;  %v1204_v37 = vpack.c.bf16 %v1199_v30, %v1199_v30  ;;  %v1812_v30 = vor.u32 %v1930_v26, %v1809_v29 }
 0x50a   : > { %v1125_v34 = vpack.c.bf16 %v1121_v32, %v1121_v32 }
 0x50b   : > { %1396 = vmatpush.bf16.msrb.mxu2 %v1812_v30 }
 0x50c   : > { %1050 = vrot.lane.b32.xlu0 %v1045_v33, %s2263_s21  ;;  %1130 = vrot.lane.b32.xlu2 %v1125_v34, %s2268_s0  ;;  %s1587_s21 = sshll.u32 %s1584_s28, 4  ;;  %s2205_s0 = scalar_lea.hbm %s2785_s16, 32  ;;  %s1588_s21 = int_to_ptr.hbm [resolvable:$true] %s1587_s21 }
 0x50d   : > { %s2199_s23 = sshra.s32 %s1588_s21, 4  ;;  %s2200_s23 = int_to_ptr.hbm [resolvable:$true] %s2199_s23 }
 0x50e   : > { %p2206_p3 = scmp.lt.s32.totalorder %s2200_s23, %s2785_s16 }
 0x510   : > { %v1201_v35 = vpop.f32.mrf.mxu3 }
 0x511   : > { %v1205_v36 = vpack.c.bf16 %v1201_v35, %v1201_v35 }
 0x513   : > { %1210 = vrot.lane.b32.xlu1 %v1205_v36, %s2265_s24 }
 0x514   : > { %1208 = vrot.lane.b32.xlu0 %v1204_v37, %s2265_s24  ;;  %s2201_s24 = scalar_lea.hbm %s2200_s23, 16 }
 0x515   : > { %p2202_p0 = scmp.ne.s32.totalorder %s2200_s23, %s2201_s24  ;;  %p2207_p4 = scmp.lt.s32.totalorder %s2205_s0, %s2201_s24 }
 0x517   : > { %p2203_p1 = pnand %p2202_p0, %p2395_p5  ;;  %p2208_p7 = por %p2207_p4, %p2206_p3 }
 0x519   : > { %p2204_p2 = pneg %p2203_p1 }
 0x51b   : > { %p2209_p8 = pnand %p2208_p7, %p2204_p2 }
 0x55a   : > { %v1049_v38 = vpop.permute.xlu1 %1048 }
 0x55b   : > { %1055 = vst.msk [vmem:[#allocation2] sm:$0xf] %vm1054_vm10, %v1049_v38 }
 0x566   : > { %v1131_v46 = vpop.permute.xlu2 %1130 }
 0x576   : > { %v1129_v43 = vpop.permute.xlu0 %1128 }
 0x577   : > { %1135 = vst.msk [vmem:[#allocation2] sm:$0xf] %vm1134_vm11, %v1129_v43 }
 0x57e   : > { %v1051_v44 = vpop.permute.xlu0 %1050 }
 0x57f   : > { %1056 = vst.msk [vmem:[#allocation2 + $0x4] sm:$0xf] %vm1054_vm10, %v1051_v44 }
 0x580   : > { %1136 = vst.msk [vmem:[#allocation2 + $0x4] sm:$0xf] %vm1134_vm11, %v1131_v46 }
 0x585   : > { %v1211_v47 = vpop.permute.xlu1 %1210 }
 0x586   : > { %1216 = vst.msk [vmem:[#allocation2 + $0x4] sm:$0xf] %vm1214_vm12, %v1211_v47  ;;  %v1209_v48 = vpop.permute.xlu0 %1208 }
 0x587   : > { %1215 = vst.msk [vmem:[#allocation2] sm:$0xf] %vm1214_vm12, %v1209_v48 }
 0x58e   : > { %v1954_v49 = vld [vmem:[#allocation2] sm:$0xff] }
 0x58f   : > { %1804 = vmatmul.msk.bf16.vlgmr.msra.gmra.mxu0 %vm637_vm0, %v1954_v49 }
 0x60c   : > { %v1260_v51 = vpop.f32.mrf.mxu0 }
 0x60d   : > { %v1265_v52 = vadd.f32 %v1260_v51, %v2456_v19  ;;  %v2043_v51 = vld [vmem:[%s2780_s11] ss:$0 sm:$0xff] }
 0x60f   : > { %v2596_v53 = vadd.f32 %v2041_v50, %v1265_v52 }
 0x611   : > { %v1272_v54 = vsel %vm637_vm0, %v2596_v53, 0.0 }
 0x612   : > { %1273 = vadd.xlane.f32.xlu2 %v1272_v54 }
 0x614   : > { %v1262_v55 = vpop.f32.mrf.mxu0 }
 0x615   : > { %v1266_v56 = vadd.f32 %v1262_v55, %v2460_v23 }
 0x617   : > { %v2601_v57 = vadd.f32 %v2041_v50, %v1266_v56 }
 0x619   : > { %v1275_v58 = vsel %vm637_vm0, %v2601_v57, 0.0 }
 0x61a   : > { %1276 = vadd.xlane.f32.xlu0 %v1275_v58 }
 0x685   : > { %v1274_v59 = vpop.xlane.xlu2 %1273 }
 0x686   : > { %v1278_v60 = vmul.f32 %v1274_v59, %v2464_v31 }
 0x688   : > { %v2607_v19 = vsub.f32 %v2596_v53, %v1278_v60  ;;  %v1945_v60 = vld [vmem:[%s2783_s14 + $0x38] sm:$0xff] }
 0x689   : > { %1540 = vmatpush.bf16.msrb.mxu3 %v1945_v60 }
 0x68a   : > { %v1282_v61 = vmul.f32 %v2607_v19, %v2607_v19 }
 0x68c   : > { %v1284_v62 = vsel %vm637_vm0, %v1282_v61, 0.0  ;;  %v1953_v61 = vld [vmem:[%s2783_s14 + $0x78] sm:$0xff] }
 0x68d   : > { %1285 = vadd.xlane.f32.xlu1 %v1284_v62  ;;  %v1277_v63 = vpop.xlane.xlu0 %1276  ;;  %1554 = vmatpush.bf16.msrb.mxu0 %v1953_v61  ;;  %v1943_v62 = vld [vmem:[%s2783_s14 + $0x28] sm:$0xff] }
 0x68e   : > { %v1279_v23 = vmul.f32 %v1277_v63, %v2464_v31  ;;  %v1952_v63 = vld [vmem:[%s2783_s14 + $0x70] sm:$0xff] }
 0x690   : > { %v2614_v0 = vsub.f32 %v2601_v57, %v1279_v23  ;;  %v1942_v23 = vld [vmem:[%s2783_s14 + $0x20] sm:$0xff] }
 0x691   : > { %1555 = vmatpush.bf16.msrb.mxu0 %v1952_v63 }
 0x692   : > { %v1283_v1 = vmul.f32 %v2614_v0, %v2614_v0 }
 0x694   : > { %v1287_v45 = vsel %vm637_vm0, %v1283_v1, 0.0  ;;  %v1941_v1 = vld [vmem:[%s2783_s14 + $0x18] sm:$0xff] }
 0x695   : > { %1288 = vadd.xlane.f32.xlu2 %v1287_v45  ;;  %v1950_v45 = vld [vmem:[%s2783_s14 + $0x60] sm:$0xff] }
 0x700   : > { %v1286_v20 = vpop.xlane.xlu1 %1285 }
 0x701   : > { %v1290_v22 = vmul.f32 %v1286_v20, %v2464_v31 }
 0x703   : > { %v1292_v27 = vadd.f32 1e-05, %v1290_v22 }
 0x705   : > { %2083 = vrsqrt.f32 %v1292_v27  ;;  %vm1300_vm14 = vweird.f32 %v1292_v27 }
 0x708   : > { %v1289_v32 = vpop.xlane.xlu2 %1288 }
 0x709   : > { %v1291_v33 = vmul.f32 %v1289_v32, %v2464_v31  ;;  %v2042_v31 = vld [vmem:[%s2779_s10] ss:$0 sm:$0xff] }
 0x70b   : > { %v2084_v34 = vpop.eup %2083  ;;  %v1293_v35 = vadd.f32 1e-05, %v1291_v33 }
 0x70c   : > { %v1295_v36 = vmul.f32 %v2084_v34, %v1292_v27  ;;  %vm1301_vm13 = vweird.f32 %v2084_v34 }
 0x70d   : > { %2085 = vrsqrt.f32 %v1293_v35  ;;  %vm1302_vm15 = vmor %vm1300_vm14, %vm1301_vm13  ;;  %vm1310_vm2 = vweird.f32 %v1293_v35 }
 0x70e   : > { %v1296_v37 = vmul.f32 %v2084_v34, %v1295_v36 }
 0x710   : > { %v1297_v38 = vmul.f32 0.5, %v1296_v37 }
 0x712   : > { %v1298_v40 = vsub.f32 1.5, %v1297_v38 }
 0x713   : > { %v2086_v39 = vpop.eup %2085 }
 0x714   : > { %v1299_v41 = vmul.f32 %v2084_v34, %v1298_v40  ;;  %v1305_v42 = vmul.f32 %v2086_v39, %v1293_v35  ;;  %vm1311_vm1 = vweird.f32 %v2086_v39 }
 0x715   : > { %vm1312_vm3 = vmor %vm1310_vm2, %vm1311_vm1 }
 0x716   : > { %v1306_v43 = vmul.f32 %v2086_v39, %v1305_v42  ;;  %v1303_v44 = vsel %vm1302_vm15, %v2084_v34, %v1299_v41 }
 0x717   : > { %v1314_v48 = vmul.f32 %v1303_v44, %v2607_v19  ;;  %v1944_v19 = vld [vmem:[%s2783_s14 + $0x30] sm:$0xff] }
 0x718   : > { %v1307_v46 = vmul.f32 0.5, %v1306_v43  ;;  %1541 = vmatpush.bf16.msrb.mxu3 %v1944_v19 }
 0x719   : > { %v1319_v52 = vmul.f32 %v2042_v31, %v1314_v48 }
 0x71a   : > { %v1308_v47 = vsub.f32 1.5, %v1307_v46 }
 0x71b   : > { %v1324_v56 = vadd.f32 %v2043_v51, %v1319_v52 }
 0x71c   : > { %v1309_v49 = vmul.f32 %v2086_v39, %v1308_v47  ;;  %1542 = vmatpush.bf16.msrb.mxu3 %v1943_v62  ;;  %v2044_v62 = vld [vmem:[%s2784_s15] ss:$0 sm:$0xff] }
 0x71e   : > { %v1313_v50 = vsel %vm1312_vm3, %v2086_v39, %v1309_v49 }
 0x71f   : > { %v1315_v54 = vmul.f32 %v1313_v50, %v2614_v0  ;;  %v1951_v0 = vld [vmem:[%s2783_s14 + $0x68] sm:$0xff] }
 0x720   : > { %1543 = vmatpush.bf16.msrb.mxu3 %v1942_v23  ;;  %1556 = vmatpush.bf16.msrb.mxu0 %v1951_v0 }
 0x721   : > { %v1320_v55 = vmul.f32 %v2042_v31, %v1315_v54 }
 0x723   : > { %v1325_v58 = vadd.f32 %v2043_v51, %v1320_v55 }
 0x724   : > { %1544 = vmatpush.bf16.msrb.mxu3 %v1941_v1  ;;  %1557 = vmatpush.bf16.msrb.mxu0 %v1950_v45 }
 0x725   : > { %v1326_v59 = vpack.c.bf16 %v1325_v58, %v1324_v56 }
 0x727   : > { %1837 = vmatmul.msk.bf16.vlgmr.msra.gmra.mxu1 %vm637_vm0, %v1326_v59  ;;  %1838 = vmatmul.msk.bf16.vlgmr.msrb.gmra.mxu2 %vm637_vm0, %v1326_v59 }
 0x728   : > { %1545 = vmatpush.bf16.msrb.mxu3 %v1940_v2  ;;  %1558 = vmatpush.bf16.msrb.mxu0 %v1949_v3 }
 0x72c   : > { %1546 = vmatpush.bf16.msrb.mxu3 %v1939_v4  ;;  %1559 = vmatpush.bf16.msrb.mxu0 %v1948_v6 }
 0x730   : > { %1547 = vmatpush.bf16.msrb.mxu3 %v1938_v7  ;;  %1560 = vmatpush.bf16.msrb.mxu0 %v1947_v9 }
 0x734   : > { %1561 = vmatpush.bf16.msrb.mxu0 %v1946_v12 }
 0x7a4   : > { %v1384_v10 = vpop.f32.mrf.mxu1 }
 0x7a5   : > { %v1385_v11 = vadd.f32 %v1384_v10, %v1328_v8 }
 0x7a7   : > { %v1407_v13 = vmul.f32 0.044715, %v1385_v11  ;;  %v1403_v47 = vmul.f32 0.5, %v1385_v11 }
 0x7a9   : > { %v1411_v15 = vmul.f32 %v1407_v13, %v1385_v11 }
 0x7aa   : > { %v1398_v16 = vpop.f32.mrf.mxu2 }
 0x7ab   : > { %v1415_v17 = vmul.f32 %v1411_v15, %v1385_v11  ;;  %v1399_v18 = vadd.f32 %v1398_v16, %v1329_v14 }
 0x7ac   : > { %v1386_v20 = vpop.f32.mrf.mxu1 }
 0x7ad   : > { %v1419_v21 = vadd.f32 %v1415_v17, %v1385_v11  ;;  %v1408_v22 = vmul.f32 0.044715, %v1399_v18  ;;  %v1387_v24 = vadd.f32 %v1386_v20, %v1328_v8  ;;  %v1404_v56 = vmul.f32 0.5, %v1399_v18 }
 0x7af   : > { %v1412_v25 = vmul.f32 %v1408_v22, %v1399_v18  ;;  %v1409_v26 = vmul.f32 0.044715, %v1387_v24  ;;  %v1423_v27 = vmul.f32 0.7978846, %v1419_v21  ;;  %v1405_v31 = vmul.f32 0.5, %v1387_v24 }
 0x7b1   : > { %v1416_v28 = vmul.f32 %v1412_v25, %v1399_v18  ;;  %v1413_v29 = vmul.f32 %v1409_v26, %v1387_v24  ;;  %2087 = vtanh.f32 %v1423_v27 }
 0x7b2   : > { %v1400_v30 = vpop.f32.mrf.mxu2 }
 0x7b3   : > { %v1420_v32 = vadd.f32 %v1416_v28, %v1399_v18  ;;  %v1417_v33 = vmul.f32 %v1413_v29, %v1387_v24  ;;  %v1401_v34 = vadd.f32 %v1400_v30, %v1329_v14 }
 0x7b5   : > { %v1421_v35 = vadd.f32 %v1417_v33, %v1387_v24  ;;  %v1410_v36 = vmul.f32 0.044715, %v1401_v34  ;;  %v1424_v37 = vmul.f32 0.7978846, %v1420_v32  ;;  %v1406_v58 = vmul.f32 0.5, %v1401_v34 }
 0x7b7   : > { %v1425_v38 = vmul.f32 0.7978846, %v1421_v35  ;;  %v1414_v40 = vmul.f32 %v1410_v36, %v1401_v34  ;;  %v2088_v41 = vpop.eup %2087 }
 0x7b8   : > { %v1431_v44 = vadd.f32 1.0, %v2088_v41 }
 0x7b9   : > { %v1418_v39 = vmul.f32 %v1414_v40, %v1401_v34  ;;  %2089 = vtanh.f32 %v1425_v38 }
 0x7ba   : > { %2091 = vtanh.f32 %v1424_v37  ;;  %v1435_v50 = vmul.f32 %v1431_v44, %v1403_v47 }
 0x7bb   : > { %v1422_v42 = vadd.f32 %v1418_v39, %v1401_v34 }
 0x7bd   : > { %v1426_v43 = vmul.f32 0.7978846, %v1422_v42 }
 0x7bf   : > { %v2090_v46 = vpop.eup %2089  ;;  %2093 = vtanh.f32 %v1426_v43 }
 0x7c0   : > { %v1433_v48 = vadd.f32 1.0, %v2090_v46  ;;  %v2092_v49 = vpop.eup %2091 }
 0x7c1   : > { %v1432_v54 = vadd.f32 1.0, %v2092_v49 }
 0x7c2   : > { %v1437_v51 = vmul.f32 %v1433_v48, %v1405_v31 }
 0x7c3   : > { %v1436_v60 = vmul.f32 %v1432_v54, %v1404_v56 }
 0x7c4   : > { %v1439_v52 = vpack.c.bf16 %v1437_v51, %v1435_v50 }
 0x7c5   : > { %v2094_v55 = vpop.eup %2093 }
 0x7c6   : > { %1548 = vmatmul.bf16.vlgmr.msrb.gmra.mxu3 %v1439_v52  ;;  %v1434_v59 = vadd.f32 1.0, %v2094_v55 }
 0x7c8   : > { %v1438_v19 = vmul.f32 %v1434_v59, %v1406_v58 }
 0x7ca   : > { %v1440_v61 = vpack.c.bf16 %v1438_v19, %v1436_v60 }
 0x7cc   : > { %1562 = vmatmul.bf16.vlgmr.msrb.gmra.mxu0 %v1440_v61 }
 0x849   : > { %v1549_v63 = vpop.f32.mrf.mxu3  ;;  %v1563_v23 = vpop.f32.mrf.mxu0 }
 0x84a   : > { %v1550_v0 = vadd.f32 %v2044_v62, %v1549_v63 }
 0x84c   : > { %v1564_v1 = vadd.f32 %v1563_v23, %v1550_v0 }
 0x84e   : > { %v1568_v45 = vadd.f32 %v1564_v1, %v2596_v53 }
 0x850   : > { %1570 = vst.msk [vmem:[%s579_s29] sm:$0xff] %vm637_vm0, %v1568_v45 }
 0x851   : > { %v1551_v2 = vpop.f32.mrf.mxu3  ;;  %v1565_v4 = vpop.f32.mrf.mxu0 }
 0x852   : > { %v1552_v3 = vadd.f32 %v2044_v62, %v1551_v2 }
 0x854   : > { %v1566_v5 = vadd.f32 %v1565_v4, %v1552_v3 }
 0x856   : > { %v1569_v6 = vadd.f32 %v1566_v5, %v2601_v57 }
 0x858   : > { %1571 = vst.msk [vmem:[%s579_s29 + $0x8] sm:$0xff] %vm637_vm0, %v1569_v6 }
 0x859   : > { %2212 = shalt.err (!%p2209_p8)
}
 0x85a   : > { %s2270_s17 = smov 128   ;;  %s2271_s19 = smov 8  }
 0x85b   : > { %1968 = dma.vmem_to_hbm [thread:$0]  (%p2395_p5), %s1586_s2, 256, %s1588_s21, %s1573_s25, %s2270_s17, %s2270_s17, %s2271_s19  }
 0x85c PF: > { %s2812_s20 = sld [smem:[#allocation15_spill]] }
 0x85d   : > { %s2813_s28 = sld [smem:[#allocation13_spill]] }
 0x862   : > { %p1990_p9 = scmp.ge.s32.totalorder %s2812_s20, 2 }
 0x863   : > { %s1602_s27 = sand.u32 1, %s2813_s28  }
 0x864   : > { %p1981_p10 = pnand %p1990_p9, %p2399_p6  ;;  %s1603_s30 = scalar_lea.sflag [#allocation5], %s1602_s27 }
 0x866   : > { %p1982_p11 = pneg %p1981_p10 }
 0x868   : > { %2238 = dma.done.wait (%p1982_p11), %s1603_s30, 256  }
 0x869   : > { %2240 = vsyncadd (%p1982_p11), %s1603_s30, 4294967040  ;;  %s2815_s24 = sld [smem:[#allocation16_spill]]  ;;  %s2818_s21 = smov %s2247_s22 }
 0x86a   : > { %s2816_s23 = sld [smem:[#allocation14_spill]] }
 0x86b   : > { %s2817_s0 = sld [smem:[#allocation17_spill]] }
 0x86f   : > { %p28_p12 = scmp.ge.s32.totalorder %s2815_s24, 4  }
 0x870   : > { %s2819_s22 = smov %s2816_s23 }
 0x871   : > { %s2820_s23 = smov %s2817_s0  ;;  %30 = sbr.rel (!%p28_p12) target bundleno = 9 (0x9), region = 135 }
 0x876   :  { %1609 = vsyncpa [#allocation4], 1 }
 0x877   :  { %1611 = vsyncpa [#allocation4 + $0x1], 1 }
 0x878   :  { %1612 = vsyncpa [#allocation7], 1 }
 0x879   :  { %1613 = vsyncpa [#allocation5], 1 }
 0x87a   :  { %1615 = vsyncpa [#allocation5 + $0x1], 1 }

</bundles_post_ra>
